<compile_context>
chip_gen: v7x
topology: tpu7x:2x2x1
jax: 0.10.0
libtpu: 0.0.40
codegen_flags: <defaults>
</compile_context>

<pallas_src>
import jax
import jax.numpy as jnp
import numpy as np
from jax.experimental import pallas as pl
from jax.experimental.pallas import tpu as pltpu


def _round_up(n, m):
    return ((n + m - 1) // m) * m


# ------------------- conv1d(k=3) + bias + ReLU + maxpool3 -------------------

def _conv_relu_pool_kernel(x_ref, w_ref, b_ref, o_ref):
    # x_ref: (1, K, 3*Lpp) im2col patches for one batch element with
    #        x_ref[0, k*Cin + ci, r*Lpp + j] = x[ci, 3*j + r + k]  (j < Lp)
    # w_ref: (Cout, K); b_ref: (Cout, 1); o_ref: (1, Cout, Lpp)
    lpp = o_ref.shape[2]
    y = jnp.dot(w_ref[...], x_ref[0], preferred_element_type=jnp.float32)
    # maxpool3(relu(conv + b)) == relu(max_r(conv_r) + b): bias is a
    # per-channel constant and ReLU is monotone.  Lpp % 128 == 0, so these
    # slices (and the final store) are lane-tile aligned.
    y = jnp.maximum(jnp.maximum(y[:, :lpp], y[:, lpp:2 * lpp]), y[:, 2 * lpp:3 * lpp])
    o_ref[0] = jnp.maximum(y + b_ref[...], 0.0)


def conv1d_relu_maxpool3(x, w2, b2):
    """x: (B, Cin, Lin) f32; w2: (Cout, 3*Cin) = w.transpose(0,2,1) flattened;
    b2: (Cout, 1).  Returns MaxPool1d(3)(ReLU(Conv1d_valid(x))): (B, Cout, Lp)."""
    B, Cin, Lin = x.shape
    Cout, K = w2.shape
    Lp = (Lin - 2) // 3
    Lpp = _round_up(Lp, 128)   # lane-aligned pool-offset block width

    # im2col glue (slices/pads/concats only, ordered to match w2's (k, ci)
    # rows and r-major pool-offset column blocks).
    # TODO(synk): im2col could move fully in-kernel via strided ref loads; kept
    # as XLA glue since the conv path is a tiny fraction of total runtime.
    cols = []
    for r in range(3):
        rows = [x[:, :, r + k::3][:, :, :Lp] for k in range(3)]
        col = jnp.concatenate(rows, axis=1)                        # (B, K, Lp)
        cols.append(jnp.pad(col, ((0, 0), (0, 0), (0, Lpp - Lp))))
    patches = jnp.concatenate(cols, axis=2)                        # (B, K, 3*Lpp)

    out = pl.pallas_call(
        _conv_relu_pool_kernel,
        out_shape=jax.ShapeDtypeStruct((B, Cout, Lpp), jnp.float32),
        grid_spec=pltpu.PrefetchScalarGridSpec(
            num_scalar_prefetch=0,
            grid=(B,),
            in_specs=[
                pl.BlockSpec((1, K, 3 * Lpp), lambda i: (i, 0, 0)),
                pl.BlockSpec((Cout, K), lambda i: (0, 0)),
                pl.BlockSpec((Cout, 1), lambda i: (0, 0)),
            ],
            out_specs=pl.BlockSpec((1, Cout, Lpp), lambda i: (i, 0, 0)),
        ),
        compiler_params=pltpu.CompilerParams(
            dimension_semantics=("parallel",)),
    )(patches, w2, b2)
    return out[:, :, :Lp]


# --------------------------- fc1: relu(x @ W.T + b) --------------------------

def _fc1_kernel(x_ref, w_ref, b_ref, o_ref):
    k = pl.program_id(1)

    @pl.when(k == 0)
    def _():
        o_ref[...] = jnp.zeros_like(o_ref)

    # bf16 x bf16 MXU matmul with f32 accumulation into the resident output.
    o_ref[...] += jnp.dot(x_ref[...], w_ref[...],
                          preferred_element_type=jnp.float32)

    @pl.when(k == pl.num_programs(1) - 1)
    def _():
        o_ref[...] = jnp.maximum(o_ref[...] + b_ref[...], 0.0)


def fc1_relu(x, wt, b, *, tn=512, tk=3072):
    """relu(x @ wt + b).  x: (M, Kp) bf16 (zero-padded K), wt: (Kp, N) bf16
    (pre-padded + pre-transposed outside jit), b: (1, N) f32."""
    M, Kp = x.shape
    N = wt.shape[1]
    assert Kp % tk == 0 and N % tn == 0
    return pl.pallas_call(
        _fc1_kernel,
        out_shape=jax.ShapeDtypeStruct((M, N), jnp.float32),
        grid_spec=pltpu.PrefetchScalarGridSpec(
            num_scalar_prefetch=0,
            grid=(N // tn, Kp // tk),
            in_specs=[
                pl.BlockSpec((M, tk), lambda j, k: (0, k)),
                pl.BlockSpec((tk, tn), lambda j, k: (k, j)),
                pl.BlockSpec((1, tn), lambda j, k: (0, j)),
            ],
            out_specs=pl.BlockSpec((M, tn), lambda j, k: (0, j)),
        ),
        compiler_params=pltpu.CompilerParams(
            dimension_semantics=("parallel", "arbitrary")),
    )(x, wt, b)


# -------------- head: log_softmax(relu(h @ W2.T + b2) @ W3.T + b3) ------------

def _head_kernel(h_ref, w2_ref, b2_ref, w3_ref, b3_ref, o_ref):
    h = h_ref[...].astype(jnp.bfloat16)
    z = jnp.dot(h, w2_ref[...], preferred_element_type=jnp.float32) + b2_ref[...]
    z = jnp.maximum(z, 0.0)
    y = jnp.dot(z, w3_ref[...], preferred_element_type=jnp.float32) + b3_ref[...]
    m = jnp.max(y, axis=-1, keepdims=True)
    e = y - m
    o_ref[...] = e - jnp.log(jnp.sum(jnp.exp(e), axis=-1, keepdims=True))


def fc_head(h, w2t, b2, w3t, b3):
    M = h.shape[0]
    C = w3t.shape[1]
    return pl.pallas_call(
        _head_kernel,
        out_shape=jax.ShapeDtypeStruct((M, C), jnp.float32),
        grid_spec=pltpu.PrefetchScalarGridSpec(
            num_scalar_prefetch=0,
            grid=(1,),
            in_specs=[
                pl.BlockSpec(h.shape, lambda i: (0, 0)),
                pl.BlockSpec(w2t.shape, lambda i: (0, 0)),
                pl.BlockSpec(b2.shape, lambda i: (0, 0)),
                pl.BlockSpec(w3t.shape, lambda i: (0, 0)),
                pl.BlockSpec(b3.shape, lambda i: (0, 0)),
            ],
            out_specs=pl.BlockSpec((M, C), lambda i: (0, 0)),
        ),
        compiler_params=pltpu.CompilerParams(
            dimension_semantics=("arbitrary",)),
    )(h, w2t, b2, w3t, b3)


# -------------------------- parameters & forward ----------------------------

def _uniform(key, shape, bound):
    return jax.random.uniform(key, shape, jnp.float32, -bound, bound)


def init_params(key):
    ks = jax.random.split(key, 16)
    p = {}

    def conv_init(kw, kb, cout, cin, ksz):
        bound = 1.0 / np.sqrt(cin * ksz)
        return _uniform(kw, (cout, cin, ksz), bound), _uniform(kb, (cout,), bound)

    def lin_init(kw, kb, nout, nin):
        bound = 1.0 / np.sqrt(nin)
        return _uniform(kw, (nout, nin), bound), _uniform(kb, (nout,), bound)

    p["conv1_w"], p["conv1_b"] = conv_init(ks[0], ks[1], 24, 12, 3)
    p["conv2_w"], p["conv2_b"] = conv_init(ks[2], ks[3], 48, 24, 3)
    p["conv3_w"], p["conv3_b"] = conv_init(ks[4], ks[5], 96, 48, 3)
    p["fc1_w"], p["fc1_b"] = lin_init(ks[6], ks[7], 1024, 17668)
    p["fc2_w"], p["fc2_b"] = lin_init(ks[8], ks[9], 512, 1024)
    p["fc3_w"], p["fc3_b"] = lin_init(ks[10], ks[11], 9, 512)
    # BatchNorm1d(12) inference (running) statistics + affine params.
    p["bn_gamma"] = 1.0 + 0.1 * jax.random.normal(ks[12], (12,), jnp.float32)
    p["bn_beta"] = 0.1 * jax.random.normal(ks[13], (12,), jnp.float32)
    p["bn_mean"] = 0.1 * jax.random.normal(ks[14], (12,), jnp.float32)
    p["bn_var"] = 1.0 + 0.1 * jax.random.uniform(ks[15], (12,), jnp.float32)
    return p


FC1_TK = 3072  # fc1 reduction tile; fc1_w is pre-padded to a multiple of this.


def prepare_params(p):
    """One-time (outside jit) repacking of weights into kernel-ready layouts."""
    eps = 1e-5
    scale = p["bn_gamma"] / jnp.sqrt(p["bn_var"] + eps)
    shift = p["bn_beta"] - p["bn_mean"] * scale

    # Fold BatchNorm1d (eval) into conv1:
    #   conv(scale*x + shift) == conv_with(w * scale[ci])(x)
    #                            + (b + sum_{ci,k} w[:,ci,k] * shift[ci]).
    conv1_w = p["conv1_w"] * scale[None, :, None]
    conv1_b = p["conv1_b"] + jnp.einsum("oik,i->o", p["conv1_w"], shift)

    K1 = p["fc1_w"].shape[1]                       # 17668
    Kp = _round_up(K1, FC1_TK)                     # 18432
    fc1_wt = jnp.pad(p["fc1_w"], ((0, 0), (0, Kp - K1))).T.astype(jnp.bfloat16)

    def conv_pack(w, b):
        cout, cin, ksz = w.shape
        return (jnp.transpose(w, (0, 2, 1)).reshape(cout, ksz * cin),
                b.reshape(cout, 1))

    prep = {
        "fc1_wt": fc1_wt,                              # (Kp, 1024) bf16
        "fc1_b": p["fc1_b"].reshape(1, -1),
        "fc2_wt": p["fc2_w"].T.astype(jnp.bfloat16),   # (1024, 512) bf16
        "fc2_b": p["fc2_b"].reshape(1, -1),
        "fc3_wt": p["fc3_w"].T,                        # (512, 9) f32
        "fc3_b": p["fc3_b"].reshape(1, -1),
    }
    prep["conv1_w2"], prep["conv1_b2"] = conv_pack(conv1_w, conv1_b)
    prep["conv2_w2"], prep["conv2_b2"] = conv_pack(p["conv2_w"], p["conv2_b"])
    prep["conv3_w2"], prep["conv3_b2"] = conv_pack(p["conv3_w"], p["conv3_b"])
    return prep


@jax.jit
def forward(prep, x1, x2):
    # BatchNorm1d (eval) is folded into conv1's packed weights/bias.
    h = x2.astype(jnp.float32)
    h = conv1d_relu_maxpool3(h, prep["conv1_w2"], prep["conv1_b2"])  # (B,24,1664)
    h = conv1d_relu_maxpool3(h, prep["conv2_w2"], prep["conv2_b2"])  # (B,48,554)
    h = conv1d_relu_maxpool3(h, prep["conv3_w2"], prep["conv3_b2"])  # (B,96,184)
    # Dropout(0.25): identity in eval mode.  Gradient hook: no forward effect.
    h = h.reshape(h.shape[0], -1)                                    # (B, 17664)

    x = jnp.concatenate([x1.astype(jnp.float32), h], axis=1)         # (B, 17668)
    Kp = prep["fc1_wt"].shape[0]
    # Only the (tiny) activation is padded/cast per call; the weight was
    # prepared once outside jit.
    x = jnp.pad(x, ((0, 0), (0, Kp - x.shape[1]))).astype(jnp.bfloat16)

    h1 = fc1_relu(x, prep["fc1_wt"], prep["fc1_b"], tn=512, tk=FC1_TK)  # (B,1024)
    return fc_head(h1, prep["fc2_wt"], prep["fc2_b"],
                   prep["fc3_wt"], prep["fc3_b"])                       # (B, 9)


# ------------------------- pure-JAX reference check -------------------------

def reference_forward(params, x1, x2):
    eps = 1e-5
    scale = params["bn_gamma"] / jnp.sqrt(params["bn_var"] + eps)
    shift = params["bn_beta"] - params["bn_mean"] * scale
    h = x2.astype(jnp.float32) * scale[None, :, None] + shift[None, :, None]

    def stage(h, w, b):
        y = jax.lax.conv_general_dilated(
            h, w, window_strides=(1,), padding="VALID",
            dimension_numbers=("NCH", "OIH", "NCH"))
        y = jax.nn.relu(y + b[None, :, None])
        Lp = y.shape[-1] // 3
        return y[:, :, :3 * Lp].reshape(y.shape[0], y.shape[1], Lp, 3).max(axis=-1)

    h = stage(h, params["conv1_w"], params["conv1_b"])
    h = stage(h, params["conv2_w"], params["conv2_b"])
    h = stage(h, params["conv3_w"], params["conv3_b"])
    h = h.reshape(h.shape[0], -1)
    z = jnp.concatenate([x1.astype(jnp.float32), h], axis=1)
    z = jax.nn.relu(z @ params["fc1_w"].T + params["fc1_b"])
    z = jax.nn.relu(z @ params["fc2_w"].T + params["fc2_b"])
    z = z @ params["fc3_w"].T + params["fc3_b"]
    return jax.nn.log_softmax(z, axis=1)


if __name__ == "__main__":
    key = jax.random.PRNGKey(0)
    kp, k1, k2 = jax.random.split(key, 3)
    params = init_params(kp)
    prep = prepare_params(params)   # one-time weight repack (outside jit)

    B = 2
    # Shapes implied by the module: fc1 expects 4 + 96*184 = 17668 features,
    # i.e. x1: (B, 4) and x2: (B, 12, 4994)  (4994 -> conv/pool x3 -> 184).
    x1 = jax.random.normal(k1, (B, 4), jnp.float32)
    x2 = jax.random.normal(k2, (B, 12, 4994), jnp.float32)

    out = jax.block_until_ready(forward(prep, x1, x2))
    ref = jax.block_until_ready(reference_forward(params, x1, x2))

    assert out.shape == (B, 9) and out.dtype == jnp.float32
    np.testing.assert_allclose(np.asarray(out), np.asarray(ref),
                               rtol=2e-3, atol=2e-3)
    print("KERNEL_OK")
</pallas_src>

<mosaic_0001>
module attributes {stable_mosaic.version = 11 : i64} {
  func.func @_conv_relu_pool_kernel(%arg0: i32, %arg1: memref<1x36x4992xf32, #tpu.memory_space<vmem>>, %arg2: memref<24x36xf32, #tpu.memory_space<vmem>>, %arg3: memref<24x1xf32, #tpu.memory_space<vmem>>, %arg4: memref<1x24x1664xf32, #tpu.memory_space<vmem>>) attributes {dimension_semantics = [#tpu.dimension_semantics<parallel>], iteration_bounds = array<i64: 2>, scalar_prefetch = 0 : i64, scratch_operands = 0 : i64, tpu.core_type = #tpu.core_type<tc>, window_params = [{transform_indices = @transform_0, window_bounds = array<i64: 1, 36, 4992>}, {pipeline_mode = #tpu.pipeline_mode<synchronous>, transform_indices = @transform_1, window_bounds = array<i64: 24, 36>}, {pipeline_mode = #tpu.pipeline_mode<synchronous>, transform_indices = @transform_2, window_bounds = array<i64: 24, 1>}, {transform_indices = @transform_3, window_bounds = array<i64: 1, 24, 1664>}]} {
    %c0 = arith.constant 0 : index
    %c0_0 = arith.constant 0 : index
    %0 = vector.load %arg2[%c0, %c0_0] : memref<24x36xf32, #tpu.memory_space<vmem>>, vector<24x36xf32>
    %c0_1 = arith.constant 0 : index
    %c0_2 = arith.constant 0 : index
    %c0_3 = arith.constant 0 : index
    %1 = vector.load %arg1[%c0_1, %c0_2, %c0_3] : memref<1x36x4992xf32, #tpu.memory_space<vmem>>, vector<1x36x4992xf32>
    %2 = vector.shape_cast %1 : vector<1x36x4992xf32> to vector<36x4992xf32>
    %cst = arith.constant dense<0.000000e+00> : vector<24x4992xf32>
    %3 = tpu.matmul %0, %2, %cst {dimension_numbers = #tpu.dot_dimension_numbers<[1], [0], [0], [1], [0, 0, 1, 1], [], []>} : vector<24x36xf32>, vector<36x4992xf32>, vector<24x4992xf32> -> vector<24x4992xf32>
    %4 = vector.extract_strided_slice %3 {offsets = [0, 0], sizes = [24, 1664], strides = [1, 1]} : vector<24x4992xf32> to vector<24x1664xf32>
    %5 = vector.extract_strided_slice %3 {offsets = [0, 1664], sizes = [24, 1664], strides = [1, 1]} : vector<24x4992xf32> to vector<24x1664xf32>
    %6 = arith.maximumf %4, %5 : vector<24x1664xf32>
    %7 = vector.extract_strided_slice %3 {offsets = [0, 3328], sizes = [24, 1664], strides = [1, 1]} : vector<24x4992xf32> to vector<24x1664xf32>
    %8 = arith.maximumf %6, %7 : vector<24x1664xf32>
    %c0_4 = arith.constant 0 : index
    %c0_5 = arith.constant 0 : index
    %9 = vector.load %arg3[%c0_4, %c0_5] : memref<24x1xf32, #tpu.memory_space<vmem>>, vector<24x1xf32>
    %10 = vector.broadcast %9 : vector<24x1xf32> to vector<24x1664xf32>
    %11 = arith.addf %8, %10 : vector<24x1664xf32>
    %cst_6 = arith.constant 0.000000e+00 : f32
    %12 = vector.broadcast %cst_6 : f32 to vector<24x1664xf32>
    %13 = arith.maximumf %11, %12 : vector<24x1664xf32>
    %c0_7 = arith.constant 0 : index
    %c0_8 = arith.constant 0 : index
    %c0_9 = arith.constant 0 : index
    %14 = vector.load %arg4[%c0_7, %c0_8, %c0_9] : memref<1x24x1664xf32, #tpu.memory_space<vmem>>, vector<1x24x1664xf32>
    %15 = vector.shape_cast %14 : vector<1x24x1664xf32> to vector<24x1664xf32>
    %16 = vector.shape_cast %13 : vector<24x1664xf32> to vector<1x24x1664xf32>
    tpu.vector_store %arg4[%c0_7, %c0_8, %c0_9], %16 {strides = array<i32>} : memref<1x24x1664xf32, #tpu.memory_space<vmem>>, vector<1x24x1664xf32>,
    return
  }
  func.func @transform_0(%arg0: i32) -> (i32, i32, i32) {
    %c0_i32 = arith.constant 0 : i32
    %c0_i32_0 = arith.constant 0 : i32
    %c0_i32_1 = arith.constant 0 : i32
    return %arg0, %c0_i32, %c0_i32_0 : i32, i32, i32
  }
  func.func @transform_1(%arg0: i32) -> (i32, i32) {
    %c0_i32 = arith.constant 0 : i32
    %c0_i32_0 = arith.constant 0 : i32
    %c0_i32_1 = arith.constant 0 : i32
    return %c0_i32, %c0_i32_0 : i32, i32
  }
  func.func @transform_2(%arg0: i32) -> (i32, i32) {
    %c0_i32 = arith.constant 0 : i32
    %c0_i32_0 = arith.constant 0 : i32
    %c0_i32_1 = arith.constant 0 : i32
    return %c0_i32, %c0_i32_0 : i32, i32
  }
  func.func @transform_3(%arg0: i32) -> (i32, i32, i32) {
    %c0_i32 = arith.constant 0 : i32
    %c0_i32_0 = arith.constant 0 : i32
    %c0_i32_1 = arith.constant 0 : i32
    return %arg0, %c0_i32, %c0_i32_0 : i32, i32, i32
  }
}

module attributes {stable_mosaic.version = 11 : i64} {
  func.func @_conv_relu_pool_kernel(%arg0: i32, %arg1: memref<1x72x1920xf32, #tpu.memory_space<vmem>>, %arg2: memref<48x72xf32, #tpu.memory_space<vmem>>, %arg3: memref<48x1xf32, #tpu.memory_space<vmem>>, %arg4: memref<1x48x640xf32, #tpu.memory_space<vmem>>) attributes {dimension_semantics = [#tpu.dimension_semantics<parallel>], iteration_bounds = array<i64: 2>, scalar_prefetch = 0 : i64, scratch_operands = 0 : i64, tpu.core_type = #tpu.core_type<tc>, window_params = [{transform_indices = @transform_0, window_bounds = array<i64: 1, 72, 1920>}, {pipeline_mode = #tpu.pipeline_mode<synchronous>, transform_indices = @transform_1, window_bounds = array<i64: 48, 72>}, {pipeline_mode = #tpu.pipeline_mode<synchronous>, transform_indices = @transform_2, window_bounds = array<i64: 48, 1>}, {transform_indices = @transform_3, window_bounds = array<i64: 1, 48, 640>}]} {
    %c0 = arith.constant 0 : index
    %c0_0 = arith.constant 0 : index
    %0 = vector.load %arg2[%c0, %c0_0] : memref<48x72xf32, #tpu.memory_space<vmem>>, vector<48x72xf32>
    %c0_1 = arith.constant 0 : index
    %c0_2 = arith.constant 0 : index
    %c0_3 = arith.constant 0 : index
    %1 = vector.load %arg1[%c0_1, %c0_2, %c0_3] : memref<1x72x1920xf32, #tpu.memory_space<vmem>>, vector<1x72x1920xf32>
    %2 = vector.shape_cast %1 : vector<1x72x1920xf32> to vector<72x1920xf32>
    %cst = arith.constant dense<0.000000e+00> : vector<48x1920xf32>
    %3 = tpu.matmul %0, %2, %cst {dimension_numbers = #tpu.dot_dimension_numbers<[1], [0], [0], [1], [0, 0, 1, 1], [], []>} : vector<48x72xf32>, vector<72x1920xf32>, vector<48x1920xf32> -> vector<48x1920xf32>
    %4 = vector.extract_strided_slice %3 {offsets = [0, 0], sizes = [48, 640], strides = [1, 1]} : vector<48x1920xf32> to vector<48x640xf32>
    %5 = vector.extract_strided_slice %3 {offsets = [0, 640], sizes = [48, 640], strides = [1, 1]} : vector<48x1920xf32> to vector<48x640xf32>
    %6 = arith.maximumf %4, %5 : vector<48x640xf32>
    %7 = vector.extract_strided_slice %3 {offsets = [0, 1280], sizes = [48, 640], strides = [1, 1]} : vector<48x1920xf32> to vector<48x640xf32>
    %8 = arith.maximumf %6, %7 : vector<48x640xf32>
    %c0_4 = arith.constant 0 : index
    %c0_5 = arith.constant 0 : index
    %9 = vector.load %arg3[%c0_4, %c0_5] : memref<48x1xf32, #tpu.memory_space<vmem>>, vector<48x1xf32>
    %10 = vector.broadcast %9 : vector<48x1xf32> to vector<48x640xf32>
    %11 = arith.addf %8, %10 : vector<48x640xf32>
    %cst_6 = arith.constant 0.000000e+00 : f32
    %12 = vector.broadcast %cst_6 : f32 to vector<48x640xf32>
    %13 = arith.maximumf %11, %12 : vector<48x640xf32>
    %c0_7 = arith.constant 0 : index
    %c0_8 = arith.constant 0 : index
    %c0_9 = arith.constant 0 : index
    %14 = vector.load %arg4[%c0_7, %c0_8, %c0_9] : memref<1x48x640xf32, #tpu.memory_space<vmem>>, vector<1x48x640xf32>
    %15 = vector.shape_cast %14 : vector<1x48x640xf32> to vector<48x640xf32>
    %16 = vector.shape_cast %13 : vector<48x640xf32> to vector<1x48x640xf32>
    tpu.vector_store %arg4[%c0_7, %c0_8, %c0_9], %16 {strides = array<i32>} : memref<1x48x640xf32, #tpu.memory_space<vmem>>, vector<1x48x640xf32>,
    return
  }
  func.func @transform_0(%arg0: i32) -> (i32, i32, i32) {
    %c0_i32 = arith.constant 0 : i32
    %c0_i32_0 = arith.constant 0 : i32
    %c0_i32_1 = arith.constant 0 : i32
    return %arg0, %c0_i32, %c0_i32_0 : i32, i32, i32
  }
  func.func @transform_1(%arg0: i32) -> (i32, i32) {
    %c0_i32 = arith.constant 0 : i32
    %c0_i32_0 = arith.constant 0 : i32
    %c0_i32_1 = arith.constant 0 : i32
    return %c0_i32, %c0_i32_0 : i32, i32
  }
  func.func @transform_2(%arg0: i32) -> (i32, i32) {
    %c0_i32 = arith.constant 0 : i32
    %c0_i32_0 = arith.constant 0 : i32
    %c0_i32_1 = arith.constant 0 : i32
    return %c0_i32, %c0_i32_0 : i32, i32
  }
  func.func @transform_3(%arg0: i32) -> (i32, i32, i32) {
    %c0_i32 = arith.constant 0 : i32
    %c0_i32_0 = arith.constant 0 : i32
    %c0_i32_1 = arith.constant 0 : i32
    return %arg0, %c0_i32, %c0_i32_0 : i32, i32, i32
  }
}

module attributes {stable_mosaic.version = 11 : i64} {
  func.func @_conv_relu_pool_kernel(%arg0: i32, %arg1: memref<1x144x768xf32, #tpu.memory_space<vmem>>, %arg2: memref<96x144xf32, #tpu.memory_space<vmem>>, %arg3: memref<96x1xf32, #tpu.memory_space<vmem>>, %arg4: memref<1x96x256xf32, #tpu.memory_space<vmem>>) attributes {dimension_semantics = [#tpu.dimension_semantics<parallel>], iteration_bounds = array<i64: 2>, scalar_prefetch = 0 : i64, scratch_operands = 0 : i64, tpu.core_type = #tpu.core_type<tc>, window_params = [{transform_indices = @transform_0, window_bounds = array<i64: 1, 144, 768>}, {pipeline_mode = #tpu.pipeline_mode<synchronous>, transform_indices = @transform_1, window_bounds = array<i64: 96, 144>}, {pipeline_mode = #tpu.pipeline_mode<synchronous>, transform_indices = @transform_2, window_bounds = array<i64: 96, 1>}, {transform_indices = @transform_3, window_bounds = array<i64: 1, 96, 256>}]} {
    %c0 = arith.constant 0 : index
    %c0_0 = arith.constant 0 : index
    %0 = vector.load %arg2[%c0, %c0_0] : memref<96x144xf32, #tpu.memory_space<vmem>>, vector<96x144xf32>
    %c0_1 = arith.constant 0 : index
    %c0_2 = arith.constant 0 : index
    %c0_3 = arith.constant 0 : index
    %1 = vector.load %arg1[%c0_1, %c0_2, %c0_3] : memref<1x144x768xf32, #tpu.memory_space<vmem>>, vector<1x144x768xf32>
    %2 = vector.shape_cast %1 : vector<1x144x768xf32> to vector<144x768xf32>
    %cst = arith.constant dense<0.000000e+00> : vector<96x768xf32>
    %3 = tpu.matmul %0, %2, %cst {dimension_numbers = #tpu.dot_dimension_numbers<[1], [0], [0], [1], [0, 0, 1, 1], [], []>} : vector<96x144xf32>, vector<144x768xf32>, vector<96x768xf32> -> vector<96x768xf32>
    %4 = vector.extract_strided_slice %3 {offsets = [0, 0], sizes = [96, 256], strides = [1, 1]} : vector<96x768xf32> to vector<96x256xf32>
    %5 = vector.extract_strided_slice %3 {offsets = [0, 256], sizes = [96, 256], strides = [1, 1]} : vector<96x768xf32> to vector<96x256xf32>
    %6 = arith.maximumf %4, %5 : vector<96x256xf32>
    %7 = vector.extract_strided_slice %3 {offsets = [0, 512], sizes = [96, 256], strides = [1, 1]} : vector<96x768xf32> to vector<96x256xf32>
    %8 = arith.maximumf %6, %7 : vector<96x256xf32>
    %c0_4 = arith.constant 0 : index
    %c0_5 = arith.constant 0 : index
    %9 = vector.load %arg3[%c0_4, %c0_5] : memref<96x1xf32, #tpu.memory_space<vmem>>, vector<96x1xf32>
    %10 = vector.broadcast %9 : vector<96x1xf32> to vector<96x256xf32>
    %11 = arith.addf %8, %10 : vector<96x256xf32>
    %cst_6 = arith.constant 0.000000e+00 : f32
    %12 = vector.broadcast %cst_6 : f32 to vector<96x256xf32>
    %13 = arith.maximumf %11, %12 : vector<96x256xf32>
    %c0_7 = arith.constant 0 : index
    %c0_8 = arith.constant 0 : index
    %c0_9 = arith.constant 0 : index
    %14 = vector.load %arg4[%c0_7, %c0_8, %c0_9] : memref<1x96x256xf32, #tpu.memory_space<vmem>>, vector<1x96x256xf32>
    %15 = vector.shape_cast %14 : vector<1x96x256xf32> to vector<96x256xf32>
    %16 = vector.shape_cast %13 : vector<96x256xf32> to vector<1x96x256xf32>
    tpu.vector_store %arg4[%c0_7, %c0_8, %c0_9], %16 {strides = array<i32>} : memref<1x96x256xf32, #tpu.memory_space<vmem>>, vector<1x96x256xf32>,
    return
  }
  func.func @transform_0(%arg0: i32) -> (i32, i32, i32) {
    %c0_i32 = arith.constant 0 : i32
    %c0_i32_0 = arith.constant 0 : i32
    %c0_i32_1 = arith.constant 0 : i32
    return %arg0, %c0_i32, %c0_i32_0 : i32, i32, i32
  }
  func.func @transform_1(%arg0: i32) -> (i32, i32) {
    %c0_i32 = arith.constant 0 : i32
    %c0_i32_0 = arith.constant 0 : i32
    %c0_i32_1 = arith.constant 0 : i32
    return %c0_i32, %c0_i32_0 : i32, i32
  }
  func.func @transform_2(%arg0: i32) -> (i32, i32) {
    %c0_i32 = arith.constant 0 : i32
    %c0_i32_0 = arith.constant 0 : i32
    %c0_i32_1 = arith.constant 0 : i32
    return %c0_i32, %c0_i32_0 : i32, i32
  }
  func.func @transform_3(%arg0: i32) -> (i32, i32, i32) {
    %c0_i32 = arith.constant 0 : i32
    %c0_i32_0 = arith.constant 0 : i32
    %c0_i32_1 = arith.constant 0 : i32
    return %arg0, %c0_i32, %c0_i32_0 : i32, i32, i32
  }
}

module attributes {stable_mosaic.version = 11 : i64} {
  func.func @_fc1_kernel(%arg0: i32, %arg1: i32, %arg2: memref<2x3072xbf16, #tpu.memory_space<vmem>>, %arg3: memref<3072x512xbf16, #tpu.memory_space<vmem>>, %arg4: memref<1x512xf32, #tpu.memory_space<vmem>>, %arg5: memref<2x512xf32, #tpu.memory_space<vmem>>) attributes {dimension_semantics = [#tpu.dimension_semantics<parallel>, #tpu.dimension_semantics<arbitrary>], iteration_bounds = array<i64: 2, 6>, scalar_prefetch = 0 : i64, scratch_operands = 0 : i64, tpu.core_type = #tpu.core_type<tc>, window_params = [{transform_indices = @transform_0, window_bounds = array<i64: 2, 3072>}, {transform_indices = @transform_1, window_bounds = array<i64: 3072, 512>}, {transform_indices = @transform_2, window_bounds = array<i64: 1, 512>}, {transform_indices = @transform_3, window_bounds = array<i64: 2, 512>}]} {
    %c0_i32 = arith.constant 0 : i32
    %0 = arith.cmpi eq, %arg1, %c0_i32 : i32
    %1 = arith.extui %0 : i1 to i32
    %c0_i32_0 = arith.constant 0 : i32
    %2 = arith.cmpi ne, %1, %c0_i32_0 : i32
    scf.if %2 {
      %cst_9 = arith.constant 0.000000e+00 : f32
      %12 = vector.broadcast %cst_9 : f32 to vector<2x512xf32>
      %c0_10 = arith.constant 0 : index
      %c0_11 = arith.constant 0 : index
      %13 = vector.load %arg5[%c0_10, %c0_11] : memref<2x512xf32, #tpu.memory_space<vmem>>, vector<2x512xf32>
      tpu.vector_store %arg5[%c0_10, %c0_11], %12 {strides = array<i32>} : memref<2x512xf32, #tpu.memory_space<vmem>>, vector<2x512xf32>,
    } else {
    }
    %c0 = arith.constant 0 : index
    %c0_1 = arith.constant 0 : index
    %3 = vector.load %arg5[%c0, %c0_1] : memref<2x512xf32, #tpu.memory_space<vmem>>, vector<2x512xf32>
    %c0_2 = arith.constant 0 : index
    %c0_3 = arith.constant 0 : index
    %4 = vector.load %arg2[%c0_2, %c0_3] : memref<2x3072xbf16, #tpu.memory_space<vmem>>, vector<2x3072xbf16>
    %c0_4 = arith.constant 0 : index
    %c0_5 = arith.constant 0 : index
    %5 = vector.load %arg3[%c0_4, %c0_5] : memref<3072x512xbf16, #tpu.memory_space<vmem>>, vector<3072x512xbf16>
    %cst = arith.constant dense<0.000000e+00> : vector<2x512xf32>
    %6 = tpu.matmul %4, %5, %cst {dimension_numbers = #tpu.dot_dimension_numbers<[1], [0], [0], [1], [0, 0, 1, 1], [], []>} : vector<2x3072xbf16>, vector<3072x512xbf16>, vector<2x512xf32> -> vector<2x512xf32>
    %7 = arith.addf %3, %6 : vector<2x512xf32>
    %c0_6 = arith.constant 0 : index
    %c0_7 = arith.constant 0 : index
    %8 = vector.load %arg5[%c0_6, %c0_7] : memref<2x512xf32, #tpu.memory_space<vmem>>, vector<2x512xf32>
    tpu.vector_store %arg5[%c0_6, %c0_7], %7 {strides = array<i32>} : memref<2x512xf32, #tpu.memory_space<vmem>>, vector<2x512xf32>,
    %c5_i32 = arith.constant 5 : i32
    %9 = arith.cmpi eq, %arg1, %c5_i32 : i32
    %10 = arith.extui %9 : i1 to i32
    %c0_i32_8 = arith.constant 0 : i32
    %11 = arith.cmpi ne, %10, %c0_i32_8 : i32
    scf.if %11 {
      %c0_9 = arith.constant 0 : index
      %c0_10 = arith.constant 0 : index
      %12 = vector.load %arg5[%c0_9, %c0_10] : memref<2x512xf32, #tpu.memory_space<vmem>>, vector<2x512xf32>
      %c0_11 = arith.constant 0 : index
      %c0_12 = arith.constant 0 : index
      %13 = vector.load %arg4[%c0_11, %c0_12] : memref<1x512xf32, #tpu.memory_space<vmem>>, vector<1x512xf32>
      %14 = vector.broadcast %13 : vector<1x512xf32> to vector<2x512xf32>
      %15 = arith.addf %12, %14 : vector<2x512xf32>
      %cst_13 = arith.constant 0.000000e+00 : f32
      %16 = vector.broadcast %cst_13 : f32 to vector<2x512xf32>
      %17 = arith.maximumf %15, %16 : vector<2x512xf32>
      %c0_14 = arith.constant 0 : index
      %c0_15 = arith.constant 0 : index
      %18 = vector.load %arg5[%c0_14, %c0_15] : memref<2x512xf32, #tpu.memory_space<vmem>>, vector<2x512xf32>
      tpu.vector_store %arg5[%c0_14, %c0_15], %17 {strides = array<i32>} : memref<2x512xf32, #tpu.memory_space<vmem>>, vector<2x512xf32>,
    } else {
    }
    return
  }
  func.func @transform_0(%arg0: i32, %arg1: i32) -> (i32, i32) {
    %c0_i32 = arith.constant 0 : i32
    %c0_i32_0 = arith.constant 0 : i32
    return %c0_i32, %arg1 : i32, i32
  }
  func.func @transform_1(%arg0: i32, %arg1: i32) -> (i32, i32) {
    %c0_i32 = arith.constant 0 : i32
    return %arg1, %arg0 : i32, i32
  }
  func.func @transform_2(%arg0: i32, %arg1: i32) -> (i32, i32) {
    %c0_i32 = arith.constant 0 : i32
    %c0_i32_0 = arith.constant 0 : i32
    return %c0_i32, %arg0 : i32, i32
  }
  func.func @transform_3(%arg0: i32, %arg1: i32) -> (i32, i32) {
    %c0_i32 = arith.constant 0 : i32
    %c0_i32_0 = arith.constant 0 : i32
    return %c0_i32, %arg0 : i32, i32
  }
}

module attributes {stable_mosaic.version = 11 : i64} {
  func.func @_head_kernel(%arg0: i32, %arg1: memref<2x1024xf32, #tpu.memory_space<vmem>>, %arg2: memref<1024x512xbf16, #tpu.memory_space<vmem>>, %arg3: memref<1x512xf32, #tpu.memory_space<vmem>>, %arg4: memref<512x9xf32, #tpu.memory_space<vmem>>, %arg5: memref<1x9xf32, #tpu.memory_space<vmem>>, %arg6: memref<2x9xf32, #tpu.memory_space<vmem>>) attributes {dimension_semantics = [#tpu.dimension_semantics<arbitrary>], iteration_bounds = array<i64: 1>, scalar_prefetch = 0 : i64, scratch_operands = 0 : i64, tpu.core_type = #tpu.core_type<tc>, window_params = [{pipeline_mode = #tpu.pipeline_mode<synchronous>, transform_indices = @transform_0, window_bounds = array<i64: 2, 1024>}, {pipeline_mode = #tpu.pipeline_mode<synchronous>, transform_indices = @transform_1, window_bounds = array<i64: 1024, 512>}, {pipeline_mode = #tpu.pipeline_mode<synchronous>, transform_indices = @transform_2, window_bounds = array<i64: 1, 512>}, {pipeline_mode = #tpu.pipeline_mode<synchronous>, transform_indices = @transform_3, window_bounds = array<i64: 512, 9>}, {pipeline_mode = #tpu.pipeline_mode<synchronous>, transform_indices = @transform_4, window_bounds = array<i64: 1, 9>}, {pipeline_mode = #tpu.pipeline_mode<synchronous>, transform_indices = @transform_5, window_bounds = array<i64: 2, 9>}]} {
    %c0 = arith.constant 0 : index
    %c0_0 = arith.constant 0 : index
    %0 = vector.load %arg1[%c0, %c0_0] : memref<2x1024xf32, #tpu.memory_space<vmem>>, vector<2x1024xf32>
    %1 = arith.truncf %0 : vector<2x1024xf32> to vector<2x1024xbf16>
    %c0_1 = arith.constant 0 : index
    %c0_2 = arith.constant 0 : index
    %2 = vector.load %arg2[%c0_1, %c0_2] : memref<1024x512xbf16, #tpu.memory_space<vmem>>, vector<1024x512xbf16>
    %cst = arith.constant dense<0.000000e+00> : vector<2x512xf32>
    %3 = tpu.matmul %1, %2, %cst {dimension_numbers = #tpu.dot_dimension_numbers<[1], [0], [0], [1], [0, 0, 1, 1], [], []>} : vector<2x1024xbf16>, vector<1024x512xbf16>, vector<2x512xf32> -> vector<2x512xf32>
    %c0_3 = arith.constant 0 : index
    %c0_4 = arith.constant 0 : index
    %4 = vector.load %arg3[%c0_3, %c0_4] : memref<1x512xf32, #tpu.memory_space<vmem>>, vector<1x512xf32>
    %5 = vector.broadcast %4 : vector<1x512xf32> to vector<2x512xf32>
    %6 = arith.addf %3, %5 : vector<2x512xf32>
    %cst_5 = arith.constant 0.000000e+00 : f32
    %7 = vector.broadcast %cst_5 : f32 to vector<2x512xf32>
    %8 = arith.maximumf %6, %7 : vector<2x512xf32>
    %c0_6 = arith.constant 0 : index
    %c0_7 = arith.constant 0 : index
    %9 = vector.load %arg4[%c0_6, %c0_7] : memref<512x9xf32, #tpu.memory_space<vmem>>, vector<512x9xf32>
    %cst_8 = arith.constant dense<0.000000e+00> : vector<2x9xf32>
    %10 = tpu.matmul %8, %9, %cst_8 {dimension_numbers = #tpu.dot_dimension_numbers<[1], [0], [0], [1], [0, 0, 1, 1], [], []>} : vector<2x512xf32>, vector<512x9xf32>, vector<2x9xf32> -> vector<2x9xf32>
    %c0_9 = arith.constant 0 : index
    %c0_10 = arith.constant 0 : index
    %11 = vector.load %arg5[%c0_9, %c0_10] : memref<1x9xf32, #tpu.memory_space<vmem>>, vector<1x9xf32>
    %12 = vector.broadcast %11 : vector<1x9xf32> to vector<2x9xf32>
    %13 = arith.addf %10, %12 : vector<2x9xf32>
    %cst_11 = arith.constant dense<0xFF800000> : vector<2xf32>
    %14 = vector.multi_reduction <maximumf>, %13, %cst_11 [1] : vector<2x9xf32> to vector<2xf32>
    %15 = vector.shape_cast %14 : vector<2xf32> to vector<2x1xf32>
    %16 = vector.broadcast %15 : vector<2x1xf32> to vector<2x9xf32>
    %17 = arith.subf %13, %16 : vector<2x9xf32>
    %18 = math.exp %17 : vector<2x9xf32>
    %cst_12 = arith.constant dense<0.000000e+00> : vector<2xf32>
    %19 = vector.multi_reduction <add>, %18, %cst_12 [1] : vector<2x9xf32> to vector<2xf32>
    %20 = vector.shape_cast %19 : vector<2xf32> to vector<2x1xf32>
    %21 = math.log %20 : vector<2x1xf32>
    %22 = vector.broadcast %21 : vector<2x1xf32> to vector<2x9xf32>
    %23 = arith.subf %17, %22 : vector<2x9xf32>
    %c0_13 = arith.constant 0 : index
    %c0_14 = arith.constant 0 : index
    %24 = vector.load %arg6[%c0_13, %c0_14] : memref<2x9xf32, #tpu.memory_space<vmem>>, vector<2x9xf32>
    tpu.vector_store %arg6[%c0_13, %c0_14], %23 {strides = array<i32>} : memref<2x9xf32, #tpu.memory_space<vmem>>, vector<2x9xf32>,
    return
  }
  func.func @transform_0(%arg0: i32) -> (i32, i32) {
    %c0_i32 = arith.constant 0 : i32
    %c0_i32_0 = arith.constant 0 : i32
    %c0_i32_1 = arith.constant 0 : i32
    return %c0_i32, %c0_i32_0 : i32, i32
  }
  func.func @transform_1(%arg0: i32) -> (i32, i32) {
    %c0_i32 = arith.constant 0 : i32
    %c0_i32_0 = arith.constant 0 : i32
    %c0_i32_1 = arith.constant 0 : i32
    return %c0_i32, %c0_i32_0 : i32, i32
  }
  func.func @transform_2(%arg0: i32) -> (i32, i32) {
    %c0_i32 = arith.constant 0 : i32
    %c0_i32_0 = arith.constant 0 : i32
    %c0_i32_1 = arith.constant 0 : i32
    return %c0_i32, %c0_i32_0 : i32, i32
  }
  func.func @transform_3(%arg0: i32) -> (i32, i32) {
    %c0_i32 = arith.constant 0 : i32
    %c0_i32_0 = arith.constant 0 : i32
    %c0_i32_1 = arith.constant 0 : i32
    return %c0_i32, %c0_i32_0 : i32, i32
  }
  func.func @transform_4(%arg0: i32) -> (i32, i32) {
    %c0_i32 = arith.constant 0 : i32
    %c0_i32_0 = arith.constant 0 : i32
    %c0_i32_1 = arith.constant 0 : i32
    return %c0_i32, %c0_i32_0 : i32, i32
  }
  func.func @transform_5(%arg0: i32) -> (i32, i32) {
    %c0_i32 = arith.constant 0 : i32
    %c0_i32_0 = arith.constant 0 : i32
    %c0_i32_1 = arith.constant 0 : i32
    return %c0_i32, %c0_i32_0 : i32, i32
  }
}

</mosaic_0001>

<bundles_post_ra>
// kernel: forward.5
= control target key start
LH: loop header
LB: loop body
LE: loop exit
PB: predicated region body
PF: predicated region fallthrough
CT: control target
= control target key end

     0   :  { %s2763_s12 = smov 0   ;;  %s3662_s0 = inlined_call_operand.vmem [shape: f32[2,36,4992], index: 0, kind: input, shape index: {}]   ;;  %s3663_s1 = inlined_call_operand.vmem [shape: f32[24,36], index: 1, kind: input, shape index: {}]   ;;  %s3664_s2 = inlined_call_operand.vmem [shape: f32[24,1], index: 2, kind: input, shape index: {}]   ;;  %s3665_s3 = inlined_call_operand.vmem [shape: f32[2,24,1664], index: 3, kind: output, shape index: {}]  }
   0x1 LB: > { %s2422_s13 = sadd.s32 4294967295, %s2737_s12   ;;  %p2426_p0 = scmp.ge.s32.totalorder %s2737_s12, 1  ;;  %s2737_s12 = sphi %s2763_s12, %s13_s12  }
   0x2   : > { %p137_p1 = scmp.lt.s32.totalorder %s2737_s12, 3 }
   0x4   : > { %p138_p2 = pnand %p2426_p0, %p137_p1 }
   0x6   : > { %141 = sbr.rel (%p138_p2) target bundleno = 368 (0x170), region = 32 }
   0xd   : > { %p161_p3 = scmp.lt.s32.totalorder %s2422_s13, 1  ;;  %v2739_v0 = vmov 0.0   ;;  %v2740_v17 = vmov 0   ;;  %vm379_vm0 = vcmask 1043456   ;;  %v2814_v38 = vld [vmem:[%s3663_s1] sm:$0xff]  ;;  %vm369_vm1 = vcmask 293888  }
   0xe   : > { %561 = vmatprep.mubr.f32.mxu0 %v2739_v0  ;;  %644 = vmatprep.mubr.f32.mxu1 %v2739_v0  ;;  %v2833_v51 = vld [vmem:[%s3663_s1 + $0x8] sm:$0xff]  ;;  %v2842_v56 = vld [vmem:[%s3663_s1 + $0x10] sm:$0xff]  ;;  %vm2742_vm2 = vmmov 0  }
   0xf   : > { %s3773_s13 = smov (!%p161_p3, %s2422_s13), 1  ;;  %2729 = vset.pattern.permute.xlu0 %v2740_v17  ;;  %2730 = vset.pattern.permute.xlu1 %v2740_v17 }
  0x10   : > { %s2715_s14 = smul.u32 1560, %s3773_s13 }
  0x11   : > { %s2716_s30 = smul.u32 312, %s3773_s13 }
  0x12   : > { %s2779_s17 = scalar_lea.vmem %s3662_s0, %s2715_s14 }
  0x13   : > { %v175_v1 = vld [vmem:[%s2779_s17 + $0x8] sm:$0xff]  ;;  %v214_v2 = vld [vmem:[%s2779_s17 + $0x140] sm:$0xff]  ;;  %v177_v3 = vld [vmem:[%s2779_s17 + $0x18] sm:$0xff]  ;;  %s3453_s6 = scalar_lea.vmem %s3665_s3, %s2716_s30 }
  0x14   : > { %v2557_v4 = vpack.c.bf16 %v214_v2, %v175_v1  ;;  %v216_v5 = vld [vmem:[%s2779_s17 + $0x150] sm:$0xff]  ;;  %v174_v6 = vld [vmem:[%s2779_s17] sm:$0xff]  ;;  %v213_v7 = vld [vmem:[%s2779_s17 + $0x138] sm:$0xff] }
  0x15   : > { %v2565_v8 = vpack.c.bf16 %v216_v5, %v177_v3  ;;  %v2559_v9 = vpack.c.bf16 %v213_v7, %v174_v6  ;;  %v176_v10 = vld [vmem:[%s2779_s17 + $0x10] sm:$0xff]  ;;  %v215_v11 = vld [vmem:[%s2779_s17 + $0x148] sm:$0xff]  ;;  %v253_v12 = vld [vmem:[%s2779_s17 + $0x278] sm:$0xff] }
  0x16   : > { %2558 = vmatprep.subr.bf16.mxu0 %v2557_v4  ;;  %v2567_v13 = vpack.c.bf16 %v215_v11, %v176_v10  ;;  %v292_v14 = vld [vmem:[%s2779_s17 + $0x3b0] sm:$0xff]  ;;  %v255_v15 = vld [vmem:[%s2779_s17 + $0x288] sm:$0xff]  ;;  %v294_v16 = vld [vmem:[%s2779_s17 + $0x3c0] sm:$0xff] }
  0x17   : > { %2566 = vmatprep.subr.bf16.mxu1 %v2565_v8  ;;  %2560 = vmatpush1.bf16.msra.mxu0 %v2559_v9  ;;  %v2561_v18 = vpack.c.bf16 %v292_v14, %v253_v12  ;;  %v2569_v19 = vpack.c.bf16 %v294_v16, %v255_v15  ;;  %v252_v20 = vld [vmem:[%s2779_s17 + $0x270] sm:$0xff]  ;;  %v291_v21 = vld [vmem:[%s2779_s17 + $0x3a8] sm:$0xff]  ;;  %v254_v22 = vld [vmem:[%s2779_s17 + $0x280] sm:$0xff] }
  0x18   : > { %2568 = vmatpush1.bf16.msra.mxu1 %v2567_v13  ;;  %v2563_v23 = vpack.c.bf16 %v291_v21, %v252_v20  ;;  %v293_v24 = vld [vmem:[%s2779_s17 + $0x3b8] sm:$0xff]  ;;  %v331_v26 = vld [vmem:[%s2779_s17 + $0x4e8] sm:$0xf]  ;;  %v218_v29 = vld [vmem:[%s2779_s17 + $0x160] sm:$0xff] }
  0x19   : > { %2562 = vmatprep.subr.bf16.mxu0 %v2561_v18  ;;  %2570 = vmatprep.subr.bf16.mxu1 %v2569_v19  ;;  %v2571_v25 = vpack.c.bf16 %v293_v24, %v254_v22  ;;  %v333_v27 = vld [vmem:[%s2779_s17 + $0x4f8] sm:$0xf]  ;;  %v179_v28 = vld [vmem:[%s2779_s17 + $0x28] sm:$0xff]  ;;  %v178_v30 = vld [vmem:[%s2779_s17 + $0x20] sm:$0xff] }
  0x1a   : > { %v217_v31 = vld [vmem:[%s2779_s17 + $0x158] sm:$0xff]  ;;  %v220_v33 = vld [vmem:[%s2779_s17 + $0x170] sm:$0xff]  ;;  %v330_v34 = vld [vmem:[%s2779_s17 + $0x4e0] sm:$0xf]  ;;  %v2573_v39 = vpack.c.bf16 %v218_v29, %v179_v28 }
  0x1b   : > { %2564 = vmatpush1.bf16.msra.mxu0 %v2563_v23  ;;  %v181_v32 = vld [vmem:[%s2779_s17 + $0x38] sm:$0xff]  ;;  %v180_v35 = vld [vmem:[%s2779_s17 + $0x30] sm:$0xff]  ;;  %v219_v36 = vld [vmem:[%s2779_s17 + $0x168] sm:$0xff]  ;;  %v2575_v40 = vpack.c.bf16 %v217_v31, %v178_v30 }
  0x1c   : > { %2572 = vmatpush1.bf16.msra.mxu1 %v2571_v25  ;;  %2429 = vmatprep.subr.msk.mxu0 %vm379_vm0, %v331_v26  ;;  %v332_v37 = vld [vmem:[%s2779_s17 + $0x4f0] sm:$0xf]  ;;  %v2581_v41 = vpack.c.bf16 %v220_v33, %v181_v32  ;;  %v257_v42 = vld [vmem:[%s2779_s17 + $0x298] sm:$0xff]  ;;  %v2583_v45 = vpack.c.bf16 %v219_v36, %v180_v35  ;;  %v295_v46 = vld [vmem:[%s2779_s17 + $0x3c8] sm:$0xff] }
  0x1d   : > { %2434 = vmatprep.subr.msk.mxu1 %vm379_vm0, %v333_v27  ;;  %v296_v43 = vld [vmem:[%s2779_s17 + $0x3d0] sm:$0xff]  ;;  %v259_v47 = vld [vmem:[%s2779_s17 + $0x2a8] sm:$0xff]  ;;  %v298_v48 = vld [vmem:[%s2779_s17 + $0x3e0] sm:$0xff] }
  0x1e   : > { %v256_v44 = vld [vmem:[%s2779_s17 + $0x290] sm:$0xff]  ;;  %v258_v49 = vld [vmem:[%s2779_s17 + $0x2a0] sm:$0xff]  ;;  %v297_v50 = vld [vmem:[%s2779_s17 + $0x3d8] sm:$0xff]  ;;  %v2577_v52 = vpack.c.bf16 %v296_v43, %v257_v42  ;;  %v2585_v54 = vpack.c.bf16 %v298_v48, %v259_v47 }
  0x1f   : > { %2430 = vmatpush1.msk.msra.mxu0 %vm379_vm0, %v330_v34  ;;  %v2579_v53 = vpack.c.bf16 %v295_v46, %v256_v44  ;;  %v2587_v55 = vpack.c.bf16 %v297_v50, %v258_v49  ;;  %v335_v57 = vld [vmem:[%s2779_s17 + $0x508] sm:$0xf]  ;;  %v334_v58 = vld [vmem:[%s2779_s17 + $0x500] sm:$0xf]  ;;  %v337_v59 = vld [vmem:[%s2779_s17 + $0x518] sm:$0xf] }
  0x20   : > { %2435 = vmatpush1.msk.msra.mxu1 %vm379_vm0, %v332_v37  ;;  %2431 = vmatmul.mubr.msk.f32.vlgmr.msra.gmra.mrb[0].mxu0 %vm369_vm1, %v2814_v38  ;;  %v183_v60 = vld [vmem:[%s2779_s17 + $0x48] sm:$0xff]  ;;  %v222_v61 = vld [vmem:[%s2779_s17 + $0x180] sm:$0xff]  ;;  %v221_v63 = vld [vmem:[%s2779_s17 + $0x178] sm:$0xff] }
  0x21   : > { %2436 = vmatmul.mubr.msk.f32.vlgmr.msra.gmra.mrb[0].mxu1 %vm369_vm1, %v2814_v38  ;;  %2574 = vmatprep.subr.bf16.mxu0 %v2573_v39  ;;  %v182_v62 = vld [vmem:[%s2779_s17 + $0x40] sm:$0xff]  ;;  %v185_v1 = vld [vmem:[%s2779_s17 + $0x58] sm:$0xff]  ;;  %v224_v2 = vld [vmem:[%s2779_s17 + $0x190] sm:$0xff]  ;;  %v2589_v6 = vpack.c.bf16 %v222_v61, %v183_v60 }
  0x22   : > { %2576 = vmatpush1.bf16.msra.mxu0 %v2575_v40  ;;  %2582 = vmatprep.subr.bf16.mxu1 %v2581_v41  ;;  %v336_v3 = vld [vmem:[%s2779_s17 + $0x510] sm:$0xf]  ;;  %v223_v5 = vld [vmem:[%s2779_s17 + $0x188] sm:$0xff]  ;;  %v2591_v7 = vpack.c.bf16 %v221_v63, %v182_v62  ;;  %v2597_v8 = vpack.c.bf16 %v224_v2, %v185_v1  ;;  %v261_v9 = vld [vmem:[%s2779_s17 + $0x2b8] sm:$0xff] }
  0x23   : > { %2584 = vmatpush1.bf16.msra.mxu1 %v2583_v45  ;;  %567 = vmatprep.mubr.f32.mxu0 %v2739_v0  ;;  %v184_v4 = vld [vmem:[%s2779_s17 + $0x50] sm:$0xff]  ;;  %v299_v13 = vld [vmem:[%s2779_s17 + $0x3e8] sm:$0xff]  ;;  %v302_v15 = vld [vmem:[%s2779_s17 + $0x400] sm:$0xff] }
  0x24   : > { %650 = vmatprep.mubr.f32.mxu1 %v2739_v0  ;;  %2432 = vmatmul.mubr.msk.f32.gmra.mrb[2].mxu0 %vm369_vm1, %v2833_v51  ;;  %v300_v10 = vld [vmem:[%s2779_s17 + $0x3f0] sm:$0xff]  ;;  %v2599_v12 = vpack.c.bf16 %v223_v5, %v184_v4  ;;  %v263_v14 = vld [vmem:[%s2779_s17 + $0x2c8] sm:$0xff]  ;;  %v262_v16 = vld [vmem:[%s2779_s17 + $0x2c0] sm:$0xff] }
  0x25   : > { %2437 = vmatmul.mubr.msk.f32.gmra.mrb[2].mxu1 %vm369_vm1, %v2833_v51  ;;  %2578 = vmatprep.subr.bf16.mxu0 %v2577_v52  ;;  %v260_v11 = vld [vmem:[%s2779_s17 + $0x2b0] sm:$0xff]  ;;  %v301_v17 = vld [vmem:[%s2779_s17 + $0x3f8] sm:$0xff]  ;;  %v2593_v18 = vpack.c.bf16 %v300_v10, %v261_v9  ;;  %v2601_v20 = vpack.c.bf16 %v302_v15, %v263_v14  ;;  %v339_v22 = vld [vmem:[%s2779_s17 + $0x528] sm:$0xf] }
  0x26   : > { %2580 = vmatpush1.bf16.msra.mxu0 %v2579_v53  ;;  %2586 = vmatprep.subr.bf16.mxu1 %v2585_v54  ;;  %v2595_v19 = vpack.c.bf16 %v299_v13, %v260_v11  ;;  %v2603_v21 = vpack.c.bf16 %v301_v17, %v262_v16  ;;  %v338_v23 = vld [vmem:[%s2779_s17 + $0x520] sm:$0xf]  ;;  %v341_v24 = vld [vmem:[%s2779_s17 + $0x538] sm:$0xf]  ;;  %v187_v25 = vld [vmem:[%s2779_s17 + $0x68] sm:$0xff] }
  0x27   : > { %2588 = vmatpush1.bf16.msra.mxu1 %v2587_v55  ;;  %573 = vmatprep.mubr.f32.mxu0 %v2739_v0  ;;  %v226_v26 = vld [vmem:[%s2779_s17 + $0x1a0] sm:$0xff]  ;;  %v225_v28 = vld [vmem:[%s2779_s17 + $0x198] sm:$0xff]  ;;  %v228_v30 = vld [vmem:[%s2779_s17 + $0x1b0] sm:$0xff] }
  0x28   : > { %656 = vmatprep.mubr.f32.mxu1 %v2739_v0  ;;  %2433 = vmatmul.mubr.msk.f32.gmra.mrb[4].mxu0 %vm369_vm1, %v2842_v56  ;;  %v186_v27 = vld [vmem:[%s2779_s17 + $0x60] sm:$0xff]  ;;  %v189_v29 = vld [vmem:[%s2779_s17 + $0x78] sm:$0xff]  ;;  %v340_v31 = vld [vmem:[%s2779_s17 + $0x530] sm:$0xf]  ;;  %v2605_v34 = vpack.c.bf16 %v226_v26, %v187_v25 }
  0x29   : > { %2438 = vmatmul.mubr.msk.f32.gmra.mrb[4].mxu1 %vm369_vm1, %v2842_v56  ;;  %2439 = vmatprep.subr.msk.mxu0 %vm379_vm0, %v335_v57  ;;  %v188_v32 = vld [vmem:[%s2779_s17 + $0x70] sm:$0xff]  ;;  %v227_v33 = vld [vmem:[%s2779_s17 + $0x1a8] sm:$0xff]  ;;  %v2607_v35 = vpack.c.bf16 %v225_v28, %v186_v27  ;;  %v2613_v36 = vpack.c.bf16 %v228_v30, %v189_v29  ;;  %v265_v37 = vld [vmem:[%s2779_s17 + $0x2d8] sm:$0xff] }
  0x2a   : > { %2440 = vmatpush1.msk.msra.mxu0 %vm379_vm0, %v334_v58  ;;  %2444 = vmatprep.subr.msk.mxu1 %vm379_vm0, %v337_v59  ;;  %v304_v39 = vld [vmem:[%s2779_s17 + $0x410] sm:$0xff]  ;;  %v2615_v41 = vpack.c.bf16 %v227_v33, %v188_v32  ;;  %v303_v42 = vld [vmem:[%s2779_s17 + $0x408] sm:$0xff]  ;;  %v306_v44 = vld [vmem:[%s2779_s17 + $0x420] sm:$0xff] }
  0x2b   : > { %2445 = vmatpush1.msk.msra.mxu1 %vm379_vm0, %v336_v3  ;;  %727 = vmatprep.mubr.f32.mxu0 %v2739_v0  ;;  %v264_v40 = vld [vmem:[%s2779_s17 + $0x2d0] sm:$0xff]  ;;  %v267_v43 = vld [vmem:[%s2779_s17 + $0x2e8] sm:$0xff]  ;;  %v266_v45 = vld [vmem:[%s2779_s17 + $0x2e0] sm:$0xff]  ;;  %v2609_v47 = vpack.c.bf16 %v304_v39, %v265_v37 }
  0x2c   : > { %810 = vmatprep.mubr.f32.mxu1 %v2739_v0  ;;  %2441 = vmatmul.mubr.msk.f32.vlgmr.msra.gmra.mrb[6].mxu0 %vm369_vm1, %v2814_v38  ;;  %v305_v46 = vld [vmem:[%s2779_s17 + $0x418] sm:$0xff]  ;;  %v2611_v48 = vpack.c.bf16 %v303_v42, %v264_v40  ;;  %v2617_v49 = vpack.c.bf16 %v306_v44, %v267_v43  ;;  %v343_v52 = vld [vmem:[%s2779_s17 + $0x548] sm:$0xf]  ;;  %v342_v53 = vld [vmem:[%s2779_s17 + $0x540] sm:$0xf] }
  0x2d   : > { %2446 = vmatmul.mubr.msk.f32.vlgmr.msra.gmra.mrb[6].mxu1 %vm369_vm1, %v2814_v38  ;;  %2590 = vmatprep.subr.bf16.mxu0 %v2589_v6  ;;  %v2619_v50 = vpack.c.bf16 %v305_v46, %v266_v45  ;;  %v345_v54 = vld [vmem:[%s2779_s17 + $0x558] sm:$0xf]  ;;  %v191_v55 = vld [vmem:[%s2779_s17 + $0x88] sm:$0xff]  ;;  %v230_v57 = vld [vmem:[%s2779_s17 + $0x1c0] sm:$0xff] }
  0x2e   : > { %2592 = vmatpush1.bf16.msra.mxu0 %v2591_v7  ;;  %2598 = vmatprep.subr.bf16.mxu1 %v2597_v8  ;;  %v190_v58 = vld [vmem:[%s2779_s17 + $0x80] sm:$0xff]  ;;  %v229_v59 = vld [vmem:[%s2779_s17 + $0x1b8] sm:$0xff]  ;;  %v232_v61 = vld [vmem:[%s2779_s17 + $0x1d0] sm:$0xff]  ;;  %v2621_v2 = vpack.c.bf16 %v230_v57, %v191_v55 }
  0x2f   : > { %2600 = vmatpush1.bf16.msra.mxu1 %v2599_v12  ;;  %733 = vmatprep.mubr.f32.mxu0 %v2739_v0  ;;  %v193_v60 = vld [vmem:[%s2779_s17 + $0x98] sm:$0xff]  ;;  %v344_v62 = vld [vmem:[%s2779_s17 + $0x550] sm:$0xf]  ;;  %v231_v1 = vld [vmem:[%s2779_s17 + $0x1c8] sm:$0xff]  ;;  %v2623_v3 = vpack.c.bf16 %v229_v59, %v190_v58 }
  0x30   : > { %816 = vmatprep.mubr.f32.mxu1 %v2739_v0  ;;  %2442 = vmatmul.mubr.msk.f32.gmra.mrb[8].mxu0 %vm369_vm1, %v2833_v51  ;;  %v192_v63 = vld [vmem:[%s2779_s17 + $0x90] sm:$0xff]  ;;  %v2629_v4 = vpack.c.bf16 %v232_v61, %v193_v60  ;;  %v269_v5 = vld [vmem:[%s2779_s17 + $0x2f8] sm:$0xff]  ;;  %v307_v9 = vld [vmem:[%s2779_s17 + $0x428] sm:$0xff] }
  0x31   : > { %2447 = vmatmul.mubr.msk.f32.gmra.mrb[8].mxu1 %vm369_vm1, %v2833_v51  ;;  %2594 = vmatprep.subr.bf16.mxu0 %v2593_v18  ;;  %v308_v6 = vld [vmem:[%s2779_s17 + $0x430] sm:$0xff]  ;;  %v2631_v8 = vpack.c.bf16 %v231_v1, %v192_v63  ;;  %v271_v10 = vld [vmem:[%s2779_s17 + $0x308] sm:$0xff]  ;;  %v310_v11 = vld [vmem:[%s2779_s17 + $0x440] sm:$0xff] }
  0x32   : > { %2596 = vmatpush1.bf16.msra.mxu0 %v2595_v19  ;;  %2602 = vmatprep.subr.bf16.mxu1 %v2601_v20  ;;  %v268_v7 = vld [vmem:[%s2779_s17 + $0x2f0] sm:$0xff]  ;;  %v270_v12 = vld [vmem:[%s2779_s17 + $0x300] sm:$0xff]  ;;  %v309_v13 = vld [vmem:[%s2779_s17 + $0x438] sm:$0xff]  ;;  %v2625_v14 = vpack.c.bf16 %v308_v6, %v269_v5  ;;  %v2633_v16 = vpack.c.bf16 %v310_v11, %v271_v10 }
  0x33   : > { %2604 = vmatpush1.bf16.msra.mxu1 %v2603_v21  ;;  %739 = vmatprep.mubr.f32.mxu0 %v2739_v0  ;;  %v2627_v15 = vpack.c.bf16 %v307_v9, %v268_v7  ;;  %v2635_v17 = vpack.c.bf16 %v309_v13, %v270_v12  ;;  %v347_v18 = vld [vmem:[%s2779_s17 + $0x568] sm:$0xf]  ;;  %v346_v19 = vld [vmem:[%s2779_s17 + $0x560] sm:$0xf]  ;;  %v349_v20 = vld [vmem:[%s2779_s17 + $0x578] sm:$0xf] }
  0x34   : > { %822 = vmatprep.mubr.f32.mxu1 %v2739_v0  ;;  %2443 = vmatmul.mubr.msk.f32.gmra.mrb[10].mxu0 %vm369_vm1, %v2842_v56  ;;  %v195_v21 = vld [vmem:[%s2779_s17 + $0xa8] sm:$0xff]  ;;  %v197_v25 = vld [vmem:[%s2779_s17 + $0xb8] sm:$0xff]  ;;  %v236_v26 = vld [vmem:[%s2779_s17 + $0x1f0] sm:$0xff] }
  0x35   : > { %2448 = vmatmul.mubr.msk.f32.gmra.mrb[10].mxu1 %vm369_vm1, %v2842_v56  ;;  %2449 = vmatprep.subr.msk.mxu0 %vm379_vm0, %v339_v22  ;;  %v234_v22 = vld [vmem:[%s2779_s17 + $0x1e0] sm:$0xff]  ;;  %v348_v27 = vld [vmem:[%s2779_s17 + $0x570] sm:$0xf]  ;;  %v235_v29 = vld [vmem:[%s2779_s17 + $0x1e8] sm:$0xff]  ;;  %v2645_v32 = vpack.c.bf16 %v236_v26, %v197_v25 }
  0x36   : > { %2450 = vmatpush1.msk.msra.mxu0 %vm379_vm0, %v338_v23  ;;  %2454 = vmatprep.subr.msk.mxu1 %vm379_vm0, %v341_v24  ;;  %v194_v23 = vld [vmem:[%s2779_s17 + $0xa0] sm:$0xff]  ;;  %v233_v24 = vld [vmem:[%s2779_s17 + $0x1d8] sm:$0xff]  ;;  %v196_v28 = vld [vmem:[%s2779_s17 + $0xb0] sm:$0xff]  ;;  %v2637_v30 = vpack.c.bf16 %v234_v22, %v195_v21 }
  0x37   : > { %2455 = vmatpush1.msk.msra.mxu1 %vm379_vm0, %v340_v31  ;;  %893 = vmatprep.mubr.f32.mxu0 %v2739_v0  ;;  %v2639_v31 = vpack.c.bf16 %v233_v24, %v194_v23  ;;  %v273_v33 = vld [vmem:[%s2779_s17 + $0x318] sm:$0xff]  ;;  %v311_v37 = vld [vmem:[%s2779_s17 + $0x448] sm:$0xff]  ;;  %v314_v40 = vld [vmem:[%s2779_s17 + $0x460] sm:$0xff] }
  0x38   : > { %976 = vmatprep.mubr.f32.mxu1 %v2739_v0  ;;  %2451 = vmatmul.mubr.msk.f32.vlgmr.msra.gmra.mrb[12].mxu0 %vm369_vm1, %v2814_v38  ;;  %v275_v39 = vld [vmem:[%s2779_s17 + $0x328] sm:$0xff]  ;;  %v313_v42 = vld [vmem:[%s2779_s17 + $0x458] sm:$0xff]  ;;  %v240_v57 = vld [vmem:[%s2779_s17 + $0x210] sm:$0xff] }
  0x39   : > { %2456 = vmatmul.mubr.msk.f32.vlgmr.msra.gmra.mrb[12].mxu1 %vm369_vm1, %v2814_v38  ;;  %2606 = vmatprep.subr.bf16.mxu0 %v2605_v34  ;;  %v312_v34 = vld [vmem:[%s2779_s17 + $0x450] sm:$0xff]  ;;  %v2649_v45 = vpack.c.bf16 %v314_v40, %v275_v39  ;;  %v201_v55 = vld [vmem:[%s2779_s17 + $0xd8] sm:$0xff]  ;;  %v239_v60 = vld [vmem:[%s2779_s17 + $0x208] sm:$0xff] }
  0x3a   : > { %2608 = vmatpush1.bf16.msra.mxu0 %v2607_v35  ;;  %2614 = vmatprep.subr.bf16.mxu1 %v2613_v36  ;;  %v272_v35 = vld [vmem:[%s2779_s17 + $0x310] sm:$0xff]  ;;  %v2647_v36 = vpack.c.bf16 %v235_v29, %v196_v28  ;;  %v2641_v43 = vpack.c.bf16 %v312_v34, %v273_v33  ;;  %v2661_v63 = vpack.c.bf16 %v240_v57, %v201_v55  ;;  %v277_v1 = vld [vmem:[%s2779_s17 + $0x338] sm:$0xff]  ;;  %v315_v5 = vld [vmem:[%s2779_s17 + $0x468] sm:$0xff] }
  0x3b   : > { %2616 = vmatpush1.bf16.msra.mxu1 %v2615_v41  ;;  %899 = vmatprep.mubr.f32.mxu0 %v2739_v0  ;;  %v274_v41 = vld [vmem:[%s2779_s17 + $0x320] sm:$0xff]  ;;  %v2643_v44 = vpack.c.bf16 %v311_v37, %v272_v35  ;;  %v352_v58 = vld [vmem:[%s2779_s17 + $0x590] sm:$0xf]  ;;  %v279_v6 = vld [vmem:[%s2779_s17 + $0x348] sm:$0xff] }
  0x3c   : > { %982 = vmatprep.mubr.f32.mxu1 %v2739_v0  ;;  %2452 = vmatmul.mubr.msk.f32.gmra.mrb[14].mxu0 %vm369_vm1, %v2833_v51  ;;  %v2651_v46 = vpack.c.bf16 %v313_v42, %v274_v41  ;;  %v200_v59 = vld [vmem:[%s2779_s17 + $0xd0] sm:$0xff]  ;;  %v318_v7 = vld [vmem:[%s2779_s17 + $0x480] sm:$0xff]  ;;  %v317_v9 = vld [vmem:[%s2779_s17 + $0x478] sm:$0xff] }
  0x3d   : > { %2457 = vmatmul.mubr.msk.f32.gmra.mrb[14].mxu1 %vm369_vm1, %v2833_v51  ;;  %2610 = vmatprep.subr.bf16.mxu0 %v2609_v47  ;;  %v351_v47 = vld [vmem:[%s2779_s17 + $0x588] sm:$0xf]  ;;  %v2665_v12 = vpack.c.bf16 %v318_v7, %v279_v6  ;;  %v205_v21 = vld [vmem:[%s2779_s17 + $0xf8] sm:$0xff]  ;;  %v244_v22 = vld [vmem:[%s2779_s17 + $0x230] sm:$0xff] }
  0x3e   : > { %2612 = vmatpush1.bf16.msra.mxu0 %v2611_v48  ;;  %2618 = vmatprep.subr.bf16.mxu1 %v2617_v49  ;;  %v350_v48 = vld [vmem:[%s2779_s17 + $0x580] sm:$0xf]  ;;  %v353_v49 = vld [vmem:[%s2779_s17 + $0x598] sm:$0xf]  ;;  %v356_v23 = vld [vmem:[%s2779_s17 + $0x5b0] sm:$0xf]  ;;  %v2677_v28 = vpack.c.bf16 %v244_v22, %v205_v21 }
  0x3f   : > { %2620 = vmatpush1.bf16.msra.mxu1 %v2619_v50  ;;  %905 = vmatprep.mubr.f32.mxu0 %v2739_v0  ;;  %v199_v50 = vld [vmem:[%s2779_s17 + $0xc8] sm:$0xff]  ;;  %v204_v24 = vld [vmem:[%s2779_s17 + $0xf0] sm:$0xff]  ;;  %v281_v29 = vld [vmem:[%s2779_s17 + $0x358] sm:$0xff] }
  0x40   : > { %988 = vmatprep.mubr.f32.mxu1 %v2739_v0  ;;  %2453 = vmatmul.mubr.msk.f32.gmra.mrb[16].mxu0 %vm369_vm1, %v2842_v56  ;;  %v243_v25 = vld [vmem:[%s2779_s17 + $0x228] sm:$0xff]  ;;  %v322_v35 = vld [vmem:[%s2779_s17 + $0x4a0] sm:$0xff]  ;;  %v321_v37 = vld [vmem:[%s2779_s17 + $0x498] sm:$0xff] }
  0x41   : > { %2458 = vmatmul.mubr.msk.f32.gmra.mrb[16].mxu1 %vm369_vm1, %v2842_v56  ;;  %2459 = vmatprep.subr.msk.mxu0 %vm379_vm0, %v343_v52  ;;  %v238_v52 = vld [vmem:[%s2779_s17 + $0x200] sm:$0xff]  ;;  %v319_v33 = vld [vmem:[%s2779_s17 + $0x488] sm:$0xff]  ;;  %v289_v22 = vld [vmem:[%s2779_s17 + $0x398] sm:$0xff] }
  0x42   : > { %2460 = vmatpush1.msk.msra.mxu0 %vm379_vm0, %v342_v53  ;;  %2464 = vmatprep.subr.msk.mxu1 %vm379_vm0, %v345_v54  ;;  %v198_v53 = vld [vmem:[%s2779_s17 + $0xc0] sm:$0xff]  ;;  %v237_v54 = vld [vmem:[%s2779_s17 + $0x1f8] sm:$0xff]  ;;  %v2653_v61 = vpack.c.bf16 %v238_v52, %v199_v50  ;;  %v283_v34 = vld [vmem:[%s2779_s17 + $0x368] sm:$0xff] }
  0x43   : > { %2465 = vmatpush1.msk.msra.mxu1 %vm379_vm0, %v344_v62  ;;  %1059 = vmatprep.mubr.f32.mxu0 %v2739_v0  ;;  %v2655_v62 = vpack.c.bf16 %v237_v54, %v198_v53  ;;  %v2681_v41 = vpack.c.bf16 %v322_v35, %v283_v34  ;;  %v209_v50 = vld [vmem:[%s2779_s17 + $0x118] sm:$0xff]  ;;  %v248_v52 = vld [vmem:[%s2779_s17 + $0x250] sm:$0xff]  ;;  %v247_v55 = vld [vmem:[%s2779_s17 + $0x248] sm:$0xff] }
  0x44   : > { %1142 = vmatprep.mubr.f32.mxu1 %v2739_v0  ;;  %2461 = vmatmul.mubr.msk.f32.vlgmr.msra.gmra.mrb[18].mxu0 %vm369_vm1, %v2814_v38  ;;  %v360_v53 = vld [vmem:[%s2779_s17 + $0x5d0] sm:$0xf]  ;;  %v366_v34 = vld [vmem:[%s2779_s17 + $0x600] sm:$0xf] }
  0x45   : > { %2466 = vmatmul.mubr.msk.f32.vlgmr.msra.gmra.mrb[18].mxu1 %vm369_vm1, %v2814_v38  ;;  %2622 = vmatprep.subr.bf16.mxu0 %v2621_v2  ;;  %v316_v2 = vld [vmem:[%s2779_s17 + $0x470] sm:$0xff] }
  0x46   : > { %2624 = vmatpush1.bf16.msra.mxu0 %v2623_v3  ;;  %2630 = vmatprep.subr.bf16.mxu1 %v2629_v4  ;;  %v276_v3 = vld [vmem:[%s2779_s17 + $0x330] sm:$0xff]  ;;  %v2663_v4 = vpack.c.bf16 %v239_v60, %v200_v59  ;;  %v2657_v10 = vpack.c.bf16 %v316_v2, %v277_v1  ;;  %v2693_v59 = vpack.c.bf16 %v248_v52, %v209_v50  ;;  %v285_v60 = vld [vmem:[%s2779_s17 + $0x378] sm:$0xff]  ;;  %v323_v1 = vld [vmem:[%s2779_s17 + $0x4a8] sm:$0xff] }
  0x47   : > { %2632 = vmatpush1.bf16.msra.mxu1 %v2631_v8  ;;  %1065 = vmatprep.mubr.f32.mxu0 %v2739_v0  ;;  %v278_v8 = vld [vmem:[%s2779_s17 + $0x340] sm:$0xff]  ;;  %v2659_v11 = vpack.c.bf16 %v315_v5, %v276_v3  ;;  %v208_v54 = vld [vmem:[%s2779_s17 + $0x110] sm:$0xff]  ;;  %v287_v2 = vld [vmem:[%s2779_s17 + $0x388] sm:$0xff] }
  0x48   : > { %1148 = vmatprep.mubr.f32.mxu1 %v2739_v0  ;;  %2462 = vmatmul.mubr.msk.f32.gmra.mrb[20].mxu0 %vm369_vm1, %v2833_v51  ;;  %v2667_v13 = vpack.c.bf16 %v317_v9, %v278_v8  ;;  %v326_v3 = vld [vmem:[%s2779_s17 + $0x4c0] sm:$0xff]  ;;  %v325_v5 = vld [vmem:[%s2779_s17 + $0x4b8] sm:$0xff]  ;;  %v368_v35 = vld [vmem:[%s2779_s17 + $0x610] sm:$0xf] }
  0x49   : > { %2467 = vmatmul.mubr.msk.f32.gmra.mrb[20].mxu1 %vm369_vm1, %v2833_v51  ;;  %2626 = vmatprep.subr.bf16.mxu0 %v2625_v14  ;;  %v355_v14 = vld [vmem:[%s2779_s17 + $0x5a8] sm:$0xf]  ;;  %v2697_v8 = vpack.c.bf16 %v326_v3, %v287_v2 }
  0x4a   : > { %2628 = vmatpush1.bf16.msra.mxu0 %v2627_v15  ;;  %2634 = vmatprep.subr.bf16.mxu1 %v2633_v16  ;;  %v354_v15 = vld [vmem:[%s2779_s17 + $0x5a0] sm:$0xf]  ;;  %v357_v16 = vld [vmem:[%s2779_s17 + $0x5b8] sm:$0xf] }
  0x4b   : > { %2636 = vmatpush1.bf16.msra.mxu1 %v2635_v17  ;;  %1071 = vmatprep.mubr.f32.mxu0 %v2739_v0  ;;  %v203_v17 = vld [vmem:[%s2779_s17 + $0xe8] sm:$0xff] }
  0x4c   : > { %1154 = vmatprep.mubr.f32.mxu1 %v2739_v0  ;;  %2463 = vmatmul.mubr.msk.f32.gmra.mrb[22].mxu0 %vm369_vm1, %v2842_v56 }
  0x4d   : > { %2468 = vmatmul.mubr.msk.f32.gmra.mrb[22].mxu1 %vm369_vm1, %v2842_v56  ;;  %2469 = vmatprep.subr.msk.mxu0 %vm379_vm0, %v347_v18  ;;  %v242_v18 = vld [vmem:[%s2779_s17 + $0x220] sm:$0xff] }
  0x4e   : > { %2470 = vmatpush1.msk.msra.mxu0 %vm379_vm0, %v346_v19  ;;  %2474 = vmatprep.subr.msk.mxu1 %vm379_vm0, %v349_v20  ;;  %v202_v19 = vld [vmem:[%s2779_s17 + $0xe0] sm:$0xff]  ;;  %v241_v20 = vld [vmem:[%s2779_s17 + $0x218] sm:$0xff]  ;;  %v2669_v26 = vpack.c.bf16 %v242_v18, %v203_v17  ;;  %v364_v17 = vld [vmem:[%s2779_s17 + $0x5f0] sm:$0xf] }
  0x4f   : > { %2475 = vmatpush1.msk.msra.mxu1 %vm379_vm0, %v348_v27  ;;  %1225 = vmatprep.mubr.f32.mxu0 %v2739_v0  ;;  %v2671_v27 = vpack.c.bf16 %v241_v20, %v202_v19  ;;  %v212_v18 = vld [vmem:[%s2779_s17 + $0x130] sm:$0xff]  ;;  %v251_v19 = vld [vmem:[%s2779_s17 + $0x268] sm:$0xff] }
  0x50   : > { %1308 = vmatprep.mubr.f32.mxu1 %v2739_v0  ;;  %2471 = vmatmul.mubr.msk.f32.vlgmr.msra.gmra.mrb[24].mxu0 %vm369_vm1, %v2814_v38 }
  0x51   : > { %2476 = vmatmul.mubr.msk.f32.vlgmr.msra.gmra.mrb[24].mxu1 %vm369_vm1, %v2814_v38  ;;  %2638 = vmatprep.subr.bf16.mxu0 %v2637_v30  ;;  %v320_v30 = vld [vmem:[%s2779_s17 + $0x490] sm:$0xff] }
  0x52   : > { %2640 = vmatpush1.bf16.msra.mxu0 %v2639_v31  ;;  %2646 = vmatprep.subr.bf16.mxu1 %v2645_v32  ;;  %v280_v31 = vld [vmem:[%s2779_s17 + $0x350] sm:$0xff]  ;;  %v2679_v32 = vpack.c.bf16 %v243_v25, %v204_v24  ;;  %v2673_v39 = vpack.c.bf16 %v320_v30, %v281_v29  ;;  %v2710_v24 = vpack.c.bf16 %v251_v19, %v212_v18  ;;  %v2741_v30 = vmov 0.0|0.0  }
  0x53   : > { %2648 = vmatpush1.bf16.msra.mxu1 %v2647_v36  ;;  %1231 = vmatprep.mubr.f32.mxu0 %v2739_v0  ;;  %v282_v36 = vld [vmem:[%s2779_s17 + $0x360] sm:$0xff]  ;;  %v2675_v40 = vpack.c.bf16 %v319_v33, %v280_v31  ;;  %v288_v25 = vld [vmem:[%s2779_s17 + $0x390] sm:$0xff]  ;;  %v367_v33 = vld [vmem:[%s2779_s17 + $0x608] sm:$0xf] }
  0x54   : > { %1314 = vmatprep.mubr.f32.mxu1 %v2739_v0  ;;  %2472 = vmatmul.mubr.msk.f32.gmra.mrb[26].mxu0 %vm369_vm1, %v2833_v51  ;;  %v2683_v42 = vpack.c.bf16 %v321_v37, %v282_v36  ;;  %v2232_v36 = vld [vmem:[%s3664_s2] sm:$0xff]  ;;  %v2234_v37 = vld [vmem:[%s3664_s2 + $0x10] sm:$0xff] }
  0x55   : > { %2477 = vmatmul.mubr.msk.f32.gmra.mrb[26].mxu1 %vm369_vm1, %v2833_v51  ;;  %2642 = vmatprep.subr.bf16.mxu0 %v2641_v43  ;;  %v359_v43 = vld [vmem:[%s2779_s17 + $0x5c8] sm:$0xf] }
  0x56   : > { %2644 = vmatpush1.bf16.msra.mxu0 %v2643_v44  ;;  %2650 = vmatprep.subr.bf16.mxu1 %v2649_v45  ;;  %v358_v44 = vld [vmem:[%s2779_s17 + $0x5c0] sm:$0xf]  ;;  %v361_v45 = vld [vmem:[%s2779_s17 + $0x5d8] sm:$0xf] }
  0x57   : > { %2652 = vmatpush1.bf16.msra.mxu1 %v2651_v46  ;;  %1237 = vmatprep.mubr.f32.mxu0 %v2739_v0  ;;  %v207_v46 = vld [vmem:[%s2779_s17 + $0x108] sm:$0xff] }
  0x58   : > { %1320 = vmatprep.mubr.f32.mxu1 %v2739_v0  ;;  %2473 = vmatmul.mubr.msk.f32.gmra.mrb[28].mxu0 %vm369_vm1, %v2842_v56 }
  0x59   : > { %2478 = vmatmul.mubr.msk.f32.gmra.mrb[28].mxu1 %vm369_vm1, %v2842_v56  ;;  %2479 = vmatprep.subr.msk.mxu0 %vm379_vm0, %v351_v47  ;;  %v246_v47 = vld [vmem:[%s2779_s17 + $0x240] sm:$0xff] }
  0x5a   : > { %2480 = vmatpush1.msk.msra.mxu0 %vm379_vm0, %v350_v48  ;;  %2484 = vmatprep.subr.msk.mxu1 %vm379_vm0, %v353_v49  ;;  %v206_v48 = vld [vmem:[%s2779_s17 + $0x100] sm:$0xff]  ;;  %v245_v49 = vld [vmem:[%s2779_s17 + $0x238] sm:$0xff]  ;;  %v2685_v57 = vpack.c.bf16 %v246_v47, %v207_v46 }
  0x5b   : > { %2485 = vmatpush1.msk.msra.mxu1 %vm379_vm0, %v352_v58  ;;  %1391 = vmatprep.mubr.f32.mxu0 %v2739_v0  ;;  %v2687_v58 = vpack.c.bf16 %v245_v49, %v206_v48 }
  0x5c   : > { %1474 = vmatprep.mubr.f32.mxu1 %v2739_v0  ;;  %2481 = vmatmul.mubr.msk.f32.vlgmr.msra.gmra.mrb[30].mxu0 %vm369_vm1, %v2814_v38 }
  0x5d   : > { %2486 = vmatmul.mubr.msk.f32.vlgmr.msra.gmra.mrb[30].mxu1 %vm369_vm1, %v2814_v38  ;;  %2654 = vmatprep.subr.bf16.mxu0 %v2653_v61  ;;  %v324_v61 = vld [vmem:[%s2779_s17 + $0x4b0] sm:$0xff] }
  0x5e   : > { %2656 = vmatpush1.bf16.msra.mxu0 %v2655_v62  ;;  %2662 = vmatprep.subr.bf16.mxu1 %v2661_v63  ;;  %v284_v62 = vld [vmem:[%s2779_s17 + $0x370] sm:$0xff]  ;;  %v2695_v63 = vpack.c.bf16 %v247_v55, %v208_v54  ;;  %v2689_v6 = vpack.c.bf16 %v324_v61, %v285_v60 }
  0x5f   : > { %2664 = vmatpush1.bf16.msra.mxu1 %v2663_v4  ;;  %1397 = vmatprep.mubr.f32.mxu0 %v2739_v0  ;;  %v286_v4 = vld [vmem:[%s2779_s17 + $0x380] sm:$0xff]  ;;  %v2691_v7 = vpack.c.bf16 %v323_v1, %v284_v62 }
  0x60   : > { %1480 = vmatprep.mubr.f32.mxu1 %v2739_v0  ;;  %2482 = vmatmul.mubr.msk.f32.gmra.mrb[32].mxu0 %vm369_vm1, %v2833_v51  ;;  %v2699_v9 = vpack.c.bf16 %v325_v5, %v286_v4 }
  0x61   : > { %2487 = vmatmul.mubr.msk.f32.gmra.mrb[32].mxu1 %vm369_vm1, %v2833_v51  ;;  %2658 = vmatprep.subr.bf16.mxu0 %v2657_v10  ;;  %v363_v10 = vld [vmem:[%s2779_s17 + $0x5e8] sm:$0xf] }
  0x62   : > { %2660 = vmatpush1.bf16.msra.mxu0 %v2659_v11  ;;  %2666 = vmatprep.subr.bf16.mxu1 %v2665_v12  ;;  %v362_v11 = vld [vmem:[%s2779_s17 + $0x5e0] sm:$0xf]  ;;  %v211_v12 = vld [vmem:[%s2779_s17 + $0x128] sm:$0xff] }
  0x63   : > { %2668 = vmatpush1.bf16.msra.mxu1 %v2667_v13  ;;  %1403 = vmatprep.mubr.f32.mxu0 %v2739_v0  ;;  %v250_v13 = vld [vmem:[%s2779_s17 + $0x260] sm:$0xff] }
  0x64   : > { %1486 = vmatprep.mubr.f32.mxu1 %v2739_v0  ;;  %2483 = vmatmul.mubr.msk.f32.gmra.mrb[34].mxu0 %vm369_vm1, %v2842_v56  ;;  %v2701_v20 = vpack.c.bf16 %v250_v13, %v211_v12 }
  0x65   : > { %2488 = vmatmul.mubr.msk.f32.gmra.mrb[34].mxu1 %vm369_vm1, %v2842_v56  ;;  %2489 = vmatprep.subr.msk.mxu0 %vm379_vm0, %v355_v14  ;;  %v365_v14 = vld [vmem:[%s2779_s17 + $0x5f8] sm:$0xf] }
  0x66   : > { %2490 = vmatpush1.msk.msra.mxu0 %vm379_vm0, %v354_v15  ;;  %2494 = vmatprep.subr.msk.mxu1 %vm379_vm0, %v357_v16  ;;  %v210_v15 = vld [vmem:[%s2779_s17 + $0x120] sm:$0xff]  ;;  %v249_v16 = vld [vmem:[%s2779_s17 + $0x258] sm:$0xff] }
  0x67   : > { %2495 = vmatpush1.msk.msra.mxu1 %vm379_vm0, %v356_v23  ;;  %1557 = vmatprep.mubr.f32.mxu0 %v2739_v0  ;;  %v2703_v21 = vpack.c.bf16 %v249_v16, %v210_v15  ;;  %v328_v23 = vld [vmem:[%s2779_s17 + $0x4d0] sm:$0xff] }
  0x68   : > { %1640 = vmatprep.mubr.f32.mxu1 %v2739_v0  ;;  %2491 = vmatmul.mubr.msk.f32.vlgmr.msra.gmra.mrb[36].mxu0 %vm369_vm1, %v2814_v38  ;;  %v2705_v29 = vpack.c.bf16 %v328_v23, %v289_v22 }
  0x69   : > { %2496 = vmatmul.mubr.msk.f32.vlgmr.msra.gmra.mrb[36].mxu1 %vm369_vm1, %v2814_v38  ;;  %2670 = vmatprep.subr.bf16.mxu0 %v2669_v26  ;;  %v327_v26 = vld [vmem:[%s2779_s17 + $0x4c8] sm:$0xff] }
  0x6a   : > { %2672 = vmatpush1.bf16.msra.mxu0 %v2671_v27  ;;  %2678 = vmatprep.subr.bf16.mxu1 %v2677_v28  ;;  %v290_v27 = vld [vmem:[%s2779_s17 + $0x3a0] sm:$0xff]  ;;  %v329_v28 = vld [vmem:[%s2779_s17 + $0x4d8] sm:$0xff]  ;;  %v2707_v31 = vpack.c.bf16 %v327_v26, %v288_v25 }
  0x6b   : > { %2680 = vmatpush1.bf16.msra.mxu1 %v2679_v32  ;;  %1563 = vmatprep.mubr.f32.mxu0 %v2739_v0  ;;  %v2713_v32 = vpack.c.bf16 %v329_v28, %v290_v27 }
  0x6c   : > { %1646 = vmatprep.mubr.f32.mxu1 %v2739_v0  ;;  %2492 = vmatmul.mubr.msk.f32.gmra.mrb[38].mxu0 %vm369_vm1, %v2833_v51 }
  0x6d   : > { %2497 = vmatmul.mubr.msk.f32.gmra.mrb[38].mxu1 %vm369_vm1, %v2833_v51  ;;  %2674 = vmatprep.subr.bf16.mxu0 %v2673_v39  ;;  %v2233_v39 = vld [vmem:[%s3664_s2 + $0x8] sm:$0xff] }
  0x6e   : > { %2676 = vmatpush1.bf16.msra.mxu0 %v2675_v40  ;;  %2682 = vmatprep.subr.bf16.mxu1 %v2681_v41 }
  0x6f   : > { %2684 = vmatpush1.bf16.msra.mxu1 %v2683_v42  ;;  %1569 = vmatprep.mubr.f32.mxu0 %v2739_v0 }
  0x70   : > { %1652 = vmatprep.mubr.f32.mxu1 %v2739_v0  ;;  %2493 = vmatmul.mubr.msk.f32.gmra.mrb[40].mxu0 %vm369_vm1, %v2842_v56 }
  0x71   : > { %2498 = vmatmul.mubr.msk.f32.gmra.mrb[40].mxu1 %vm369_vm1, %v2842_v56  ;;  %2499 = vmatprep.subr.msk.mxu0 %vm379_vm0, %v359_v43 }
  0x72   : > { %2500 = vmatpush1.msk.msra.mxu0 %vm379_vm0, %v358_v44  ;;  %2504 = vmatprep.subr.msk.mxu1 %vm379_vm0, %v361_v45 }
  0x73   : > { %2505 = vmatpush1.msk.msra.mxu1 %vm379_vm0, %v360_v53  ;;  %1723 = vmatprep.mubr.f32.mxu0 %v2739_v0 }
  0x74   : > { %1806 = vmatprep.mubr.f32.mxu1 %v2739_v0  ;;  %2501 = vmatmul.mubr.msk.f32.vlgmr.msra.gmra.mrb[42].mxu0 %vm369_vm1, %v2814_v38 }
  0x75   : > { %2506 = vmatmul.mubr.msk.f32.vlgmr.msra.gmra.mrb[42].mxu1 %vm369_vm1, %v2814_v38  ;;  %2686 = vmatprep.subr.bf16.mxu0 %v2685_v57 }
  0x76   : > { %2688 = vmatpush1.bf16.msra.mxu0 %v2687_v58  ;;  %2694 = vmatprep.subr.bf16.mxu1 %v2693_v59 }
  0x77   : > { %2696 = vmatpush1.bf16.msra.mxu1 %v2695_v63  ;;  %1729 = vmatprep.mubr.f32.mxu0 %v2739_v0 }
  0x78   : > { %1812 = vmatprep.mubr.f32.mxu1 %v2739_v0  ;;  %2502 = vmatmul.mubr.msk.f32.gmra.mrb[44].mxu0 %vm369_vm1, %v2833_v51 }
  0x79   : > { %2507 = vmatmul.mubr.msk.f32.gmra.mrb[44].mxu1 %vm369_vm1, %v2833_v51  ;;  %2690 = vmatprep.subr.bf16.mxu0 %v2689_v6 }
  0x7a   : > { %2692 = vmatpush1.bf16.msra.mxu0 %v2691_v7  ;;  %2698 = vmatprep.subr.bf16.mxu1 %v2697_v8 }
  0x7b   : > { %2700 = vmatpush1.bf16.msra.mxu1 %v2699_v9  ;;  %1735 = vmatprep.mubr.f32.mxu0 %v2739_v0 }
  0x7c   : > { %1818 = vmatprep.mubr.f32.mxu1 %v2739_v0  ;;  %2503 = vmatmul.mubr.msk.f32.gmra.mrb[46].mxu0 %vm369_vm1, %v2842_v56 }
  0x7d   : > { %2508 = vmatmul.mubr.msk.f32.gmra.mrb[46].mxu1 %vm369_vm1, %v2842_v56  ;;  %2509 = vmatprep.subr.msk.mxu0 %vm379_vm0, %v363_v10 }
  0x7e   : > { %2510 = vmatpush1.msk.msra.mxu0 %vm379_vm0, %v362_v11  ;;  %2514 = vmatprep.subr.msk.mxu1 %vm379_vm0, %v365_v14 }
  0x7f   : > { %2515 = vmatpush1.msk.msra.mxu1 %vm379_vm0, %v364_v17  ;;  %1889 = vmatprep.mubr.f32.mxu0 %v2739_v0 }
  0x80   : > { %1972 = vmatprep.mubr.f32.mxu1 %v2739_v0  ;;  %2511 = vmatmul.mubr.msk.f32.vlgmr.msra.gmra.mrb[48].mxu0 %vm369_vm1, %v2814_v38 }
  0x81   : > { %2516 = vmatmul.mubr.msk.f32.vlgmr.msra.gmra.mrb[48].mxu1 %vm369_vm1, %v2814_v38  ;;  %2702 = vmatprep.subr.bf16.mxu0 %v2701_v20 }
  0x82   : > { %2704 = vmatpush1.bf16.msra.mxu0 %v2703_v21  ;;  %2709 = vmatprep.subr.bf16.mxu1 %v2741_v30 }
  0x83   : > { %2711 = vmatpush3.bf16.msra.mxu1 %v2710_v24  ;;  %1895 = vmatprep.mubr.f32.mxu0 %v2739_v0 }
  0x84   : > { %1978 = vmatprep.mubr.f32.mxu1 %v2739_v0  ;;  %2512 = vmatmul.mubr.msk.f32.gmra.mrb[50].mxu0 %vm369_vm1, %v2833_v51 }
  0x85   : > { %2517 = vmatmul.mubr.msk.f32.gmra.mrb[50].mxu1 %vm369_vm1, %v2833_v51  ;;  %2706 = vmatprep.subr.bf16.mxu0 %v2705_v29 }
  0x86   : > { %2708 = vmatpush1.bf16.msra.mxu0 %v2707_v31  ;;  %2712 = vmatprep.subr.bf16.mxu1 %v2741_v30 }
  0x87   : > { %2714 = vmatpush3.bf16.msra.mxu1 %v2713_v32  ;;  %1901 = vmatprep.mubr.f32.mxu0 %v2739_v0 }
  0x88   : > { %1984 = vmatprep.mubr.f32.mxu1 %v2739_v0  ;;  %2513 = vmatmul.mubr.msk.f32.gmra.mrb[52].mxu0 %vm369_vm1, %v2842_v56 }
  0x89   : > { %2518 = vmatmul.mubr.msk.f32.gmra.mrb[52].mxu1 %vm369_vm1, %v2842_v56  ;;  %2519 = vmatprep.subr.msk.mxu0 %vm379_vm0, %v367_v33 }
  0x8a   : > { %2520 = vmatpush1.msk.msra.mxu0 %vm379_vm0, %v366_v34  ;;  %2546 = vmatprep.subr.mxu1 %v2739_v0 }
  0x8b   : > { %2547 = vmatpush3.msk.msra.mxu1 %vm379_vm0, %v368_v35  ;;  %2055 = vmatprep.mubr.f32.mxu0 %v2739_v0 }
  0x8c   : > { %2548 = vmatprep.mubr.msk.f32.mxu1 %vm2742_vm2, %v2739_v0  ;;  %2521 = vmatmul.mubr.msk.f32.vlgmr.msra.gmra.mrb[54].mxu0 %vm369_vm1, %v2814_v38 }
  0x8d   : > { %2549 = vmatmul.mubr.msk.f32.vlgmr.msra.gmra.mrb[54].mxu1 %vm369_vm1, %v2814_v38  ;;  %2061 = vmatprep.mubr.f32.mxu0 %v2739_v0 }
  0x8e   : > { %2551 = vmatprep.mubr.msk.f32.mxu1 %vm2742_vm2, %v2739_v0  ;;  %2237 = vperm.xlu0 %2729, %v2232_v36  }
  0x8f   : > { %2247 = vperm.xlu1 %2730, %v2234_v37  }
  0x90   : > { %2522 = vmatmul.mubr.msk.f32.gmra.mrb[56].mxu0 %vm369_vm1, %v2833_v51 }
  0x91   : > { %2552 = vmatmul.mubr.msk.f32.gmra.mrb[56].mxu1 %vm369_vm1, %v2833_v51  ;;  %2067 = vmatprep.mubr.f32.mxu0 %v2739_v0 }
  0x92   : > { %2554 = vmatprep.mubr.msk.f32.mxu1 %vm2742_vm2, %v2739_v0  ;;  %2242 = vperm.xlu0 %2729, %v2233_v39  }
  0x94   : > { %2523 = vmatmul.mubr.msk.f32.gmra.mrb[58].mxu0 %vm369_vm1, %v2842_v56 }
  0x95   : > { %2555 = vmatmul.mubr.msk.f32.gmra.mrb[58].mxu1 %vm369_vm1, %v2842_v56 }
  0xf3   : > { %v3218_v38 = vpop.f32.mrb[0].mxu0 }
  0xf4   : > { %v3220_v40 = vpop.f32.mrb[1].mxu0  ;;  %v3222_v41 = vpop.f32.mrb[0].mxu1 }
  0xf5   : > { %v3224_v42 = vpop.f32.mrb[1].mxu1 }
  0xf7   : > { %v3226_v51 = vpop.f32.mrb[2].mxu0 }
  0xf8   : > { %v3228_v43 = vpop.f32.mrb[3].mxu0  ;;  %v3230_v0 = vpop.f32.mrb[2].mxu1 }
  0xf9   : > { %v3232_v44 = vpop.f32.mrb[3].mxu1 }
  0xfb   : > { %v3234_v45 = vpop.f32.mrb[4].mxu0 }
  0xfc   : > { %v3236_v46 = vpop.f32.mrb[5].mxu0  ;;  %v3238_v56 = vpop.f32.mrb[4].mxu1 }
  0xfd   : > { %v3240_v47 = vpop.f32.mrb[5].mxu1 }
  0xff   : > { %v3242_v48 = vpop.f32.mrb[6].mxu0 }
 0x100   : > { %v3244_v49 = vpop.f32.mrb[7].mxu0  ;;  %v3246_v50 = vpop.f32.mrb[6].mxu1 }
 0x101   : > { %3689 = vst [vmem:[#allocation2_spill] sm:$0xff] %v3246_v50  ;;  %v3248_v52 = vpop.f32.mrb[7].mxu1 }
 0x103   : > { %v3250_v53 = vpop.f32.mrb[8].mxu0 }
 0x104   : > { %v3252_v54 = vpop.f32.mrb[9].mxu0  ;;  %v3254_v55 = vpop.f32.mrb[8].mxu1 }
 0x105   : > { %3690 = vst [vmem:[#allocation3_spill] sm:$0xff] %v3254_v55  ;;  %v3256_v57 = vpop.f32.mrb[9].mxu1 }
 0x107   : > { %v3258_v58 = vpop.f32.mrb[10].mxu0 }
 0x108   : > { %v3260_v59 = vpop.f32.mrb[11].mxu0  ;;  %v3262_v60 = vpop.f32.mrb[10].mxu1 }
 0x109   : > { %3691 = vst [vmem:[#allocation4_spill] sm:$0xff] %v3262_v60  ;;  %v3264_v61 = vpop.f32.mrb[11].mxu1 }
 0x10a   : > { %3692 = vst [vmem:[#allocation5_spill] sm:$0xff] %v3264_v61 }
 0x10b   : > { %v3266_v62 = vpop.f32.mrb[12].mxu0 }
 0x10c   : > { %v3268_v63 = vpop.f32.mrb[13].mxu0  ;;  %v3270_v1 = vpop.f32.mrb[12].mxu1 }
 0x10d   : > { %3693 = vst [vmem:[#allocation6_spill] sm:$0xff] %v3270_v1  ;;  %v3272_v2 = vpop.f32.mrb[13].mxu1 }
 0x10f   : > { %v3274_v3 = vpop.f32.mrb[14].mxu0 }
 0x110   : > { %v3276_v4 = vpop.f32.mrb[15].mxu0  ;;  %v3278_v5 = vpop.f32.mrb[14].mxu1 }
 0x111   : > { %3694 = vst [vmem:[#allocation7_spill] sm:$0xff] %v3276_v4  ;;  %3695 = vst [vmem:[#allocation8_spill] sm:$0xff] %v3278_v5  ;;  %v3280_v6 = vpop.f32.mrb[15].mxu1  ;;  %v3426_v4 = vpop.permute.xlu0 %2237 }
 0x113   : > { %v3282_v7 = vpop.f32.mrb[16].mxu0 }
 0x114   : > { %v3284_v8 = vpop.f32.mrb[17].mxu0  ;;  %v3286_v9 = vpop.f32.mrb[16].mxu1 }
 0x115   : > { %3696 = vst [vmem:[#allocation9_spill] sm:$0xff] %v3284_v8  ;;  %3697 = vst [vmem:[#allocation10_spill] sm:$0xff] %v3286_v9  ;;  %v3288_v10 = vpop.f32.mrb[17].mxu1  ;;  %v3448_v33 = vpop.permute.xlu0 %2242 }
 0x117   : > { %v3290_v11 = vpop.f32.mrb[18].mxu0 }
 0x118   : > { %v3292_v12 = vpop.f32.mrb[18].mxu1  ;;  %v3294_v13 = vpop.f32.mrb[19].mxu0 }
 0x119   : > { %v3300_v16 = vpop.f32.mrb[19].mxu1  ;;  %v3711_v36 = vmax.f32 %v3218_v38, %v3294_v13  ;;  %v3712_v31 = vmax.f32 %v3220_v40, %v3292_v12 }
 0x11b   : > { %v3304_v18 = vpop.f32.mrb[20].mxu0 }
 0x11c   : > { %v3306_v19 = vpop.f32.mrb[20].mxu1  ;;  %v3308_v20 = vpop.f32.mrb[21].mxu0 }
 0x11d   : > { %v3314_v23 = vpop.f32.mrb[21].mxu1  ;;  %v3714_v13 = vmax.f32 %v3226_v51, %v3308_v20 }
 0x11f   : > { %v3318_v25 = vpop.f32.mrb[22].mxu0 }
 0x120   : > { %v3320_v26 = vpop.f32.mrb[22].mxu1  ;;  %v3322_v27 = vpop.f32.mrb[23].mxu0 }
 0x121   : > { %v3328_v30 = vpop.f32.mrb[23].mxu1 }
 0x123   : > { %v3332_v32 = vpop.f32.mrb[24].mxu0 }
 0x124   : > { %v3336_v34 = vpop.f32.mrb[24].mxu1  ;;  %v3338_v35 = vpop.f32.mrb[25].mxu0 }
 0x125   : > { %v3344_v39 = vpop.f32.mrb[25].mxu1 }
 0x126   : > { %3698 = vst [vmem:[#allocation11_spill] sm:$0xff] %v3344_v39 }
 0x127   : > { %v3348_v24 = vpop.f32.mrb[26].mxu0 }
 0x128   : > { %v3352_v17 = vpop.f32.mrb[26].mxu1  ;;  %v3354_v28 = vpop.f32.mrb[27].mxu0 }
 0x129   : > { %v3360_v29 = vpop.f32.mrb[27].mxu1 }
 0x12a   : > { %3699 = vst [vmem:[#allocation12_spill] sm:$0xff] %v3360_v29 }
 0x12b   : > { %v3364_v21 = vpop.f32.mrb[28].mxu0 }
 0x12c   : > { %v3368_v22 = vpop.f32.mrb[28].mxu1  ;;  %v3370_v14 = vpop.f32.mrb[29].mxu0 }
 0x12d   : > { %v3376_v15 = vpop.f32.mrb[29].mxu1 }
 0x12e   : > { %3700 = vst [vmem:[#allocation13_spill] sm:$0xff] %v3376_v15 }
 0x12f   : > { %v3380_v29 = vpop.f32.mrb[30].mxu0 }
 0x130   : > { %3701 = vst [vmem:[#allocation14_spill] sm:$0xff] %v3380_v29  ;;  %v3384_v55 = vpop.f32.mrb[30].mxu1  ;;  %v3386_v39 = vpop.f32.mrb[31].mxu0 }
 0x131   : > { %3702 = vst [vmem:[#allocation15_spill] sm:$0xff] %v3384_v55  ;;  %v3392_v50 = vpop.f32.mrb[31].mxu1 }
 0x132   : > { %3703 = vst [vmem:[#allocation16_spill] sm:$0xff] %v3392_v50 }
 0x133   : > { %v3396_v15 = vpop.f32.mrb[32].mxu0 }
 0x134   : > { %3704 = vst [vmem:[#allocation17_spill] sm:$0xff] %v3396_v15  ;;  %v3400_v60 = vpop.f32.mrb[32].mxu1  ;;  %v3402_v29 = vpop.f32.mrb[33].mxu0 }
 0x135   : > { %3705 = vst [vmem:[#allocation18_spill] sm:$0xff] %v3400_v60  ;;  %v3408_v55 = vpop.f32.mrb[33].mxu1 }
 0x136   : > { %3706 = vst [vmem:[#allocation19_spill] sm:$0xff] %v3408_v55 }
 0x137   : > { %v3412_v50 = vpop.f32.mrb[34].mxu0 }
 0x138   : > { %3707 = vst [vmem:[#allocation20_spill] sm:$0xff] %v3412_v50  ;;  %v3416_v1 = vpop.f32.mrb[34].mxu1  ;;  %v3418_v15 = vpop.f32.mrb[35].mxu0 }
 0x139   : > { %3708 = vst [vmem:[#allocation21_spill] sm:$0xff] %v3416_v1  ;;  %v3424_v60 = vpop.f32.mrb[35].mxu1 }
 0x13a   : > { %3709 = vst [vmem:[#allocation22_spill] sm:$0xff] %v3424_v60 }
 0x13b   : > { %v3430_v55 = vpop.f32.mrb[36].mxu0 }
 0x13c   : > { %3710 = vst [vmem:[#allocation23_spill] sm:$0xff] %v3430_v55  ;;  %v1642_v5 = vpop.f32.mrb[36].mxu1  ;;  %v3434_v50 = vpop.f32.mrb[37].mxu0  ;;  %v3715_v55 = vmax.f32 %v3228_v43, %v3306_v19 }
 0x13d   : > { %v2193_v37 = vmax.f32 %v3711_v36, %v1642_v5  ;;  %v1644_v8 = vpop.f32.mrb[37].mxu1 }
 0x13e   : > { %v2194_v60 = vmax.f32 %v3712_v31, %v1644_v8 }
 0x13f   : > { %v2250_v9 = vadd.f32 %v3426_v4, %v2193_v37  ;;  %v3446_v61 = vpop.f32.mrb[38].mxu0 }
 0x140   : > { %3713 = vst [vmem:[#allocation24_spill] sm:$0xff] %v3446_v61  ;;  %v2251_v38 = vadd.f32 %v3426_v4, %v2194_v60  ;;  %v1648_v40 = vpop.f32.mrb[38].mxu1  ;;  %v3458_v8 = vpop.f32.mrb[39].mxu0 }
 0x141   : > { %v2289_v12 = vmax.f32 %v2250_v9, 0.0  ;;  %v2206_v31 = vmax.f32 %v3714_v13, %v1648_v40  ;;  %v2179_v36 = vmax.f32 %v3304_v18, %v3458_v8  ;;  %v1650_v37 = vpop.f32.mrb[39].mxu1  ;;  %v3472_v9 = vpop.permute.xlu1 %2247  ;;  %v3768_v8 = vld [vmem:[#allocation10_spill] sm:$0xff] }
 0x142   : > { %v2290_v1 = vmax.f32 %v2251_v38, 0.0  ;;  %v2207_v60 = vmax.f32 %v3715_v55, %v1650_v37  ;;  %v3716_v55 = vmax.f32 %v3234_v45, %v3322_v27  ;;  %v3718_v45 = vmax.f32 %v3222_v41, %v3300_v16 }
 0x143   : > { %2328 = vst [vmem:[%s3453_s6] sm:$0xff] %v2289_v12  ;;  %v2263_v5 = vadd.f32 %v3448_v33, %v2206_v31  ;;  %v3470_v61 = vpop.f32.mrb[40].mxu0 }
 0x144   : > { %2329 = vst [vmem:[%s3453_s6 + $0x8] sm:$0xff] %v2290_v1  ;;  %v2264_v51 = vadd.f32 %v3448_v33, %v2207_v60  ;;  %v1654_v38 = vpop.f32.mrb[40].mxu1  ;;  %v3478_v40 = vpop.f32.mrb[41].mxu0  ;;  %v3717_v1 = vmax.f32 %v3236_v46, %v3320_v26  ;;  %v3719_v46 = vmax.f32 %v3242_v48, %v3338_v35  ;;  %v3722_v35 = vmax.f32 %v3230_v0, %v3314_v23 }
 0x145   : > { %v2302_v43 = vmax.f32 %v2263_v5, 0.0  ;;  %v2219_v19 = vmax.f32 %v3716_v55, %v1654_v38  ;;  %v2192_v12 = vmax.f32 %v3318_v25, %v3478_v40  ;;  %v1656_v13 = vpop.f32.mrb[41].mxu1  ;;  %v3725_v0 = vmax.f32 %v3252_v54, %v3352_v17 }
 0x146   : > { %v2303_v31 = vmax.f32 %v2264_v51, 0.0  ;;  %v2220_v37 = vmax.f32 %v3717_v1, %v1656_v13 }
 0x147   : > { %2341 = vst [vmem:[%s3453_s6 + $0x68] sm:$0xff] %v2302_v43  ;;  %v2276_v60 = vadd.f32 %v3472_v9, %v2219_v19  ;;  %v1725_v20 = vpop.f32.mrb[42].mxu0  ;;  %v3720_v43 = vmax.f32 %v3224_v42, %v3332_v32 }
 0x148   : > { %2342 = vst [vmem:[%s3453_s6 + $0x70] sm:$0xff] %v2303_v31  ;;  %v2277_v5 = vadd.f32 %v3472_v9, %v2220_v37  ;;  %v2195_v27 = vmax.f32 %v3718_v45, %v1725_v20  ;;  %v1808_v38 = vpop.f32.mrb[42].mxu1  ;;  %v1727_v55 = vpop.f32.mrb[43].mxu0  ;;  %v3721_v37 = vmax.f32 %v3244_v49, %v3336_v34 }
 0x149   : > { %v2315_v51 = vmax.f32 %v2276_v60, 0.0  ;;  %v2197_v26 = vmax.f32 %v3719_v46, %v1808_v38  ;;  %v2196_v19 = vmax.f32 %v3720_v43, %v1727_v55  ;;  %v1810_v13 = vpop.f32.mrb[43].mxu1  ;;  %v3724_v55 = vmax.f32 %v3232_v44, %v3348_v24 }
 0x14a   : > { %v2316_v31 = vmax.f32 %v2277_v5, 0.0  ;;  %v2252_v1 = vadd.f32 %v3426_v4, %v2195_v27  ;;  %v2198_v41 = vmax.f32 %v3721_v37, %v1810_v13  ;;  %v3723_v27 = vmax.f32 %v3250_v53, %v3354_v28 }
 0x14b   : > { %2354 = vst [vmem:[%s3453_s6 + $0xd0] sm:$0xff] %v2315_v51  ;;  %v2254_v16 = vadd.f32 %v3426_v4, %v2197_v26  ;;  %v2253_v20 = vadd.f32 %v3426_v4, %v2196_v19  ;;  %v1731_v48 = vpop.f32.mrb[44].mxu0  ;;  %v3726_v13 = vmax.f32 %v3238_v56, %v3328_v30  ;;  %v3729_v56 = vmax.f32 %v3260_v59, %v3368_v22 }
 0x14c   : > { %2355 = vst [vmem:[%s3453_s6 + $0xd8] sm:$0xff] %v2316_v31  ;;  %v2291_v42 = vmax.f32 %v2252_v1, 0.0  ;;  %v2255_v32 = vadd.f32 %v3426_v4, %v2198_v41  ;;  %v2208_v60 = vmax.f32 %v3722_v35, %v1731_v48  ;;  %v1814_v5 = vpop.f32.mrb[44].mxu1  ;;  %v1733_v49 = vpop.f32.mrb[45].mxu0  ;;  %v3727_v41 = vmax.f32 %v3258_v58, %v3370_v14 }
 0x14d   : > { %v2293_v34 = vmax.f32 %v2254_v16, 0.0  ;;  %v2292_v45 = vmax.f32 %v2253_v20, 0.0  ;;  %v2210_v38 = vmax.f32 %v3723_v27, %v1814_v5  ;;  %v2209_v51 = vmax.f32 %v3724_v55, %v1733_v49  ;;  %v1816_v46 = vpop.f32.mrb[45].mxu1  ;;  %v3730_v5 = vld [vmem:[#allocation2_spill] sm:$0xff]  ;;  %v3731_v49 = vld [vmem:[#allocation11_spill] sm:$0xff] }
 0x14e   : > { %2330 = vst [vmem:[%s3453_s6 + $0x10] sm:$0xff] %v2291_v42  ;;  %v2294_v26 = vmax.f32 %v2255_v32, 0.0  ;;  %v2265_v43 = vadd.f32 %v3448_v33, %v2208_v60  ;;  %v2211_v23 = vmax.f32 %v3725_v0, %v1816_v46  ;;  %v3728_v20 = vmax.f32 %v3240_v47, %v3364_v21  ;;  %v3734_v46 = vld [vmem:[#allocation14_spill] sm:$0xff] }
 0x14f   : > { %2332 = vst [vmem:[%s3453_s6 + $0x20] sm:$0xff] %v2293_v34  ;;  %2331 = vst [vmem:[%s3453_s6 + $0x18] sm:$0xff] %v2292_v45  ;;  %v2267_v19 = vadd.f32 %v3448_v33, %v2210_v38  ;;  %v2266_v53 = vadd.f32 %v3448_v33, %v2209_v51  ;;  %v1737_v28 = vpop.f32.mrb[46].mxu0  ;;  %v3732_v34 = vmax.f32 %v3730_v5, %v3731_v49 }
 0x150   : > { %2333 = vst [vmem:[%s3453_s6 + $0x28] sm:$0xff] %v2294_v26  ;;  %v2304_v44 = vmax.f32 %v2265_v43, 0.0  ;;  %v2268_v24 = vadd.f32 %v3448_v33, %v2211_v23  ;;  %v2221_v31 = vmax.f32 %v3726_v13, %v1737_v28  ;;  %v1820_v54 = vpop.f32.mrb[46].mxu1  ;;  %v1739_v17 = vpop.f32.mrb[47].mxu0  ;;  %v3733_v55 = vmax.f32 %v3266_v62, %v3386_v39 }
 0x151   : > { %v2306_v1 = vmax.f32 %v2267_v19, 0.0  ;;  %v2305_v37 = vmax.f32 %v2266_v53, 0.0  ;;  %v2223_v16 = vmax.f32 %v3727_v41, %v1820_v54  ;;  %v2222_v48 = vmax.f32 %v3728_v20, %v1739_v17  ;;  %v1822_v42 = vpop.f32.mrb[47].mxu1  ;;  %v3736_v53 = vld [vmem:[#allocation15_spill] sm:$0xff]  ;;  %v3739_v54 = vld [vmem:[#allocation12_spill] sm:$0xff] }
 0x152   : > { %2343 = vst [vmem:[%s3453_s6 + $0x78] sm:$0xff] %v2304_v44  ;;  %v2307_v32 = vmax.f32 %v2268_v24, 0.0  ;;  %v2278_v35 = vadd.f32 %v3472_v9, %v2221_v31  ;;  %v2224_v30 = vmax.f32 %v3729_v56, %v1822_v42  ;;  %v3735_v26 = vmax.f32 %v3248_v52, %v3734_v46  ;;  %v3738_v31 = vld [vmem:[#allocation3_spill] sm:$0xff]  ;;  %v3742_v42 = vld [vmem:[#allocation17_spill] sm:$0xff] }
 0x153   : > { %2345 = vst [vmem:[%s3453_s6 + $0x88] sm:$0xff] %v2306_v1  ;;  %2344 = vst [vmem:[%s3453_s6 + $0x80] sm:$0xff] %v2305_v37  ;;  %v2280_v60 = vadd.f32 %v3472_v9, %v2223_v16  ;;  %v2279_v58 = vadd.f32 %v3472_v9, %v2222_v48  ;;  %v1891_v14 = vpop.f32.mrb[48].mxu0  ;;  %v3737_v28 = vmax.f32 %v3268_v63, %v3736_v53 }
 0x154   : > { %2346 = vst [vmem:[%s3453_s6 + $0x90] sm:$0xff] %v2307_v32  ;;  %v2317_v47 = vmax.f32 %v2278_v35, 0.0  ;;  %v2281_v21 = vadd.f32 %v3472_v9, %v2224_v30  ;;  %v2199_v45 = vmax.f32 %v3732_v34, %v1891_v14  ;;  %v1974_v59 = vpop.f32.mrb[48].mxu1  ;;  %v1893_v22 = vpop.f32.mrb[49].mxu0  ;;  %v3740_v17 = vmax.f32 %v3738_v31, %v3739_v54  ;;  %v3745_v14 = vld [vmem:[#allocation18_spill] sm:$0xff]  ;;  %v3747_v34 = vld [vmem:[#allocation4_spill] sm:$0xff] }
 0x155   : > { %v2319_v27 = vmax.f32 %v2280_v60, 0.0  ;;  %v2318_v38 = vmax.f32 %v2279_v58, 0.0  ;;  %v2201_v51 = vmax.f32 %v3733_v55, %v1974_v59  ;;  %v2200_v43 = vmax.f32 %v3735_v26, %v1893_v22  ;;  %v1976_v0 = vpop.f32.mrb[49].mxu1  ;;  %v3744_v58 = vld [vmem:[#allocation7_spill] sm:$0xff] }
 0x156   : > { %2356 = vst [vmem:[%s3453_s6 + $0xe0] sm:$0xff] %v2317_v47  ;;  %v2320_v23 = vmax.f32 %v2281_v21, 0.0  ;;  %v2256_v19 = vadd.f32 %v3426_v4, %v2199_v45  ;;  %v2202_v44 = vmax.f32 %v3737_v28, %v1976_v0  ;;  %v3741_v20 = vmax.f32 %v3274_v3, %v3402_v29  ;;  %v3748_v45 = vld [vmem:[#allocation13_spill] sm:$0xff]  ;;  %v3752_v0 = vld [vmem:[#allocation20_spill] sm:$0xff] }
 0x157   : > { %2358 = vst [vmem:[%s3453_s6 + $0xf0] sm:$0xff] %v2319_v27  ;;  %2357 = vst [vmem:[%s3453_s6 + $0xe8] sm:$0xff] %v2318_v38  ;;  %v2258_v24 = vadd.f32 %v3426_v4, %v2201_v51  ;;  %v2257_v62 = vadd.f32 %v3426_v4, %v2200_v43  ;;  %v1897_v39 = vpop.f32.mrb[50].mxu0  ;;  %v3743_v32 = vmax.f32 %v3256_v57, %v3742_v42  ;;  %v3751_v43 = vld [vmem:[#allocation5_spill] sm:$0xff] }
 0x158   : > { %2359 = vst [vmem:[%s3453_s6 + $0xf8] sm:$0xff] %v2320_v23  ;;  %v2295_v52 = vmax.f32 %v2256_v19, 0.0  ;;  %v2259_v13 = vadd.f32 %v3426_v4, %v2202_v44  ;;  %v2212_v1 = vmax.f32 %v3740_v17, %v1897_v39  ;;  %v1980_v63 = vpop.f32.mrb[50].mxu1  ;;  %v1899_v37 = vpop.f32.mrb[51].mxu0  ;;  %v3746_v47 = vmax.f32 %v3744_v58, %v3745_v14  ;;  %v3757_v17 = vld [vmem:[#allocation6_spill] sm:$0xff] }
 0x159   : > { %v2297_v41 = vmax.f32 %v2258_v24, 0.0  ;;  %v2296_v16 = vmax.f32 %v2257_v62, 0.0  ;;  %v2214_v48 = vmax.f32 %v3741_v20, %v1980_v63  ;;  %v2213_v35 = vmax.f32 %v3743_v32, %v1899_v37  ;;  %v1982_v56 = vpop.f32.mrb[51].mxu1  ;;  %v3754_v24 = vld [vmem:[#allocation9_spill] sm:$0xff] }
 0x15a   : > { %2334 = vst [vmem:[%s3453_s6 + $0x30] sm:$0xff] %v2295_v52  ;;  %v2298_v30 = vmax.f32 %v2259_v13, 0.0  ;;  %v2269_v60 = vadd.f32 %v3448_v33, %v2212_v1  ;;  %v2215_v21 = vmax.f32 %v3746_v47, %v1982_v56  ;;  %v3749_v59 = vmax.f32 %v3747_v34, %v3748_v45  ;;  %v3755_v62 = vld [vmem:[#allocation21_spill] sm:$0xff]  ;;  %v3758_v1 = vld [vmem:[#allocation16_spill] sm:$0xff] }
 0x15b   : > { %2336 = vst [vmem:[%s3453_s6 + $0x40] sm:$0xff] %v2297_v41  ;;  %2335 = vst [vmem:[%s3453_s6 + $0x38] sm:$0xff] %v2296_v16  ;;  %v2271_v5 = vadd.f32 %v3448_v33, %v2214_v48  ;;  %v2270_v3 = vadd.f32 %v3448_v33, %v2213_v35  ;;  %v1903_v29 = vpop.f32.mrb[52].mxu0  ;;  %v3750_v46 = vmax.f32 %v3282_v7, %v3418_v15  ;;  %v3761_v35 = vld [vmem:[#allocation23_spill] sm:$0xff] }
 0x15c   : > { %2337 = vst [vmem:[%s3453_s6 + $0x48] sm:$0xff] %v2298_v30  ;;  %v2308_v57 = vmax.f32 %v2269_v60, 0.0  ;;  %v2272_v49 = vadd.f32 %v3448_v33, %v2215_v21  ;;  %v2225_v22 = vmax.f32 %v3749_v59, %v1903_v29  ;;  %v1986_v27 = vpop.f32.mrb[52].mxu1  ;;  %v1905_v38 = vpop.f32.mrb[53].mxu0  ;;  %v3753_v23 = vmax.f32 %v3751_v43, %v3752_v0 }
 0x15d   : > { %v2310_v55 = vmax.f32 %v2271_v5, 0.0  ;;  %v2309_v51 = vmax.f32 %v2270_v3, 0.0  ;;  %v2227_v26 = vmax.f32 %v3750_v46, %v1986_v27  ;;  %v1988_v53 = vpop.f32.mrb[53].mxu1  ;;  %v3756_v39 = vmax.f32 %v3754_v24, %v3755_v62  ;;  %v3763_v5 = vld [vmem:[#allocation8_spill] sm:$0xff] }
 0x15e   : > { %v2226_v19 = vmax.f32 %v3753_v23, %v1905_v38  ;;  %2347 = vst [vmem:[%s3453_s6 + $0x98] sm:$0xff] %v2308_v57  ;;  %v2311_v28 = vmax.f32 %v2272_v49, 0.0  ;;  %v2282_v44 = vadd.f32 %v3472_v9, %v2225_v22  ;;  %v3759_v63 = vmax.f32 %v3757_v17, %v3758_v1  ;;  %v3766_v22 = vld [vmem:[#allocation24_spill] sm:$0xff] }
 0x15f   : > { %v2228_v52 = vmax.f32 %v3756_v39, %v1988_v53  ;;  %2349 = vst [vmem:[%s3453_s6 + $0xa8] sm:$0xff] %v2310_v55  ;;  %2348 = vst [vmem:[%s3453_s6 + $0xa0] sm:$0xff] %v2309_v51  ;;  %v2284_v13 = vadd.f32 %v3472_v9, %v2227_v26  ;;  %v2057_v15 = vpop.f32.mrb[54].mxu0  ;;  %v3760_v42 = vmax.f32 %v3290_v11, %v3434_v50 }
 0x160   : > { %v2283_v7 = vadd.f32 %v3472_v9, %v2226_v19  ;;  %2350 = vst [vmem:[%s3453_s6 + $0xb0] sm:$0xff] %v2311_v28  ;;  %v2321_v31 = vmax.f32 %v2282_v44, 0.0  ;;  %v2203_v37 = vmax.f32 %v3759_v63, %v2057_v15  ;;  %v2140_v41 = vpop.f32.mrb[54].mxu1  ;;  %v2059_v16 = vpop.f32.mrb[55].mxu0  ;;  %v3762_v56 = vmax.f32 %v3272_v2, %v3761_v35  ;;  %v3764_v2 = vld [vmem:[#allocation19_spill] sm:$0xff] }
 0x161   : > { %v2285_v54 = vadd.f32 %v3472_v9, %v2228_v52  ;;  %v2323_v20 = vmax.f32 %v2284_v13, 0.0  ;;  %v2205_v32 = vmax.f32 %v3760_v42, %v2140_v41  ;;  %v2550_v60 = vpop.f32.mrb[55].mxu1  ;;  %v3765_v3 = vmax.f32 %v3763_v5, %v3764_v2 }
 0x162   : > { %v2322_v48 = vmax.f32 %v2283_v7, 0.0  ;;  %v2204_v30 = vmax.f32 %v3762_v56, %v2059_v16  ;;  %2360 = vst [vmem:[%s3453_s6 + $0x100] sm:$0xff] %v2321_v31  ;;  %v2260_v14 = vadd.f32 %v3426_v4, %v2203_v37  ;;  %v3767_v27 = vmax.f32 %v3280_v6, %v3766_v22 }
 0x163   : > { %v2324_v58 = vmax.f32 %v2285_v54, 0.0  ;;  %2362 = vst [vmem:[%s3453_s6 + $0x110] sm:$0xff] %v2323_v20  ;;  %v2262_v47 = vadd.f32 %v3426_v4, %v2205_v32  ;;  %v2063_v50 = vpop.f32.mrb[56].mxu0 }
 0x164   : > { %2361 = vst [vmem:[%s3453_s6 + $0x108] sm:$0xff] %v2322_v48  ;;  %v2261_v21 = vadd.f32 %v3426_v4, %v2204_v30  ;;  %v2299_v11 = vmax.f32 %v2260_v14, 0.0  ;;  %v2216_v29 = vmax.f32 %v3765_v3, %v2063_v50  ;;  %v2145_v57 = vpop.f32.mrb[56].mxu1  ;;  %v2065_v49 = vpop.f32.mrb[57].mxu0 }
 0x165   : > { %2363 = vst [vmem:[%s3453_s6 + $0x118] sm:$0xff] %v2324_v58  ;;  %v2301_v34 = vmax.f32 %v2262_v47, 0.0  ;;  %v2218_v59 = vmax.f32 %v2179_v36, %v2145_v57  ;;  %v2217_v38 = vmax.f32 %v3767_v27, %v2065_v49  ;;  %v2553_v4 = vpop.f32.mrb[57].mxu1  ;;  %v3769_v36 = vld [vmem:[#allocation22_spill] sm:$0xff] }
 0x166   : > { %v2300_v45 = vmax.f32 %v2261_v21, 0.0  ;;  %2338 = vst [vmem:[%s3453_s6 + $0x50] sm:$0xff] %v2299_v11  ;;  %v2273_v55 = vadd.f32 %v3448_v33, %v2216_v29  ;;  %v3770_v43 = vmax.f32 %v3768_v8, %v3769_v36 }
 0x167   : > { %2340 = vst [vmem:[%s3453_s6 + $0x60] sm:$0xff] %v2301_v34  ;;  %v2275_v51 = vadd.f32 %v3448_v33, %v2218_v59  ;;  %v2274_v46 = vadd.f32 %v3448_v33, %v2217_v38  ;;  %v2069_v26 = vpop.f32.mrb[58].mxu0  ;;  %v3771_v33 = vmax.f32 %v3288_v10, %v3470_v61 }
 0x168   : > { %2339 = vst [vmem:[%s3453_s6 + $0x58] sm:$0xff] %v2300_v45  ;;  %v2312_v18 = vmax.f32 %v2273_v55, 0.0  ;;  %v2229_v6 = vmax.f32 %v3770_v43, %v2069_v26  ;;  %v2150_v0 = vpop.f32.mrb[58].mxu1  ;;  %v2071_v23 = vpop.f32.mrb[59].mxu0 }
 0x169   : > { %v2314_v19 = vmax.f32 %v2275_v51, 0.0  ;;  %v2313_v53 = vmax.f32 %v2274_v46, 0.0  ;;  %v2231_v28 = vmax.f32 %v2192_v12, %v2150_v0  ;;  %v2230_v44 = vmax.f32 %v3771_v33, %v2071_v23  ;;  %v2556_v24 = vpop.f32.mrb[59].mxu1 }
 0x16a   : > { %2351 = vst [vmem:[%s3453_s6 + $0xb8] sm:$0xff] %v2312_v18  ;;  %v2286_v62 = vadd.f32 %v3472_v9, %v2229_v6 }
 0x16b   : > { %2353 = vst [vmem:[%s3453_s6 + $0xc8] sm:$0xff] %v2314_v19  ;;  %2352 = vst [vmem:[%s3453_s6 + $0xc0] sm:$0xff] %v2313_v53  ;;  %v2288_v39 = vadd.f32 %v3472_v9, %v2231_v28  ;;  %v2287_v52 = vadd.f32 %v3472_v9, %v2230_v44 }
 0x16c   : > { %v2325_v13 = vmax.f32 %v2286_v62, 0.0 }
 0x16d   : > { %v2327_v7 = vmax.f32 %v2288_v39, 0.0  ;;  %v2326_v15 = vmax.f32 %v2287_v52, 0.0 }
 0x16e   : > { %2364 = vst [vmem:[%s3453_s6 + $0x120] sm:$0xff] %v2325_v13 }
 0x16f   : > { %2366 = vst [vmem:[%s3453_s6 + $0x130] sm:$0xff] %v2327_v7  ;;  %2365 = vst [vmem:[%s3453_s6 + $0x128] sm:$0xff] %v2326_v15 }
 0x170 PF: > { %s13_s12 = sadd.s32 1, %s2737_s12  }
 0x171   : > { %p10_p4 = scmp.ge.s32.totalorder %s13_s12, 4  }
 0x173   :  { %12 = sbr.rel (!%p10_p4) target bundleno = 1 (0x1), region = 62 }

// kernel: forward.6
= control target key start
LH: loop header
LB: loop body
LE: loop exit
PB: predicated region body
PF: predicated region fallthrough
CT: control target
= control target key end

     0   :  { %s1645_s12 = smov 0   ;;  %s2294_s0 = inlined_call_operand.vmem [shape: f32[2,72,1920], index: 0, kind: input, shape index: {}]   ;;  %s2295_s1 = inlined_call_operand.vmem [shape: f32[48,72], index: 1, kind: input, shape index: {}]   ;;  %s2296_s2 = inlined_call_operand.vmem [shape: f32[48,1], index: 2, kind: input, shape index: {}]   ;;  %s2297_s3 = inlined_call_operand.vmem [shape: f32[2,48,640], index: 3, kind: output, shape index: {}]  }
   0x1 LB: > { %s1374_s13 = sadd.s32 4294967295, %s1621_s12   ;;  %p1378_p0 = scmp.ge.s32.totalorder %s1621_s12, 1  ;;  %s1621_s12 = sphi %s1645_s12, %s13_s12  }
   0x2   : > { %p137_p1 = scmp.lt.s32.totalorder %s1621_s12, 3 }
   0x4   : > { %p138_p2 = pnand %p1378_p0, %p137_p1 }
   0x5   : > { %p161_p3 = scmp.lt.s32.totalorder (!%p138_p2), %s1374_s13, 1  ;;  %v1623_v0 = vmov (!%p138_p2), 0.0   ;;  %v1624_v1 = vmov (!%p138_p2), 0   ;;  %v1193_v2 = vld [vmem:[%s2296_s2] sm:$0xff] (!%p138_p2)  ;;  %v1195_v3 = vld [vmem:[%s2296_s2 + $0x10] sm:$0xff] (!%p138_p2)  ;;  %v1194_v4 = vld [vmem:[%s2296_s2 + $0x8] sm:$0xff] (!%p138_p2) }
   0x6   : > { %141 = sbr.rel (%p138_p2) target bundleno = 350 (0x15e), region = 32  ;;  %395 = vmatprep.mubr.f32.mxu0 (!%p138_p2), %v1623_v0  ;;  %496 = vmatprep.mubr.f32.mxu1 (!%p138_p2), %v1623_v0  ;;  %v1196_v5 = vld [vmem:[%s2296_s2 + $0x18] sm:$0xff] (!%p138_p2)  ;;  %v1197_v9 = vld [vmem:[%s2296_s2 + $0x20] sm:$0xff] (!%p138_p2)  ;;  %v1198_v19 = vld [vmem:[%s2296_s2 + $0x28] sm:$0xff] (!%p138_p2)  ;;  %vm312_vm0 = vcmask (!%p138_p2), 588800  }
   0x7   : > { %1613 = vset.pattern.permute.xlu0 (!%p138_p2), %v1624_v1  ;;  %1614 = vset.pattern.permute.xlu1 (!%p138_p2), %v1624_v1  ;;  %v1720_v60 = vld [vmem:[%s2295_s1] sm:$0xff] (!%p138_p2) }
   0x8   : > { %1201 = vperm.xlu0 (!%p138_p2), %1613, %v1193_v2   ;;  %1211 = vperm.xlu1 (!%p138_p2), %1614, %v1195_v3  }
   0xc   : > { %1206 = vperm.xlu0 (!%p138_p2), %1613, %v1194_v4   ;;  %1216 = vperm.xlu1 (!%p138_p2), %1614, %v1196_v5  }
   0xd   : > { %s2313_s13 = smov (!%p161_p3, %s1374_s13), 1 }
   0xe   : > { %s1601_s18 = smul.u32 1080, %s2313_s13 }
   0xf   : > { %s1602_s17 = smul.u32 240, %s2313_s13 }
  0x10   : > { %s1673_s25 = scalar_lea.vmem %s2294_s0, %s1601_s18  ;;  %1221 = vperm.xlu0 %1613, %v1197_v9   ;;  %1226 = vperm.xlu1 %1614, %v1198_v19  }
  0x11   : > { %v178_v6 = vld [vmem:[%s1673_s25 + $0x8] sm:$0xff]  ;;  %v193_v7 = vld [vmem:[%s1673_s25 + $0x80] sm:$0xff]  ;;  %v180_v8 = vld [vmem:[%s1673_s25 + $0x18] sm:$0xff]  ;;  %s2118_s20 = scalar_lea.vmem %s2297_s3, %s1602_s17 }
  0x12   : > { %v1473_v10 = vpack.c.bf16 %v193_v7, %v178_v6  ;;  %v195_v11 = vld [vmem:[%s1673_s25 + $0x90] sm:$0xff]  ;;  %v177_v12 = vld [vmem:[%s1673_s25] sm:$0xff]  ;;  %v192_v13 = vld [vmem:[%s1673_s25 + $0x78] sm:$0xff] }
  0x13   : > { %v1489_v14 = vpack.c.bf16 %v195_v11, %v180_v8  ;;  %v1475_v15 = vpack.c.bf16 %v192_v13, %v177_v12  ;;  %v179_v16 = vld [vmem:[%s1673_s25 + $0x10] sm:$0xff]  ;;  %v194_v17 = vld [vmem:[%s1673_s25 + $0x88] sm:$0xff]  ;;  %v208_v18 = vld [vmem:[%s1673_s25 + $0xf8] sm:$0xff] }
  0x14   : > { %1474 = vmatprep.subr.bf16.mxu0 %v1473_v10  ;;  %v1491_v20 = vpack.c.bf16 %v194_v17, %v179_v16  ;;  %v223_v21 = vld [vmem:[%s1673_s25 + $0x170] sm:$0xff]  ;;  %v210_v22 = vld [vmem:[%s1673_s25 + $0x108] sm:$0xff]  ;;  %v225_v23 = vld [vmem:[%s1673_s25 + $0x180] sm:$0xff] }
  0x15   : > { %1490 = vmatprep.subr.bf16.mxu1 %v1489_v14  ;;  %1476 = vmatpush1.bf16.msra.mxu0 %v1475_v15  ;;  %v1477_v24 = vpack.c.bf16 %v223_v21, %v208_v18  ;;  %v1493_v25 = vpack.c.bf16 %v225_v23, %v210_v22  ;;  %v207_v26 = vld [vmem:[%s1673_s25 + $0xf0] sm:$0xff]  ;;  %v222_v27 = vld [vmem:[%s1673_s25 + $0x168] sm:$0xff]  ;;  %v209_v28 = vld [vmem:[%s1673_s25 + $0x100] sm:$0xff] }
  0x16   : > { %1492 = vmatpush1.bf16.msra.mxu1 %v1491_v20  ;;  %v1479_v29 = vpack.c.bf16 %v222_v27, %v207_v26  ;;  %v224_v30 = vld [vmem:[%s1673_s25 + $0x178] sm:$0xff]  ;;  %v238_v31 = vld [vmem:[%s1673_s25 + $0x1e8] sm:$0xff]  ;;  %v253_v32 = vld [vmem:[%s1673_s25 + $0x260] sm:$0xff] }
  0x17   : > { %1478 = vmatprep.subr.bf16.mxu0 %v1477_v24  ;;  %1494 = vmatprep.subr.bf16.mxu1 %v1493_v25  ;;  %v1495_v33 = vpack.c.bf16 %v224_v30, %v209_v28  ;;  %v1481_v34 = vpack.c.bf16 %v253_v32, %v238_v31  ;;  %v240_v35 = vld [vmem:[%s1673_s25 + $0x1f8] sm:$0xff]  ;;  %v255_v36 = vld [vmem:[%s1673_s25 + $0x270] sm:$0xff]  ;;  %v237_v37 = vld [vmem:[%s1673_s25 + $0x1e0] sm:$0xff] }
  0x18   : > { %v1497_v38 = vpack.c.bf16 %v255_v36, %v240_v35  ;;  %v252_v39 = vld [vmem:[%s1673_s25 + $0x258] sm:$0xff]  ;;  %v239_v40 = vld [vmem:[%s1673_s25 + $0x1f0] sm:$0xff]  ;;  %v254_v41 = vld [vmem:[%s1673_s25 + $0x268] sm:$0xff] }
  0x19   : > { %1480 = vmatpush1.bf16.msra.mxu0 %v1479_v29  ;;  %v1483_v42 = vpack.c.bf16 %v252_v39, %v237_v37  ;;  %v268_v43 = vld [vmem:[%s1673_s25 + $0x2d8] sm:$0xff]  ;;  %v283_v44 = vld [vmem:[%s1673_s25 + $0x350] sm:$0xff]  ;;  %v270_v45 = vld [vmem:[%s1673_s25 + $0x2e8] sm:$0xff]  ;;  %v1499_v46 = vpack.c.bf16 %v254_v41, %v239_v40 }
  0x1a   : > { %1496 = vmatpush1.bf16.msra.mxu1 %v1495_v33  ;;  %1482 = vmatprep.subr.bf16.mxu0 %v1481_v34  ;;  %v1485_v47 = vpack.c.bf16 %v283_v44, %v268_v43  ;;  %v285_v48 = vld [vmem:[%s1673_s25 + $0x360] sm:$0xff]  ;;  %v267_v49 = vld [vmem:[%s1673_s25 + $0x2d0] sm:$0xff]  ;;  %v282_v50 = vld [vmem:[%s1673_s25 + $0x348] sm:$0xff] }
  0x1b   : > { %1498 = vmatprep.subr.bf16.mxu1 %v1497_v38  ;;  %v1501_v51 = vpack.c.bf16 %v285_v48, %v270_v45  ;;  %v269_v52 = vld [vmem:[%s1673_s25 + $0x2e0] sm:$0xff]  ;;  %v284_v53 = vld [vmem:[%s1673_s25 + $0x358] sm:$0xff]  ;;  %v1487_v54 = vpack.c.bf16 %v282_v50, %v267_v49  ;;  %v298_v56 = vld [vmem:[%s1673_s25 + $0x3c8] sm:$0xff] }
  0x1c   : > { %v1503_v55 = vpack.c.bf16 %v284_v53, %v269_v52  ;;  %v300_v57 = vld [vmem:[%s1673_s25 + $0x3d8] sm:$0xff]  ;;  %v182_v58 = vld [vmem:[%s1673_s25 + $0x28] sm:$0xff]  ;;  %v197_v59 = vld [vmem:[%s1673_s25 + $0xa0] sm:$0xff] }
  0x1d   : > { %1484 = vmatpush1.bf16.msra.mxu0 %v1483_v42  ;;  %v181_v61 = vld [vmem:[%s1673_s25 + $0x20] sm:$0xff]  ;;  %v196_v62 = vld [vmem:[%s1673_s25 + $0x98] sm:$0xff]  ;;  %v227_v2 = vld [vmem:[%s1673_s25 + $0x190] sm:$0xff]  ;;  %v1505_v4 = vpack.c.bf16 %v197_v59, %v182_v58 }
  0x1e   : > { %1500 = vmatpush1.bf16.msra.mxu1 %v1499_v46  ;;  %1486 = vmatprep.subr.bf16.mxu0 %v1485_v47  ;;  %v297_v63 = vld [vmem:[%s1673_s25 + $0x3c0] sm:$0xff]  ;;  %v212_v1 = vld [vmem:[%s1673_s25 + $0x118] sm:$0xff]  ;;  %v299_v3 = vld [vmem:[%s1673_s25 + $0x3d0] sm:$0xff]  ;;  %v1507_v7 = vpack.c.bf16 %v196_v62, %v181_v61 }
  0x1f   : > { %1502 = vmatprep.subr.bf16.mxu1 %v1501_v51  ;;  %v184_v5 = vld [vmem:[%s1673_s25 + $0x38] sm:$0xff]  ;;  %v199_v6 = vld [vmem:[%s1673_s25 + $0xb0] sm:$0xff]  ;;  %v1509_v8 = vpack.c.bf16 %v227_v2, %v212_v1  ;;  %v226_v10 = vld [vmem:[%s1673_s25 + $0x188] sm:$0xff] }
  0x20   : > { %v211_v9 = vld [vmem:[%s1673_s25 + $0x110] sm:$0xff]  ;;  %v1521_v12 = vpack.c.bf16 %v199_v6, %v184_v5  ;;  %v198_v13 = vld [vmem:[%s1673_s25 + $0xa8] sm:$0xff]  ;;  %v257_v15 = vld [vmem:[%s1673_s25 + $0x280] sm:$0xff] }
  0x21   : > { %1488 = vmatpush1.bf16.msra.mxu0 %v1487_v54  ;;  %v183_v11 = vld [vmem:[%s1673_s25 + $0x30] sm:$0xff]  ;;  %v242_v14 = vld [vmem:[%s1673_s25 + $0x208] sm:$0xff]  ;;  %v229_v18 = vld [vmem:[%s1673_s25 + $0x1a0] sm:$0xff]  ;;  %v1511_v19 = vpack.c.bf16 %v226_v10, %v211_v9 }
  0x22   : > { %1504 = vmatpush1.bf16.msra.mxu1 %v1503_v55  ;;  %347 = vmatprep.subr.mxu0 %v298_v56  ;;  %v1743_v16 = vld [vmem:[%s2295_s1 + $0x8] sm:$0xff]  ;;  %v1523_v20 = vpack.c.bf16 %v198_v13, %v183_v11  ;;  %v1513_v21 = vpack.c.bf16 %v257_v15, %v242_v14  ;;  %v241_v22 = vld [vmem:[%s1673_s25 + $0x200] sm:$0xff]  ;;  %v256_v23 = vld [vmem:[%s1673_s25 + $0x278] sm:$0xff] }
  0x23   : > { %448 = vmatprep.subr.mxu1 %v300_v57  ;;  %v214_v17 = vld [vmem:[%s1673_s25 + $0x128] sm:$0xff]  ;;  %v213_v24 = vld [vmem:[%s1673_s25 + $0x120] sm:$0xff]  ;;  %v228_v26 = vld [vmem:[%s1673_s25 + $0x198] sm:$0xff]  ;;  %v1515_v32 = vpack.c.bf16 %v256_v23, %v241_v22 }
  0x24   : > { %v1525_v25 = vpack.c.bf16 %v229_v18, %v214_v17  ;;  %v272_v27 = vld [vmem:[%s1673_s25 + $0x2f8] sm:$0xff]  ;;  %v287_v28 = vld [vmem:[%s1673_s25 + $0x370] sm:$0xff]  ;;  %v1527_v33 = vpack.c.bf16 %v228_v26, %v213_v24  ;;  %v286_v36 = vld [vmem:[%s1673_s25 + $0x368] sm:$0xff] }
  0x25   : > { %348 = vmatpush1.msra.mxu0 %v297_v63  ;;  %v1763_v29 = vld [vmem:[%s2295_s1 + $0x10] sm:$0xff]  ;;  %v244_v30 = vld [vmem:[%s1673_s25 + $0x218] sm:$0xff]  ;;  %v1517_v34 = vpack.c.bf16 %v287_v28, %v272_v27  ;;  %v258_v39 = vld [vmem:[%s1673_s25 + $0x288] sm:$0xff] }
  0x26   : > { %449 = vmatpush1.msra.mxu1 %v299_v3  ;;  %1381 = vmatmul.mubr.msk.f32.vlgmr.msra.gmra.mrb[0].mxu0 %vm312_vm0, %v1720_v60  ;;  %v259_v31 = vld [vmem:[%s1673_s25 + $0x290] sm:$0xff]  ;;  %v1780_v40 = vld [vmem:[%s2295_s1 + $0x18] sm:$0xff]  ;;  %v274_v41 = vld [vmem:[%s1673_s25 + $0x308] sm:$0xff] }
  0x27   : > { %1387 = vmatmul.mubr.msk.f32.vlgmr.msra.gmra.mrb[0].mxu1 %vm312_vm0, %v1720_v60  ;;  %1506 = vmatprep.subr.bf16.mxu0 %v1505_v4  ;;  %v271_v35 = vld [vmem:[%s1673_s25 + $0x2f0] sm:$0xff]  ;;  %v1529_v37 = vpack.c.bf16 %v259_v31, %v244_v30  ;;  %v289_v42 = vld [vmem:[%s1673_s25 + $0x380] sm:$0xff]  ;;  %v288_v46 = vld [vmem:[%s1673_s25 + $0x378] sm:$0xff] }
  0x28   : > { %1508 = vmatpush1.bf16.msra.mxu0 %v1507_v7  ;;  %401 = vmatprep.mubr.f32.mxu0 %v1623_v0  ;;  %v243_v38 = vld [vmem:[%s1673_s25 + $0x210] sm:$0xff]  ;;  %v1519_v43 = vpack.c.bf16 %v286_v36, %v271_v35  ;;  %v273_v45 = vld [vmem:[%s1673_s25 + $0x300] sm:$0xff]  ;;  %v1533_v47 = vpack.c.bf16 %v289_v42, %v274_v41  ;;  %v302_v48 = vld [vmem:[%s1673_s25 + $0x3e8] sm:$0xff] }
  0x29   : > { %502 = vmatprep.mubr.f32.mxu1 %v1623_v0  ;;  %1510 = vmatprep.subr.bf16.mxu0 %v1509_v8  ;;  %v1531_v44 = vpack.c.bf16 %v258_v39, %v243_v38  ;;  %v186_v49 = vld [vmem:[%s1673_s25 + $0x48] sm:$0xff]  ;;  %v201_v50 = vld [vmem:[%s1673_s25 + $0xc0] sm:$0xff]  ;;  %v1535_v52 = vpack.c.bf16 %v288_v46, %v273_v45  ;;  %v304_v56 = vld [vmem:[%s1673_s25 + $0x3f8] sm:$0xff] }
  0x2a   : > { %1382 = vmatmul.mubr.msk.f32.gmra.mrb[2].mxu0 %vm312_vm0, %v1743_v16  ;;  %1522 = vmatprep.subr.bf16.mxu1 %v1521_v12  ;;  %v1798_v51 = vld [vmem:[%s2295_s1 + $0x20] sm:$0xff]  ;;  %v1537_v54 = vpack.c.bf16 %v201_v50, %v186_v49  ;;  %v1807_v55 = vld [vmem:[%s2295_s1 + $0x28] sm:$0xff]  ;;  %v188_v57 = vld [vmem:[%s1673_s25 + $0x58] sm:$0xff] }
  0x2b   : > { %1388 = vmatmul.mubr.msk.f32.gmra.mrb[2].mxu1 %vm312_vm0, %v1743_v16  ;;  %407 = vmatprep.mubr.f32.mxu0 %v1623_v0  ;;  %v301_v53 = vld [vmem:[%s1673_s25 + $0x3e0] sm:$0xff]  ;;  %v203_v58 = vld [vmem:[%s1673_s25 + $0xd0] sm:$0xff]  ;;  %v200_v61 = vld [vmem:[%s1673_s25 + $0xb8] sm:$0xff] }
  0x2c   : > { %1512 = vmatpush1.bf16.msra.mxu0 %v1511_v19  ;;  %508 = vmatprep.mubr.f32.mxu1 %v1623_v0  ;;  %v185_v59 = vld [vmem:[%s1673_s25 + $0x40] sm:$0xff]  ;;  %v303_v62 = vld [vmem:[%s1673_s25 + $0x3f0] sm:$0xff]  ;;  %v216_v63 = vld [vmem:[%s1673_s25 + $0x138] sm:$0xff]  ;;  %v1553_v2 = vpack.c.bf16 %v203_v58, %v188_v57 }
  0x2d   : > { %1524 = vmatpush1.bf16.msra.mxu1 %v1523_v20  ;;  %1514 = vmatprep.subr.bf16.mxu0 %v1513_v21  ;;  %v231_v1 = vld [vmem:[%s1673_s25 + $0x1b0] sm:$0xff]  ;;  %v202_v4 = vld [vmem:[%s1673_s25 + $0xc8] sm:$0xff]  ;;  %v1539_v5 = vpack.c.bf16 %v200_v61, %v185_v59  ;;  %v233_v7 = vld [vmem:[%s1673_s25 + $0x1c0] sm:$0xff] }
  0x2e   : > { %1383 = vmatmul.mubr.msk.f32.gmra.mrb[4].mxu0 %vm312_vm0, %v1763_v29  ;;  %1526 = vmatprep.subr.bf16.mxu1 %v1525_v25  ;;  %v187_v3 = vld [vmem:[%s1673_s25 + $0x50] sm:$0xff]  ;;  %v218_v6 = vld [vmem:[%s1673_s25 + $0x148] sm:$0xff]  ;;  %v1541_v10 = vpack.c.bf16 %v231_v1, %v216_v63  ;;  %v261_v13 = vld [vmem:[%s1673_s25 + $0x2a0] sm:$0xff] }
  0x2f   : > { %1389 = vmatmul.mubr.msk.f32.gmra.mrb[4].mxu1 %vm312_vm0, %v1763_v29  ;;  %413 = vmatprep.mubr.f32.mxu0 %v1623_v0  ;;  %v215_v8 = vld [vmem:[%s1673_s25 + $0x130] sm:$0xff]  ;;  %v230_v9 = vld [vmem:[%s1673_s25 + $0x1a8] sm:$0xff]  ;;  %v1555_v11 = vpack.c.bf16 %v202_v4, %v187_v3  ;;  %v1557_v14 = vpack.c.bf16 %v233_v7, %v218_v6  ;;  %v217_v15 = vld [vmem:[%s1673_s25 + $0x140] sm:$0xff] }
  0x30   : > { %514 = vmatprep.mubr.f32.mxu1 %v1623_v0  ;;  %1516 = vmatpush1.bf16.msra.mxu0 %v1515_v32  ;;  %v246_v12 = vld [vmem:[%s1673_s25 + $0x228] sm:$0xff]  ;;  %v232_v17 = vld [vmem:[%s1673_s25 + $0x1b8] sm:$0xff]  ;;  %v1543_v18 = vpack.c.bf16 %v230_v9, %v215_v8  ;;  %v263_v20 = vld [vmem:[%s1673_s25 + $0x2b0] sm:$0xff] }
  0x31   : > { %1528 = vmatpush1.bf16.msra.mxu1 %v1527_v33  ;;  %1518 = vmatprep.subr.bf16.mxu0 %v1517_v34  ;;  %v248_v19 = vld [vmem:[%s1673_s25 + $0x238] sm:$0xff]  ;;  %v1545_v21 = vpack.c.bf16 %v261_v13, %v246_v12  ;;  %v245_v22 = vld [vmem:[%s1673_s25 + $0x220] sm:$0xff]  ;;  %v1559_v24 = vpack.c.bf16 %v232_v17, %v217_v15  ;;  %v291_v27 = vld [vmem:[%s1673_s25 + $0x390] sm:$0xff] }
  0x32   : > { %1384 = vmatmul.mubr.msk.f32.gmra.mrb[6].mxu0 %vm312_vm0, %v1780_v40  ;;  %1530 = vmatprep.subr.bf16.mxu1 %v1529_v37  ;;  %v260_v23 = vld [vmem:[%s1673_s25 + $0x298] sm:$0xff]  ;;  %v1561_v26 = vpack.c.bf16 %v263_v20, %v248_v19  ;;  %v247_v28 = vld [vmem:[%s1673_s25 + $0x230] sm:$0xff]  ;;  %v262_v30 = vld [vmem:[%s1673_s25 + $0x2a8] sm:$0xff] }
  0x33   : > { %1390 = vmatmul.mubr.msk.f32.gmra.mrb[6].mxu1 %vm312_vm0, %v1780_v40  ;;  %419 = vmatprep.mubr.f32.mxu0 %v1623_v0  ;;  %v276_v25 = vld [vmem:[%s1673_s25 + $0x318] sm:$0xff]  ;;  %v278_v31 = vld [vmem:[%s1673_s25 + $0x328] sm:$0xff]  ;;  %v293_v32 = vld [vmem:[%s1673_s25 + $0x3a0] sm:$0xff]  ;;  %v1547_v33 = vpack.c.bf16 %v260_v23, %v245_v22  ;;  %v1563_v35 = vpack.c.bf16 %v262_v30, %v247_v28 }
  0x34   : > { %520 = vmatprep.mubr.f32.mxu1 %v1623_v0  ;;  %1520 = vmatpush1.bf16.msra.mxu0 %v1519_v43  ;;  %v1549_v34 = vpack.c.bf16 %v291_v27, %v276_v25  ;;  %v275_v36 = vld [vmem:[%s1673_s25 + $0x310] sm:$0xff]  ;;  %v290_v37 = vld [vmem:[%s1673_s25 + $0x388] sm:$0xff]  ;;  %v1565_v38 = vpack.c.bf16 %v293_v32, %v278_v31  ;;  %v277_v39 = vld [vmem:[%s1673_s25 + $0x320] sm:$0xff] }
  0x35   : > { %1532 = vmatpush1.bf16.msra.mxu1 %v1531_v44  ;;  %549 = vmatprep.subr.mxu0 %v302_v48  ;;  %v292_v41 = vld [vmem:[%s1673_s25 + $0x398] sm:$0xff]  ;;  %v1551_v42 = vpack.c.bf16 %v290_v37, %v275_v36  ;;  %v306_v44 = vld [vmem:[%s1673_s25 + $0x408] sm:$0xff]  ;;  %v205_v46 = vld [vmem:[%s1673_s25 + $0xe0] sm:$0xff] }
  0x36   : > { %1385 = vmatmul.mubr.msk.f32.gmra.mrb[8].mxu0 %vm312_vm0, %v1798_v51  ;;  %1534 = vmatprep.subr.bf16.mxu1 %v1533_v47  ;;  %v1567_v43 = vpack.c.bf16 %v292_v41, %v277_v39  ;;  %v190_v45 = vld [vmem:[%s1673_s25 + $0x68] sm:$0xff]  ;;  %v308_v47 = vld [vmem:[%s1673_s25 + $0x418] sm:$0xff]  ;;  %v191_v48 = vld [vmem:[%s1673_s25 + $0x70] sm:$0xff] }
  0x37   : > { %1391 = vmatmul.mubr.msk.f32.gmra.mrb[8].mxu1 %vm312_vm0, %v1798_v51  ;;  %425 = vmatprep.mubr.f32.mxu0 %v1623_v0  ;;  %v206_v49 = vld [vmem:[%s1673_s25 + $0xe8] sm:$0xff]  ;;  %v305_v50 = vld [vmem:[%s1673_s25 + $0x400] sm:$0xff]  ;;  %v204_v57 = vld [vmem:[%s1673_s25 + $0xd8] sm:$0xff] }
  0x38   : > { %526 = vmatprep.mubr.f32.mxu1 %v1623_v0  ;;  %550 = vmatpush1.msra.mxu0 %v301_v53  ;;  %v307_v53 = vld [vmem:[%s1673_s25 + $0x410] sm:$0xff]  ;;  %v220_v58 = vld [vmem:[%s1673_s25 + $0x158] sm:$0xff]  ;;  %v250_v4 = vld [vmem:[%s1673_s25 + $0x248] sm:$0xff] }
  0x39   : > { %1536 = vmatpush1.bf16.msra.mxu1 %v1535_v52  ;;  %1538 = vmatprep.subr.bf16.mxu0 %v1537_v54  ;;  %v1569_v52 = vpack.c.bf16 %v205_v46, %v190_v45  ;;  %v1585_v54 = vpack.c.bf16 %v206_v49, %v191_v48  ;;  %v235_v59 = vld [vmem:[%s1673_s25 + $0x1d0] sm:$0xff]  ;;  %v236_v63 = vld [vmem:[%s1673_s25 + $0x1d8] sm:$0xff]  ;;  %v266_v9 = vld [vmem:[%s1673_s25 + $0x2c8] sm:$0xff] }
  0x3a   : > { %1386 = vmatmul.mubr.msk.f32.gmra.mrb[10].mxu0 %vm312_vm0, %v1807_v55  ;;  %650 = vmatprep.subr.mxu1 %v304_v56  ;;  %v189_v56 = vld [vmem:[%s1673_s25 + $0x60] sm:$0xff]  ;;  %v219_v1 = vld [vmem:[%s1673_s25 + $0x150] sm:$0xff]  ;;  %v1573_v3 = vpack.c.bf16 %v235_v59, %v220_v58  ;;  %v264_v12 = vld [vmem:[%s1673_s25 + $0x2b8] sm:$0xff] }
  0x3b   : > { %1392 = vmatmul.mubr.msk.f32.gmra.mrb[10].mxu1 %vm312_vm0, %v1807_v55  ;;  %597 = vmatprep.mubr.f32.mxu0 %v1623_v0  ;;  %v1571_v61 = vpack.c.bf16 %v204_v57, %v189_v56  ;;  %v251_v8 = vld [vmem:[%s1673_s25 + $0x250] sm:$0xff]  ;;  %v281_v17 = vld [vmem:[%s1673_s25 + $0x340] sm:$0xff]  ;;  %v294_v22 = vld [vmem:[%s1673_s25 + $0x3a8] sm:$0xff] }
  0x3c   : > { %698 = vmatprep.mubr.f32.mxu1 %v1623_v0  ;;  %v1593_v13 = vpack.c.bf16 %v266_v9, %v251_v8  ;;  %v295_v15 = vld [vmem:[%s1673_s25 + $0x3b0] sm:$0xff]  ;;  %v310_v25 = vld [vmem:[%s1673_s25 + $0x428] sm:$0xff]  ;;  %v309_v27 = vld [vmem:[%s1673_s25 + $0x420] sm:$0xff] }
  0x3d   : > { %651 = vmatpush1.msra.mxu1 %v303_v62  ;;  %v221_v62 = vld [vmem:[%s1673_s25 + $0x160] sm:$0xff] }
  0x3e   : > { %1393 = vmatmul.mubr.msk.f32.vlgmr.msra.gmra.mrb[12].mxu0 %vm312_vm0, %v1720_v60  ;;  %1554 = vmatprep.subr.bf16.mxu1 %v1553_v2  ;;  %v234_v2 = vld [vmem:[%s1673_s25 + $0x1c8] sm:$0xff]  ;;  %v1589_v6 = vpack.c.bf16 %v236_v63, %v221_v62 }
  0x3f   : > { %1399 = vmatmul.mubr.msk.f32.vlgmr.msra.gmra.mrb[12].mxu1 %vm312_vm0, %v1720_v60  ;;  %1540 = vmatpush1.bf16.msra.mxu0 %v1539_v5  ;;  %v265_v5 = vld [vmem:[%s1673_s25 + $0x2c0] sm:$0xff]  ;;  %v1575_v7 = vpack.c.bf16 %v234_v2, %v219_v1 }
  0x40   : > { %603 = vmatprep.mubr.f32.mxu0 %v1623_v0  ;;  %704 = vmatprep.mubr.f32.mxu1 %v1623_v0 }
  0x41   : > { %1542 = vmatprep.subr.bf16.mxu0 %v1541_v10  ;;  %1556 = vmatpush1.bf16.msra.mxu1 %v1555_v11  ;;  %v1577_v10 = vpack.c.bf16 %v265_v5, %v250_v4  ;;  %v249_v11 = vld [vmem:[%s1673_s25 + $0x240] sm:$0xff] }
  0x42   : > { %1394 = vmatmul.mubr.msk.f32.gmra.mrb[14].mxu0 %vm312_vm0, %v1743_v16  ;;  %1558 = vmatprep.subr.bf16.mxu1 %v1557_v14  ;;  %v280_v14 = vld [vmem:[%s1673_s25 + $0x338] sm:$0xff]  ;;  %v1579_v19 = vpack.c.bf16 %v264_v12, %v249_v11 }
  0x43   : > { %1400 = vmatmul.mubr.msk.f32.gmra.mrb[14].mxu1 %vm312_vm0, %v1743_v16  ;;  %1544 = vmatpush1.bf16.msra.mxu0 %v1543_v18  ;;  %v296_v18 = vld [vmem:[%s1673_s25 + $0x3b8] sm:$0xff]  ;;  %v1581_v20 = vpack.c.bf16 %v295_v15, %v280_v14 }
  0x44   : > { %609 = vmatprep.mubr.f32.mxu0 %v1623_v0  ;;  %710 = vmatprep.mubr.f32.mxu1 %v1623_v0  ;;  %v1597_v23 = vpack.c.bf16 %v296_v18, %v281_v17 }
  0x45   : > { %1546 = vmatprep.subr.bf16.mxu0 %v1545_v21  ;;  %1560 = vmatpush1.bf16.msra.mxu1 %v1559_v24  ;;  %v279_v21 = vld [vmem:[%s1673_s25 + $0x330] sm:$0xff] }
  0x46   : > { %1395 = vmatmul.mubr.msk.f32.gmra.mrb[16].mxu0 %vm312_vm0, %v1763_v29  ;;  %1562 = vmatprep.subr.bf16.mxu1 %v1561_v26  ;;  %v1583_v24 = vpack.c.bf16 %v294_v22, %v279_v21  ;;  %v311_v26 = vld [vmem:[%s1673_s25 + $0x430] sm:$0xff] }
  0x47   : > { %1401 = vmatmul.mubr.msk.f32.gmra.mrb[16].mxu1 %vm312_vm0, %v1763_v29  ;;  %615 = vmatprep.mubr.f32.mxu0 %v1623_v0 }
  0x48   : > { %716 = vmatprep.mubr.f32.mxu1 %v1623_v0  ;;  %1548 = vmatpush1.bf16.msra.mxu0 %v1547_v33 }
  0x49   : > { %1550 = vmatprep.subr.bf16.mxu0 %v1549_v34  ;;  %1564 = vmatpush1.bf16.msra.mxu1 %v1563_v35 }
  0x4a   : > { %1396 = vmatmul.mubr.msk.f32.gmra.mrb[18].mxu0 %vm312_vm0, %v1780_v40  ;;  %1566 = vmatprep.subr.bf16.mxu1 %v1565_v38 }
  0x4b   : > { %1402 = vmatmul.mubr.msk.f32.gmra.mrb[18].mxu1 %vm312_vm0, %v1780_v40  ;;  %621 = vmatprep.mubr.f32.mxu0 %v1623_v0 }
  0x4c   : > { %722 = vmatprep.mubr.f32.mxu1 %v1623_v0  ;;  %1552 = vmatpush1.bf16.msra.mxu0 %v1551_v42 }
  0x4d   : > { %1568 = vmatpush1.bf16.msra.mxu1 %v1567_v43  ;;  %751 = vmatprep.subr.mxu0 %v306_v44 }
  0x4e   : > { %1397 = vmatmul.mubr.msk.f32.gmra.mrb[20].mxu0 %vm312_vm0, %v1798_v51  ;;  %852 = vmatprep.subr.mxu1 %v308_v47 }
  0x4f   : > { %1403 = vmatmul.mubr.msk.f32.gmra.mrb[20].mxu1 %vm312_vm0, %v1798_v51  ;;  %627 = vmatprep.mubr.f32.mxu0 %v1623_v0 }
  0x50   : > { %728 = vmatprep.mubr.f32.mxu1 %v1623_v0  ;;  %752 = vmatpush1.msra.mxu0 %v305_v50 }
  0x51   : > { %853 = vmatpush1.msra.mxu1 %v307_v53  ;;  %1570 = vmatprep.subr.bf16.mxu0 %v1569_v52 }
  0x52   : > { %1398 = vmatmul.mubr.msk.f32.gmra.mrb[22].mxu0 %vm312_vm0, %v1807_v55  ;;  %1586 = vmatprep.subr.bf16.mxu1 %v1585_v54 }
  0x53   : > { %1404 = vmatmul.mubr.msk.f32.gmra.mrb[22].mxu1 %vm312_vm0, %v1807_v55  ;;  %799 = vmatprep.mubr.f32.mxu0 %v1623_v0 }
  0x54   : > { %900 = vmatprep.mubr.f32.mxu1 %v1623_v0 }
  0x56   : > { %1405 = vmatmul.mubr.msk.f32.vlgmr.msra.gmra.mrb[24].mxu0 %vm312_vm0, %v1720_v60 }
  0x57   : > { %1411 = vmatmul.mubr.msk.f32.vlgmr.msra.gmra.mrb[24].mxu1 %vm312_vm0, %v1720_v60  ;;  %1572 = vmatpush1.bf16.msra.mxu0 %v1571_v61 }
  0x58   : > { %805 = vmatprep.mubr.f32.mxu0 %v1623_v0  ;;  %906 = vmatprep.mubr.f32.mxu1 %v1623_v0 }
  0x59   : > { %1574 = vmatprep.subr.bf16.mxu0 %v1573_v3  ;;  %1588 = vmatpush3.bf16.msra.mxu1 %v1585_v54 }
  0x5a   : > { %1406 = vmatmul.mubr.msk.f32.gmra.mrb[26].mxu0 %vm312_vm0, %v1743_v16  ;;  %1590 = vmatprep.subr.bf16.mxu1 %v1589_v6 }
  0x5b   : > { %1412 = vmatmul.mubr.msk.f32.gmra.mrb[26].mxu1 %vm312_vm0, %v1743_v16  ;;  %1576 = vmatpush1.bf16.msra.mxu0 %v1575_v7 }
  0x5c   : > { %811 = vmatprep.mubr.f32.mxu0 %v1623_v0  ;;  %912 = vmatprep.mubr.f32.mxu1 %v1623_v0 }
  0x5d   : > { %1578 = vmatprep.subr.bf16.mxu0 %v1577_v10  ;;  %1592 = vmatpush3.bf16.msra.mxu1 %v1589_v6 }
  0x5e   : > { %1407 = vmatmul.mubr.msk.f32.gmra.mrb[28].mxu0 %vm312_vm0, %v1763_v29  ;;  %1594 = vmatprep.subr.bf16.mxu1 %v1593_v13 }
  0x5f   : > { %1413 = vmatmul.mubr.msk.f32.gmra.mrb[28].mxu1 %vm312_vm0, %v1763_v29  ;;  %817 = vmatprep.mubr.f32.mxu0 %v1623_v0 }
  0x60   : > { %918 = vmatprep.mubr.f32.mxu1 %v1623_v0  ;;  %1580 = vmatpush1.bf16.msra.mxu0 %v1579_v19 }
  0x61   : > { %1582 = vmatprep.subr.bf16.mxu0 %v1581_v20  ;;  %1596 = vmatpush3.bf16.msra.mxu1 %v1593_v13 }
  0x62   : > { %1408 = vmatmul.mubr.msk.f32.gmra.mrb[30].mxu0 %vm312_vm0, %v1780_v40  ;;  %1598 = vmatprep.subr.bf16.mxu1 %v1597_v23 }
  0x63   : > { %1414 = vmatmul.mubr.msk.f32.gmra.mrb[30].mxu1 %vm312_vm0, %v1780_v40  ;;  %823 = vmatprep.mubr.f32.mxu0 %v1623_v0 }
  0x64   : > { %924 = vmatprep.mubr.f32.mxu1 %v1623_v0  ;;  %1584 = vmatpush1.bf16.msra.mxu0 %v1583_v24 }
  0x65   : > { %1600 = vmatpush3.bf16.msra.mxu1 %v1597_v23  ;;  %953 = vmatprep.subr.mxu0 %v310_v25 }
  0x66   : > { %1409 = vmatmul.mubr.msk.f32.gmra.mrb[32].mxu0 %vm312_vm0, %v1798_v51  ;;  %1462 = vmatprep.subr.mxu1 %v311_v26 }
  0x67   : > { %1415 = vmatmul.mubr.msk.f32.gmra.mrb[32].mxu1 %vm312_vm0, %v1798_v51  ;;  %829 = vmatprep.mubr.f32.mxu0 %v1623_v0 }
  0x68   : > { %930 = vmatprep.mubr.f32.mxu1 %v1623_v0  ;;  %954 = vmatpush1.msra.mxu0 %v309_v27 }
  0x69   : > { %1463 = vmatpush3.msra.mxu1 %v311_v26 }
  0x6a   : > { %1410 = vmatmul.mubr.msk.f32.gmra.mrb[34].mxu0 %vm312_vm0, %v1807_v55 }
  0x6b   : > { %1416 = vmatmul.mubr.msk.f32.gmra.mrb[34].mxu1 %vm312_vm0, %v1807_v55  ;;  %1001 = vmatprep.mubr.f32.mxu0 %v1623_v0 }
  0x6c   : > { %1464 = vmatprep.mubr.msk.f32.mxu1 %vm312_vm0, %v1720_v60 }
  0x6e   : > { %1417 = vmatmul.mubr.msk.f32.vlgmr.msra.gmra.mrb[36].mxu0 %vm312_vm0, %v1720_v60 }
  0x6f   : > { %1465 = vmatmul.mubr.msk.f32.vlgmr.msra.gmra.mrb[36].mxu1 %vm312_vm0, %v1743_v16  ;;  %1007 = vmatprep.mubr.f32.mxu0 %v1623_v0 }
  0x70   : > { %1467 = vmatprep.mubr.msk.f32.mxu1 %vm312_vm0, %v1763_v29 }
  0x72   : > { %1418 = vmatmul.mubr.msk.f32.gmra.mrb[38].mxu0 %vm312_vm0, %v1743_v16 }
  0x73   : > { %1468 = vmatmul.mubr.msk.f32.gmra.mrb[38].mxu1 %vm312_vm0, %v1780_v40  ;;  %1013 = vmatprep.mubr.f32.mxu0 %v1623_v0 }
  0x74   : > { %1470 = vmatprep.mubr.msk.f32.mxu1 %vm312_vm0, %v1798_v51 }
  0x76   : > { %1419 = vmatmul.mubr.msk.f32.gmra.mrb[40].mxu0 %vm312_vm0, %v1763_v29 }
  0x77   : > { %1471 = vmatmul.mubr.msk.f32.gmra.mrb[40].mxu1 %vm312_vm0, %v1807_v55  ;;  %1019 = vmatprep.mubr.f32.mxu0 %v1623_v0 }
  0x7a   : > { %1420 = vmatmul.mubr.msk.f32.gmra.mrb[42].mxu0 %vm312_vm0, %v1780_v40 }
  0x7b   : > { %1025 = vmatprep.mubr.f32.mxu0 %v1623_v0 }
  0x7e   : > { %1421 = vmatmul.mubr.msk.f32.gmra.mrb[44].mxu0 %vm312_vm0, %v1798_v51 }
  0x7f   : > { %1031 = vmatprep.mubr.f32.mxu0 %v1623_v0 }
  0x82   : > { %1422 = vmatmul.mubr.msk.f32.gmra.mrb[46].mxu0 %vm312_vm0, %v1807_v55 }
  0x87   : > { %v2127_v54 = vpop.permute.xlu1 %1211 }
  0xf9   : > { %v1982_v60 = vpop.f32.mrb[0].mxu0 }
  0xfa   : > { %v1984_v16 = vpop.f32.mrb[1].mxu0  ;;  %v1986_v29 = vpop.f32.mrb[0].mxu1 }
  0xfb   : > { %v1988_v28 = vpop.f32.mrb[1].mxu1 }
  0xfd   : > { %v1990_v30 = vpop.f32.mrb[2].mxu0 }
  0xfe   : > { %v1992_v40 = vpop.f32.mrb[3].mxu0  ;;  %v1994_v31 = vpop.f32.mrb[2].mxu1 }
  0xff   : > { %v1996_v51 = vpop.f32.mrb[3].mxu1 }
 0x101   : > { %v1998_v0 = vpop.f32.mrb[4].mxu0 }
 0x102   : > { %v2000_v32 = vpop.f32.mrb[5].mxu0  ;;  %v2002_v55 = vpop.f32.mrb[4].mxu1 }
 0x103   : > { %v2004_v33 = vpop.f32.mrb[5].mxu1 }
 0x105   : > { %v2006_v34 = vpop.f32.mrb[6].mxu0 }
 0x106   : > { %v2008_v35 = vpop.f32.mrb[7].mxu0  ;;  %v2010_v36 = vpop.f32.mrb[6].mxu1 }
 0x107   : > { %v2012_v37 = vpop.f32.mrb[7].mxu1 }
 0x109   : > { %v2014_v38 = vpop.f32.mrb[8].mxu0 }
 0x10a   : > { %v2016_v39 = vpop.f32.mrb[9].mxu0  ;;  %v2018_v41 = vpop.f32.mrb[8].mxu1 }
 0x10b   : > { %v2020_v42 = vpop.f32.mrb[9].mxu1 }
 0x10d   : > { %v2022_v43 = vpop.f32.mrb[10].mxu0 }
 0x10e   : > { %v2024_v44 = vpop.f32.mrb[11].mxu0  ;;  %v2026_v45 = vpop.f32.mrb[10].mxu1 }
 0x10f   : > { %v2028_v46 = vpop.f32.mrb[11].mxu1 }
 0x111   : > { %v2030_v47 = vpop.f32.mrb[12].mxu0 }
 0x112   : > { %v700_v48 = vpop.f32.mrb[12].mxu1  ;;  %v601_v49 = vpop.f32.mrb[13].mxu0 }
 0x113   : > { %v1134_v50 = vmax.f32 %v1984_v16, %v700_v48  ;;  %v1133_v52 = vmax.f32 %v1982_v60, %v601_v49  ;;  %v2034_v53 = vpop.f32.mrb[13].mxu1  ;;  %v2097_v16 = vpop.permute.xlu0 %1201 }
 0x115   : > { %v2038_v56 = vpop.f32.mrb[14].mxu0 }
 0x116   : > { %v706_v57 = vpop.f32.mrb[14].mxu1  ;;  %v607_v58 = vpop.f32.mrb[15].mxu0 }
 0x117   : > { %v1139_v59 = vmax.f32 %v1992_v40, %v706_v57  ;;  %v1138_v61 = vmax.f32 %v1990_v30, %v607_v58  ;;  %v2042_v62 = vpop.f32.mrb[15].mxu1  ;;  %v2113_v30 = vpop.permute.xlu0 %1206 }
 0x119   : > { %v2046_v1 = vpop.f32.mrb[16].mxu0 }
 0x11a   : > { %v2048_v2 = vpop.f32.mrb[16].mxu1  ;;  %v613_v3 = vpop.f32.mrb[17].mxu0 }
 0x11b   : > { %v1144_v4 = vmax.f32 %v2000_v32, %v2048_v2  ;;  %v1143_v5 = vmax.f32 %v1998_v0, %v613_v3  ;;  %v2053_v6 = vpop.f32.mrb[17].mxu1 }
 0x11d   : > { %v2057_v8 = vpop.f32.mrb[18].mxu0 }
 0x11e   : > { %v2059_v9 = vpop.f32.mrb[18].mxu1  ;;  %v2061_v10 = vpop.f32.mrb[19].mxu0 }
 0x11f   : > { %v1149_v11 = vmax.f32 %v2008_v35, %v2059_v9  ;;  %v1148_v12 = vmax.f32 %v2006_v34, %v2061_v10  ;;  %v2067_v13 = vpop.f32.mrb[19].mxu1 }
 0x121   : > { %v2071_v15 = vpop.f32.mrb[20].mxu0 }
 0x122   : > { %v2073_v17 = vpop.f32.mrb[20].mxu1  ;;  %v2075_v18 = vpop.f32.mrb[21].mxu0 }
 0x123   : > { %v2081_v21 = vpop.f32.mrb[21].mxu1  ;;  %v2298_v9 = vmax.f32 %v2014_v38, %v2075_v18 }
 0x125   : > { %v2085_v23 = vpop.f32.mrb[22].mxu0 }
 0x126   : > { %v2087_v24 = vpop.f32.mrb[22].mxu1  ;;  %v2089_v25 = vpop.f32.mrb[23].mxu0 }
 0x127   : > { %v2095_v60 = vpop.f32.mrb[23].mxu1 }
 0x129   : > { %v2101_v40 = vpop.f32.mrb[24].mxu0 }
 0x12a   : > { %v902_v48 = vpop.f32.mrb[24].mxu1  ;;  %v2105_v49 = vpop.f32.mrb[25].mxu0 }
 0x12b   : > { %v1163_v57 = vmax.f32 %v1133_v52, %v902_v48  ;;  %v904_v3 = vpop.f32.mrb[25].mxu1 }
 0x12c   : > { %v1164_v22 = vmax.f32 %v1134_v50, %v904_v3 }
 0x12d   : > { %v1229_v14 = vadd.f32 %v2097_v16, %v1163_v57  ;;  %v2111_v7 = vpop.f32.mrb[26].mxu0 }
 0x12e   : > { %v1230_v52 = vadd.f32 %v2097_v16, %v1164_v22  ;;  %v908_v63 = vpop.f32.mrb[26].mxu1  ;;  %v2123_v50 = vpop.f32.mrb[27].mxu0 }
 0x12f   : > { %v1259_v57 = vmax.f32 %v1229_v14, 0.0  ;;  %v1168_v3 = vmax.f32 %v1138_v61, %v908_v63  ;;  %v910_v0 = vpop.f32.mrb[27].mxu1 }
 0x130   : > { %v1260_v26 = vmax.f32 %v1230_v52, 0.0  ;;  %v1169_v27 = vmax.f32 %v1139_v59, %v910_v0 }
 0x131   : > { %1289 = vst [vmem:[%s2118_s20] sm:$0xff] %v1259_v57  ;;  %v1234_v22 = vadd.f32 %v2113_v30, %v1168_v3  ;;  %v2131_v19 = vpop.f32.mrb[28].mxu0  ;;  %v2148_v3 = vpop.permute.xlu1 %1216 }
 0x132   : > { %1290 = vst [vmem:[%s2118_s20 + $0x8] sm:$0xff] %v1260_v26  ;;  %v1235_v48 = vadd.f32 %v2113_v30, %v1169_v27  ;;  %v1146_v61 = vmax.f32 %v2004_v33, %v2131_v19  ;;  %v914_v63 = vpop.f32.mrb[28].mxu1  ;;  %v2137_v14 = vpop.f32.mrb[29].mxu0 }
 0x133   : > { %v1264_v58 = vmax.f32 %v1234_v22, 0.0  ;;  %v1173_v20 = vmax.f32 %v1143_v5, %v914_v63  ;;  %v1147_v59 = vmax.f32 %v2046_v1, %v2137_v14  ;;  %v916_v0 = vpop.f32.mrb[29].mxu1 }
 0x134   : > { %v1265_v52 = vmax.f32 %v1235_v48, 0.0  ;;  %v1174_v57 = vmax.f32 %v1144_v4, %v916_v0 }
 0x135   : > { %1294 = vst [vmem:[%s2118_s20 + $0x28] sm:$0xff] %v1264_v58  ;;  %v1239_v26 = vadd.f32 %v2127_v54, %v1173_v20  ;;  %v2146_v27 = vpop.f32.mrb[30].mxu0 }
 0x136   : > { %1295 = vst [vmem:[%s2118_s20 + $0x30] sm:$0xff] %v1265_v52  ;;  %v1240_v5 = vadd.f32 %v2127_v54, %v1174_v57  ;;  %v1151_v22 = vmax.f32 %v2012_v37, %v2146_v27  ;;  %v920_v48 = vpop.f32.mrb[30].mxu1  ;;  %v2154_v63 = vpop.f32.mrb[31].mxu0 }
 0x137   : > { %v1269_v32 = vmax.f32 %v1239_v26, 0.0  ;;  %v1178_v2 = vmax.f32 %v1148_v12, %v920_v48  ;;  %v1152_v4 = vmax.f32 %v2057_v8, %v2154_v63  ;;  %v922_v20 = vpop.f32.mrb[31].mxu1  ;;  %v2168_v26 = vpop.permute.xlu0 %1221 }
 0x138   : > { %v1270_v58 = vmax.f32 %v1240_v5, 0.0  ;;  %v1179_v0 = vmax.f32 %v1149_v11, %v922_v20 }
 0x139   : > { %1299 = vst [vmem:[%s2118_s20 + $0x50] sm:$0xff] %v1269_v32  ;;  %v1244_v52 = vadd.f32 %v2148_v3, %v1178_v2  ;;  %v2166_v57 = vpop.f32.mrb[32].mxu0  ;;  %v2299_v32 = vmax.f32 %v2016_v39, %v2073_v17  ;;  %v2300_v39 = vmax.f32 %v2022_v43, %v2089_v25  ;;  %v2302_v43 = vmax.f32 %v1986_v29, %v2034_v53 }
 0x13a   : > { %1300 = vst [vmem:[%s2118_s20 + $0x58] sm:$0xff] %v1270_v58  ;;  %v1245_v34 = vadd.f32 %v2148_v3, %v1179_v0  ;;  %v1156_v8 = vmax.f32 %v2020_v42, %v2166_v57  ;;  %v926_v10 = vpop.f32.mrb[32].mxu1  ;;  %v2174_v12 = vpop.f32.mrb[33].mxu0 }
 0x13b   : > { %v1274_v35 = vmax.f32 %v1244_v52, 0.0  ;;  %v1183_v11 = vmax.f32 %v2298_v9, %v926_v10  ;;  %v1157_v5 = vmax.f32 %v2071_v15, %v2174_v12  ;;  %v928_v48 = vpop.f32.mrb[33].mxu1  ;;  %v2188_v0 = vpop.permute.xlu1 %1226 }
 0x13c   : > { %v1275_v63 = vmax.f32 %v1245_v34, 0.0  ;;  %v1184_v2 = vmax.f32 %v2299_v32, %v928_v48  ;;  %v2301_v48 = vmax.f32 %v2024_v44, %v2087_v24  ;;  %v2303_v44 = vmax.f32 %v2038_v56, %v2123_v50 }
 0x13d   : > { %1304 = vst [vmem:[%s2118_s20 + $0x78] sm:$0xff] %v1274_v35  ;;  %v1249_v20 = vadd.f32 %v2168_v26, %v1183_v11  ;;  %v2186_v58 = vpop.f32.mrb[34].mxu0  ;;  %v2306_v50 = vmax.f32 %v1994_v31, %v2042_v62 }
 0x13e   : > { %1305 = vst [vmem:[%s2118_s20 + $0x80] sm:$0xff] %v1275_v63  ;;  %v1250_v38 = vadd.f32 %v2168_v26, %v1184_v2  ;;  %v1161_v18 = vmax.f32 %v2028_v46, %v2186_v58  ;;  %v932_v52 = vpop.f32.mrb[34].mxu1  ;;  %v833_v34 = vpop.f32.mrb[35].mxu0 }
 0x13f   : > { %v1279_v10 = vmax.f32 %v1249_v20, 0.0  ;;  %v1188_v17 = vmax.f32 %v2300_v39, %v932_v52  ;;  %v1162_v35 = vmax.f32 %v2085_v23, %v833_v34  ;;  %v934_v9 = vpop.f32.mrb[35].mxu1  ;;  %v2304_v34 = vmax.f32 %v1988_v28, %v2101_v40 }
 0x140   : > { %v1280_v11 = vmax.f32 %v1250_v38, 0.0  ;;  %v1189_v63 = vmax.f32 %v2301_v48, %v934_v9 }
 0x141   : > { %1309 = vst [vmem:[%s2118_s20 + $0xa0] sm:$0xff] %v1279_v10  ;;  %v1254_v32 = vadd.f32 %v2188_v0, %v1188_v17  ;;  %v1003_v2 = vpop.f32.mrb[36].mxu0 }
 0x142   : > { %1310 = vst [vmem:[%s2118_s20 + $0xa8] sm:$0xff] %v1280_v11  ;;  %v1255_v20 = vadd.f32 %v2188_v0, %v1189_v63  ;;  %v1165_v25 = vmax.f32 %v2302_v43, %v1003_v2  ;;  %v1466_v23 = vpop.f32.mrb[36].mxu1  ;;  %v1005_v52 = vpop.f32.mrb[37].mxu0  ;;  %v2305_v11 = vmax.f32 %v2030_v47, %v2105_v49  ;;  %v2307_v43 = vmax.f32 %v1996_v51, %v2111_v7 }
 0x143   : > { %v1284_v38 = vmax.f32 %v1254_v32, 0.0  ;;  %v1172_v24 = vmax.f32 %v2303_v44, %v1466_v23  ;;  %v1166_v10 = vmax.f32 %v2304_v34, %v1005_v52  ;;  %v1104_v39 = vpop.f32.mrb[37].mxu1  ;;  %v2308_v44 = vmax.f32 %v2002_v55, %v2053_v6 }
 0x144   : > { %v1285_v17 = vmax.f32 %v1255_v20, 0.0  ;;  %v1231_v9 = vadd.f32 %v2097_v16, %v1165_v25  ;;  %v1167_v29 = vmax.f32 %v2305_v11, %v1104_v39  ;;  %v2309_v11 = vmax.f32 %v2010_v36, %v2067_v13 }
 0x145   : > { %1314 = vst [vmem:[%s2118_s20 + $0xc8] sm:$0xff] %v1284_v38  ;;  %v1238_v53 = vadd.f32 %v2113_v30, %v1172_v24  ;;  %v1232_v48 = vadd.f32 %v2097_v16, %v1166_v10  ;;  %v1009_v56 = vpop.f32.mrb[38].mxu0  ;;  %v2310_v13 = vmax.f32 %v2018_v41, %v2081_v21  ;;  %v2311_v41 = vmax.f32 %v2026_v45, %v2095_v60 }
 0x146   : > { %1315 = vst [vmem:[%s2118_s20 + $0xd0] sm:$0xff] %v1285_v17  ;;  %v1261_v28 = vmax.f32 %v1231_v9, 0.0  ;;  %v1233_v40 = vadd.f32 %v2097_v16, %v1167_v29  ;;  %v1170_v63 = vmax.f32 %v2306_v50, %v1009_v56  ;;  %v1469_v32 = vpop.f32.mrb[38].mxu1  ;;  %v1011_v47 = vpop.f32.mrb[39].mxu0 }
 0x147   : > { %v1268_v49 = vmax.f32 %v1238_v53, 0.0  ;;  %v1262_v2 = vmax.f32 %v1232_v48, 0.0  ;;  %v1182_v20 = vmax.f32 %v1152_v4, %v1469_v32  ;;  %v1171_v25 = vmax.f32 %v2307_v43, %v1011_v47  ;;  %v1114_v23 = vpop.f32.mrb[39].mxu1 }
 0x148   : > { %1291 = vst [vmem:[%s2118_s20 + $0x10] sm:$0xff] %v1261_v28  ;;  %v1263_v52 = vmax.f32 %v1233_v40, 0.0  ;;  %v1236_v38 = vadd.f32 %v2113_v30, %v1170_v63  ;;  %v1177_v31 = vmax.f32 %v1147_v59, %v1114_v23 }
 0x149   : > { %1298 = vst [vmem:[%s2118_s20 + $0x48] sm:$0xff] %v1268_v49  ;;  %1292 = vst [vmem:[%s2118_s20 + $0x18] sm:$0xff] %v1262_v2  ;;  %v1248_v62 = vadd.f32 %v2148_v3, %v1182_v20  ;;  %v1237_v16 = vadd.f32 %v2113_v30, %v1171_v25  ;;  %v1015_v4 = vpop.f32.mrb[40].mxu0 }
 0x14a   : > { %1293 = vst [vmem:[%s2118_s20 + $0x20] sm:$0xff] %v1263_v52  ;;  %v1266_v51 = vmax.f32 %v1236_v38, 0.0  ;;  %v1243_v7 = vadd.f32 %v2127_v54, %v1177_v31  ;;  %v1175_v24 = vmax.f32 %v2308_v44, %v1015_v4  ;;  %v1472_v1 = vpop.f32.mrb[40].mxu1  ;;  %v1017_v14 = vpop.f32.mrb[41].mxu0 }
 0x14b   : > { %v1278_v59 = vmax.f32 %v1248_v62, 0.0  ;;  %v1267_v34 = vmax.f32 %v1237_v16, 0.0  ;;  %v1192_v10 = vmax.f32 %v1162_v35, %v1472_v1  ;;  %v1176_v30 = vmax.f32 %v1146_v61, %v1017_v14  ;;  %v1124_v39 = vpop.f32.mrb[41].mxu1 }
 0x14c   : > { %1296 = vst [vmem:[%s2118_s20 + $0x38] sm:$0xff] %v1266_v51  ;;  %v1273_v17 = vmax.f32 %v1243_v7, 0.0  ;;  %v1241_v9 = vadd.f32 %v2127_v54, %v1175_v24  ;;  %v1187_v55 = vmax.f32 %v1157_v5, %v1124_v39 }
 0x14d   : > { %1308 = vst [vmem:[%s2118_s20 + $0x98] sm:$0xff] %v1278_v59  ;;  %1297 = vst [vmem:[%s2118_s20 + $0x40] sm:$0xff] %v1267_v34  ;;  %v1258_v6 = vadd.f32 %v2188_v0, %v1192_v10  ;;  %v1242_v35 = vadd.f32 %v2127_v54, %v1176_v30  ;;  %v1021_v33 = vpop.f32.mrb[42].mxu0 }
 0x14e   : > { %1303 = vst [vmem:[%s2118_s20 + $0x70] sm:$0xff] %v1273_v17  ;;  %v1271_v19 = vmax.f32 %v1241_v9, 0.0  ;;  %v1253_v61 = vadd.f32 %v2168_v26, %v1187_v55  ;;  %v1180_v29 = vmax.f32 %v2309_v11, %v1021_v33  ;;  %v1023_v15 = vpop.f32.mrb[43].mxu0 }
 0x14f   : > { %v1288_v12 = vmax.f32 %v1258_v6, 0.0  ;;  %v1272_v5 = vmax.f32 %v1242_v35, 0.0  ;;  %v1181_v53 = vmax.f32 %v1151_v22, %v1023_v15 }
 0x150   : > { %1301 = vst [vmem:[%s2118_s20 + $0x60] sm:$0xff] %v1271_v19  ;;  %v1283_v54 = vmax.f32 %v1253_v61, 0.0  ;;  %v1246_v48 = vadd.f32 %v2148_v3, %v1180_v29 }
 0x151   : > { %1318 = vst [vmem:[%s2118_s20 + $0xe8] sm:$0xff] %v1288_v12  ;;  %1302 = vst [vmem:[%s2118_s20 + $0x68] sm:$0xff] %v1272_v5  ;;  %v1247_v56 = vadd.f32 %v2148_v3, %v1181_v53  ;;  %v1027_v28 = vpop.f32.mrb[44].mxu0 }
 0x152   : > { %1313 = vst [vmem:[%s2118_s20 + $0xc0] sm:$0xff] %v1283_v54  ;;  %v1276_v36 = vmax.f32 %v1246_v48, 0.0  ;;  %v1185_v40 = vmax.f32 %v2310_v13, %v1027_v28  ;;  %v1029_v37 = vpop.f32.mrb[45].mxu0 }
 0x153   : > { %v1277_v27 = vmax.f32 %v1247_v56, 0.0  ;;  %v1186_v22 = vmax.f32 %v1156_v8, %v1029_v37 }
 0x154   : > { %1306 = vst [vmem:[%s2118_s20 + $0x88] sm:$0xff] %v1276_v36  ;;  %v1251_v50 = vadd.f32 %v2168_v26, %v1185_v40 }
 0x155   : > { %1307 = vst [vmem:[%s2118_s20 + $0x90] sm:$0xff] %v1277_v27  ;;  %v1252_v3 = vadd.f32 %v2168_v26, %v1186_v22  ;;  %v1033_v63 = vpop.f32.mrb[46].mxu0 }
 0x156   : > { %v1281_v32 = vmax.f32 %v1251_v50, 0.0  ;;  %v1190_v21 = vmax.f32 %v2311_v41, %v1033_v63  ;;  %v1035_v47 = vpop.f32.mrb[47].mxu0 }
 0x157   : > { %v1282_v49 = vmax.f32 %v1252_v3, 0.0  ;;  %v1191_v42 = vmax.f32 %v1161_v18, %v1035_v47 }
 0x158   : > { %1311 = vst [vmem:[%s2118_s20 + $0xb0] sm:$0xff] %v1281_v32  ;;  %v1256_v57 = vadd.f32 %v2188_v0, %v1190_v21 }
 0x159   : > { %1312 = vst [vmem:[%s2118_s20 + $0xb8] sm:$0xff] %v1282_v49  ;;  %v1257_v8 = vadd.f32 %v2188_v0, %v1191_v42 }
 0x15a   : > { %v1286_v2 = vmax.f32 %v1256_v57, 0.0 }
 0x15b   : > { %v1287_v26 = vmax.f32 %v1257_v8, 0.0 }
 0x15c   : > { %1316 = vst [vmem:[%s2118_s20 + $0xd8] sm:$0xff] %v1286_v2 }
 0x15d   : > { %1317 = vst [vmem:[%s2118_s20 + $0xe0] sm:$0xff] %v1287_v26 }
 0x15e PF: > { %s13_s12 = sadd.s32 1, %s1621_s12  }
 0x15f   : > { %p10_p4 = scmp.ge.s32.totalorder %s13_s12, 4  }
 0x161   :  { %12 = sbr.rel (!%p10_p4) target bundleno = 1 (0x1), region = 62 }

// kernel: forward.7
= control target key start
LH: loop header
LB: loop body
LE: loop exit
PB: predicated region body
PF: predicated region fallthrough
CT: control target
= control target key end

     0   :  { %s1211_s12 = smov 0   ;;  %s1796_s0 = inlined_call_operand.vmem [shape: f32[2,144,768], index: 0, kind: input, shape index: {}]   ;;  %s1797_s1 = inlined_call_operand.vmem [shape: f32[96,144], index: 1, kind: input, shape index: {}]   ;;  %s1798_s2 = inlined_call_operand.vmem [shape: f32[96,1], index: 2, kind: input, shape index: {}]   ;;  %s1799_s3 = inlined_call_operand.vmem [shape: f32[2,96,256], index: 3, kind: output, shape index: {}]  }
   0x1 LB: > { %s998_s13 = sadd.s32 4294967295, %s1188_s12   ;;  %p1002_p0 = scmp.ge.s32.totalorder %s1188_s12, 1  ;;  %s1188_s12 = sphi %s1211_s12, %s13_s12  }
   0x2   : > { %p137_p1 = scmp.lt.s32.totalorder %s1188_s12, 3 }
   0x4   : > { %p138_p2 = pnand %p1002_p0, %p137_p1 }
   0x5   : > { %p161_p3 = scmp.lt.s32.totalorder (!%p138_p2), %s998_s13, 1  ;;  %v1222_v0 = vld [vmem:[%s1797_s1 + $0x8] sm:$0xff] (!%p138_p2)  ;;  %vm303_vm0 = vcmask (!%p138_p2), 130048   ;;  %v1190_v1 = vmov (!%p138_p2), 0  }
   0x6   : > { %141 = sbr.rel (%p138_p2) target bundleno = 346 (0x15a), region = 32  ;;  %1005 = vmatprep.mubr.msk.f32.mxu0 (!%p138_p2), %vm303_vm0, %v1222_v0  ;;  %1017 = vmatprep.mubr.msk.f32.mxu1 (!%p138_p2), %vm303_vm0, %v1222_v0 }
   0x7   : > { %1181 = vset.pattern.permute.xlu1 (!%p138_p2), %v1190_v1  ;;  %1180 = vset.pattern.permute.xlu0 (!%p138_p2), %v1190_v1 }
   0xd   : > { %s1818_s13 = smov (!%p161_p3, %s998_s13), 1 }
   0xe   : > { %s1169_s16 = smul.u32 864, %s1818_s13 }
   0xf   : > { %s1170_s15 = smul.u32 192, %s1818_s13 }
  0x10   : > { %s1234_s19 = scalar_lea.vmem %s1796_s0, %s1169_s16 }
  0x11   : > { %v196_v2 = vld [vmem:[%s1234_s19 + $0x8] sm:$0xff]  ;;  %v202_v3 = vld [vmem:[%s1234_s19 + $0x38] sm:$0xff]  ;;  %v195_v7 = vld [vmem:[%s1234_s19] sm:$0xff]  ;;  %s1705_s13 = scalar_lea.vmem %s1799_s3, %s1170_s15 }
  0x12   : > { %v198_v4 = vld [vmem:[%s1234_s19 + $0x18] sm:$0xff]  ;;  %v1043_v5 = vpack.c.bf16 %v202_v3, %v196_v2  ;;  %v204_v6 = vld [vmem:[%s1234_s19 + $0x48] sm:$0xff]  ;;  %v201_v8 = vld [vmem:[%s1234_s19 + $0x30] sm:$0xff] }
  0x13   : > { %v1079_v9 = vpack.c.bf16 %v204_v6, %v198_v4  ;;  %v1045_v10 = vpack.c.bf16 %v201_v8, %v195_v7  ;;  %v197_v11 = vld [vmem:[%s1234_s19 + $0x10] sm:$0xff]  ;;  %v203_v12 = vld [vmem:[%s1234_s19 + $0x40] sm:$0xff]  ;;  %v208_v13 = vld [vmem:[%s1234_s19 + $0x68] sm:$0xff] }
  0x14   : > { %1044 = vmatprep.subr.bf16.mxu0 %v1043_v5  ;;  %v1081_v14 = vpack.c.bf16 %v203_v12, %v197_v11  ;;  %v214_v15 = vld [vmem:[%s1234_s19 + $0x98] sm:$0xff]  ;;  %v216_v17 = vld [vmem:[%s1234_s19 + $0xa8] sm:$0xff]  ;;  %v207_v20 = vld [vmem:[%s1234_s19 + $0x60] sm:$0xff] }
  0x15   : > { %v210_v16 = vld [vmem:[%s1234_s19 + $0x78] sm:$0xff]  ;;  %1080 = vmatprep.subr.bf16.mxu1 %v1079_v9  ;;  %1046 = vmatpush1.bf16.msra.mxu0 %v1045_v10  ;;  %v1047_v18 = vpack.c.bf16 %v214_v15, %v208_v13  ;;  %v213_v21 = vld [vmem:[%s1234_s19 + $0x90] sm:$0xff]  ;;  %v215_v24 = vld [vmem:[%s1234_s19 + $0xa0] sm:$0xff] }
  0x16   : > { %v1083_v19 = vpack.c.bf16 %v216_v17, %v210_v16  ;;  %v209_v22 = vld [vmem:[%s1234_s19 + $0x70] sm:$0xff]  ;;  %1082 = vmatpush1.bf16.msra.mxu1 %v1081_v14  ;;  %v1049_v23 = vpack.c.bf16 %v213_v21, %v207_v20  ;;  %v220_v25 = vld [vmem:[%s1234_s19 + $0xc8] sm:$0xff]  ;;  %v226_v26 = vld [vmem:[%s1234_s19 + $0xf8] sm:$0xff] }
  0x17   : > { %1048 = vmatprep.subr.bf16.mxu0 %v1047_v18  ;;  %v1085_v27 = vpack.c.bf16 %v215_v24, %v209_v22  ;;  %v1051_v28 = vpack.c.bf16 %v226_v26, %v220_v25  ;;  %v222_v29 = vld [vmem:[%s1234_s19 + $0xd8] sm:$0xff]  ;;  %v228_v30 = vld [vmem:[%s1234_s19 + $0x108] sm:$0xff]  ;;  %v219_v31 = vld [vmem:[%s1234_s19 + $0xc0] sm:$0xff] }
  0x18   : > { %1084 = vmatprep.subr.bf16.mxu1 %v1083_v19  ;;  %v1087_v32 = vpack.c.bf16 %v228_v30, %v222_v29  ;;  %v225_v33 = vld [vmem:[%s1234_s19 + $0xf0] sm:$0xff]  ;;  %v227_v35 = vld [vmem:[%s1234_s19 + $0x100] sm:$0xff]  ;;  %v232_v37 = vld [vmem:[%s1234_s19 + $0x128] sm:$0xff] }
  0x19   : > { %v221_v34 = vld [vmem:[%s1234_s19 + $0xd0] sm:$0xff]  ;;  %1050 = vmatpush1.bf16.msra.mxu0 %v1049_v23  ;;  %v1053_v36 = vpack.c.bf16 %v225_v33, %v219_v31  ;;  %v238_v38 = vld [vmem:[%s1234_s19 + $0x158] sm:$0xff]  ;;  %v240_v42 = vld [vmem:[%s1234_s19 + $0x168] sm:$0xff] }
  0x1a   : > { %v234_v39 = vld [vmem:[%s1234_s19 + $0x138] sm:$0xff]  ;;  %1086 = vmatpush1.bf16.msra.mxu1 %v1085_v27  ;;  %1052 = vmatprep.subr.bf16.mxu0 %v1051_v28  ;;  %v1089_v40 = vpack.c.bf16 %v227_v35, %v221_v34  ;;  %v1055_v41 = vpack.c.bf16 %v238_v38, %v232_v37  ;;  %v231_v43 = vld [vmem:[%s1234_s19 + $0x120] sm:$0xff]  ;;  %v237_v44 = vld [vmem:[%s1234_s19 + $0x150] sm:$0xff] }
  0x1b   : > { %1088 = vmatprep.subr.bf16.mxu1 %v1087_v32  ;;  %v1091_v45 = vpack.c.bf16 %v240_v42, %v234_v39  ;;  %v233_v46 = vld [vmem:[%s1234_s19 + $0x130] sm:$0xff]  ;;  %v239_v47 = vld [vmem:[%s1234_s19 + $0x160] sm:$0xff]  ;;  %v244_v48 = vld [vmem:[%s1234_s19 + $0x188] sm:$0xff]  ;;  %v1057_v52 = vpack.c.bf16 %v237_v44, %v231_v43 }
  0x1c   : > { %v250_v49 = vld [vmem:[%s1234_s19 + $0x1b8] sm:$0xff]  ;;  %v252_v51 = vld [vmem:[%s1234_s19 + $0x1c8] sm:$0xff]  ;;  %v1093_v53 = vpack.c.bf16 %v239_v47, %v233_v46  ;;  %v243_v55 = vld [vmem:[%s1234_s19 + $0x180] sm:$0xff] }
  0x1d   : > { %v246_v50 = vld [vmem:[%s1234_s19 + $0x198] sm:$0xff]  ;;  %1054 = vmatpush1.bf16.msra.mxu0 %v1053_v36  ;;  %v1059_v54 = vpack.c.bf16 %v250_v49, %v244_v48  ;;  %v249_v56 = vld [vmem:[%s1234_s19 + $0x1b0] sm:$0xff]  ;;  %v251_v59 = vld [vmem:[%s1234_s19 + $0x1c0] sm:$0xff] }
  0x1e   : > { %1090 = vmatpush1.bf16.msra.mxu1 %v1089_v40  ;;  %1056 = vmatprep.subr.bf16.mxu0 %v1055_v41  ;;  %v245_v57 = vld [vmem:[%s1234_s19 + $0x190] sm:$0xff]  ;;  %v1095_v58 = vpack.c.bf16 %v252_v51, %v246_v50  ;;  %v256_v60 = vld [vmem:[%s1234_s19 + $0x1e8] sm:$0xff]  ;;  %v262_v61 = vld [vmem:[%s1234_s19 + $0x218] sm:$0xff]  ;;  %v1061_v1 = vpack.c.bf16 %v249_v56, %v243_v55 }
  0x1f   : > { %1092 = vmatprep.subr.bf16.mxu1 %v1091_v45  ;;  %v258_v62 = vld [vmem:[%s1234_s19 + $0x1f8] sm:$0xff]  ;;  %v264_v63 = vld [vmem:[%s1234_s19 + $0x228] sm:$0xff]  ;;  %v1097_v2 = vpack.c.bf16 %v251_v59, %v245_v57  ;;  %v1063_v3 = vpack.c.bf16 %v262_v61, %v256_v60  ;;  %v255_v4 = vld [vmem:[%s1234_s19 + $0x1e0] sm:$0xff] }
  0x20   : > { %v261_v5 = vld [vmem:[%s1234_s19 + $0x210] sm:$0xff]  ;;  %v1099_v7 = vpack.c.bf16 %v264_v63, %v258_v62  ;;  %v263_v8 = vld [vmem:[%s1234_s19 + $0x220] sm:$0xff]  ;;  %v268_v9 = vld [vmem:[%s1234_s19 + $0x248] sm:$0xff] }
  0x21   : > { %1058 = vmatpush1.bf16.msra.mxu0 %v1057_v52  ;;  %v257_v6 = vld [vmem:[%s1234_s19 + $0x1f0] sm:$0xff]  ;;  %v274_v10 = vld [vmem:[%s1234_s19 + $0x278] sm:$0xff]  ;;  %v276_v12 = vld [vmem:[%s1234_s19 + $0x288] sm:$0xff]  ;;  %v1065_v13 = vpack.c.bf16 %v261_v5, %v255_v4 }
  0x22   : > { %1094 = vmatpush1.bf16.msra.mxu1 %v1093_v53  ;;  %1060 = vmatprep.subr.bf16.mxu0 %v1059_v54  ;;  %v270_v11 = vld [vmem:[%s1234_s19 + $0x258] sm:$0xff]  ;;  %v1101_v14 = vpack.c.bf16 %v263_v8, %v257_v6  ;;  %v1067_v15 = vpack.c.bf16 %v274_v10, %v268_v9  ;;  %v267_v16 = vld [vmem:[%s1234_s19 + $0x240] sm:$0xff]  ;;  %v273_v17 = vld [vmem:[%s1234_s19 + $0x270] sm:$0xff] }
  0x23   : > { %1096 = vmatprep.subr.bf16.mxu1 %v1095_v58  ;;  %v269_v18 = vld [vmem:[%s1234_s19 + $0x250] sm:$0xff]  ;;  %v1103_v19 = vpack.c.bf16 %v276_v12, %v270_v11  ;;  %v275_v20 = vld [vmem:[%s1234_s19 + $0x280] sm:$0xff]  ;;  %v280_v21 = vld [vmem:[%s1234_s19 + $0x2a8] sm:$0xff]  ;;  %v1069_v25 = vpack.c.bf16 %v273_v17, %v267_v16 }
  0x24   : > { %v286_v22 = vld [vmem:[%s1234_s19 + $0x2d8] sm:$0xff]  ;;  %v288_v24 = vld [vmem:[%s1234_s19 + $0x2e8] sm:$0xff]  ;;  %v1105_v26 = vpack.c.bf16 %v275_v20, %v269_v18  ;;  %v279_v28 = vld [vmem:[%s1234_s19 + $0x2a0] sm:$0xff] }
  0x25   : > { %1062 = vmatpush1.bf16.msra.mxu0 %v1061_v1  ;;  %v282_v23 = vld [vmem:[%s1234_s19 + $0x2b8] sm:$0xff]  ;;  %v1071_v27 = vpack.c.bf16 %v286_v22, %v280_v21  ;;  %v285_v29 = vld [vmem:[%s1234_s19 + $0x2d0] sm:$0xff]  ;;  %v287_v32 = vld [vmem:[%s1234_s19 + $0x2e0] sm:$0xff] }
  0x26   : > { %1098 = vmatpush1.bf16.msra.mxu1 %v1097_v2  ;;  %1064 = vmatprep.subr.bf16.mxu0 %v1063_v3  ;;  %v281_v30 = vld [vmem:[%s1234_s19 + $0x2b0] sm:$0xff]  ;;  %v1107_v31 = vpack.c.bf16 %v288_v24, %v282_v23  ;;  %v292_v33 = vld [vmem:[%s1234_s19 + $0x308] sm:$0xff]  ;;  %v298_v34 = vld [vmem:[%s1234_s19 + $0x338] sm:$0xff]  ;;  %v1073_v37 = vpack.c.bf16 %v285_v29, %v279_v28 }
  0x27   : > { %1100 = vmatprep.subr.bf16.mxu1 %v1099_v7  ;;  %v294_v35 = vld [vmem:[%s1234_s19 + $0x318] sm:$0xff]  ;;  %v300_v36 = vld [vmem:[%s1234_s19 + $0x348] sm:$0xff]  ;;  %v1109_v38 = vpack.c.bf16 %v287_v32, %v281_v30  ;;  %v1075_v39 = vpack.c.bf16 %v298_v34, %v292_v33  ;;  %v291_v40 = vld [vmem:[%s1234_s19 + $0x300] sm:$0xff] }
  0x28   : > { %v297_v41 = vld [vmem:[%s1234_s19 + $0x330] sm:$0xff]  ;;  %v1111_v43 = vpack.c.bf16 %v300_v36, %v294_v35  ;;  %v299_v44 = vld [vmem:[%s1234_s19 + $0x340] sm:$0xff]  ;;  %v200_v45 = vld [vmem:[%s1234_s19 + $0x28] sm:$0xff] }
  0x29   : > { %1066 = vmatpush1.bf16.msra.mxu0 %v1065_v13  ;;  %v293_v42 = vld [vmem:[%s1234_s19 + $0x310] sm:$0xff]  ;;  %v206_v46 = vld [vmem:[%s1234_s19 + $0x58] sm:$0xff]  ;;  %v1077_v47 = vpack.c.bf16 %v297_v41, %v291_v40  ;;  %v199_v50 = vld [vmem:[%s1234_s19 + $0x20] sm:$0xff] }
  0x2a   : > { %1102 = vmatpush1.bf16.msra.mxu1 %v1101_v14  ;;  %1068 = vmatprep.subr.bf16.mxu0 %v1067_v15  ;;  %v1113_v48 = vpack.c.bf16 %v299_v44, %v293_v42  ;;  %v1115_v49 = vpack.c.bf16 %v206_v46, %v200_v45  ;;  %v205_v51 = vld [vmem:[%s1234_s19 + $0x50] sm:$0xff]  ;;  %v212_v52 = vld [vmem:[%s1234_s19 + $0x88] sm:$0xff]  ;;  %v218_v53 = vld [vmem:[%s1234_s19 + $0xb8] sm:$0xff] }
  0x2b   : > { %1104 = vmatprep.subr.bf16.mxu1 %v1103_v19  ;;  %v1317_v54 = vld [vmem:[%s1797_s1] sm:$0xff]  ;;  %v1117_v55 = vpack.c.bf16 %v205_v51, %v199_v50  ;;  %v801_v56 = vld [vmem:[%s1798_s2 + $0x10] sm:$0xff]  ;;  %v1328_v58 = vld [vmem:[%s1797_s1 + $0x18] sm:$0xff]  ;;  %v1119_v59 = vpack.c.bf16 %v218_v53, %v212_v52 }
  0x2c   : > { %v799_v57 = vld [vmem:[%s1798_s2] sm:$0xff]  ;;  %v217_v61 = vld [vmem:[%s1234_s19 + $0xb0] sm:$0xff]  ;;  %823 = vperm.xlu1 %1181, %v801_v56   ;;  %v224_v62 = vld [vmem:[%s1234_s19 + $0xe8] sm:$0xff] }
  0x2d   : > { %1070 = vmatpush1.bf16.msra.mxu0 %v1069_v25  ;;  %v211_v60 = vld [vmem:[%s1234_s19 + $0x80] sm:$0xff]  ;;  %v230_v63 = vld [vmem:[%s1234_s19 + $0x118] sm:$0xff]  ;;  %813 = vperm.xlu0 %1180, %v799_v57   ;;  %v1339_v1 = vld [vmem:[%s1797_s1 + $0x10] sm:$0xff] }
  0x2e   : > { %1106 = vmatpush1.bf16.msra.mxu1 %v1105_v26  ;;  %1072 = vmatprep.subr.bf16.mxu0 %v1071_v27  ;;  %v1346_v2 = vld [vmem:[%s1797_s1 + $0x28] sm:$0xff]  ;;  %v1121_v3 = vpack.c.bf16 %v217_v61, %v211_v60  ;;  %v1123_v4 = vpack.c.bf16 %v230_v63, %v224_v62  ;;  %v223_v5 = vld [vmem:[%s1234_s19 + $0xe0] sm:$0xff]  ;;  %v229_v6 = vld [vmem:[%s1234_s19 + $0x110] sm:$0xff] }
  0x2f   : > { %1108 = vmatprep.subr.bf16.mxu1 %v1107_v31  ;;  %v236_v7 = vld [vmem:[%s1234_s19 + $0x148] sm:$0xff]  ;;  %v242_v8 = vld [vmem:[%s1234_s19 + $0x178] sm:$0xff]  ;;  %v1361_v9 = vld [vmem:[%s1797_s1 + $0x20] sm:$0xff]  ;;  %v1125_v11 = vpack.c.bf16 %v229_v6, %v223_v5 }
  0x30   : > { %v1368_v10 = vld [vmem:[%s1797_s1 + $0x38] sm:$0xff]  ;;  %v1127_v12 = vpack.c.bf16 %v242_v8, %v236_v7  ;;  %v235_v13 = vld [vmem:[%s1234_s19 + $0x140] sm:$0xff]  ;;  %v241_v14 = vld [vmem:[%s1234_s19 + $0x170] sm:$0xff] }
  0x31   : > { %1074 = vmatpush1.bf16.msra.mxu0 %v1073_v37  ;;  %v248_v15 = vld [vmem:[%s1234_s19 + $0x1a8] sm:$0xff]  ;;  %v254_v16 = vld [vmem:[%s1234_s19 + $0x1d8] sm:$0xff]  ;;  %v1381_v17 = vld [vmem:[%s1797_s1 + $0x30] sm:$0xff]  ;;  %v1129_v19 = vpack.c.bf16 %v241_v14, %v235_v13 }
  0x32   : > { %1110 = vmatpush1.bf16.msra.mxu1 %v1109_v38  ;;  %1076 = vmatprep.subr.bf16.mxu0 %v1075_v39  ;;  %v1388_v18 = vld [vmem:[%s1797_s1 + $0x48] sm:$0xff]  ;;  %v1131_v20 = vpack.c.bf16 %v254_v16, %v248_v15  ;;  %v247_v21 = vld [vmem:[%s1234_s19 + $0x1a0] sm:$0xff]  ;;  %v253_v22 = vld [vmem:[%s1234_s19 + $0x1d0] sm:$0xff] }
  0x33   : > { %1112 = vmatprep.subr.bf16.mxu1 %v1111_v43  ;;  %v260_v23 = vld [vmem:[%s1234_s19 + $0x208] sm:$0xff]  ;;  %v266_v24 = vld [vmem:[%s1234_s19 + $0x238] sm:$0xff]  ;;  %v1401_v25 = vld [vmem:[%s1797_s1 + $0x40] sm:$0xff]  ;;  %v1133_v27 = vpack.c.bf16 %v253_v22, %v247_v21 }
  0x34   : > { %v1408_v26 = vld [vmem:[%s1797_s1 + $0x58] sm:$0xff]  ;;  %v1135_v28 = vpack.c.bf16 %v266_v24, %v260_v23  ;;  %v259_v29 = vld [vmem:[%s1234_s19 + $0x200] sm:$0xff]  ;;  %v265_v30 = vld [vmem:[%s1234_s19 + $0x230] sm:$0xff] }
  0x35   : > { %1078 = vmatpush1.bf16.msra.mxu0 %v1077_v47  ;;  %v272_v31 = vld [vmem:[%s1234_s19 + $0x268] sm:$0xff]  ;;  %v278_v32 = vld [vmem:[%s1234_s19 + $0x298] sm:$0xff]  ;;  %v1421_v33 = vld [vmem:[%s1797_s1 + $0x50] sm:$0xff]  ;;  %v1137_v35 = vpack.c.bf16 %v265_v30, %v259_v29 }
  0x36   : > { %1114 = vmatpush1.bf16.msra.mxu1 %v1113_v48  ;;  %1116 = vmatprep.subr.bf16.mxu0 %v1115_v49  ;;  %v1428_v34 = vld [vmem:[%s1797_s1 + $0x68] sm:$0xff]  ;;  %v1139_v36 = vpack.c.bf16 %v278_v32, %v272_v31  ;;  %v271_v37 = vld [vmem:[%s1234_s19 + $0x260] sm:$0xff]  ;;  %v277_v38 = vld [vmem:[%s1234_s19 + $0x290] sm:$0xff] }
  0x37   : > { %1151 = vmatprep.subr.bf16.mxu1 %v1115_v49  ;;  %v284_v39 = vld [vmem:[%s1234_s19 + $0x2c8] sm:$0xff]  ;;  %v290_v40 = vld [vmem:[%s1234_s19 + $0x2f8] sm:$0xff]  ;;  %v1441_v41 = vld [vmem:[%s1797_s1 + $0x60] sm:$0xff]  ;;  %v1141_v43 = vpack.c.bf16 %v277_v38, %v271_v37 }
  0x38   : > { %405 = vmatmul.mubr.f32.vlgmr.msra.gmra.mrb[0].mxu0 %v1317_v54  ;;  %v1448_v42 = vld [vmem:[%s1797_s1 + $0x78] sm:$0xff]  ;;  %v1143_v44 = vpack.c.bf16 %v290_v40, %v284_v39  ;;  %v283_v45 = vld [vmem:[%s1234_s19 + $0x2c0] sm:$0xff]  ;;  %v289_v46 = vld [vmem:[%s1234_s19 + $0x2f0] sm:$0xff] }
  0x39   : > { %542 = vmatmul.mubr.f32.vlgmr.msra.gmra.mrb[0].mxu1 %v1317_v54  ;;  %1118 = vmatpush1.bf16.msra.mxu0 %v1117_v55  ;;  %v296_v47 = vld [vmem:[%s1234_s19 + $0x328] sm:$0xff]  ;;  %v302_v48 = vld [vmem:[%s1234_s19 + $0x358] sm:$0xff]  ;;  %v1461_v49 = vld [vmem:[%s1797_s1 + $0x70] sm:$0xff]  ;;  %v1145_v51 = vpack.c.bf16 %v289_v46, %v283_v45 }
  0x3a   : > { %1160 = vmatpush1.bf16.msra.mxu1 %v1117_v55  ;;  %1006 = vmatprep.mubr.msk.f32.mxu0 %vm303_vm0, %v1328_v58  ;;  %v1468_v50 = vld [vmem:[%s1797_s1 + $0x88] sm:$0xff]  ;;  %v1147_v52 = vpack.c.bf16 %v302_v48, %v296_v47  ;;  %v295_v53 = vld [vmem:[%s1234_s19 + $0x320] sm:$0xff]  ;;  %v301_v55 = vld [vmem:[%s1234_s19 + $0x350] sm:$0xff] }
  0x3b   : > { %1018 = vmatprep.mubr.msk.f32.mxu1 %vm303_vm0, %v1328_v58  ;;  %1120 = vmatprep.subr.bf16.mxu0 %v1119_v59  ;;  %v187_v56 = vld [vmem:[%s1797_s1 + $0x80] sm:$0xff]  ;;  %v190_v57 = vld [vmem:[%s1797_s1 + $0x98] sm:$0xff]  ;;  %v189_v61 = vld [vmem:[%s1797_s1 + $0x90] sm:$0xff] }
  0x3c   : > { %411 = vmatmul.mubr.f32.gmra.mrb[2].mxu0 %v1339_v1  ;;  %1152 = vmatprep.subr.bf16.mxu1 %v1119_v59  ;;  %v1149_v59 = vpack.c.bf16 %v301_v55, %v295_v53  ;;  %v802_v60 = vld [vmem:[%s1798_s2 + $0x18] sm:$0xff]  ;;  %v800_v62 = vld [vmem:[%s1798_s2 + $0x8] sm:$0xff]  ;;  %v803_v5 = vld [vmem:[%s1798_s2 + $0x20] sm:$0xff] }
  0x3d   : > { %548 = vmatmul.mubr.f32.gmra.mrb[2].mxu1 %v1339_v1  ;;  %1007 = vmatprep.mubr.msk.f32.mxu0 %vm303_vm0, %v1346_v2  ;;  %v192_v63 = vld [vmem:[%s1797_s1 + $0xa8] sm:$0xff]  ;;  %v194_v6 = vld [vmem:[%s1797_s1 + $0xb8] sm:$0xff]  ;;  %v193_v8 = vld [vmem:[%s1797_s1 + $0xb0] sm:$0xff] }
  0x3e   : > { %1019 = vmatprep.mubr.msk.f32.mxu1 %vm303_vm0, %v1346_v2  ;;  %1122 = vmatpush1.bf16.msra.mxu0 %v1121_v3  ;;  %v806_v7 = vld [vmem:[%s1798_s2 + $0x38] sm:$0xff]  ;;  %v807_v13 = vld [vmem:[%s1798_s2 + $0x40] sm:$0xff] }
  0x3f   : > { %1161 = vmatpush1.bf16.msra.mxu1 %v1121_v3  ;;  %1124 = vmatprep.subr.bf16.mxu0 %v1123_v4  ;;  %v804_v3 = vld [vmem:[%s1798_s2 + $0x28] sm:$0xff]  ;;  %v810_v14 = vld [vmem:[%s1798_s2 + $0x58] sm:$0xff] }
  0x40   : > { %417 = vmatmul.mubr.f32.gmra.mrb[4].mxu0 %v1361_v9  ;;  %1153 = vmatprep.subr.bf16.mxu1 %v1123_v4  ;;  %v191_v4 = vld [vmem:[%s1797_s1 + $0xa0] sm:$0xff] }
  0x41   : > { %554 = vmatmul.mubr.f32.gmra.mrb[4].mxu1 %v1361_v9  ;;  %1008 = vmatprep.mubr.msk.f32.mxu0 %vm303_vm0, %v1368_v10 }
  0x42   : > { %1020 = vmatprep.mubr.msk.f32.mxu1 %vm303_vm0, %v1368_v10  ;;  %1126 = vmatpush1.bf16.msra.mxu0 %v1125_v11 }
  0x43   : > { %1162 = vmatpush1.bf16.msra.mxu1 %v1125_v11  ;;  %1128 = vmatprep.subr.bf16.mxu0 %v1127_v12  ;;  %v805_v11 = vld [vmem:[%s1798_s2 + $0x30] sm:$0xff] }
  0x44   : > { %423 = vmatmul.mubr.f32.gmra.mrb[6].mxu0 %v1381_v17  ;;  %1154 = vmatprep.subr.bf16.mxu1 %v1127_v12  ;;  %v808_v12 = vld [vmem:[%s1798_s2 + $0x48] sm:$0xff] }
  0x45   : > { %560 = vmatmul.mubr.f32.gmra.mrb[6].mxu1 %v1381_v17  ;;  %1009 = vmatprep.mubr.msk.f32.mxu0 %vm303_vm0, %v1388_v18 }
  0x46   : > { %1021 = vmatprep.mubr.msk.f32.mxu1 %vm303_vm0, %v1388_v18  ;;  %1130 = vmatpush1.bf16.msra.mxu0 %v1129_v19 }
  0x47   : > { %1163 = vmatpush1.bf16.msra.mxu1 %v1129_v19  ;;  %1132 = vmatprep.subr.bf16.mxu0 %v1131_v20 }
  0x48   : > { %429 = vmatmul.mubr.f32.gmra.mrb[8].mxu0 %v1401_v25  ;;  %1155 = vmatprep.subr.bf16.mxu1 %v1131_v20 }
  0x49   : > { %566 = vmatmul.mubr.f32.gmra.mrb[8].mxu1 %v1401_v25  ;;  %1010 = vmatprep.mubr.msk.f32.mxu0 %vm303_vm0, %v1408_v26 }
  0x4a   : > { %1022 = vmatprep.mubr.msk.f32.mxu1 %vm303_vm0, %v1408_v26  ;;  %1134 = vmatpush1.bf16.msra.mxu0 %v1133_v27 }
  0x4b   : > { %1164 = vmatpush1.bf16.msra.mxu1 %v1133_v27  ;;  %1136 = vmatprep.subr.bf16.mxu0 %v1135_v28 }
  0x4c   : > { %435 = vmatmul.mubr.f32.gmra.mrb[10].mxu0 %v1421_v33  ;;  %1156 = vmatprep.subr.bf16.mxu1 %v1135_v28 }
  0x4d   : > { %572 = vmatmul.mubr.f32.gmra.mrb[10].mxu1 %v1421_v33  ;;  %1011 = vmatprep.mubr.msk.f32.mxu0 %vm303_vm0, %v1428_v34 }
  0x4e   : > { %1023 = vmatprep.mubr.msk.f32.mxu1 %vm303_vm0, %v1428_v34  ;;  %1138 = vmatpush1.bf16.msra.mxu0 %v1137_v35 }
  0x4f   : > { %1165 = vmatpush1.bf16.msra.mxu1 %v1137_v35  ;;  %1140 = vmatprep.subr.bf16.mxu0 %v1139_v36 }
  0x50   : > { %441 = vmatmul.mubr.f32.gmra.mrb[12].mxu0 %v1441_v41  ;;  %1157 = vmatprep.subr.bf16.mxu1 %v1139_v36 }
  0x51   : > { %578 = vmatmul.mubr.f32.gmra.mrb[12].mxu1 %v1441_v41  ;;  %1012 = vmatprep.mubr.msk.f32.mxu0 %vm303_vm0, %v1448_v42 }
  0x52   : > { %1024 = vmatprep.mubr.msk.f32.mxu1 %vm303_vm0, %v1448_v42  ;;  %1142 = vmatpush1.bf16.msra.mxu0 %v1141_v43 }
  0x53   : > { %1166 = vmatpush1.bf16.msra.mxu1 %v1141_v43  ;;  %1144 = vmatprep.subr.bf16.mxu0 %v1143_v44 }
  0x54   : > { %447 = vmatmul.mubr.f32.gmra.mrb[14].mxu0 %v1461_v49  ;;  %1158 = vmatprep.subr.bf16.mxu1 %v1143_v44 }
  0x55   : > { %584 = vmatmul.mubr.f32.gmra.mrb[14].mxu1 %v1461_v49  ;;  %1013 = vmatprep.mubr.msk.f32.mxu0 %vm303_vm0, %v1468_v50 }
  0x56   : > { %1025 = vmatprep.mubr.msk.f32.mxu1 %vm303_vm0, %v1468_v50  ;;  %1146 = vmatpush1.bf16.msra.mxu0 %v1145_v51 }
  0x57   : > { %1167 = vmatpush1.bf16.msra.mxu1 %v1145_v51  ;;  %1148 = vmatprep.subr.bf16.mxu0 %v1147_v52 }
  0x58   : > { %453 = vmatmul.mubr.f32.gmra.mrb[16].mxu0 %v187_v56  ;;  %1159 = vmatprep.subr.bf16.mxu1 %v1147_v52 }
  0x59   : > { %590 = vmatmul.mubr.f32.gmra.mrb[16].mxu1 %v187_v56  ;;  %1014 = vmatprep.mubr.msk.f32.mxu0 %vm303_vm0, %v190_v57 }
  0x5a   : > { %1026 = vmatprep.mubr.msk.f32.mxu1 %vm303_vm0, %v190_v57  ;;  %1150 = vmatpush1.bf16.msra.mxu0 %v1149_v59 }
  0x5b   : > { %1168 = vmatpush1.bf16.msra.mxu1 %v1149_v59  ;;  %828 = vperm.xlu1 %1181, %v802_v60  }
  0x5c   : > { %459 = vmatmul.mubr.f32.gmra.mrb[18].mxu0 %v189_v61  ;;  %818 = vperm.xlu0 %1180, %v800_v62  }
  0x5d   : > { %596 = vmatmul.mubr.f32.gmra.mrb[18].mxu1 %v189_v61  ;;  %1015 = vmatprep.mubr.msk.f32.mxu0 %vm303_vm0, %v192_v63 }
  0x5e   : > { %1027 = vmatprep.mubr.msk.f32.mxu1 %vm303_vm0, %v192_v63 }
  0x5f   : > { %838 = vperm.xlu1 %1181, %v804_v3  }
  0x60   : > { %465 = vmatmul.mubr.f32.gmra.mrb[20].mxu0 %v191_v4  ;;  %833 = vperm.xlu0 %1180, %v803_v5  }
  0x61   : > { %602 = vmatmul.mubr.f32.gmra.mrb[20].mxu1 %v191_v4  ;;  %1016 = vmatprep.mubr.msk.f32.mxu0 %vm303_vm0, %v194_v6 }
  0x62   : > { %1028 = vmatprep.mubr.msk.f32.mxu1 %vm303_vm0, %v194_v6 }
  0x63   : > { %848 = vperm.xlu1 %1181, %v806_v7  }
  0x64   : > { %471 = vmatmul.mubr.f32.gmra.mrb[22].mxu0 %v193_v8  ;;  %843 = vperm.xlu0 %1180, %v805_v11  }
  0x65   : > { %608 = vmatmul.mubr.f32.gmra.mrb[22].mxu1 %v193_v8  ;;  %1029 = vmatprep.mubr.msk.f32.mxu0 %vm303_vm0, %v1222_v0  ;;  %v809_v0 = vld [vmem:[%s1798_s2 + $0x50] sm:$0xff] }
  0x66   : > { %1035 = vmatprep.mubr.msk.f32.mxu1 %vm303_vm0, %v1428_v34 }
  0x67   : > { %858 = vperm.xlu1 %1181, %v808_v12  }
  0x68   : > { %679 = vmatmul.mubr.f32.vlgmr.msra.gmra.mrb[24].mxu0 %v1317_v54  ;;  %853 = vperm.xlu0 %1180, %v807_v13  }
  0x69   : > { %715 = vmatmul.mubr.f32.vlgmr.msra.gmra.mrb[24].mxu1 %v1441_v41  ;;  %1030 = vmatprep.mubr.msk.f32.mxu0 %vm303_vm0, %v1328_v58 }
  0x6a   : > { %1036 = vmatprep.mubr.msk.f32.mxu1 %vm303_vm0, %v1448_v42 }
  0x6b   : > { %868 = vperm.xlu1 %1181, %v810_v14  }
  0x6c   : > { %685 = vmatmul.mubr.f32.gmra.mrb[26].mxu0 %v1339_v1  ;;  %863 = vperm.xlu0 %1180, %v809_v0  }
  0x6d   : > { %721 = vmatmul.mubr.f32.gmra.mrb[26].mxu1 %v1461_v49  ;;  %1031 = vmatprep.mubr.msk.f32.mxu0 %vm303_vm0, %v1346_v2 }
  0x6e   : > { %1037 = vmatprep.mubr.msk.f32.mxu1 %vm303_vm0, %v1468_v50 }
  0x70   : > { %691 = vmatmul.mubr.f32.gmra.mrb[28].mxu0 %v1361_v9 }
  0x71   : > { %727 = vmatmul.mubr.f32.gmra.mrb[28].mxu1 %v187_v56  ;;  %1032 = vmatprep.mubr.msk.f32.mxu0 %vm303_vm0, %v1368_v10 }
  0x72   : > { %1038 = vmatprep.mubr.msk.f32.mxu1 %vm303_vm0, %v190_v57 }
  0x74   : > { %697 = vmatmul.mubr.f32.gmra.mrb[30].mxu0 %v1381_v17 }
  0x75   : > { %733 = vmatmul.mubr.f32.gmra.mrb[30].mxu1 %v189_v61  ;;  %1033 = vmatprep.mubr.msk.f32.mxu0 %vm303_vm0, %v1388_v18 }
  0x76   : > { %1039 = vmatprep.mubr.msk.f32.mxu1 %vm303_vm0, %v192_v63 }
  0x78   : > { %703 = vmatmul.mubr.f32.gmra.mrb[32].mxu0 %v1401_v25 }
  0x79   : > { %739 = vmatmul.mubr.f32.gmra.mrb[32].mxu1 %v191_v4  ;;  %1034 = vmatprep.mubr.msk.f32.mxu0 %vm303_vm0, %v1408_v26 }
  0x7a   : > { %1040 = vmatprep.mubr.msk.f32.mxu1 %vm303_vm0, %v194_v6 }
  0x7c   : > { %709 = vmatmul.mubr.f32.gmra.mrb[34].mxu0 %v1421_v33 }
  0x7d   : > { %745 = vmatmul.mubr.f32.gmra.mrb[34].mxu1 %v193_v8 }
  0xab   : > { %v1651_v5 = vpop.permute.xlu1 %823 }
  0xac   : > { %v814_v59 = vpop.permute.xlu0 %813 }
  0xdb   : > { %v819_v11 = vpop.permute.xlu0 %818 }
 0x10b   : > { %v1564_v54 = vpop.f32.mrb[0].mxu0 }
 0x10c   : > { %v1566_v58 = vpop.f32.mrb[0].mxu1  ;;  %v1568_v1 = vpop.f32.mrb[1].mxu0 }
 0x10d   : > { %v751_v2 = vmax.f32 %v1564_v54, %v1566_v58  ;;  %v1572_v9 = vpop.f32.mrb[1].mxu1 }
 0x10e   : > { %v752_v10 = vmax.f32 %v1568_v1, %v1572_v9 }
 0x10f   : > { %v1576_v15 = vpop.f32.mrb[2].mxu0 }
 0x110   : > { %v1578_v16 = vpop.f32.mrb[2].mxu1  ;;  %v1580_v17 = vpop.f32.mrb[3].mxu0 }
 0x111   : > { %v753_v18 = vmax.f32 %v1576_v15, %v1578_v16  ;;  %v1584_v19 = vpop.f32.mrb[3].mxu1 }
 0x113   : > { %v1588_v21 = vpop.f32.mrb[4].mxu0 }
 0x114   : > { %v1590_v22 = vpop.f32.mrb[4].mxu1  ;;  %v1592_v23 = vpop.f32.mrb[5].mxu0 }
 0x115   : > { %v1596_v25 = vpop.f32.mrb[5].mxu1 }
 0x117   : > { %v1600_v27 = vpop.f32.mrb[6].mxu0 }
 0x118   : > { %v1602_v28 = vpop.f32.mrb[6].mxu1  ;;  %v1604_v29 = vpop.f32.mrb[7].mxu0 }
 0x119   : > { %v1608_v31 = vpop.f32.mrb[7].mxu1 }
 0x11b   : > { %v1612_v33 = vpop.f32.mrb[8].mxu0 }
 0x11c   : > { %v1614_v34 = vpop.f32.mrb[8].mxu1  ;;  %v1616_v35 = vpop.f32.mrb[9].mxu0 }
 0x11d   : > { %v1620_v37 = vpop.f32.mrb[9].mxu1 }
 0x11f   : > { %v1624_v39 = vpop.f32.mrb[10].mxu0 }
 0x120   : > { %v1626_v40 = vpop.f32.mrb[10].mxu1  ;;  %v1628_v41 = vpop.f32.mrb[11].mxu0 }
 0x121   : > { %v1632_v43 = vpop.f32.mrb[11].mxu1 }
 0x123   : > { %v442_v45 = vpop.f32.mrb[12].mxu0 }
 0x124   : > { %v579_v46 = vpop.f32.mrb[12].mxu1  ;;  %v444_v47 = vpop.f32.mrb[13].mxu0 }
 0x125   : > { %v763_v48 = vmax.f32 %v442_v45, %v579_v46  ;;  %v581_v49 = vpop.f32.mrb[13].mxu1 }
 0x126   : > { %v764_v50 = vmax.f32 %v444_v47, %v581_v49  ;;  %v1671_v47 = vpop.permute.xlu1 %828 }
 0x127   : > { %v448_v51 = vpop.f32.mrb[14].mxu0 }
 0x128   : > { %v585_v52 = vpop.f32.mrb[14].mxu1  ;;  %v1636_v53 = vpop.f32.mrb[15].mxu0 }
 0x129   : > { %v765_v55 = vmax.f32 %v448_v51, %v585_v52  ;;  %v587_v56 = vpop.f32.mrb[15].mxu1 }
 0x12a   : > { %v766_v57 = vmax.f32 %v1636_v53, %v587_v56  ;;  %v1679_v53 = vpop.permute.xlu0 %833  ;;  %v1693_v14 = vpop.permute.xlu1 %838 }
 0x12b   : > { %v1639_v60 = vpop.f32.mrb[16].mxu0 }
 0x12c   : > { %v1641_v61 = vpop.f32.mrb[16].mxu1  ;;  %v1643_v62 = vpop.f32.mrb[17].mxu0 }
 0x12d   : > { %v1647_v3 = vpop.f32.mrb[17].mxu1 }
 0x12e   : > { %v844_v63 = vpop.permute.xlu0 %843 }
 0x12f   : > { %v1653_v6 = vpop.f32.mrb[18].mxu0 }
 0x130   : > { %v1655_v7 = vpop.f32.mrb[18].mxu1  ;;  %v1657_v8 = vpop.f32.mrb[19].mxu0 }
 0x131   : > { %v1661_v13 = vpop.f32.mrb[19].mxu1 }
 0x133   : > { %v1665_v0 = vpop.f32.mrb[20].mxu0 }
 0x134   : > { %v1667_v45 = vpop.f32.mrb[20].mxu1  ;;  %v1669_v46 = vpop.f32.mrb[21].mxu0 }
 0x135   : > { %v1675_v51 = vpop.f32.mrb[21].mxu1 }
 0x137   : > { %v1681_v56 = vpop.f32.mrb[22].mxu0 }
 0x138   : > { %v1683_v44 = vpop.f32.mrb[22].mxu1  ;;  %v1685_v42 = vpop.f32.mrb[23].mxu0 }
 0x139   : > { %v1689_v36 = vpop.f32.mrb[23].mxu1 }
 0x13b   : > { %v680_v52 = vpop.f32.mrb[24].mxu0 }
 0x13c   : > { %v775_v32 = vmax.f32 %v751_v2, %v680_v52  ;;  %v716_v12 = vpop.f32.mrb[24].mxu1  ;;  %v682_v30 = vpop.f32.mrb[25].mxu0 }
 0x13d   : > { %v787_v4 = vmax.f32 %v763_v48, %v716_v12  ;;  %v776_v38 = vmax.f32 %v752_v10, %v682_v30  ;;  %v718_v26 = vpop.f32.mrb[25].mxu1 }
 0x13e   : > { %v871_v24 = vadd.f32 %v814_v59, %v775_v32  ;;  %v788_v20 = vmax.f32 %v764_v50, %v718_v26  ;;  %v1800_v50 = vmax.f32 %v1580_v17, %v1584_v19  ;;  %v1801_v17 = vmax.f32 %v1588_v21, %v1590_v22 }
 0x13f   : > { %v883_v49 = vadd.f32 %v844_v63, %v787_v4  ;;  %v872_v54 = vadd.f32 %v814_v59, %v776_v38  ;;  %v686_v58 = vpop.f32.mrb[26].mxu0  ;;  %v849_v59 = vpop.permute.xlu1 %848  ;;  %v1804_v22 = vmax.f32 %v1643_v62, %v1647_v3 }
 0x140   : > { %v895_v2 = vmax.f32 %v871_v24, 0.0  ;;  %v884_v48 = vadd.f32 %v844_v63, %v788_v20  ;;  %v777_v1 = vmax.f32 %v753_v18, %v686_v58  ;;  %v722_v9 = vpop.f32.mrb[26].mxu1  ;;  %v688_v10 = vpop.f32.mrb[27].mxu0  ;;  %v1802_v58 = vmax.f32 %v1639_v60, %v1641_v61 }
 0x141   : > { %v907_v26 = vmax.f32 %v883_v49, 0.0  ;;  %v896_v30 = vmax.f32 %v872_v54, 0.0  ;;  %v789_v32 = vmax.f32 %v765_v55, %v722_v9  ;;  %v778_v4 = vmax.f32 %v1800_v50, %v688_v10  ;;  %v724_v38 = vpop.f32.mrb[27].mxu1  ;;  %v854_v9 = vpop.permute.xlu0 %853 }
 0x142   : > { %919 = vst [vmem:[%s1705_s13] sm:$0xff] %v895_v2  ;;  %v908_v24 = vmax.f32 %v884_v48, 0.0  ;;  %v873_v12 = vadd.f32 %v819_v11, %v777_v1  ;;  %v790_v20 = vmax.f32 %v766_v57, %v724_v38 }
 0x143   : > { %931 = vst [vmem:[%s1705_s13 + $0x60] sm:$0xff] %v907_v26  ;;  %920 = vst [vmem:[%s1705_s13 + $0x8] sm:$0xff] %v896_v30  ;;  %v885_v15 = vadd.f32 %v849_v59, %v789_v32  ;;  %v874_v16 = vadd.f32 %v819_v11, %v778_v4  ;;  %v692_v18 = vpop.f32.mrb[28].mxu0  ;;  %v1803_v11 = vmax.f32 %v1592_v23, %v1596_v25 }
 0x144   : > { %932 = vst [vmem:[%s1705_s13 + $0x68] sm:$0xff] %v908_v24  ;;  %v897_v63 = vmax.f32 %v873_v12, 0.0  ;;  %v886_v55 = vadd.f32 %v849_v59, %v790_v20  ;;  %v779_v19 = vmax.f32 %v1801_v17, %v692_v18  ;;  %v728_v49 = vpop.f32.mrb[28].mxu1  ;;  %v694_v52 = vpop.f32.mrb[29].mxu0  ;;  %v1805_v32 = vmax.f32 %v1600_v27, %v1602_v28 }
 0x145   : > { %v909_v54 = vmax.f32 %v885_v15, 0.0  ;;  %v898_v57 = vmax.f32 %v874_v16, 0.0  ;;  %v791_v2 = vmax.f32 %v1802_v58, %v728_v49  ;;  %v780_v48 = vmax.f32 %v1803_v11, %v694_v52  ;;  %v730_v1 = vpop.f32.mrb[29].mxu1  ;;  %v859_v15 = vpop.permute.xlu1 %858 }
 0x146   : > { %921 = vst [vmem:[%s1705_s13 + $0x10] sm:$0xff] %v897_v63  ;;  %v910_v10 = vmax.f32 %v886_v55, 0.0  ;;  %v875_v21 = vadd.f32 %v1651_v5, %v779_v19  ;;  %v792_v26 = vmax.f32 %v1804_v22, %v730_v1  ;;  %v1806_v59 = vmax.f32 %v1653_v6, %v1655_v7 }
 0x147   : > { %933 = vst [vmem:[%s1705_s13 + $0x70] sm:$0xff] %v909_v54  ;;  %922 = vst [vmem:[%s1705_s13 + $0x18] sm:$0xff] %v898_v57  ;;  %v887_v30 = vadd.f32 %v854_v9, %v791_v2  ;;  %v876_v60 = vadd.f32 %v1651_v5, %v780_v48  ;;  %v698_v61 = vpop.f32.mrb[30].mxu0  ;;  %v1807_v5 = vmax.f32 %v1604_v29, %v1608_v31  ;;  %v864_v2 = vpop.permute.xlu0 %863 }
 0x148   : > { %934 = vst [vmem:[%s1705_s13 + $0x78] sm:$0xff] %v910_v10  ;;  %v899_v23 = vmax.f32 %v875_v21, 0.0  ;;  %v888_v25 = vadd.f32 %v854_v9, %v792_v26  ;;  %v781_v50 = vmax.f32 %v1805_v32, %v698_v61  ;;  %v734_v4 = vpop.f32.mrb[30].mxu1  ;;  %v700_v38 = vpop.f32.mrb[31].mxu0  ;;  %v1808_v28 = vmax.f32 %v1657_v8, %v1661_v13 }
 0x149   : > { %v911_v62 = vmax.f32 %v887_v30, 0.0  ;;  %v900_v3 = vmax.f32 %v876_v60, 0.0  ;;  %v793_v24 = vmax.f32 %v1806_v59, %v734_v4  ;;  %v782_v12 = vmax.f32 %v1807_v5, %v700_v38  ;;  %v736_v20 = vpop.f32.mrb[31].mxu1 }
 0x14a   : > { %923 = vst [vmem:[%s1705_s13 + $0x20] sm:$0xff] %v899_v23  ;;  %v912_v16 = vmax.f32 %v888_v25, 0.0  ;;  %v877_v27 = vadd.f32 %v1671_v47, %v781_v50  ;;  %v794_v18 = vmax.f32 %v1808_v28, %v736_v20  ;;  %v1809_v55 = vmax.f32 %v1612_v33, %v1614_v34  ;;  %v869_v23 = vpop.permute.xlu1 %868 }
 0x14b   : > { %935 = vst [vmem:[%s1705_s13 + $0x80] sm:$0xff] %v911_v62  ;;  %924 = vst [vmem:[%s1705_s13 + $0x28] sm:$0xff] %v900_v3  ;;  %v889_v63 = vadd.f32 %v859_v15, %v793_v24  ;;  %v878_v6 = vadd.f32 %v1671_v47, %v782_v12  ;;  %v704_v7 = vpop.f32.mrb[32].mxu0  ;;  %v1810_v52 = vmax.f32 %v1665_v0, %v1667_v45 }
 0x14c   : > { %936 = vst [vmem:[%s1705_s13 + $0x88] sm:$0xff] %v912_v16  ;;  %v901_v29 = vmax.f32 %v877_v27, 0.0  ;;  %v890_v31 = vadd.f32 %v859_v15, %v794_v18  ;;  %v783_v17 = vmax.f32 %v1809_v55, %v704_v7  ;;  %v740_v19 = vpop.f32.mrb[32].mxu1  ;;  %v706_v49 = vpop.f32.mrb[33].mxu0  ;;  %v1811_v47 = vmax.f32 %v1616_v35, %v1620_v37 }
 0x14d   : > { %v913_v8 = vmax.f32 %v889_v63, 0.0  ;;  %v902_v13 = vmax.f32 %v878_v6, 0.0  ;;  %v795_v54 = vmax.f32 %v1810_v52, %v740_v19  ;;  %v742_v58 = vpop.f32.mrb[33].mxu1  ;;  %v1812_v34 = vmax.f32 %v1669_v46, %v1675_v51 }
 0x14e   : > { %v784_v57 = vmax.f32 %v1811_v47, %v706_v49  ;;  %925 = vst [vmem:[%s1705_s13 + $0x30] sm:$0xff] %v901_v29  ;;  %v914_v11 = vmax.f32 %v890_v31, 0.0  ;;  %v879_v33 = vadd.f32 %v1679_v53, %v783_v17  ;;  %v1813_v9 = vmax.f32 %v1624_v39, %v1626_v40 }
 0x14f   : > { %v796_v48 = vmax.f32 %v1812_v34, %v742_v58  ;;  %937 = vst [vmem:[%s1705_s13 + $0x90] sm:$0xff] %v913_v8  ;;  %926 = vst [vmem:[%s1705_s13 + $0x38] sm:$0xff] %v902_v13  ;;  %v891_v1 = vadd.f32 %v864_v2, %v795_v54  ;;  %v710_v45 = vpop.f32.mrb[34].mxu0  ;;  %v1814_v26 = vmax.f32 %v1681_v56, %v1683_v44 }
 0x150   : > { %v880_v0 = vadd.f32 %v1679_v53, %v784_v57  ;;  %938 = vst [vmem:[%s1705_s13 + $0x98] sm:$0xff] %v914_v11  ;;  %v903_v35 = vmax.f32 %v879_v33, 0.0  ;;  %v785_v10 = vmax.f32 %v1813_v9, %v710_v45  ;;  %v746_v21 = vpop.f32.mrb[34].mxu1  ;;  %v712_v46 = vpop.f32.mrb[35].mxu0  ;;  %v1815_v53 = vmax.f32 %v1628_v41, %v1632_v43 }
 0x151   : > { %v892_v37 = vadd.f32 %v864_v2, %v796_v48  ;;  %v915_v51 = vmax.f32 %v891_v1, 0.0  ;;  %v797_v30 = vmax.f32 %v1814_v26, %v746_v21  ;;  %v748_v61 = vpop.f32.mrb[35].mxu1  ;;  %v1816_v25 = vmax.f32 %v1685_v42, %v1689_v36 }
 0x152   : > { %v904_v22 = vmax.f32 %v880_v0, 0.0  ;;  %v786_v60 = vmax.f32 %v1815_v53, %v712_v46  ;;  %927 = vst [vmem:[%s1705_s13 + $0x40] sm:$0xff] %v903_v35  ;;  %v881_v40 = vadd.f32 %v1693_v14, %v785_v10 }
 0x153   : > { %v916_v39 = vmax.f32 %v892_v37, 0.0  ;;  %v798_v32 = vmax.f32 %v1816_v25, %v748_v61  ;;  %939 = vst [vmem:[%s1705_s13 + $0xa0] sm:$0xff] %v915_v51  ;;  %v893_v44 = vadd.f32 %v869_v23, %v797_v30 }
 0x154   : > { %928 = vst [vmem:[%s1705_s13 + $0x48] sm:$0xff] %v904_v22  ;;  %v882_v41 = vadd.f32 %v1693_v14, %v786_v60  ;;  %v905_v43 = vmax.f32 %v881_v40, 0.0 }
 0x155   : > { %940 = vst [vmem:[%s1705_s13 + $0xa8] sm:$0xff] %v916_v39  ;;  %v894_v56 = vadd.f32 %v869_v23, %v798_v32  ;;  %v917_v50 = vmax.f32 %v893_v44, 0.0 }
 0x156   : > { %v906_v4 = vmax.f32 %v882_v41, 0.0  ;;  %929 = vst [vmem:[%s1705_s13 + $0x50] sm:$0xff] %v905_v43 }
 0x157   : > { %v918_v38 = vmax.f32 %v894_v56, 0.0  ;;  %941 = vst [vmem:[%s1705_s13 + $0xb0] sm:$0xff] %v917_v50 }
 0x158   : > { %930 = vst [vmem:[%s1705_s13 + $0x58] sm:$0xff] %v906_v4 }
 0x159   : > { %942 = vst [vmem:[%s1705_s13 + $0xb8] sm:$0xff] %v918_v38 }
 0x15a PF: > { %s13_s12 = sadd.s32 1, %s1188_s12  }
 0x15b   : > { %p10_p4 = scmp.ge.s32.totalorder %s13_s12, 4  }
 0x15d   :  { %12 = sbr.rel (!%p10_p4) target bundleno = 1 (0x1), region = 62 }

// kernel: forward.9
= control target key start
LH: loop header
LB: loop body
LE: loop exit
PB: predicated region body
PF: predicated region fallthrough
CT: control target
= control target key end

     0   :  { %v3039_v36 = vmov 1983009808   ;;  %v29_v38 = vlaneseq  ;;  %s4094_s0 = inlined_call_operand.vmem [shape: f32[2,1024], index: 0, kind: input, shape index: {}]   ;;  %s4095_s1 = inlined_call_operand.vmem [shape: bf16[1024,512], index: 1, kind: input, shape index: {}]   ;;  %s4096_s2 = inlined_call_operand.vmem [shape: f32[1,512], index: 2, kind: input, shape index: {}]   ;;  %s4097_s3 = inlined_call_operand.vmem [shape: f32[512,9], index: 3, kind: input, shape index: {}]   ;;  %s4098_s4 = inlined_call_operand.vmem [shape: f32[1,9], index: 4, kind: input, shape index: {}]   ;;  %s4099_s5 = inlined_call_operand.hbm [shape: f32[2,9], index: 5, kind: output, shape index: {}]  }
   0x1   :  { %v2625_v0 = vld [vmem:[%s4095_s1 + $0x4] ss:$16 sps:$4 sm:$0xff]   ;;  %v2627_v1 = vld [vmem:[%s4095_s1 + $0xc] ss:$16 sps:$4 sm:$0xff]   ;;  %v2629_v2 = vld [vmem:[%s4095_s1] ss:$16 sps:$4 sm:$0xff]   ;;  %v27_v37 = vunpack.c.l.s4 %v3039_v36 }
   0x2   :  { %1633 = vmatprep.subr.bf16.mxu0 %v2625_v0  ;;  %v2630_v3 = vld [vmem:[%s4095_s1 + $0x8] ss:$16 sps:$4 sm:$0xff]   ;;  %1797 = vmatprep.subr.bf16.mxu1 %v2627_v1  ;;  %v2631_v4 = vld [vmem:[%s4095_s1 + $0x24] ss:$16 sps:$4 sm:$0xff]   ;;  %v2633_v5 = vld [vmem:[%s4095_s1 + $0x2c] ss:$16 sps:$4 sm:$0xff]  }
   0x3   :  { %1634 = vmatpush1.bf16.msra.mxu0 %v2629_v2  ;;  %1798 = vmatpush1.bf16.msra.mxu1 %v2630_v3  ;;  %v2635_v6 = vld [vmem:[%s4095_s1 + $0x20] ss:$16 sps:$4 sm:$0xff]   ;;  %v2636_v7 = vld [vmem:[%s4095_s1 + $0x28] ss:$16 sps:$4 sm:$0xff]   ;;  %v2637_v8 = vld [vmem:[%s4095_s1 + $0x44] ss:$16 sps:$4 sm:$0xff]   ;;  %v28_v42 = vunpack.c.0.s8 %v27_v37 }
   0x4   :  { %1635 = vmatprep.subr.bf16.mxu0 %v2631_v4  ;;  %1799 = vmatprep.subr.bf16.mxu1 %v2633_v5  ;;  %v2639_v9 = vld [vmem:[%s4095_s1 + $0x4c] ss:$16 sps:$4 sm:$0xff]   ;;  %v2641_v10 = vld [vmem:[%s4095_s1 + $0x40] ss:$16 sps:$4 sm:$0xff]   ;;  %v2642_v11 = vld [vmem:[%s4095_s1 + $0x48] ss:$16 sps:$4 sm:$0xff]  }
   0x5   :  { %v2643_v12 = vld [vmem:[%s4095_s1 + $0x64] ss:$16 sps:$4 sm:$0xff]   ;;  %v2645_v13 = vld [vmem:[%s4095_s1 + $0x6c] ss:$16 sps:$4 sm:$0xff]   ;;  %v2647_v14 = vld [vmem:[%s4095_s1 + $0x60] ss:$16 sps:$4 sm:$0xff]  }
   0x6   :  { %v2648_v15 = vld [vmem:[%s4095_s1 + $0x68] ss:$16 sps:$4 sm:$0xff]   ;;  %v2649_v16 = vld [vmem:[%s4095_s1 + $0x84] ss:$16 sps:$4 sm:$0xff]   ;;  %v2651_v17 = vld [vmem:[%s4095_s1 + $0x8c] ss:$16 sps:$4 sm:$0xff]  }
   0x7   :  { %1636 = vmatpush1.bf16.msra.mxu0 %v2635_v6  ;;  %1800 = vmatpush1.bf16.msra.mxu1 %v2636_v7  ;;  %v2653_v18 = vld [vmem:[%s4095_s1 + $0x80] ss:$16 sps:$4 sm:$0xff]   ;;  %v2654_v19 = vld [vmem:[%s4095_s1 + $0x88] ss:$16 sps:$4 sm:$0xff]   ;;  %v2655_v20 = vld [vmem:[%s4095_s1 + $0xa4] ss:$16 sps:$4 sm:$0xff]  }
   0x8   :  { %1637 = vmatprep.subr.bf16.mxu0 %v2637_v8  ;;  %1801 = vmatprep.subr.bf16.mxu1 %v2639_v9  ;;  %v2657_v21 = vld [vmem:[%s4095_s1 + $0xac] ss:$16 sps:$4 sm:$0xff]   ;;  %v2659_v22 = vld [vmem:[%s4095_s1 + $0xa0] ss:$16 sps:$4 sm:$0xff]   ;;  %v2660_v23 = vld [vmem:[%s4095_s1 + $0xa8] ss:$16 sps:$4 sm:$0xff]  }
   0x9   :  { %v2661_v24 = vld [vmem:[%s4095_s1 + $0xc4] ss:$16 sps:$4 sm:$0xff]   ;;  %v2663_v25 = vld [vmem:[%s4095_s1 + $0xcc] ss:$16 sps:$4 sm:$0xff]   ;;  %v2665_v26 = vld [vmem:[%s4095_s1 + $0xc0] ss:$16 sps:$4 sm:$0xff]  }
   0xa   :  { %v2666_v27 = vld [vmem:[%s4095_s1 + $0xc8] ss:$16 sps:$4 sm:$0xff]   ;;  %v2667_v28 = vld [vmem:[%s4095_s1 + $0xe4] ss:$16 sps:$4 sm:$0xff]   ;;  %v2669_v29 = vld [vmem:[%s4095_s1 + $0xec] ss:$16 sps:$4 sm:$0xff]  }
   0xb   :  { %1638 = vmatpush1.bf16.msra.mxu0 %v2641_v10  ;;  %1802 = vmatpush1.bf16.msra.mxu1 %v2642_v11  ;;  %v2671_v30 = vld [vmem:[%s4095_s1 + $0xe0] ss:$16 sps:$4 sm:$0xff]   ;;  %v2672_v31 = vld [vmem:[%s4095_s1 + $0xe8] ss:$16 sps:$4 sm:$0xff]   ;;  %v2673_v32 = vld [vmem:[%s4095_s1 + $0x104] ss:$16 sps:$4 sm:$0xff]  }
   0xc   :  { %1639 = vmatprep.subr.bf16.mxu0 %v2643_v12  ;;  %1803 = vmatprep.subr.bf16.mxu1 %v2645_v13  ;;  %v2675_v33 = vld [vmem:[%s4095_s1 + $0x10c] ss:$16 sps:$4 sm:$0xff]   ;;  %v2677_v34 = vld [vmem:[%s4095_s1 + $0x100] ss:$16 sps:$4 sm:$0xff]   ;;  %v2678_v35 = vld [vmem:[%s4095_s1 + $0x108] ss:$16 sps:$4 sm:$0xff]  }
   0xd   :  { %v2679_v39 = vld [vmem:[%s4095_s1 + $0x124] ss:$16 sps:$4 sm:$0xff]   ;;  %v2681_v40 = vld [vmem:[%s4095_s1 + $0x12c] ss:$16 sps:$4 sm:$0xff]   ;;  %v2683_v41 = vld [vmem:[%s4095_s1 + $0x120] ss:$16 sps:$4 sm:$0xff]  }
   0xe   :  { %v3188_v43 = vshrl.u32 %v29_v38, 7  ;;  %v2684_v44 = vld [vmem:[%s4095_s1 + $0x128] ss:$16 sps:$4 sm:$0xff]   ;;  %v2685_v45 = vld [vmem:[%s4095_s1 + $0x144] ss:$16 sps:$4 sm:$0xff]  }
   0xf   :  { %1640 = vmatpush1.bf16.msra.mxu0 %v2647_v14  ;;  %1804 = vmatpush1.bf16.msra.mxu1 %v2648_v15  ;;  %v2687_v46 = vld [vmem:[%s4095_s1 + $0x14c] ss:$16 sps:$4 sm:$0xff]   ;;  %v2689_v47 = vld [vmem:[%s4095_s1 + $0x140] ss:$16 sps:$4 sm:$0xff]   ;;  %v2690_v48 = vld [vmem:[%s4095_s1 + $0x148] ss:$16 sps:$4 sm:$0xff]  }
  0x10   :  { %1641 = vmatprep.subr.bf16.mxu0 %v2649_v16  ;;  %1805 = vmatprep.subr.bf16.mxu1 %v2651_v17  ;;  %v3206_v49 = vsub.s32 %v28_v42, %v3188_v43  ;;  %v2691_v50 = vld [vmem:[%s4095_s1 + $0x164] ss:$16 sps:$4 sm:$0xff]   ;;  %v2693_v51 = vld [vmem:[%s4095_s1 + $0x16c] ss:$16 sps:$4 sm:$0xff]   ;;  %v2695_v53 = vld [vmem:[%s4095_s1 + $0x160] ss:$16 sps:$4 sm:$0xff]  }
  0x11   :  { %v21_v52 = vld [vmem:[%s4094_s0] sm:$0xff]  ;;  %v2696_v55 = vld [vmem:[%s4095_s1 + $0x168] ss:$16 sps:$4 sm:$0xff]   ;;  %v2699_v57 = vld [vmem:[%s4095_s1 + $0x18c] ss:$16 sps:$4 sm:$0xff]  }
  0x12   :  { %v32_v54 = vrot.slane %v21_v52, %v3206_v49  ;;  %v2697_v56 = vld [vmem:[%s4095_s1 + $0x184] ss:$16 sps:$4 sm:$0xff]   ;;  %v2701_v59 = vld [vmem:[%s4095_s1 + $0x180] ss:$16 sps:$4 sm:$0xff]   ;;  %v2702_v61 = vld [vmem:[%s4095_s1 + $0x188] ss:$16 sps:$4 sm:$0xff]   ;;  %v25_v4 = vcombine.high %v21_v52, %v21_v52 }
  0x13   :  { %1642 = vmatpush1.bf16.msra.mxu0 %v2653_v18  ;;  %1806 = vmatpush1.bf16.msra.mxu1 %v2654_v19  ;;  %v2703_v62 = vld [vmem:[%s4095_s1 + $0x1a4] ss:$16 sps:$4 sm:$0xff]   ;;  %v2705_v63 = vld [vmem:[%s4095_s1 + $0x1ac] ss:$16 sps:$4 sm:$0xff]   ;;  %v2707_v0 = vld [vmem:[%s4095_s1 + $0x1a0] ss:$16 sps:$4 sm:$0xff]  }
  0x14   :  { %1643 = vmatprep.subr.bf16.mxu0 %v2655_v20  ;;  %1807 = vmatprep.subr.bf16.mxu1 %v2657_v21  ;;  %v40_v58 = vcombine.high %v32_v54, %v32_v54  ;;  %v2708_v1 = vld [vmem:[%s4095_s1 + $0x1a8] ss:$16 sps:$4 sm:$0xff]   ;;  %v2709_v2 = vld [vmem:[%s4095_s1 + $0x1c4] ss:$16 sps:$4 sm:$0xff]   ;;  %v2711_v3 = vld [vmem:[%s4095_s1 + $0x1cc] ss:$16 sps:$4 sm:$0xff]   ;;  %v3267_v9 = vrot.slane %v25_v4, %v3206_v49  ;;  %v67_v16 = vpack.c.bf16 %v32_v54, %v32_v54 }
  0x15   :  { %v2713_v5 = vld [vmem:[%s4095_s1 + $0x1c0] ss:$16 sps:$4 sm:$0xff]   ;;  %v2714_v6 = vld [vmem:[%s4095_s1 + $0x1c8] ss:$16 sps:$4 sm:$0xff]   ;;  %v2715_v7 = vld [vmem:[%s4095_s1 + $0x1e4] ss:$16 sps:$4 sm:$0xff]  }
  0x16   :  { %v68_v60 = vpack.c.bf16 %v40_v58, %v40_v58  ;;  %v2717_v8 = vld [vmem:[%s4095_s1 + $0x1ec] ss:$16 sps:$4 sm:$0xff]   ;;  %v2719_v10 = vld [vmem:[%s4095_s1 + $0x1e0] ss:$16 sps:$4 sm:$0xff]   ;;  %v2720_v11 = vld [vmem:[%s4095_s1 + $0x1e8] ss:$16 sps:$4 sm:$0xff]   ;;  %v41_v14 = vcombine.high %v3267_v9, %v3267_v9 }
  0x17   :  { %1644 = vmatpush1.bf16.msra.mxu0 %v2659_v22  ;;  %1808 = vmatpush1.bf16.msra.mxu1 %v2660_v23  ;;  %v2724_v12 = vld [vmem:[%s4095_s1 + $0x204] ss:$16 sps:$4 sm:$0xff]   ;;  %v2727_v13 = vld [vmem:[%s4095_s1 + $0x20c] ss:$16 sps:$4 sm:$0xff]   ;;  %v2722_v15 = vld [vmem:[%s4095_s1 + $0x200] ss:$16 sps:$4 sm:$0xff]  }
  0x18   :  { %1645 = vmatprep.subr.bf16.mxu0 %v2661_v24  ;;  %1809 = vmatprep.subr.bf16.mxu1 %v2663_v25  ;;  %v2725_v17 = vld [vmem:[%s4095_s1 + $0x208] ss:$16 sps:$4 sm:$0xff]   ;;  %v2730_v18 = vld [vmem:[%s4095_s1 + $0x224] ss:$16 sps:$4 sm:$0xff]   ;;  %v2733_v19 = vld [vmem:[%s4095_s1 + $0x22c] ss:$16 sps:$4 sm:$0xff]   ;;  %v70_v20 = vpack.c.bf16 %v41_v14, %v41_v14 }
  0x19   :  { %1665 = vmatprep.mubr.bf16.mxu0 %v68_v60  ;;  %1829 = vmatprep.mubr.bf16.mxu1 %v68_v60  ;;  %v2728_v21 = vld [vmem:[%s4095_s1 + $0x220] ss:$16 sps:$4 sm:$0xff]   ;;  %v2731_v22 = vld [vmem:[%s4095_s1 + $0x228] ss:$16 sps:$4 sm:$0xff]   ;;  %v2736_v23 = vld [vmem:[%s4095_s1 + $0x244] ss:$16 sps:$4 sm:$0xff]  }
  0x1a   :  { %v2739_v24 = vld [vmem:[%s4095_s1 + $0x24c] ss:$16 sps:$4 sm:$0xff]   ;;  %v2734_v25 = vld [vmem:[%s4095_s1 + $0x240] ss:$16 sps:$4 sm:$0xff]   ;;  %v2755_v38 = vld [vmem:[%s4095_s1 + $0x2a8] ss:$16 sps:$4 sm:$0xff]  }
  0x1b   :  { %1646 = vmatpush1.bf16.msra.mxu0 %v2665_v26  ;;  %1810 = vmatpush1.bf16.msra.mxu1 %v2666_v27  ;;  %v2737_v26 = vld [vmem:[%s4095_s1 + $0x248] ss:$16 sps:$4 sm:$0xff]   ;;  %v2742_v27 = vld [vmem:[%s4095_s1 + $0x264] ss:$16 sps:$4 sm:$0xff]   ;;  %v2757_v36 = vld [vmem:[%s4095_s1 + $0x2ac] ss:$16 sps:$4 sm:$0xff]  }
  0x1c   :  { %1647 = vmatprep.subr.bf16.mxu0 %v2667_v28  ;;  %1811 = vmatprep.subr.bf16.mxu1 %v2669_v29  ;;  %v2745_v28 = vld [vmem:[%s4095_s1 + $0x26c] ss:$16 sps:$4 sm:$0xff]   ;;  %v2740_v29 = vld [vmem:[%s4095_s1 + $0x260] ss:$16 sps:$4 sm:$0xff]   ;;  %v2761_v42 = vld [vmem:[%s4095_s1 + $0x2c8] ss:$16 sps:$4 sm:$0xff]  }
  0x1d   :  { %v2752_v37 = vld [vmem:[%s4095_s1 + $0x2a0] ss:$16 sps:$4 sm:$0xff]   ;;  %v2773_v52 = vld [vmem:[%s4095_s1 + $0x308] ss:$16 sps:$4 sm:$0xff]   ;;  %v2781_v54 = vld [vmem:[%s4095_s1 + $0x32c] ss:$16 sps:$4 sm:$0xff]  }
  0x1e   :  { %v2787_v58 = vld [vmem:[%s4095_s1 + $0x34c] ss:$16 sps:$4 sm:$0xff]   ;;  %v2785_v60 = vld [vmem:[%s4095_s1 + $0x348] ss:$16 sps:$4 sm:$0xff]   ;;  %v2814_v14 = vld [vmem:[%s4095_s1 + $0x3e4] ss:$16 sps:$4 sm:$0xff]  }
  0x1f   :  { %1648 = vmatpush1.bf16.msra.mxu0 %v2671_v30  ;;  %1812 = vmatpush1.bf16.msra.mxu1 %v2672_v31  ;;  %v2743_v30 = vld [vmem:[%s4095_s1 + $0x268] ss:$16 sps:$4 sm:$0xff]   ;;  %v2748_v31 = vld [vmem:[%s4095_s1 + $0x284] ss:$16 sps:$4 sm:$0xff]  }
  0x20   :  { %1649 = vmatprep.subr.bf16.mxu0 %v2673_v32  ;;  %1813 = vmatprep.subr.bf16.mxu1 %v2675_v33  ;;  %v2751_v32 = vld [vmem:[%s4095_s1 + $0x28c] ss:$16 sps:$4 sm:$0xff]   ;;  %v2746_v33 = vld [vmem:[%s4095_s1 + $0x280] ss:$16 sps:$4 sm:$0xff]   ;;  %v2797_v4 = vld [vmem:[%s4095_s1 + $0x388] ss:$16 sps:$4 sm:$0xff]  }
  0x23   :  { %1650 = vmatpush1.bf16.msra.mxu0 %v2677_v34  ;;  %1814 = vmatpush1.bf16.msra.mxu1 %v2678_v35  ;;  %v2749_v34 = vld [vmem:[%s4095_s1 + $0x288] ss:$16 sps:$4 sm:$0xff]   ;;  %v2754_v35 = vld [vmem:[%s4095_s1 + $0x2a4] ss:$16 sps:$4 sm:$0xff]  }
  0x24   :  { %1651 = vmatprep.subr.bf16.mxu0 %v2679_v39  ;;  %1815 = vmatprep.subr.bf16.mxu1 %v2681_v40  ;;  %v2760_v39 = vld [vmem:[%s4095_s1 + $0x2c4] ss:$16 sps:$4 sm:$0xff]   ;;  %v2763_v40 = vld [vmem:[%s4095_s1 + $0x2cc] ss:$16 sps:$4 sm:$0xff]  }
  0x27   :  { %1652 = vmatpush1.bf16.msra.mxu0 %v2683_v41  ;;  %1816 = vmatpush1.bf16.msra.mxu1 %v2684_v44  ;;  %v2758_v41 = vld [vmem:[%s4095_s1 + $0x2c0] ss:$16 sps:$4 sm:$0xff]   ;;  %v2766_v44 = vld [vmem:[%s4095_s1 + $0x2e4] ss:$16 sps:$4 sm:$0xff]  }
  0x28   :  { %1653 = vmatprep.subr.bf16.mxu0 %v2685_v45  ;;  %1817 = vmatprep.subr.bf16.mxu1 %v2687_v46  ;;  %v2769_v45 = vld [vmem:[%s4095_s1 + $0x2ec] ss:$16 sps:$4 sm:$0xff]   ;;  %v2764_v46 = vld [vmem:[%s4095_s1 + $0x2e0] ss:$16 sps:$4 sm:$0xff]  }
  0x2b   :  { %1654 = vmatpush1.bf16.msra.mxu0 %v2689_v47  ;;  %1818 = vmatpush1.bf16.msra.mxu1 %v2690_v48  ;;  %v2767_v47 = vld [vmem:[%s4095_s1 + $0x2e8] ss:$16 sps:$4 sm:$0xff]   ;;  %v2772_v48 = vld [vmem:[%s4095_s1 + $0x304] ss:$16 sps:$4 sm:$0xff]  }
  0x2c   :  { %1655 = vmatprep.subr.bf16.mxu0 %v2691_v50  ;;  %1819 = vmatprep.subr.bf16.mxu1 %v2693_v51  ;;  %v2775_v50 = vld [vmem:[%s4095_s1 + $0x30c] ss:$16 sps:$4 sm:$0xff]   ;;  %v2770_v51 = vld [vmem:[%s4095_s1 + $0x300] ss:$16 sps:$4 sm:$0xff]  }
  0x2f   :  { %1656 = vmatpush1.bf16.msra.mxu0 %v2695_v53  ;;  %1820 = vmatpush1.bf16.msra.mxu1 %v2696_v55  ;;  %v2778_v53 = vld [vmem:[%s4095_s1 + $0x324] ss:$16 sps:$4 sm:$0xff]   ;;  %v2776_v55 = vld [vmem:[%s4095_s1 + $0x320] ss:$16 sps:$4 sm:$0xff]  }
  0x30   :  { %1657 = vmatprep.subr.bf16.mxu0 %v2697_v56  ;;  %1821 = vmatprep.subr.bf16.mxu1 %v2699_v57  ;;  %v2779_v56 = vld [vmem:[%s4095_s1 + $0x328] ss:$16 sps:$4 sm:$0xff]   ;;  %v2784_v57 = vld [vmem:[%s4095_s1 + $0x344] ss:$16 sps:$4 sm:$0xff]  }
  0x33   :  { %1658 = vmatpush1.bf16.msra.mxu0 %v2701_v59  ;;  %1822 = vmatpush1.bf16.msra.mxu1 %v2702_v61  ;;  %v2782_v59 = vld [vmem:[%s4095_s1 + $0x340] ss:$16 sps:$4 sm:$0xff]   ;;  %v2790_v61 = vld [vmem:[%s4095_s1 + $0x364] ss:$16 sps:$4 sm:$0xff]  }
  0x34   :  { %1659 = vmatprep.subr.bf16.mxu0 %v2703_v62  ;;  %1823 = vmatprep.subr.bf16.mxu1 %v2705_v63  ;;  %v2793_v62 = vld [vmem:[%s4095_s1 + $0x36c] ss:$16 sps:$4 sm:$0xff]   ;;  %v2788_v63 = vld [vmem:[%s4095_s1 + $0x360] ss:$16 sps:$4 sm:$0xff]  }
  0x37   :  { %1660 = vmatpush1.bf16.msra.mxu0 %v2707_v0  ;;  %1824 = vmatpush1.bf16.msra.mxu1 %v2708_v1  ;;  %v2791_v0 = vld [vmem:[%s4095_s1 + $0x368] ss:$16 sps:$4 sm:$0xff]   ;;  %v2796_v1 = vld [vmem:[%s4095_s1 + $0x384] ss:$16 sps:$4 sm:$0xff]  }
  0x38   :  { %1661 = vmatprep.subr.bf16.mxu0 %v2709_v2  ;;  %1825 = vmatprep.subr.bf16.mxu1 %v2711_v3  ;;  %v2799_v2 = vld [vmem:[%s4095_s1 + $0x38c] ss:$16 sps:$4 sm:$0xff]   ;;  %v2794_v3 = vld [vmem:[%s4095_s1 + $0x380] ss:$16 sps:$4 sm:$0xff]  }
  0x3b   :  { %1662 = vmatpush1.bf16.msra.mxu0 %v2713_v5  ;;  %1826 = vmatpush1.bf16.msra.mxu1 %v2714_v6  ;;  %v2802_v5 = vld [vmem:[%s4095_s1 + $0x3a4] ss:$16 sps:$4 sm:$0xff]   ;;  %v2805_v6 = vld [vmem:[%s4095_s1 + $0x3ac] ss:$16 sps:$4 sm:$0xff]  }
  0x3c   :  { %1663 = vmatprep.subr.bf16.mxu0 %v2715_v7  ;;  %1827 = vmatprep.subr.bf16.mxu1 %v2717_v8  ;;  %v2800_v7 = vld [vmem:[%s4095_s1 + $0x3a0] ss:$16 sps:$4 sm:$0xff]   ;;  %v2803_v8 = vld [vmem:[%s4095_s1 + $0x3a8] ss:$16 sps:$4 sm:$0xff]  }
  0x3f   :  { %1664 = vmatpush1.bf16.msra.mxu0 %v2719_v10  ;;  %1828 = vmatpush1.bf16.msra.mxu1 %v2720_v11  ;;  %v2808_v10 = vld [vmem:[%s4095_s1 + $0x3c4] ss:$16 sps:$4 sm:$0xff]   ;;  %v2811_v11 = vld [vmem:[%s4095_s1 + $0x3cc] ss:$16 sps:$4 sm:$0xff]  }
  0x40   :  { %1674 = vmatprep.subr.bf16.mxu0 %v2724_v12  ;;  %1838 = vmatprep.subr.bf16.mxu1 %v2727_v13  ;;  %v2806_v12 = vld [vmem:[%s4095_s1 + $0x3c0] ss:$16 sps:$4 sm:$0xff]   ;;  %v2809_v13 = vld [vmem:[%s4095_s1 + $0x3c8] ss:$16 sps:$4 sm:$0xff]  }
  0x42   :  { %1666 = vmatmul.mubr.bf16.vlgmr.msra.gmra.mrb[0].mxu0 %v67_v16  ;;  %1830 = vmatmul.mubr.bf16.vlgmr.msra.gmra.mrb[0].mxu1 %v67_v16  ;;  %v2812_v16 = vld [vmem:[%s4095_s1 + $0x3e0] ss:$16 sps:$4 sm:$0xff]  }
  0x43   :  { %1675 = vmatpush1.bf16.msra.mxu0 %v2722_v15  ;;  %1839 = vmatpush1.bf16.msra.mxu1 %v2725_v17  ;;  %v2817_v15 = vld [vmem:[%s4095_s1 + $0x3ec] ss:$16 sps:$4 sm:$0xff]   ;;  %v2815_v17 = vld [vmem:[%s4095_s1 + $0x3e8] ss:$16 sps:$4 sm:$0xff]  }
  0x44   :  { %1676 = vmatprep.subr.bf16.mxu0 %v2730_v18  ;;  %1840 = vmatprep.subr.bf16.mxu1 %v2733_v19  ;;  %v2820_v18 = vld [vmem:[%s4095_s1 + $0x404] ss:$16 sps:$4 sm:$0xff]   ;;  %v2823_v19 = vld [vmem:[%s4095_s1 + $0x40c] ss:$16 sps:$4 sm:$0xff]  }
  0x45   :  { %1706 = vmatprep.mubr.bf16.mxu0 %v70_v20  ;;  %1870 = vmatprep.mubr.bf16.mxu1 %v70_v20  ;;  %v2818_v20 = vld [vmem:[%s4095_s1 + $0x400] ss:$16 sps:$4 sm:$0xff]  }
  0x47   :  { %1677 = vmatpush1.bf16.msra.mxu0 %v2728_v21  ;;  %1841 = vmatpush1.bf16.msra.mxu1 %v2731_v22  ;;  %v69_v21 = vpack.c.bf16 %v3267_v9, %v3267_v9  ;;  %v2821_v22 = vld [vmem:[%s4095_s1 + $0x408] ss:$16 sps:$4 sm:$0xff]   ;;  %v2829_v9 = vld [vmem:[%s4095_s1 + $0x42c] ss:$16 sps:$4 sm:$0xff]  }
  0x48   :  { %1678 = vmatprep.subr.bf16.mxu0 %v2736_v23  ;;  %1842 = vmatprep.subr.bf16.mxu1 %v2739_v24  ;;  %v3486_v23 = vld [vmem:[%s4094_s0 + $0x8] sm:$0xff]  ;;  %v2826_v24 = vld [vmem:[%s4095_s1 + $0x424] ss:$16 sps:$4 sm:$0xff]  }
  0x4b   :  { %1679 = vmatpush1.bf16.msra.mxu0 %v2734_v25  ;;  %1843 = vmatpush1.bf16.msra.mxu1 %v2737_v26  ;;  %v3496_v25 = vrot.slane %v3486_v23, %v3206_v49 }
  0x4c   :  { %1680 = vmatprep.subr.bf16.mxu0 %v2742_v27  ;;  %1844 = vmatprep.subr.bf16.mxu1 %v2745_v28  ;;  %v2824_v27 = vld [vmem:[%s4095_s1 + $0x420] ss:$16 sps:$4 sm:$0xff]   ;;  %v2827_v28 = vld [vmem:[%s4095_s1 + $0x428] ss:$16 sps:$4 sm:$0xff]  }
  0x4d   :  { %v57_v26 = vcombine.high %v3496_v25, %v3496_v25 }
  0x4f   :  { %1681 = vmatpush1.bf16.msra.mxu0 %v2740_v29  ;;  %1845 = vmatpush1.bf16.msra.mxu1 %v2743_v30  ;;  %v2832_v29 = vld [vmem:[%s4095_s1 + $0x444] ss:$16 sps:$4 sm:$0xff]   ;;  %v2835_v30 = vld [vmem:[%s4095_s1 + $0x44c] ss:$16 sps:$4 sm:$0xff]  }
  0x50   :  { %1682 = vmatprep.subr.bf16.mxu0 %v2748_v31  ;;  %1846 = vmatprep.subr.bf16.mxu1 %v2751_v32  ;;  %v72_v31 = vpack.c.bf16 %v57_v26, %v57_v26  ;;  %v2830_v32 = vld [vmem:[%s4095_s1 + $0x440] ss:$16 sps:$4 sm:$0xff]   ;;  %v2911_v26 = vld [vmem:[%s4095_s1 + $0x5e8] ss:$16 sps:$4 sm:$0xff]  }
  0x53   :  { %1683 = vmatpush1.bf16.msra.mxu0 %v2746_v33  ;;  %1847 = vmatpush1.bf16.msra.mxu1 %v2749_v34  ;;  %v2833_v33 = vld [vmem:[%s4095_s1 + $0x448] ss:$16 sps:$4 sm:$0xff]   ;;  %v2838_v34 = vld [vmem:[%s4095_s1 + $0x464] ss:$16 sps:$4 sm:$0xff]  }
  0x54   :  { %1684 = vmatprep.subr.bf16.mxu0 %v2754_v35  ;;  %1848 = vmatprep.subr.bf16.mxu1 %v2757_v36  ;;  %v2841_v35 = vld [vmem:[%s4095_s1 + $0x46c] ss:$16 sps:$4 sm:$0xff]   ;;  %v2836_v36 = vld [vmem:[%s4095_s1 + $0x460] ss:$16 sps:$4 sm:$0xff]  }
  0x57   :  { %1685 = vmatpush1.bf16.msra.mxu0 %v2752_v37  ;;  %1849 = vmatpush1.bf16.msra.mxu1 %v2755_v38  ;;  %v2839_v37 = vld [vmem:[%s4095_s1 + $0x468] ss:$16 sps:$4 sm:$0xff]   ;;  %v2844_v38 = vld [vmem:[%s4095_s1 + $0x484] ss:$16 sps:$4 sm:$0xff]  }
  0x58   :  { %1686 = vmatprep.subr.bf16.mxu0 %v2760_v39  ;;  %1850 = vmatprep.subr.bf16.mxu1 %v2763_v40  ;;  %v2847_v39 = vld [vmem:[%s4095_s1 + $0x48c] ss:$16 sps:$4 sm:$0xff]   ;;  %v2842_v40 = vld [vmem:[%s4095_s1 + $0x480] ss:$16 sps:$4 sm:$0xff]  }
  0x5b   :  { %1687 = vmatpush1.bf16.msra.mxu0 %v2758_v41  ;;  %1851 = vmatpush1.bf16.msra.mxu1 %v2761_v42  ;;  %v2845_v41 = vld [vmem:[%s4095_s1 + $0x488] ss:$16 sps:$4 sm:$0xff]   ;;  %v2850_v42 = vld [vmem:[%s4095_s1 + $0x4a4] ss:$16 sps:$4 sm:$0xff]  }
  0x5c   :  { %1688 = vmatprep.subr.bf16.mxu0 %v2766_v44  ;;  %1852 = vmatprep.subr.bf16.mxu1 %v2769_v45  ;;  %v2853_v44 = vld [vmem:[%s4095_s1 + $0x4ac] ss:$16 sps:$4 sm:$0xff]   ;;  %v2848_v45 = vld [vmem:[%s4095_s1 + $0x4a0] ss:$16 sps:$4 sm:$0xff]  }
  0x5f   :  { %1689 = vmatpush1.bf16.msra.mxu0 %v2764_v46  ;;  %1853 = vmatpush1.bf16.msra.mxu1 %v2767_v47  ;;  %v2851_v46 = vld [vmem:[%s4095_s1 + $0x4a8] ss:$16 sps:$4 sm:$0xff]   ;;  %v2856_v47 = vld [vmem:[%s4095_s1 + $0x4c4] ss:$16 sps:$4 sm:$0xff]  }
  0x60   :  { %1690 = vmatprep.subr.bf16.mxu0 %v2772_v48  ;;  %1854 = vmatprep.subr.bf16.mxu1 %v2775_v50  ;;  %v2859_v48 = vld [vmem:[%s4095_s1 + $0x4cc] ss:$16 sps:$4 sm:$0xff]   ;;  %v2854_v50 = vld [vmem:[%s4095_s1 + $0x4c0] ss:$16 sps:$4 sm:$0xff]  }
  0x63   :  { %1691 = vmatpush1.bf16.msra.mxu0 %v2770_v51  ;;  %1855 = vmatpush1.bf16.msra.mxu1 %v2773_v52  ;;  %v2857_v51 = vld [vmem:[%s4095_s1 + $0x4c8] ss:$16 sps:$4 sm:$0xff]   ;;  %v2862_v52 = vld [vmem:[%s4095_s1 + $0x4e4] ss:$16 sps:$4 sm:$0xff]  }
  0x64   :  { %1692 = vmatprep.subr.bf16.mxu0 %v2778_v53  ;;  %1856 = vmatprep.subr.bf16.mxu1 %v2781_v54  ;;  %v2865_v53 = vld [vmem:[%s4095_s1 + $0x4ec] ss:$16 sps:$4 sm:$0xff]   ;;  %v2860_v54 = vld [vmem:[%s4095_s1 + $0x4e0] ss:$16 sps:$4 sm:$0xff]  }
  0x67   :  { %1693 = vmatpush1.bf16.msra.mxu0 %v2776_v55  ;;  %1857 = vmatpush1.bf16.msra.mxu1 %v2779_v56  ;;  %v2863_v55 = vld [vmem:[%s4095_s1 + $0x4e8] ss:$16 sps:$4 sm:$0xff]   ;;  %v2868_v56 = vld [vmem:[%s4095_s1 + $0x504] ss:$16 sps:$4 sm:$0xff]  }
  0x68   :  { %1694 = vmatprep.subr.bf16.mxu0 %v2784_v57  ;;  %1858 = vmatprep.subr.bf16.mxu1 %v2787_v58  ;;  %v2871_v57 = vld [vmem:[%s4095_s1 + $0x50c] ss:$16 sps:$4 sm:$0xff]   ;;  %v2866_v58 = vld [vmem:[%s4095_s1 + $0x500] ss:$16 sps:$4 sm:$0xff]  }
  0x6b   :  { %1695 = vmatpush1.bf16.msra.mxu0 %v2782_v59  ;;  %1859 = vmatpush1.bf16.msra.mxu1 %v2785_v60  ;;  %v2869_v59 = vld [vmem:[%s4095_s1 + $0x508] ss:$16 sps:$4 sm:$0xff]   ;;  %v2874_v60 = vld [vmem:[%s4095_s1 + $0x524] ss:$16 sps:$4 sm:$0xff]  }
  0x6c   :  { %1696 = vmatprep.subr.bf16.mxu0 %v2790_v61  ;;  %1860 = vmatprep.subr.bf16.mxu1 %v2793_v62  ;;  %v2877_v61 = vld [vmem:[%s4095_s1 + $0x52c] ss:$16 sps:$4 sm:$0xff]   ;;  %v2872_v62 = vld [vmem:[%s4095_s1 + $0x520] ss:$16 sps:$4 sm:$0xff]  }
  0x6f   :  { %1697 = vmatpush1.bf16.msra.mxu0 %v2788_v63  ;;  %1861 = vmatpush1.bf16.msra.mxu1 %v2791_v0  ;;  %v2875_v63 = vld [vmem:[%s4095_s1 + $0x528] ss:$16 sps:$4 sm:$0xff]   ;;  %v2880_v0 = vld [vmem:[%s4095_s1 + $0x544] ss:$16 sps:$4 sm:$0xff]  }
  0x70   :  { %1698 = vmatprep.subr.bf16.mxu0 %v2796_v1  ;;  %1862 = vmatprep.subr.bf16.mxu1 %v2799_v2  ;;  %v2883_v1 = vld [vmem:[%s4095_s1 + $0x54c] ss:$16 sps:$4 sm:$0xff]   ;;  %v2878_v2 = vld [vmem:[%s4095_s1 + $0x540] ss:$16 sps:$4 sm:$0xff]  }
  0x73   :  { %1699 = vmatpush1.bf16.msra.mxu0 %v2794_v3  ;;  %1863 = vmatpush1.bf16.msra.mxu1 %v2797_v4  ;;  %v2881_v3 = vld [vmem:[%s4095_s1 + $0x548] ss:$16 sps:$4 sm:$0xff]   ;;  %v2886_v4 = vld [vmem:[%s4095_s1 + $0x564] ss:$16 sps:$4 sm:$0xff]  }
  0x74   :  { %1700 = vmatprep.subr.bf16.mxu0 %v2802_v5  ;;  %1864 = vmatprep.subr.bf16.mxu1 %v2805_v6  ;;  %v2889_v5 = vld [vmem:[%s4095_s1 + $0x56c] ss:$16 sps:$4 sm:$0xff]   ;;  %v2884_v6 = vld [vmem:[%s4095_s1 + $0x560] ss:$16 sps:$4 sm:$0xff]  }
  0x77   :  { %1701 = vmatpush1.bf16.msra.mxu0 %v2800_v7  ;;  %1865 = vmatpush1.bf16.msra.mxu1 %v2803_v8  ;;  %v2887_v7 = vld [vmem:[%s4095_s1 + $0x568] ss:$16 sps:$4 sm:$0xff]   ;;  %v2892_v8 = vld [vmem:[%s4095_s1 + $0x584] ss:$16 sps:$4 sm:$0xff]  }
  0x78   :  { %1702 = vmatprep.subr.bf16.mxu0 %v2808_v10  ;;  %1866 = vmatprep.subr.bf16.mxu1 %v2811_v11  ;;  %v2895_v10 = vld [vmem:[%s4095_s1 + $0x58c] ss:$16 sps:$4 sm:$0xff]   ;;  %v2890_v11 = vld [vmem:[%s4095_s1 + $0x580] ss:$16 sps:$4 sm:$0xff]  }
  0x7b   :  { %1703 = vmatpush1.bf16.msra.mxu0 %v2806_v12  ;;  %1867 = vmatpush1.bf16.msra.mxu1 %v2809_v13  ;;  %v2893_v12 = vld [vmem:[%s4095_s1 + $0x588] ss:$16 sps:$4 sm:$0xff]   ;;  %v2898_v13 = vld [vmem:[%s4095_s1 + $0x5a4] ss:$16 sps:$4 sm:$0xff]  }
  0x7c   :  { %1704 = vmatprep.subr.bf16.mxu0 %v2814_v14  ;;  %1868 = vmatprep.subr.bf16.mxu1 %v2817_v15  ;;  %v2901_v14 = vld [vmem:[%s4095_s1 + $0x5ac] ss:$16 sps:$4 sm:$0xff]   ;;  %v2896_v15 = vld [vmem:[%s4095_s1 + $0x5a0] ss:$16 sps:$4 sm:$0xff]  }
  0x7f   :  { %1705 = vmatpush1.bf16.msra.mxu0 %v2812_v16  ;;  %1869 = vmatpush1.bf16.msra.mxu1 %v2815_v17  ;;  %v2899_v16 = vld [vmem:[%s4095_s1 + $0x5a8] ss:$16 sps:$4 sm:$0xff]   ;;  %v2904_v17 = vld [vmem:[%s4095_s1 + $0x5c4] ss:$16 sps:$4 sm:$0xff]  }
  0x80   :  { %1715 = vmatprep.subr.bf16.mxu0 %v2820_v18  ;;  %1879 = vmatprep.subr.bf16.mxu1 %v2823_v19  ;;  %v2907_v18 = vld [vmem:[%s4095_s1 + $0x5cc] ss:$16 sps:$4 sm:$0xff]   ;;  %v42_v19 = vcombine.high %v3486_v23, %v3486_v23 }
  0x81   :  { %v2913_v23 = vld [vmem:[%s4095_s1 + $0x5ec] ss:$16 sps:$4 sm:$0xff]  }
  0x82   :  { %1707 = vmatmul.mubr.bf16.vlgmr.msra.gmra.mrb[0].mxu0 %v69_v21  ;;  %1871 = vmatmul.mubr.bf16.vlgmr.msra.gmra.mrb[0].mxu1 %v69_v21  ;;  %v2905_v21 = vld [vmem:[%s4095_s1 + $0x5c8] ss:$16 sps:$4 sm:$0xff]  }
  0x83   :  { %1716 = vmatpush1.bf16.msra.mxu0 %v2818_v20  ;;  %1880 = vmatpush1.bf16.msra.mxu1 %v2821_v22  ;;  %v2902_v20 = vld [vmem:[%s4095_s1 + $0x5c0] ss:$16 sps:$4 sm:$0xff]   ;;  %v2910_v22 = vld [vmem:[%s4095_s1 + $0x5e4] ss:$16 sps:$4 sm:$0xff]  }
  0x84   :  { %1717 = vmatprep.subr.bf16.mxu0 %v2826_v24  ;;  %1881 = vmatprep.subr.bf16.mxu1 %v2829_v9  ;;  %v3671_v24 = vrot.slane %v42_v19, %v3206_v49  ;;  %v2908_v9 = vld [vmem:[%s4095_s1 + $0x5e0] ss:$16 sps:$4 sm:$0xff]   ;;  %v2919_v49 = vld [vmem:[%s4095_s1 + $0x60c] ss:$16 sps:$4 sm:$0xff]  }
  0x85   :  { %1747 = vmatprep.mubr.bf16.mxu0 %v72_v31  ;;  %1911 = vmatprep.mubr.bf16.mxu1 %v72_v31 }
  0x87   :  { %1718 = vmatpush1.bf16.msra.mxu0 %v2824_v27  ;;  %1882 = vmatpush1.bf16.msra.mxu1 %v2827_v28  ;;  %v2916_v27 = vld [vmem:[%s4095_s1 + $0x604] ss:$16 sps:$4 sm:$0xff]  }
  0x88   :  { %1719 = vmatprep.subr.bf16.mxu0 %v2832_v29  ;;  %1883 = vmatprep.subr.bf16.mxu1 %v2835_v30 }
  0x8b   :  { %1720 = vmatpush1.bf16.msra.mxu0 %v2830_v32  ;;  %1884 = vmatpush1.bf16.msra.mxu1 %v2833_v33 }
  0x8c   :  { %1721 = vmatprep.subr.bf16.mxu0 %v2838_v34  ;;  %1885 = vmatprep.subr.bf16.mxu1 %v2841_v35 }
  0x8f   :  { %1722 = vmatpush1.bf16.msra.mxu0 %v2836_v36  ;;  %1886 = vmatpush1.bf16.msra.mxu1 %v2839_v37 }
  0x90   :  { %1723 = vmatprep.subr.bf16.mxu0 %v2844_v38  ;;  %1887 = vmatprep.subr.bf16.mxu1 %v2847_v39 }
  0x93   :  { %1724 = vmatpush1.bf16.msra.mxu0 %v2842_v40  ;;  %1888 = vmatpush1.bf16.msra.mxu1 %v2845_v41 }
  0x94   :  { %1725 = vmatprep.subr.bf16.mxu0 %v2850_v42  ;;  %1889 = vmatprep.subr.bf16.mxu1 %v2853_v44 }
  0x97   :  { %1726 = vmatpush1.bf16.msra.mxu0 %v2848_v45  ;;  %1890 = vmatpush1.bf16.msra.mxu1 %v2851_v46 }
  0x98   :  { %1727 = vmatprep.subr.bf16.mxu0 %v2856_v47  ;;  %1891 = vmatprep.subr.bf16.mxu1 %v2859_v48 }
  0x9b   :  { %1728 = vmatpush1.bf16.msra.mxu0 %v2854_v50  ;;  %1892 = vmatpush1.bf16.msra.mxu1 %v2857_v51 }
  0x9c   :  { %1729 = vmatprep.subr.bf16.mxu0 %v2862_v52  ;;  %1893 = vmatprep.subr.bf16.mxu1 %v2865_v53 }
  0x9f   :  { %1730 = vmatpush1.bf16.msra.mxu0 %v2860_v54  ;;  %1894 = vmatpush1.bf16.msra.mxu1 %v2863_v55 }
  0xa0   :  { %1731 = vmatprep.subr.bf16.mxu0 %v2868_v56  ;;  %1895 = vmatprep.subr.bf16.mxu1 %v2871_v57 }
  0xa3   :  { %1732 = vmatpush1.bf16.msra.mxu0 %v2866_v58  ;;  %1896 = vmatpush1.bf16.msra.mxu1 %v2869_v59 }
  0xa4   :  { %1733 = vmatprep.subr.bf16.mxu0 %v2874_v60  ;;  %1897 = vmatprep.subr.bf16.mxu1 %v2877_v61 }
  0xa7   :  { %1734 = vmatpush1.bf16.msra.mxu0 %v2872_v62  ;;  %1898 = vmatpush1.bf16.msra.mxu1 %v2875_v63 }
  0xa8   :  { %1735 = vmatprep.subr.bf16.mxu0 %v2880_v0  ;;  %1899 = vmatprep.subr.bf16.mxu1 %v2883_v1 }
  0xab   :  { %1736 = vmatpush1.bf16.msra.mxu0 %v2878_v2  ;;  %1900 = vmatpush1.bf16.msra.mxu1 %v2881_v3 }
  0xac   :  { %1737 = vmatprep.subr.bf16.mxu0 %v2886_v4  ;;  %1901 = vmatprep.subr.bf16.mxu1 %v2889_v5 }
  0xaf   :  { %1738 = vmatpush1.bf16.msra.mxu0 %v2884_v6  ;;  %1902 = vmatpush1.bf16.msra.mxu1 %v2887_v7 }
  0xb0   :  { %1739 = vmatprep.subr.bf16.mxu0 %v2892_v8  ;;  %1903 = vmatprep.subr.bf16.mxu1 %v2895_v10 }
  0xb3   :  { %1740 = vmatpush1.bf16.msra.mxu0 %v2890_v11  ;;  %1904 = vmatpush1.bf16.msra.mxu1 %v2893_v12 }
  0xb4   :  { %1741 = vmatprep.subr.bf16.mxu0 %v2898_v13  ;;  %1905 = vmatprep.subr.bf16.mxu1 %v2901_v14 }
  0xb7   :  { %1742 = vmatpush1.bf16.msra.mxu0 %v2896_v15  ;;  %1906 = vmatpush1.bf16.msra.mxu1 %v2899_v16 }
  0xb8   :  { %1743 = vmatprep.subr.bf16.mxu0 %v2904_v17  ;;  %1907 = vmatprep.subr.bf16.mxu1 %v2907_v18 }
  0xbb   :  { %1744 = vmatpush1.bf16.msra.mxu0 %v2902_v20  ;;  %1908 = vmatpush1.bf16.msra.mxu1 %v2905_v21 }
  0xbc   :  { %1745 = vmatprep.subr.bf16.mxu0 %v2910_v22  ;;  %1909 = vmatprep.subr.bf16.mxu1 %v2913_v23 }
  0xbd   :  { %10 = vsyncpa [#allocation3], 0  ;;  %v58_v28 = vcombine.high %v3671_v24, %v3671_v24  ;;  %v71_v29 = vpack.c.bf16 %v3496_v25, %v3496_v25  ;;  %v2914_v30 = vld [vmem:[%s4095_s1 + $0x600] ss:$16 sps:$4 sm:$0xff]   ;;  %v2917_v31 = vld [vmem:[%s4095_s1 + $0x608] ss:$16 sps:$4 sm:$0xff]  }
  0xbe   :  { %v2922_v32 = vld [vmem:[%s4095_s1 + $0x624] ss:$16 sps:$4 sm:$0xff]   ;;  %v2925_v25 = vld [vmem:[%s4095_s1 + $0x62c] ss:$16 sps:$4 sm:$0xff]   ;;  %v2920_v34 = vld [vmem:[%s4095_s1 + $0x620] ss:$16 sps:$4 sm:$0xff]  }
  0xbf   :  { %1746 = vmatpush1.bf16.msra.mxu0 %v2908_v9  ;;  %1910 = vmatpush1.bf16.msra.mxu1 %v2911_v26  ;;  %v74_v33 = vpack.c.bf16 %v58_v28, %v58_v28  ;;  %v2923_v35 = vld [vmem:[%s4095_s1 + $0x628] ss:$16 sps:$4 sm:$0xff]   ;;  %v2928_v36 = vld [vmem:[%s4095_s1 + $0x644] ss:$16 sps:$4 sm:$0xff]   ;;  %v2931_v37 = vld [vmem:[%s4095_s1 + $0x64c] ss:$16 sps:$4 sm:$0xff]  }
  0xc0   :  { %1756 = vmatprep.subr.bf16.mxu0 %v2916_v27  ;;  %1920 = vmatprep.subr.bf16.mxu1 %v2919_v49  ;;  %v2926_v38 = vld [vmem:[%s4095_s1 + $0x640] ss:$16 sps:$4 sm:$0xff]   ;;  %v2929_v39 = vld [vmem:[%s4095_s1 + $0x648] ss:$16 sps:$4 sm:$0xff]   ;;  %v2934_v40 = vld [vmem:[%s4095_s1 + $0x664] ss:$16 sps:$4 sm:$0xff]  }
  0xc1   :  { %v2937_v41 = vld [vmem:[%s4095_s1 + $0x66c] ss:$16 sps:$4 sm:$0xff]   ;;  %v2932_v42 = vld [vmem:[%s4095_s1 + $0x660] ss:$16 sps:$4 sm:$0xff]   ;;  %v2935_v44 = vld [vmem:[%s4095_s1 + $0x668] ss:$16 sps:$4 sm:$0xff]  }
  0xc2   :  { %1748 = vmatmul.mubr.bf16.vlgmr.msra.gmra.mrb[0].mxu0 %v71_v29  ;;  %1912 = vmatmul.mubr.bf16.vlgmr.msra.gmra.mrb[0].mxu1 %v71_v29  ;;  %v2940_v45 = vld [vmem:[%s4095_s1 + $0x684] ss:$16 sps:$4 sm:$0xff]   ;;  %v2943_v46 = vld [vmem:[%s4095_s1 + $0x68c] ss:$16 sps:$4 sm:$0xff]   ;;  %v2938_v47 = vld [vmem:[%s4095_s1 + $0x680] ss:$16 sps:$4 sm:$0xff]  }
  0xc3   :  { %1757 = vmatpush1.bf16.msra.mxu0 %v2914_v30  ;;  %1921 = vmatpush1.bf16.msra.mxu1 %v2917_v31  ;;  %v2941_v48 = vld [vmem:[%s4095_s1 + $0x688] ss:$16 sps:$4 sm:$0xff]   ;;  %v2946_v50 = vld [vmem:[%s4095_s1 + $0x6a4] ss:$16 sps:$4 sm:$0xff]   ;;  %v2949_v51 = vld [vmem:[%s4095_s1 + $0x6ac] ss:$16 sps:$4 sm:$0xff]  }
  0xc4   :  { %1758 = vmatprep.subr.bf16.mxu0 %v2922_v32  ;;  %1922 = vmatprep.subr.bf16.mxu1 %v2925_v25  ;;  %v2944_v52 = vld [vmem:[%s4095_s1 + $0x6a0] ss:$16 sps:$4 sm:$0xff]   ;;  %v2947_v53 = vld [vmem:[%s4095_s1 + $0x6a8] ss:$16 sps:$4 sm:$0xff]   ;;  %v2952_v54 = vld [vmem:[%s4095_s1 + $0x6c4] ss:$16 sps:$4 sm:$0xff]  }
  0xc5   :  { %1788 = vmatprep.mubr.bf16.mxu0 %v74_v33  ;;  %1952 = vmatprep.mubr.bf16.mxu1 %v74_v33  ;;  %v2955_v55 = vld [vmem:[%s4095_s1 + $0x6cc] ss:$16 sps:$4 sm:$0xff]   ;;  %v2950_v56 = vld [vmem:[%s4095_s1 + $0x6c0] ss:$16 sps:$4 sm:$0xff]   ;;  %v2953_v57 = vld [vmem:[%s4095_s1 + $0x6c8] ss:$16 sps:$4 sm:$0xff]  }
  0xc6   :  { %v2958_v58 = vld [vmem:[%s4095_s1 + $0x6e4] ss:$16 sps:$4 sm:$0xff]   ;;  %v2961_v59 = vld [vmem:[%s4095_s1 + $0x6ec] ss:$16 sps:$4 sm:$0xff]   ;;  %v2956_v60 = vld [vmem:[%s4095_s1 + $0x6e0] ss:$16 sps:$4 sm:$0xff]  }
  0xc7   :  { %1759 = vmatpush1.bf16.msra.mxu0 %v2920_v34  ;;  %1923 = vmatpush1.bf16.msra.mxu1 %v2923_v35  ;;  %v2959_v61 = vld [vmem:[%s4095_s1 + $0x6e8] ss:$16 sps:$4 sm:$0xff]   ;;  %v2964_v62 = vld [vmem:[%s4095_s1 + $0x704] ss:$16 sps:$4 sm:$0xff]   ;;  %v2967_v63 = vld [vmem:[%s4095_s1 + $0x70c] ss:$16 sps:$4 sm:$0xff]  }
  0xc8   :  { %1760 = vmatprep.subr.bf16.mxu0 %v2928_v36  ;;  %1924 = vmatprep.subr.bf16.mxu1 %v2931_v37  ;;  %v2962_v0 = vld [vmem:[%s4095_s1 + $0x700] ss:$16 sps:$4 sm:$0xff]   ;;  %v2965_v1 = vld [vmem:[%s4095_s1 + $0x708] ss:$16 sps:$4 sm:$0xff]   ;;  %v2970_v2 = vld [vmem:[%s4095_s1 + $0x724] ss:$16 sps:$4 sm:$0xff]  }
  0xc9   :  { %v2973_v3 = vld [vmem:[%s4095_s1 + $0x72c] ss:$16 sps:$4 sm:$0xff]   ;;  %v2968_v4 = vld [vmem:[%s4095_s1 + $0x720] ss:$16 sps:$4 sm:$0xff]   ;;  %v2971_v5 = vld [vmem:[%s4095_s1 + $0x728] ss:$16 sps:$4 sm:$0xff]  }
  0xca   :  { %v2976_v6 = vld [vmem:[%s4095_s1 + $0x744] ss:$16 sps:$4 sm:$0xff]   ;;  %v2979_v7 = vld [vmem:[%s4095_s1 + $0x74c] ss:$16 sps:$4 sm:$0xff]   ;;  %v2974_v8 = vld [vmem:[%s4095_s1 + $0x740] ss:$16 sps:$4 sm:$0xff]  }
  0xcb   :  { %1761 = vmatpush1.bf16.msra.mxu0 %v2926_v38  ;;  %1925 = vmatpush1.bf16.msra.mxu1 %v2929_v39  ;;  %v2977_v10 = vld [vmem:[%s4095_s1 + $0x748] ss:$16 sps:$4 sm:$0xff]   ;;  %v2982_v11 = vld [vmem:[%s4095_s1 + $0x764] ss:$16 sps:$4 sm:$0xff]   ;;  %v2985_v12 = vld [vmem:[%s4095_s1 + $0x76c] ss:$16 sps:$4 sm:$0xff]  }
  0xcc   :  { %1762 = vmatprep.subr.bf16.mxu0 %v2934_v40  ;;  %1926 = vmatprep.subr.bf16.mxu1 %v2937_v41  ;;  %v2980_v13 = vld [vmem:[%s4095_s1 + $0x760] ss:$16 sps:$4 sm:$0xff]   ;;  %v2983_v14 = vld [vmem:[%s4095_s1 + $0x768] ss:$16 sps:$4 sm:$0xff]   ;;  %v2988_v15 = vld [vmem:[%s4095_s1 + $0x784] ss:$16 sps:$4 sm:$0xff]  }
  0xcd   :  { %v2991_v16 = vld [vmem:[%s4095_s1 + $0x78c] ss:$16 sps:$4 sm:$0xff]   ;;  %v2986_v17 = vld [vmem:[%s4095_s1 + $0x780] ss:$16 sps:$4 sm:$0xff]   ;;  %v2989_v18 = vld [vmem:[%s4095_s1 + $0x788] ss:$16 sps:$4 sm:$0xff]  }
  0xce   :  { %v2994_v19 = vld [vmem:[%s4095_s1 + $0x7a4] ss:$16 sps:$4 sm:$0xff]   ;;  %v2997_v20 = vld [vmem:[%s4095_s1 + $0x7ac] ss:$16 sps:$4 sm:$0xff]   ;;  %v2992_v21 = vld [vmem:[%s4095_s1 + $0x7a0] ss:$16 sps:$4 sm:$0xff]  }
  0xcf   :  { %1763 = vmatpush1.bf16.msra.mxu0 %v2932_v42  ;;  %1927 = vmatpush1.bf16.msra.mxu1 %v2935_v44  ;;  %v2995_v22 = vld [vmem:[%s4095_s1 + $0x7a8] ss:$16 sps:$4 sm:$0xff]   ;;  %v3000_v23 = vld [vmem:[%s4095_s1 + $0x7c4] ss:$16 sps:$4 sm:$0xff]   ;;  %v3003_v9 = vld [vmem:[%s4095_s1 + $0x7cc] ss:$16 sps:$4 sm:$0xff]  }
  0xd0   :  { %1764 = vmatprep.subr.bf16.mxu0 %v2940_v45  ;;  %1928 = vmatprep.subr.bf16.mxu1 %v2943_v46  ;;  %v2998_v26 = vld [vmem:[%s4095_s1 + $0x7c0] ss:$16 sps:$4 sm:$0xff]   ;;  %v3001_v27 = vld [vmem:[%s4095_s1 + $0x7c8] ss:$16 sps:$4 sm:$0xff]   ;;  %v3006_v49 = vld [vmem:[%s4095_s1 + $0x7e4] ss:$16 sps:$4 sm:$0xff]   ;;  %v73_v45 = vpack.c.bf16 %v3671_v24, %v3671_v24 }
  0xd1   :  { %v3009_v28 = vld [vmem:[%s4095_s1 + $0x7ec] ss:$16 sps:$4 sm:$0xff]   ;;  %v1981_v29 = vld [vmem:[%s4097_s3 + $0x80] sm:$0xff]  ;;  %v3007_v33 = vld [vmem:[%s4095_s1 + $0x7e8] ss:$16 sps:$4 sm:$0xff]   ;;  %vm2176_vm0 = vcmask 66560  }
  0xd2   :  { %v1982_v30 = vld [vmem:[%s4097_s3 + $0x88] sm:$0xff]  ;;  %v2013_v31 = vld [vmem:[%s4097_s3 + $0x180] sm:$0xff]  ;;  %v1983_v40 = vld [vmem:[%s4097_s3 + $0x90] sm:$0xff] }
  0xd3   :  { %1765 = vmatpush1.bf16.msra.mxu0 %v2938_v47  ;;  %1929 = vmatpush1.bf16.msra.mxu1 %v2941_v48  ;;  %v2014_v32 = vld [vmem:[%s4097_s3 + $0x188] sm:$0xff]  ;;  %v3004_v25 = vld [vmem:[%s4095_s1 + $0x7e0] ss:$16 sps:$4 sm:$0xff]   ;;  %v2531_v36 = vpack.c.bf16 %v1982_v30, %v1981_v29  ;;  %v1984_v41 = vld [vmem:[%s4097_s3 + $0x98] sm:$0xff] }
  0xd4   :  { %1766 = vmatprep.subr.bf16.mxu0 %v2946_v50  ;;  %1930 = vmatprep.subr.bf16.mxu1 %v2949_v51  ;;  %v1965_v34 = vld [vmem:[%s4097_s3] sm:$0xff]  ;;  %v1966_v35 = vld [vmem:[%s4097_s3 + $0x8] sm:$0xff]  ;;  %v2563_v37 = vpack.c.bf16 %v2014_v32, %v2013_v31  ;;  %v2015_v42 = vld [vmem:[%s4097_s3 + $0x190] sm:$0xff]  ;;  %v2535_v51 = vpack.c.bf16 %v1984_v41, %v1983_v40 }
  0xd5   :  { %v1997_v38 = vld [vmem:[%s4097_s3 + $0x100] sm:$0xff]  ;;  %v1998_v39 = vld [vmem:[%s4097_s3 + $0x108] sm:$0xff]  ;;  %v2016_v44 = vld [vmem:[%s4097_s3 + $0x198] sm:$0xff]  ;;  %v2533_v46 = vpack.c.bf16 %v1966_v35, %v1965_v34 }
  0xd6   :  { %v2565_v47 = vpack.c.bf16 %v1998_v39, %v1997_v38  ;;  %v1967_v48 = vld [vmem:[%s4097_s3 + $0x10] sm:$0xff]  ;;  %v1968_v50 = vld [vmem:[%s4097_s3 + $0x18] sm:$0xff]  ;;  %v1993_v38 = vld [vmem:[%s4097_s3 + $0xe0] sm:$0xff] }
  0xd7   :  { %1767 = vmatpush1.bf16.msra.mxu0 %v2944_v52  ;;  %1931 = vmatpush1.bf16.msra.mxu1 %v2947_v53  ;;  %v2567_v52 = vpack.c.bf16 %v2016_v44, %v2015_v42  ;;  %v1999_v24 = vld [vmem:[%s4097_s3 + $0x110] sm:$0xff]  ;;  %v2000_v53 = vld [vmem:[%s4097_s3 + $0x118] sm:$0xff]  ;;  %v1994_v39 = vld [vmem:[%s4097_s3 + $0xe8] sm:$0xff] }
  0xd8   :  { %1768 = vmatprep.subr.bf16.mxu0 %v2952_v54  ;;  %1932 = vmatprep.subr.bf16.mxu1 %v2955_v55  ;;  %v1985_v54 = vld [vmem:[%s4097_s3 + $0xa0] sm:$0xff]  ;;  %v1986_v55 = vld [vmem:[%s4097_s3 + $0xa8] sm:$0xff]  ;;  %v2023_v29 = vld [vmem:[%s4097_s3 + $0x1d0] sm:$0xff] }
  0xd9   :  { %v2024_v30 = vld [vmem:[%s4097_s3 + $0x1d8] sm:$0xff]  ;;  %v2025_v40 = vld [vmem:[%s4097_s3 + $0x1e0] sm:$0xff]  ;;  %v2026_v41 = vld [vmem:[%s4097_s3 + $0x1e8] sm:$0xff] }
  0xda   :  { %v2583_v35 = vpack.c.bf16 %v2024_v30, %v2023_v29 }
  0xdb   :  { %1769 = vmatpush1.bf16.msra.mxu0 %v2950_v56  ;;  %1933 = vmatpush1.bf16.msra.mxu1 %v2953_v57  ;;  %v2017_v56 = vld [vmem:[%s4097_s3 + $0x1a0] sm:$0xff]  ;;  %v2018_v57 = vld [vmem:[%s4097_s3 + $0x1a8] sm:$0xff] }
  0xdc   :  { %1770 = vmatprep.subr.bf16.mxu0 %v2958_v58  ;;  %1934 = vmatprep.subr.bf16.mxu1 %v2961_v59  ;;  %v2537_v58 = vpack.c.bf16 %v1968_v50, %v1967_v48  ;;  %v2569_v59 = vpack.c.bf16 %v2000_v53, %v1999_v24  ;;  %v1978_v48 = vld [vmem:[%s4097_s3 + $0x68] sm:$0xff]  ;;  %v2009_v50 = vld [vmem:[%s4097_s3 + $0x160] sm:$0xff]  ;;  %v1995_v53 = vld [vmem:[%s4097_s3 + $0xf0] sm:$0xff] }
  0xdf   :  { %1771 = vmatpush1.bf16.msra.mxu0 %v2956_v60  ;;  %1935 = vmatpush1.bf16.msra.mxu1 %v2959_v61  ;;  %v1969_v60 = vld [vmem:[%s4097_s3 + $0x20] sm:$0xff]  ;;  %v1970_v61 = vld [vmem:[%s4097_s3 + $0x28] sm:$0xff] }
  0xe0   :  { %1772 = vmatprep.subr.bf16.mxu0 %v2964_v62  ;;  %1936 = vmatprep.subr.bf16.mxu1 %v2967_v63  ;;  %v2539_v62 = vpack.c.bf16 %v1986_v55, %v1985_v54  ;;  %v2571_v63 = vpack.c.bf16 %v2018_v57, %v2017_v56  ;;  %v1996_v54 = vld [vmem:[%s4097_s3 + $0xf8] sm:$0xff]  ;;  %v2027_v55 = vld [vmem:[%s4097_s3 + $0x1f0] sm:$0xff] }
  0xe1   :  { %v2559_v56 = vpack.c.bf16 %v1996_v54, %v1995_v53  ;;  %v2028_v57 = vld [vmem:[%s4097_s3 + $0x1f8] sm:$0xff] }
  0xe3   :  { %1773 = vmatpush1.bf16.msra.mxu0 %v2962_v0  ;;  %1937 = vmatpush1.bf16.msra.mxu1 %v2965_v1  ;;  %v2001_v0 = vld [vmem:[%s4097_s3 + $0x120] sm:$0xff]  ;;  %v2002_v1 = vld [vmem:[%s4097_s3 + $0x128] sm:$0xff] }
  0xe4   :  { %1774 = vmatprep.subr.bf16.mxu0 %v2970_v2  ;;  %1938 = vmatprep.subr.bf16.mxu1 %v2973_v3  ;;  %v1987_v2 = vld [vmem:[%s4097_s3 + $0xb0] sm:$0xff]  ;;  %v1988_v3 = vld [vmem:[%s4097_s3 + $0xb8] sm:$0xff] }
  0xe7   :  { %1775 = vmatpush1.bf16.msra.mxu0 %v2968_v4  ;;  %1939 = vmatpush1.bf16.msra.mxu1 %v2971_v5  ;;  %v2019_v4 = vld [vmem:[%s4097_s3 + $0x1b0] sm:$0xff]  ;;  %v2020_v5 = vld [vmem:[%s4097_s3 + $0x1b8] sm:$0xff] }
  0xe8   :  { %1776 = vmatprep.subr.bf16.mxu0 %v2976_v6  ;;  %1940 = vmatprep.subr.bf16.mxu1 %v2979_v7  ;;  %v2541_v6 = vpack.c.bf16 %v1970_v61, %v1969_v60  ;;  %v2573_v7 = vpack.c.bf16 %v2002_v1, %v2001_v0  ;;  %v2591_v60 = vpack.c.bf16 %v2028_v57, %v2027_v55  ;;  %v335_v1 = vsub.s32 0, %v3188_v43 }
  0xeb   :  { %1777 = vmatpush1.bf16.msra.mxu0 %v2974_v8  ;;  %1941 = vmatpush1.bf16.msra.mxu1 %v2977_v10  ;;  %v1971_v8 = vld [vmem:[%s4097_s3 + $0x30] sm:$0xff]  ;;  %v1972_v10 = vld [vmem:[%s4097_s3 + $0x38] sm:$0xff] }
  0xec   :  { %1778 = vmatprep.subr.bf16.mxu0 %v2982_v11  ;;  %1942 = vmatprep.subr.bf16.mxu1 %v2985_v12  ;;  %v2543_v11 = vpack.c.bf16 %v1988_v3, %v1987_v2  ;;  %v2575_v12 = vpack.c.bf16 %v2020_v5, %v2019_v4  ;;  %v343_v2 = vsub.s32 2, %v3188_v43  ;;  %v331_v3 = vld [vmem:[%s4096_s2] sm:$0xf]  ;;  %v339_v4 = vsub.s32 1, %v3188_v43 }
  0xed   :  { %v347_v5 = vsub.s32 3, %v3188_v43 }
  0xef   :  { %1779 = vmatpush1.bf16.msra.mxu0 %v2980_v13  ;;  %1943 = vmatpush1.bf16.msra.mxu1 %v2983_v14  ;;  %v2003_v13 = vld [vmem:[%s4097_s3 + $0x130] sm:$0xff]  ;;  %v2004_v14 = vld [vmem:[%s4097_s3 + $0x138] sm:$0xff] }
  0xf0   :  { %1780 = vmatprep.subr.bf16.mxu0 %v2988_v15  ;;  %1944 = vmatprep.subr.bf16.mxu1 %v2991_v16  ;;  %v1989_v15 = vld [vmem:[%s4097_s3 + $0xc0] sm:$0xff]  ;;  %v1990_v16 = vld [vmem:[%s4097_s3 + $0xc8] sm:$0xff] }
  0xf3   :  { %1781 = vmatpush1.bf16.msra.mxu0 %v2986_v17  ;;  %1945 = vmatpush1.bf16.msra.mxu1 %v2989_v18  ;;  %v2021_v17 = vld [vmem:[%s4097_s3 + $0x1c0] sm:$0xff]  ;;  %v2022_v18 = vld [vmem:[%s4097_s3 + $0x1c8] sm:$0xff] }
  0xf4   :  { %1782 = vmatprep.subr.bf16.mxu0 %v2994_v19  ;;  %1946 = vmatprep.subr.bf16.mxu1 %v2997_v20  ;;  %v2545_v19 = vpack.c.bf16 %v1972_v10, %v1971_v8  ;;  %v2577_v20 = vpack.c.bf16 %v2004_v14, %v2003_v13  ;;  %v340_v8 = vrot.slane %v331_v3, %v339_v4 }
  0xf5   :  { %v348_v10 = vrot.slane %v331_v3, %v347_v5 }
  0xf7   :  { %1783 = vmatpush1.bf16.msra.mxu0 %v2992_v21  ;;  %1947 = vmatpush1.bf16.msra.mxu1 %v2995_v22  ;;  %v1973_v21 = vld [vmem:[%s4097_s3 + $0x40] sm:$0xff]  ;;  %v1974_v22 = vld [vmem:[%s4097_s3 + $0x48] sm:$0xff] }
  0xf8   :  { %1784 = vmatprep.subr.bf16.mxu0 %v3000_v23  ;;  %1948 = vmatprep.subr.bf16.mxu1 %v3003_v9  ;;  %v2547_v23 = vpack.c.bf16 %v1990_v16, %v1989_v15  ;;  %v2579_v9 = vpack.c.bf16 %v2022_v18, %v2021_v17  ;;  %v2549_v31 = vpack.c.bf16 %v1974_v22, %v1973_v21 }
  0xfb   :  { %1785 = vmatpush1.bf16.msra.mxu0 %v2998_v26  ;;  %1949 = vmatpush1.bf16.msra.mxu1 %v3001_v27  ;;  %v2005_v26 = vld [vmem:[%s4097_s3 + $0x140] sm:$0xff]  ;;  %v2006_v27 = vld [vmem:[%s4097_s3 + $0x148] sm:$0xff] }
  0xfc   :  { %1786 = vmatprep.subr.bf16.mxu0 %v3006_v49  ;;  %1950 = vmatprep.subr.bf16.mxu1 %v3009_v28  ;;  %v1991_v49 = vld [vmem:[%s4097_s3 + $0xd0] sm:$0xff]  ;;  %v1992_v28 = vld [vmem:[%s4097_s3 + $0xd8] sm:$0xff]  ;;  %v2581_v32 = vpack.c.bf16 %v2006_v27, %v2005_v26 }
  0xfd   :  { %v2551_v34 = vpack.c.bf16 %v1992_v28, %v1991_v49  ;;  %v2460_v28 = vld [vmem:[%s4098_s4] ss:$0 sm:$0xff]  ;;  %s3040_s4 = smov [#allocation2]  }
  0xfe   :  { %s2196_s19 = sshll.u32 %s3040_s4, 4  ;;  %s2197_s19 = int_to_ptr.vmem [resolvable:$true] %s2196_s19 }
  0xff   :  { %1787 = vmatpush1.bf16.msra.mxu0 %v3004_v25  ;;  %1951 = vmatpush1.bf16.msra.mxu1 %v3007_v33  ;;  %v1975_v25 = vld [vmem:[%s4097_s3 + $0x50] sm:$0xff]  ;;  %v1976_v33 = vld [vmem:[%s4097_s3 + $0x58] sm:$0xff]  ;;  %s3015_s20 = scalar_lea.vmem %s2197_s19, 32  ;;  %p3020_p1 = scmp.lt.s32.totalorder %s2197_s19, %s2197_s19 }
 0x100   :  { %2532 = vmatprep.subr.bf16.mxu0 %v2531_v36  ;;  %2564 = vmatprep.subr.bf16.mxu1 %v2563_v37  ;;  %v2007_v36 = vld [vmem:[%s4097_s3 + $0x150] sm:$0xff]  ;;  %v2008_v37 = vld [vmem:[%s4097_s3 + $0x158] sm:$0xff]  ;;  %v2553_v42 = vpack.c.bf16 %v1976_v33, %v1975_v25  ;;  %p3016_p0 = scmp.ne.s32.totalorder %s2197_s19, %s3015_s20  ;;  %p3021_p2 = scmp.lt.s32.totalorder %s3015_s20, %s3015_s20 }
 0x101   :  { %v2585_v44 = vpack.c.bf16 %v2008_v37, %v2007_v36 }
 0x102   :  { %1789 = vmatmul.mubr.bf16.vlgmr.msra.gmra.mrb[0].mxu0 %v73_v45  ;;  %1953 = vmatmul.mubr.bf16.vlgmr.msra.gmra.mrb[0].mxu1 %v73_v45  ;;  %v2555_v45 = vpack.c.bf16 %v1994_v39, %v1993_v38  ;;  %p3022_p3 = por %p3021_p2, %p3020_p1 }
 0x103   :  { %2534 = vmatpush3.bf16.msra.mxu0 %v2533_v46  ;;  %2566 = vmatpush3.bf16.msra.mxu1 %v2565_v47  ;;  %v2587_v46 = vpack.c.bf16 %v2026_v41, %v2025_v40  ;;  %v1977_v47 = vld [vmem:[%s4097_s3 + $0x60] sm:$0xff] }
 0x104   :  { %2536 = vmatprep.subr.bf16.mxu0 %v2535_v51  ;;  %2568 = vmatprep.subr.bf16.mxu1 %v2567_v52  ;;  %v2557_v51 = vpack.c.bf16 %v1978_v48, %v1977_v47  ;;  %v2010_v52 = vld [vmem:[%s4097_s3 + $0x168] sm:$0xff]  ;;  %p3023_p4 = pnand %p3022_p3, %p3016_p0 }
 0x105   :  { %v2589_v24 = vpack.c.bf16 %v2010_v52, %v2009_v50 }
 0x107   :  { %2538 = vmatpush3.bf16.msra.mxu0 %v2537_v58  ;;  %2570 = vmatpush3.bf16.msra.mxu1 %v2569_v59  ;;  %v1979_v58 = vld [vmem:[%s4097_s3 + $0x70] sm:$0xff]  ;;  %v1980_v59 = vld [vmem:[%s4097_s3 + $0x78] sm:$0xff] }
 0x108   :  { %2540 = vmatprep.subr.bf16.mxu0 %v2539_v62  ;;  %2572 = vmatprep.subr.bf16.mxu1 %v2571_v63  ;;  %v2561_v61 = vpack.c.bf16 %v1980_v59, %v1979_v58  ;;  %v2011_v62 = vld [vmem:[%s4097_s3 + $0x170] sm:$0xff]  ;;  %v2012_v63 = vld [vmem:[%s4097_s3 + $0x178] sm:$0xff] }
 0x109   :  { %v2593_v0 = vpack.c.bf16 %v2012_v63, %v2011_v62 }
 0x10b   :  { %2542 = vmatpush3.bf16.msra.mxu0 %v2541_v6  ;;  %2574 = vmatpush3.bf16.msra.mxu1 %v2573_v7  ;;  %v336_v6 = vrot.slane %v331_v3, %v335_v1  ;;  %v344_v7 = vrot.slane %v331_v3, %v343_v2 }
 0x10c   :  { %2544 = vmatprep.subr.bf16.mxu0 %v2543_v11  ;;  %2576 = vmatprep.subr.bf16.mxu1 %v2575_v12 }
 0x10f   :  { %2546 = vmatpush3.bf16.msra.mxu0 %v2545_v19  ;;  %2578 = vmatpush3.bf16.msra.mxu1 %v2577_v20 }
 0x110   :  { %2548 = vmatprep.subr.bf16.mxu0 %v2547_v23  ;;  %2580 = vmatprep.subr.bf16.mxu1 %v2579_v9 }
 0x113   :  { %2550 = vmatpush3.bf16.msra.mxu0 %v2549_v31  ;;  %2582 = vmatpush3.bf16.msra.mxu1 %v2581_v32 }
 0x114   :  { %2552 = vmatprep.subr.bf16.mxu0 %v2551_v34  ;;  %2584 = vmatprep.subr.bf16.mxu1 %v2583_v35 }
 0x117   :  { %2554 = vmatpush3.bf16.msra.mxu0 %v2553_v42  ;;  %2586 = vmatpush3.bf16.msra.mxu1 %v2585_v44 }
 0x118   :  { %2556 = vmatprep.subr.bf16.mxu0 %v2555_v45  ;;  %2588 = vmatprep.subr.bf16.mxu1 %v2587_v46 }
 0x11b   :  { %2558 = vmatpush3.bf16.msra.mxu0 %v2557_v51  ;;  %2590 = vmatpush3.bf16.msra.mxu1 %v2589_v24 }
 0x11c   :  { %2560 = vmatprep.subr.bf16.mxu0 %v2559_v56  ;;  %2592 = vmatprep.subr.bf16.mxu1 %v2591_v60 }
 0x11f   :  { %2562 = vmatpush3.bf16.msra.mxu0 %v2561_v61  ;;  %2594 = vmatpush3.bf16.msra.mxu1 %v2593_v0 }
 0x1d5   :  { %v1790_v11 = vpop.f32.mrb[0].mxu0  ;;  %v1954_v12 = vpop.f32.mrb[0].mxu1 }
 0x1d6   :  { %v2595_v13 = vadd.f32 %v1790_v11, %v336_v6  ;;  %v2597_v14 = vadd.f32 %v1954_v12, %v344_v7  ;;  %v1792_v15 = vpop.f32.mrb[1].mxu0  ;;  %v1956_v16 = vpop.f32.mrb[1].mxu1 }
 0x1d7   :  { %v2596_v17 = vadd.f32 %v1792_v15, %v340_v8  ;;  %v2598_v18 = vadd.f32 %v1956_v16, %v348_v10  ;;  %v1794_v19 = vpop.f32.mrb[2].mxu0  ;;  %v1958_v20 = vpop.f32.mrb[2].mxu1 }
 0x1d8   :  { %v1795_v21 = vpop.f32.mrb[3].mxu0  ;;  %v1959_v22 = vpop.f32.mrb[3].mxu1  ;;  %v1961_v26 = vmax.f32 %v2595_v13, 0.0  ;;  %v1963_v43 = vmax.f32 %v2597_v14, 0.0 }
 0x1d9   :  { %v1962_v23 = vmax.f32 %v2596_v17, 0.0  ;;  %v1964_v9 = vmax.f32 %v2598_v18, 0.0 }
 0x1db   :  { %2100 = vmatprep.mubr.f32.mxu0 %v1962_v23  ;;  %2170 = vmatprep.mubr.f32.mxu1 %v1964_v9 }
 0x1dc   :  { %2101 = vmatmul.mubr.f32.vlgmr.msra.gmra.mrb[4].mxu0 %v1961_v26  ;;  %2171 = vmatmul.mubr.f32.vlgmr.msra.gmra.mrb[4].mxu1 %v1963_v43 }
 0x2af   :  { %v2493_v27 = vpop.f32.mrb[4].mxu0  ;;  %v2528_v49 = vpop.f32.mrb[4].mxu1 }
 0x2b0   :  { %v2494_v29 = vpop.f32.mrb[5].mxu0  ;;  %v2529_v30 = vpop.f32.mrb[5].mxu1 }
 0x2b1   :  { %v2495_v31 = vadd.f32 %v2494_v29, %v2493_v27  ;;  %v2530_v32 = vadd.f32 %v2529_v30, %v2528_v49 }
 0x2b3   :  { %v2103_v25 = vadd.f32 %v2495_v31, %v2460_v28 }
 0x2b5   :  { %v2173_v33 = vadd.f32 %v2530_v32, %v2103_v25 }
 0x2b7   :  { %v2177_v34 = vsel %vm2176_vm0, %v2173_v33, -inf }
 0x2b8   :  { %2178 = vmax.xlane.f32.xlu0 %v2177_v34 }
 0x345   :  { %v2179_v35 = vpop.xlane.xlu0 %2178 }
 0x346   :  { %v2180_v36 = vsub.f32 %v2173_v33, %v2179_v35 }
 0x348   :  { %v2181_v37 = vmul.f32 1.442695, %v2180_v36 }
 0x34a   :  { %3011 = vpow2.f32 %v2181_v37 }
 0x354   :  { %v3012_v38 = vpop.eup %3011 }
 0x355   :  { %v2183_v39 = vsel %vm2176_vm0, %v3012_v38, 0.0 }
 0x356   :  { %2184 = vadd.xlane.f32.xlu0 %v2183_v39 }
 0x3e3   :  { %v2185_v40 = vpop.xlane.xlu0 %2184 }
 0x3e4   :  { %3013 = vlog2.f32 %v2185_v40 }
 0x3ee   :  { %v3014_v41 = vpop.eup %3013 }
 0x3ef   :  { %v2187_v42 = vmul.f32 0.6931472, %v3014_v41 }
 0x3f1   :  { %v2188_v44 = vsub.f32 %v2180_v36, %v2187_v42 }
 0x3f3   :  { %2189 = vst.msk [vmem:[#allocation2] sm:$0x3] %vm2176_vm0, %v2188_v44 }
 0x3f4   :  { %3026 = shalt.err (!%p3023_p4)
}
 0x3f5   :  { %s3027_s23 = scalar_lea.hbm %s4099_s5, 32 }
 0x3f6   :  { %p3028_p5 = scmp.ne.s32.totalorder %s4099_s5, %s3027_s23  ;;  %p3031_p6 = scmp.lt.u32.totalorder %s3027_s23, %s4099_s5 }
 0x3f8   :  { %p3033_p7 = pnand %p3031_p6, %p3028_p5 }
 0x3fa   :  { %3036 = shalt.err (!%p3033_p7)
}
 0x3fb   :  { %2199 = dma.vmem_to_hbm [thread:$0]  %s2197_s19, 32, %s4099_s5, [#allocation3]  }
 0x3fc   :  { %3037 = dma.done.wait [#allocation3], 32  }
 0x3fd   :  { %3038 = vsyncadd [#allocation3], 4294967264 }
 0x3fe   :  { %2203 = vsyncpa [#allocation3], 1 }

// kernel: forward.8
= control target key start
LH: loop header
LB: loop body
LE: loop exit
PB: predicated region body
PF: predicated region fallthrough
CT: control target
= control target key end

     0   :  { %8 = vsyncpa [#allocation3], 0  ;;  %s9500_s0 = inlined_call_operand.vmem [shape: bf16[2,18432], index: 0, kind: input, shape index: {}]   ;;  %s9501_s1 = inlined_call_operand.hbm [shape: bf16[18432,1024], index: 1, kind: input, shape index: {}]   ;;  %s9502_s2 = inlined_call_operand.vmem [shape: f32[1,1024], index: 2, kind: input, shape index: {}]   ;;  %s9503_s3 = inlined_call_operand.vmem [shape: f32[2,1024], index: 3, kind: output, shape index: {}]  }
   0x1   :  { %10 = vsyncpa [#allocation3 + $0x1], 0  ;;  %s8425_s12 = smov 0   ;;  %s8427_s13 = smov 0  }
   0x2   :  { %s8429_s14 = smov 0   ;;  %s8431_s15 = smov 0  }
   0x3   :  { %s8433_s16 = smov 0   ;;  %s8435_s17 = smov 0  }
   0x4   :  { %s8437_s18 = smov 0   ;;  %s8439_s19 = smov 0  }
   0x5 LB: > { %s6192_s20 = sadd.s32 4294967295, %s8396_s19   ;;  %s25_s21 = sadd.s32 1, %s8388_s17  ;;  %s8396_s19 = sphi %s8439_s19, %s16_s19   ;;  %s8392_s18 = sphi %s8437_s18, %s9513_s18   ;;  %s8388_s17 = sphi %s8435_s17, %s9512_s17   ;;  %s8384_s16 = sphi %s8433_s16, %s9511_s16   ;;  %s8380_s15 = sphi %s8431_s15, %s9510_s15   ;;  %s8376_s14 = sphi %s8429_s14, %s9509_s14   ;;  %s8372_s13 = sphi %s8427_s13, %s9508_s13   ;;  %s8368_s12 = sphi %s8425_s12, %s9507_s12  }
   0x6   : > { %p26_p0 = scmp.ge.s32.totalorder %s25_s21, 6  ;;  %s28_s22 = sadd.s32 1, %s8392_s18 }
   0x7   : > { %s63_s23 = sadd.s32 1, %s8376_s14  ;;  %p70_p1 = scmp.ne.s32.totalorder %s8376_s14, %s8372_s13 }
   0x8   : > { %s9515_s21 = smov (%p26_p0, %s25_s21), 0  ;;  %s9517_s22 = smov (!%p26_p0, %s28_s22), %s8392_s18 }
   0x9   : > { %s58_s24 = ssub.s32 %s8388_s17, %s9515_s21  ;;  %p71_p2 = scmp.eq.s32.totalorder %s8396_s19, 0 }
   0xa   : > { %p30_p3 = scmp.ge.s32.totalorder %s9517_s22, 2  ;;  %p76_p4 = scmp.ne.s32.totalorder %s8372_s13, %s8368_s12 }
   0xb   : > { %p8476_p5 = por %p71_p2, %p70_p1  ;;  %p77_p6 = scmp.eq.s32.totalorder %s6192_s20, 0 }
   0xc   : > { %s9519_s22 = smov (%p30_p3, %s9517_s22), 0  ;;  %p7072_p8 = scmp.lt.s32.totalorder %s8396_s19, 12 }
   0xd   : > { %p8482_p7 = por %p77_p6, %p76_p4  ;;  %s59_s27 = ssub.s32 %s8392_s18, %s9519_s22 }
   0xe   : > { %s60_s28 = sor.u32 %s59_s27, %s58_s24  ;;  %s160_s29 = sand.u32 1, %s8376_s14  }
   0xf   : > { %p61_p9 = scmp.eq.s32.totalorder %s60_s28, 0  ;;  %s7064_s30 = smul.u32 6144, %s160_s29 }
  0x10   : > { %s6196_s4 = sshll.u32 %s8392_s18, 2  ;;  %s6975_s6 = smul.u32 3072, %s8388_s17 }
  0x11   : > { %s8492_s5 = scalar_select %p61_p9, %s8376_s14, %s63_s23  }
  0x12   : > { %s164_s7 = scalar_lea.vmem [#allocation2], %s7064_s30  ;;  %p8497_p10 = pnand %p7072_p8, %p8476_p5 }
  0x13   : > { %s174_s8 = sshll.u32 %s164_s7, 4  ;;  %s171_s10 = sadd.s32 %s6975_s6, %s6196_s4  ;;  %s8501_s8 = int_to_ptr.vmem [resolvable:$true] %s174_s8 }
  0x14   : > { %s6198_s11 = sshll.u32 %s171_s10, 6  ;;  %s8508_s23 = scalar_lea.sflag [#allocation3], %s160_s29 }
  0x15   : > { %s8506_s24 = scalar_lea.hbm %s9501_s1, %s6198_s11  ;;  %p8302_p12 = pneg %p8497_p10 }
  0x16   : > { %s8300_s25 = scalar_lea.hbm %s8506_s24, 98304  ;;  %s8305_s30 = scalar_lea.hbm %s9501_s1, 1179648 }
  0x17   : > { %p8301_p11 = scmp.ne.s32.totalorder %s8506_s24, %s8300_s25  ;;  %p8306_p1 = scmp.lt.u32.totalorder %s8506_s24, %s9501_s1 }
  0x18   : > { %p8307_p2 = scmp.lt.u32.totalorder %s8305_s30, %s8300_s25  ;;  %p8309_p4 = scmp.lt.u32.totalorder %s8300_s25, %s8506_s24 }
  0x19   : > { %p8303_p13 = pnand %p8302_p12, %p8301_p11 }
  0x1a   : > { %p8308_p3 = por %p8307_p2, %p8306_p1 }
  0x1b   : > { %p8304_p0 = pneg %p8303_p13 }
  0x1c   : > { %p8310_p5 = por %p8309_p4, %p8308_p3 }
  0x1e   : > { %p8311_p6 = pnand %p8310_p5, %p8304_p0 }
  0x20   : > { %8314 = shalt.err (!%p8311_p6)
}
  0x21   : > { %s8315_s29 = scalar_lea.vmem %s8501_s8, 98304  ;;  %s8398_s7 = smov [#allocation2]  }
  0x22   : > { %p8316_p8 = scmp.ne.s32.totalorder %s8501_s8, %s8315_s29  ;;  %s8320_s10 = sshll.u32 %s8398_s7, 4  ;;  %s8321_s10 = int_to_ptr.vmem [resolvable:$false] %s8320_s10 }
  0x23   : > { %s8322_s11 = scalar_lea.vmem %s8321_s10, 196608  ;;  %p8323_p13 = scmp.lt.s32.totalorder %s8501_s8, %s8321_s10 }
  0x24   : > { %p8318_p9 = pnand %p8316_p8, %p8302_p12  ;;  %p8324_p1 = scmp.lt.s32.totalorder %s8322_s11, %s8315_s29 }
  0x26   : > { %p8319_p11 = pneg %p8318_p9  ;;  %p8325_p2 = por %p8324_p1, %p8323_p13 }
  0x28   : > { %p8326_p3 = pnand %p8325_p2, %p8319_p11 }
  0x2a   : > { %8329 = shalt.err (!%p8326_p3)
}
  0x2b   : > { %s8399_s12 = smov 512   ;;  %s8400_s20 = smov 256  }
  0x2c   : > { %s8401_s25 = smov 16   ;;  %p6199_p12 = scmp.ge.s32.totalorder %s8396_s19, 1 }
  0x2d   : > { %7071 = dma.hbm_to_vmem [thread:$0]  (!%p8497_p10), %s8506_s24, 98304, %s8501_s8, %s8508_s23, %s8399_s12, %s8400_s20, %s8401_s25  }
  0x2e   : > { %p190_p0 = scmp.lt.s32.totalorder %s8396_s19, 13 }
  0x30   : > { %p191_p4 = pnand %p6199_p12, %p190_p0 }
  0x31   : > { %s196_s27 = sand.u32 (!%p191_p4), 1, %s8372_s13  }
  0x32   : > { %194 = sbr.rel (%p191_p4) target bundleno = 1071 (0x42f), region = 32  ;;  %s197_s30 = scalar_lea.sflag (!%p191_p4), [#allocation3], %s196_s27 }
  0x33   : > { %s7065_s28 = smul.u32 (!%p191_p4), 6144, %s196_s27 }
  0x35   : > { %s8539_s4 = scalar_lea.vmem (!%p191_p4), [#allocation2], %s7065_s28 }
  0x39   : > { %8363 = dma.done.wait (%p8482_p7), %s197_s30, 98304  }
  0x3a   : > { %8365 = vsyncadd (%p8482_p7), %s197_s30, 4294868992  ;;  %s231_s9 = smul.u32 24, %s8380_s15  ;;  %s6200_s8 = sshll.u32 %s8384_s16, 2 }
  0x3b   : > { %p239_p10 = scmp.lt.s32.totalorder %s6200_s8, 7  ;;  %p6203_p7 = scmp.ne.s32.totalorder %s8380_s15, 0 }
  0x3c   : > { %p232_p5 = scmp.lt.s32.totalorder %s231_s9, 143  ;;  %v8402_v0 = vmov (!%p6203_p7), 0.0  }
  0x3d   : > { %s9521_s8 = smov (!%p239_p10, %s6200_s8), 7  ;;  %252 = sbr.rel (%p6203_p7) target bundleno = 68 (0x44), region = 40 }
  0x3e   : > { %s9523_s9 = smov (!%p232_p5, %s231_s9), 143  ;;  %s241_s6 = scalar_lea.vmem %s9502_s2, %s9521_s8 }
  0x3f   : > { %s6202_s29 = sshll.u32 %s9521_s8, 1  ;;  %s8557_s26 = scalar_lea.vmem %s9500_s0, %s9523_s9 }
  0x40   : > { %s8562_s16 = scalar_lea.vmem %s9503_s3, %s6202_s29 }
  0x41   : > { %253 = vst [vmem:[%s8562_s16] sm:$0xff] (!%p6203_p7), %v8402_v0 }
  0x44 PF: > { %v7143_v1 = vld [vmem:[%s8539_s4 + $0x4] ss:$16 sps:$4 sm:$0xff]   ;;  %v7145_v2 = vld [vmem:[%s8539_s4 + $0xc] ss:$16 sps:$4 sm:$0xff]   ;;  %v7147_v3 = vld [vmem:[%s8539_s4] ss:$16 sps:$4 sm:$0xff]   ;;  %v1033_v39 = vlaneseq }
  0x45   : > { %5040 = vmatprep.subr.bf16.mxu0 %v7143_v1  ;;  %v7148_v4 = vld [vmem:[%s8539_s4 + $0x8] ss:$16 sps:$4 sm:$0xff]   ;;  %5532 = vmatprep.subr.bf16.mxu1 %v7145_v2  ;;  %v7149_v5 = vld [vmem:[%s8539_s4 + $0x24] ss:$16 sps:$4 sm:$0xff]   ;;  %v7151_v6 = vld [vmem:[%s8539_s4 + $0x2c] ss:$16 sps:$4 sm:$0xff]  }
  0x46   : > { %5041 = vmatpush1.bf16.msra.mxu0 %v7147_v3  ;;  %5533 = vmatpush1.bf16.msra.mxu1 %v7148_v4  ;;  %v7153_v7 = vld [vmem:[%s8539_s4 + $0x20] ss:$16 sps:$4 sm:$0xff]   ;;  %v7154_v8 = vld [vmem:[%s8539_s4 + $0x28] ss:$16 sps:$4 sm:$0xff]   ;;  %v7155_v9 = vld [vmem:[%s8539_s4 + $0x44] ss:$16 sps:$4 sm:$0xff]  }
  0x47   : > { %5042 = vmatprep.subr.bf16.mxu0 %v7149_v5  ;;  %5534 = vmatprep.subr.bf16.mxu1 %v7151_v6  ;;  %v7157_v10 = vld [vmem:[%s8539_s4 + $0x4c] ss:$16 sps:$4 sm:$0xff]   ;;  %v7159_v11 = vld [vmem:[%s8539_s4 + $0x40] ss:$16 sps:$4 sm:$0xff]   ;;  %v7160_v12 = vld [vmem:[%s8539_s4 + $0x48] ss:$16 sps:$4 sm:$0xff]  }
  0x48   : > { %v7161_v13 = vld [vmem:[%s8539_s4 + $0x64] ss:$16 sps:$4 sm:$0xff]   ;;  %v7163_v14 = vld [vmem:[%s8539_s4 + $0x6c] ss:$16 sps:$4 sm:$0xff]   ;;  %v7165_v15 = vld [vmem:[%s8539_s4 + $0x60] ss:$16 sps:$4 sm:$0xff]  }
  0x49   : > { %v7166_v16 = vld [vmem:[%s8539_s4 + $0x68] ss:$16 sps:$4 sm:$0xff]   ;;  %v7167_v17 = vld [vmem:[%s8539_s4 + $0x84] ss:$16 sps:$4 sm:$0xff]   ;;  %v7169_v18 = vld [vmem:[%s8539_s4 + $0x8c] ss:$16 sps:$4 sm:$0xff]  }
  0x4a   : > { %5043 = vmatpush1.bf16.msra.mxu0 %v7153_v7  ;;  %5535 = vmatpush1.bf16.msra.mxu1 %v7154_v8  ;;  %v7171_v19 = vld [vmem:[%s8539_s4 + $0x80] ss:$16 sps:$4 sm:$0xff]   ;;  %v7172_v20 = vld [vmem:[%s8539_s4 + $0x88] ss:$16 sps:$4 sm:$0xff]   ;;  %v7173_v21 = vld [vmem:[%s8539_s4 + $0xa4] ss:$16 sps:$4 sm:$0xff]  }
  0x4b   : > { %5044 = vmatprep.subr.bf16.mxu0 %v7155_v9  ;;  %5536 = vmatprep.subr.bf16.mxu1 %v7157_v10  ;;  %v7175_v22 = vld [vmem:[%s8539_s4 + $0xac] ss:$16 sps:$4 sm:$0xff]   ;;  %v7177_v23 = vld [vmem:[%s8539_s4 + $0xa0] ss:$16 sps:$4 sm:$0xff]   ;;  %v7178_v24 = vld [vmem:[%s8539_s4 + $0xa8] ss:$16 sps:$4 sm:$0xff]  }
  0x4c   : > { %v7179_v25 = vld [vmem:[%s8539_s4 + $0xc4] ss:$16 sps:$4 sm:$0xff]   ;;  %v7181_v26 = vld [vmem:[%s8539_s4 + $0xcc] ss:$16 sps:$4 sm:$0xff]   ;;  %v7183_v27 = vld [vmem:[%s8539_s4 + $0xc0] ss:$16 sps:$4 sm:$0xff]  }
  0x4d   : > { %v7184_v28 = vld [vmem:[%s8539_s4 + $0xc8] ss:$16 sps:$4 sm:$0xff]   ;;  %v7185_v29 = vld [vmem:[%s8539_s4 + $0xe4] ss:$16 sps:$4 sm:$0xff]   ;;  %v7187_v30 = vld [vmem:[%s8539_s4 + $0xec] ss:$16 sps:$4 sm:$0xff]  }
  0x4e   : > { %5045 = vmatpush1.bf16.msra.mxu0 %v7159_v11  ;;  %5537 = vmatpush1.bf16.msra.mxu1 %v7160_v12  ;;  %v7189_v31 = vld [vmem:[%s8539_s4 + $0xe0] ss:$16 sps:$4 sm:$0xff]   ;;  %v7190_v32 = vld [vmem:[%s8539_s4 + $0xe8] ss:$16 sps:$4 sm:$0xff]   ;;  %v7191_v33 = vld [vmem:[%s8539_s4 + $0x104] ss:$16 sps:$4 sm:$0xff]  }
  0x4f   : > { %5046 = vmatprep.subr.bf16.mxu0 %v7161_v13  ;;  %5538 = vmatprep.subr.bf16.mxu1 %v7163_v14  ;;  %v7193_v34 = vld [vmem:[%s8539_s4 + $0x10c] ss:$16 sps:$4 sm:$0xff]   ;;  %v7195_v35 = vld [vmem:[%s8539_s4 + $0x100] ss:$16 sps:$4 sm:$0xff]   ;;  %v7196_v36 = vld [vmem:[%s8539_s4 + $0x108] ss:$16 sps:$4 sm:$0xff]  }
  0x50   : > { %v8403_v37 = vmov 1966171168   ;;  %v7197_v40 = vld [vmem:[%s8539_s4 + $0x124] ss:$16 sps:$4 sm:$0xff]   ;;  %v7199_v41 = vld [vmem:[%s8539_s4 + $0x12c] ss:$16 sps:$4 sm:$0xff]  }
  0x51   : > { %v1031_v38 = vunpack.c.l.s4 %v8403_v37  ;;  %v7201_v42 = vld [vmem:[%s8539_s4 + $0x120] ss:$16 sps:$4 sm:$0xff]   ;;  %v8605_v44 = vshrl.u32 %v1033_v39, 7  ;;  %v7202_v45 = vld [vmem:[%s8539_s4 + $0x128] ss:$16 sps:$4 sm:$0xff]   ;;  %p6972_p6 = scmp.ne.s32.totalorder %s8380_s15, 5 }
  0x52   : > { %5047 = vmatpush1.bf16.msra.mxu0 %v7165_v15  ;;  %5539 = vmatpush1.bf16.msra.mxu1 %v7166_v16  ;;  %v7203_v46 = vld [vmem:[%s8539_s4 + $0x144] ss:$16 sps:$4 sm:$0xff]   ;;  %v7205_v47 = vld [vmem:[%s8539_s4 + $0x14c] ss:$16 sps:$4 sm:$0xff]   ;;  %v7207_v48 = vld [vmem:[%s8539_s4 + $0x140] ss:$16 sps:$4 sm:$0xff]  }
  0x53   : > { %5048 = vmatprep.subr.bf16.mxu0 %v7167_v17  ;;  %5540 = vmatprep.subr.bf16.mxu1 %v7169_v18  ;;  %v1032_v43 = vunpack.c.0.s8 %v1031_v38  ;;  %v7208_v49 = vld [vmem:[%s8539_s4 + $0x148] ss:$16 sps:$4 sm:$0xff]   ;;  %v7209_v51 = vld [vmem:[%s8539_s4 + $0x164] ss:$16 sps:$4 sm:$0xff]   ;;  %v7211_v52 = vld [vmem:[%s8539_s4 + $0x16c] ss:$16 sps:$4 sm:$0xff]  }
  0x54   : > { %v8618_v53 = vld [vmem:[%s8557_s26] sm:$0xff]  ;;  %v7214_v56 = vld [vmem:[%s8539_s4 + $0x168] ss:$16 sps:$4 sm:$0xff]   ;;  %v7217_v58 = vld [vmem:[%s8539_s4 + $0x18c] ss:$16 sps:$4 sm:$0xff]  }
  0x55   : > { %v8613_v50 = vsub.s32 %v1032_v43, %v8605_v44  ;;  %v7213_v54 = vld [vmem:[%s8539_s4 + $0x160] ss:$16 sps:$4 sm:$0xff]   ;;  %v7215_v57 = vld [vmem:[%s8539_s4 + $0x184] ss:$16 sps:$4 sm:$0xff]   ;;  %v7220_v62 = vld [vmem:[%s8539_s4 + $0x188] ss:$16 sps:$4 sm:$0xff]  }
  0x56   : > { %5049 = vmatpush1.bf16.msra.mxu0 %v7171_v19  ;;  %5541 = vmatpush1.bf16.msra.mxu1 %v7172_v20  ;;  %v7219_v60 = vld [vmem:[%s8539_s4 + $0x180] ss:$16 sps:$4 sm:$0xff]   ;;  %v7221_v63 = vld [vmem:[%s8539_s4 + $0x1a4] ss:$16 sps:$4 sm:$0xff]   ;;  %v7223_v0 = vld [vmem:[%s8539_s4 + $0x1ac] ss:$16 sps:$4 sm:$0xff]  }
  0x57   : > { %5050 = vmatprep.subr.bf16.mxu0 %v7173_v21  ;;  %5542 = vmatprep.subr.bf16.mxu1 %v7175_v22  ;;  %v1036_v55 = vrot.slane %v8618_v53, %v8613_v50  ;;  %v7225_v1 = vld [vmem:[%s8539_s4 + $0x1a0] ss:$16 sps:$4 sm:$0xff]   ;;  %v7226_v2 = vld [vmem:[%s8539_s4 + $0x1a8] ss:$16 sps:$4 sm:$0xff]   ;;  %v7227_v3 = vld [vmem:[%s8539_s4 + $0x1c4] ss:$16 sps:$4 sm:$0xff]  }
  0x58   : > { %v7229_v4 = vld [vmem:[%s8539_s4 + $0x1cc] ss:$16 sps:$4 sm:$0xff]   ;;  %v7231_v5 = vld [vmem:[%s8539_s4 + $0x1c0] ss:$16 sps:$4 sm:$0xff]   ;;  %v7232_v6 = vld [vmem:[%s8539_s4 + $0x1c8] ss:$16 sps:$4 sm:$0xff]  }
  0x59   : > { %v1044_v59 = vcombine.high %v1036_v55, %v1036_v55  ;;  %v7233_v7 = vld [vmem:[%s8539_s4 + $0x1e4] ss:$16 sps:$4 sm:$0xff]   ;;  %v7235_v8 = vld [vmem:[%s8539_s4 + $0x1ec] ss:$16 sps:$4 sm:$0xff]   ;;  %v7237_v9 = vld [vmem:[%s8539_s4 + $0x1e0] ss:$16 sps:$4 sm:$0xff]   ;;  %v8645_v14 = vrot.slane %v1036_v55, %v8613_v50 }
  0x5a   : > { %5051 = vmatpush1.bf16.msra.mxu0 %v7177_v23  ;;  %5543 = vmatpush1.bf16.msra.mxu1 %v7178_v24  ;;  %v7238_v10 = vld [vmem:[%s8539_s4 + $0x1e8] ss:$16 sps:$4 sm:$0xff]   ;;  %v7241_v11 = vld [vmem:[%s8539_s4 + $0x204] ss:$16 sps:$4 sm:$0xff]   ;;  %v7244_v12 = vld [vmem:[%s8539_s4 + $0x20c] ss:$16 sps:$4 sm:$0xff]  }
  0x5b   : > { %5052 = vmatprep.subr.bf16.mxu0 %v7179_v25  ;;  %5544 = vmatprep.subr.bf16.mxu1 %v7181_v26  ;;  %v1066_v61 = vrot.slane %v1044_v59, %v8613_v50  ;;  %v7239_v13 = vld [vmem:[%s8539_s4 + $0x200] ss:$16 sps:$4 sm:$0xff]   ;;  %v7242_v15 = vld [vmem:[%s8539_s4 + $0x208] ss:$16 sps:$4 sm:$0xff]   ;;  %v7247_v16 = vld [vmem:[%s8539_s4 + $0x224] ss:$16 sps:$4 sm:$0xff]  }
  0x5c   : > { %v7250_v17 = vld [vmem:[%s8539_s4 + $0x22c] ss:$16 sps:$4 sm:$0xff]   ;;  %v7245_v19 = vld [vmem:[%s8539_s4 + $0x220] ss:$16 sps:$4 sm:$0xff]   ;;  %v7248_v20 = vld [vmem:[%s8539_s4 + $0x228] ss:$16 sps:$4 sm:$0xff]  }
  0x5d   : > { %5072 = vmatprep.mubr.bf16.mxu0 %v1066_v61  ;;  %5564 = vmatprep.mubr.bf16.mxu1 %v1066_v61  ;;  %v1076_v18 = vcombine.high %v1066_v61, %v1066_v61  ;;  %v7253_v21 = vld [vmem:[%s8539_s4 + $0x244] ss:$16 sps:$4 sm:$0xff]   ;;  %v7256_v22 = vld [vmem:[%s8539_s4 + $0x24c] ss:$16 sps:$4 sm:$0xff]   ;;  %v7251_v23 = vld [vmem:[%s8539_s4 + $0x240] ss:$16 sps:$4 sm:$0xff]  }
  0x5e   : > { %5053 = vmatpush1.bf16.msra.mxu0 %v7183_v27  ;;  %5545 = vmatpush1.bf16.msra.mxu1 %v7184_v28  ;;  %v7254_v24 = vld [vmem:[%s8539_s4 + $0x248] ss:$16 sps:$4 sm:$0xff]   ;;  %v7259_v25 = vld [vmem:[%s8539_s4 + $0x264] ss:$16 sps:$4 sm:$0xff]   ;;  %v7262_v26 = vld [vmem:[%s8539_s4 + $0x26c] ss:$16 sps:$4 sm:$0xff]  }
  0x5f   : > { %5054 = vmatprep.subr.bf16.mxu0 %v7185_v29  ;;  %5546 = vmatprep.subr.bf16.mxu1 %v7187_v30  ;;  %v7257_v27 = vld [vmem:[%s8539_s4 + $0x260] ss:$16 sps:$4 sm:$0xff]   ;;  %v7260_v28 = vld [vmem:[%s8539_s4 + $0x268] ss:$16 sps:$4 sm:$0xff]   ;;  %v7265_v29 = vld [vmem:[%s8539_s4 + $0x284] ss:$16 sps:$4 sm:$0xff]  }
  0x60   : > { %v7268_v30 = vld [vmem:[%s8539_s4 + $0x28c] ss:$16 sps:$4 sm:$0xff]   ;;  %v7277_v37 = vld [vmem:[%s8539_s4 + $0x2c4] ss:$16 sps:$4 sm:$0xff]   ;;  %v7275_v39 = vld [vmem:[%s8539_s4 + $0x2c0] ss:$16 sps:$4 sm:$0xff]  }
  0x61   : > { %v7280_v38 = vld [vmem:[%s8539_s4 + $0x2cc] ss:$16 sps:$4 sm:$0xff]   ;;  %v7281_v43 = vld [vmem:[%s8539_s4 + $0x2e0] ss:$16 sps:$4 sm:$0xff]   ;;  %v7296_v55 = vld [vmem:[%s8539_s4 + $0x328] ss:$16 sps:$4 sm:$0xff]  }
  0x62   : > { %5055 = vmatpush1.bf16.msra.mxu0 %v7189_v31  ;;  %5547 = vmatpush1.bf16.msra.mxu1 %v7190_v32  ;;  %v7263_v31 = vld [vmem:[%s8539_s4 + $0x280] ss:$16 sps:$4 sm:$0xff]   ;;  %v7266_v32 = vld [vmem:[%s8539_s4 + $0x288] ss:$16 sps:$4 sm:$0xff]   ;;  %v7310_v61 = vld [vmem:[%s8539_s4 + $0x36c] ss:$16 sps:$4 sm:$0xff]  }
  0x63   : > { %5056 = vmatprep.subr.bf16.mxu0 %v7191_v33  ;;  %5548 = vmatprep.subr.bf16.mxu1 %v7193_v34  ;;  %v7271_v33 = vld [vmem:[%s8539_s4 + $0x2a4] ss:$16 sps:$4 sm:$0xff]   ;;  %v7274_v34 = vld [vmem:[%s8539_s4 + $0x2ac] ss:$16 sps:$4 sm:$0xff]   ;;  %v7302_v59 = vld [vmem:[%s8539_s4 + $0x348] ss:$16 sps:$4 sm:$0xff]  }
  0x66   : > { %5057 = vmatpush1.bf16.msra.mxu0 %v7195_v35  ;;  %5549 = vmatpush1.bf16.msra.mxu1 %v7196_v36  ;;  %v7269_v35 = vld [vmem:[%s8539_s4 + $0x2a0] ss:$16 sps:$4 sm:$0xff]   ;;  %v7272_v36 = vld [vmem:[%s8539_s4 + $0x2a8] ss:$16 sps:$4 sm:$0xff]  }
  0x67   : > { %5058 = vmatprep.subr.bf16.mxu0 %v7197_v40  ;;  %5550 = vmatprep.subr.bf16.mxu1 %v7199_v41  ;;  %v7278_v40 = vld [vmem:[%s8539_s4 + $0x2c8] ss:$16 sps:$4 sm:$0xff]   ;;  %v7283_v41 = vld [vmem:[%s8539_s4 + $0x2e4] ss:$16 sps:$4 sm:$0xff]  }
  0x6a   : > { %5059 = vmatpush1.bf16.msra.mxu0 %v7201_v42  ;;  %5551 = vmatpush1.bf16.msra.mxu1 %v7202_v45  ;;  %v7286_v42 = vld [vmem:[%s8539_s4 + $0x2ec] ss:$16 sps:$4 sm:$0xff]   ;;  %v7284_v45 = vld [vmem:[%s8539_s4 + $0x2e8] ss:$16 sps:$4 sm:$0xff]  }
  0x6b   : > { %5060 = vmatprep.subr.bf16.mxu0 %v7203_v46  ;;  %5552 = vmatprep.subr.bf16.mxu1 %v7205_v47  ;;  %v7289_v46 = vld [vmem:[%s8539_s4 + $0x304] ss:$16 sps:$4 sm:$0xff]   ;;  %v7292_v47 = vld [vmem:[%s8539_s4 + $0x30c] ss:$16 sps:$4 sm:$0xff]  }
  0x6e   : > { %5061 = vmatpush1.bf16.msra.mxu0 %v7207_v48  ;;  %5553 = vmatpush1.bf16.msra.mxu1 %v7208_v49  ;;  %v7287_v48 = vld [vmem:[%s8539_s4 + $0x300] ss:$16 sps:$4 sm:$0xff]   ;;  %v7290_v49 = vld [vmem:[%s8539_s4 + $0x308] ss:$16 sps:$4 sm:$0xff]  }
  0x6f   : > { %5062 = vmatprep.subr.bf16.mxu0 %v7209_v51  ;;  %5554 = vmatprep.subr.bf16.mxu1 %v7211_v52  ;;  %v7295_v51 = vld [vmem:[%s8539_s4 + $0x324] ss:$16 sps:$4 sm:$0xff]   ;;  %v7298_v52 = vld [vmem:[%s8539_s4 + $0x32c] ss:$16 sps:$4 sm:$0xff]  }
  0x72   : > { %5063 = vmatpush1.bf16.msra.mxu0 %v7213_v54  ;;  %5555 = vmatpush1.bf16.msra.mxu1 %v7214_v56  ;;  %v7293_v54 = vld [vmem:[%s8539_s4 + $0x320] ss:$16 sps:$4 sm:$0xff]   ;;  %v7301_v56 = vld [vmem:[%s8539_s4 + $0x344] ss:$16 sps:$4 sm:$0xff]  }
  0x73   : > { %5064 = vmatprep.subr.bf16.mxu0 %v7215_v57  ;;  %5556 = vmatprep.subr.bf16.mxu1 %v7217_v58  ;;  %v7304_v57 = vld [vmem:[%s8539_s4 + $0x34c] ss:$16 sps:$4 sm:$0xff]   ;;  %v7299_v58 = vld [vmem:[%s8539_s4 + $0x340] ss:$16 sps:$4 sm:$0xff]  }
  0x76   : > { %5065 = vmatpush1.bf16.msra.mxu0 %v7219_v60  ;;  %5557 = vmatpush1.bf16.msra.mxu1 %v7220_v62  ;;  %v7307_v60 = vld [vmem:[%s8539_s4 + $0x364] ss:$16 sps:$4 sm:$0xff]   ;;  %v7305_v62 = vld [vmem:[%s8539_s4 + $0x360] ss:$16 sps:$4 sm:$0xff]  }
  0x77   : > { %5066 = vmatprep.subr.bf16.mxu0 %v7221_v63  ;;  %5558 = vmatprep.subr.bf16.mxu1 %v7223_v0  ;;  %v7308_v63 = vld [vmem:[%s8539_s4 + $0x368] ss:$16 sps:$4 sm:$0xff]   ;;  %v7313_v0 = vld [vmem:[%s8539_s4 + $0x384] ss:$16 sps:$4 sm:$0xff]  }
  0x7a   : > { %5067 = vmatpush1.bf16.msra.mxu0 %v7225_v1  ;;  %5559 = vmatpush1.bf16.msra.mxu1 %v7226_v2  ;;  %v7316_v1 = vld [vmem:[%s8539_s4 + $0x38c] ss:$16 sps:$4 sm:$0xff]   ;;  %v7311_v2 = vld [vmem:[%s8539_s4 + $0x380] ss:$16 sps:$4 sm:$0xff]  }
  0x7b   : > { %5068 = vmatprep.subr.bf16.mxu0 %v7227_v3  ;;  %5560 = vmatprep.subr.bf16.mxu1 %v7229_v4  ;;  %v7314_v3 = vld [vmem:[%s8539_s4 + $0x388] ss:$16 sps:$4 sm:$0xff]   ;;  %v7319_v4 = vld [vmem:[%s8539_s4 + $0x3a4] ss:$16 sps:$4 sm:$0xff]  }
  0x7e   : > { %5069 = vmatpush1.bf16.msra.mxu0 %v7231_v5  ;;  %5561 = vmatpush1.bf16.msra.mxu1 %v7232_v6  ;;  %v7322_v5 = vld [vmem:[%s8539_s4 + $0x3ac] ss:$16 sps:$4 sm:$0xff]   ;;  %v7317_v6 = vld [vmem:[%s8539_s4 + $0x3a0] ss:$16 sps:$4 sm:$0xff]  }
  0x7f   : > { %5070 = vmatprep.subr.bf16.mxu0 %v7233_v7  ;;  %5562 = vmatprep.subr.bf16.mxu1 %v7235_v8  ;;  %v7320_v7 = vld [vmem:[%s8539_s4 + $0x3a8] ss:$16 sps:$4 sm:$0xff]   ;;  %v7325_v8 = vld [vmem:[%s8539_s4 + $0x3c4] ss:$16 sps:$4 sm:$0xff]  }
  0x82   : > { %5071 = vmatpush1.bf16.msra.mxu0 %v7237_v9  ;;  %5563 = vmatpush1.bf16.msra.mxu1 %v7238_v10  ;;  %v7328_v9 = vld [vmem:[%s8539_s4 + $0x3cc] ss:$16 sps:$4 sm:$0xff]   ;;  %v1029_v10 = vcombine.high %v8618_v53, %v8618_v53  ;;  %v7332_v53 = vld [vmem:[%s8539_s4 + $0x3e8] ss:$16 sps:$4 sm:$0xff]  }
  0x83   : > { %5081 = vmatprep.subr.bf16.mxu0 %v7241_v11  ;;  %5573 = vmatprep.subr.bf16.mxu1 %v7244_v12  ;;  %v7323_v11 = vld [vmem:[%s8539_s4 + $0x3c0] ss:$16 sps:$4 sm:$0xff]   ;;  %v7326_v12 = vld [vmem:[%s8539_s4 + $0x3c8] ss:$16 sps:$4 sm:$0xff]  }
  0x85   : > { %5073 = vmatmul.mubr.bf16.vlgmr.msra.gmra.mrb[0].mxu0 %v8645_v14  ;;  %5565 = vmatmul.mubr.bf16.vlgmr.msra.gmra.mrb[0].mxu1 %v8645_v14 }
  0x86   : > { %5082 = vmatpush1.bf16.msra.mxu0 %v7239_v13  ;;  %5574 = vmatpush1.bf16.msra.mxu1 %v7242_v15  ;;  %v7331_v13 = vld [vmem:[%s8539_s4 + $0x3e4] ss:$16 sps:$4 sm:$0xff]   ;;  %v7334_v15 = vld [vmem:[%s8539_s4 + $0x3ec] ss:$16 sps:$4 sm:$0xff]  }
  0x87   : > { %5083 = vmatprep.subr.bf16.mxu0 %v7247_v16  ;;  %5575 = vmatprep.subr.bf16.mxu1 %v7250_v17  ;;  %v8711_v16 = vrot.slane %v1029_v10, %v8613_v50  ;;  %v7329_v17 = vld [vmem:[%s8539_s4 + $0x3e0] ss:$16 sps:$4 sm:$0xff]   ;;  %v7410_v10 = vld [vmem:[%s8539_s4 + $0x588] ss:$16 sps:$4 sm:$0xff]  }
  0x88   : > { %5113 = vmatprep.mubr.bf16.mxu0 %v1076_v18  ;;  %5605 = vmatprep.mubr.bf16.mxu1 %v1076_v18  ;;  %v7337_v18 = vld [vmem:[%s8539_s4 + $0x404] ss:$16 sps:$4 sm:$0xff]  }
  0x8a   : > { %5084 = vmatpush1.bf16.msra.mxu0 %v7245_v19  ;;  %5576 = vmatpush1.bf16.msra.mxu1 %v7248_v20  ;;  %v7340_v19 = vld [vmem:[%s8539_s4 + $0x40c] ss:$16 sps:$4 sm:$0xff]   ;;  %v1045_v20 = vcombine.high %v8711_v16, %v8711_v16 }
  0x8b   : > { %5085 = vmatprep.subr.bf16.mxu0 %v7253_v21  ;;  %5577 = vmatprep.subr.bf16.mxu1 %v7256_v22  ;;  %v7335_v21 = vld [vmem:[%s8539_s4 + $0x400] ss:$16 sps:$4 sm:$0xff]   ;;  %v1074_v22 = vcombine.high %v8645_v14, %v8645_v14  ;;  %v7344_v14 = vld [vmem:[%s8539_s4 + $0x428] ss:$16 sps:$4 sm:$0xff]  }
  0x8e   : > { %5086 = vmatpush1.bf16.msra.mxu0 %v7251_v23  ;;  %5578 = vmatpush1.bf16.msra.mxu1 %v7254_v24  ;;  %v7338_v23 = vld [vmem:[%s8539_s4 + $0x408] ss:$16 sps:$4 sm:$0xff]   ;;  %v7343_v24 = vld [vmem:[%s8539_s4 + $0x424] ss:$16 sps:$4 sm:$0xff]  }
  0x8f   : > { %5087 = vmatprep.subr.bf16.mxu0 %v7259_v25  ;;  %5579 = vmatprep.subr.bf16.mxu1 %v7262_v26  ;;  %v7346_v25 = vld [vmem:[%s8539_s4 + $0x42c] ss:$16 sps:$4 sm:$0xff]   ;;  %v8726_v26 = vrot.slane %v1045_v20, %v8613_v50  ;;  %v7427_v20 = vld [vmem:[%s8539_s4 + $0x5e4] ss:$16 sps:$4 sm:$0xff]  }
  0x92   : > { %5088 = vmatpush1.bf16.msra.mxu0 %v7257_v27  ;;  %5580 = vmatpush1.bf16.msra.mxu1 %v7260_v28  ;;  %v7341_v27 = vld [vmem:[%s8539_s4 + $0x420] ss:$16 sps:$4 sm:$0xff]   ;;  %v7349_v28 = vld [vmem:[%s8539_s4 + $0x444] ss:$16 sps:$4 sm:$0xff]  }
  0x93   : > { %5089 = vmatprep.subr.bf16.mxu0 %v7265_v29  ;;  %5581 = vmatprep.subr.bf16.mxu1 %v7268_v30  ;;  %v7352_v29 = vld [vmem:[%s8539_s4 + $0x44c] ss:$16 sps:$4 sm:$0xff]   ;;  %v7347_v30 = vld [vmem:[%s8539_s4 + $0x440] ss:$16 sps:$4 sm:$0xff]  }
  0x96   : > { %5090 = vmatpush1.bf16.msra.mxu0 %v7263_v31  ;;  %5582 = vmatpush1.bf16.msra.mxu1 %v7266_v32  ;;  %v7350_v31 = vld [vmem:[%s8539_s4 + $0x448] ss:$16 sps:$4 sm:$0xff]   ;;  %v7355_v32 = vld [vmem:[%s8539_s4 + $0x464] ss:$16 sps:$4 sm:$0xff]  }
  0x97   : > { %5091 = vmatprep.subr.bf16.mxu0 %v7271_v33  ;;  %5583 = vmatprep.subr.bf16.mxu1 %v7274_v34  ;;  %v7358_v33 = vld [vmem:[%s8539_s4 + $0x46c] ss:$16 sps:$4 sm:$0xff]   ;;  %v7353_v34 = vld [vmem:[%s8539_s4 + $0x460] ss:$16 sps:$4 sm:$0xff]  }
  0x9a   : > { %5092 = vmatpush1.bf16.msra.mxu0 %v7269_v35  ;;  %5584 = vmatpush1.bf16.msra.mxu1 %v7272_v36  ;;  %v7356_v35 = vld [vmem:[%s8539_s4 + $0x468] ss:$16 sps:$4 sm:$0xff]   ;;  %v7361_v36 = vld [vmem:[%s8539_s4 + $0x484] ss:$16 sps:$4 sm:$0xff]  }
  0x9b   : > { %5093 = vmatprep.subr.bf16.mxu0 %v7277_v37  ;;  %5585 = vmatprep.subr.bf16.mxu1 %v7280_v38  ;;  %v7364_v37 = vld [vmem:[%s8539_s4 + $0x48c] ss:$16 sps:$4 sm:$0xff]   ;;  %v7359_v38 = vld [vmem:[%s8539_s4 + $0x480] ss:$16 sps:$4 sm:$0xff]  }
  0x9e   : > { %5094 = vmatpush1.bf16.msra.mxu0 %v7275_v39  ;;  %5586 = vmatpush1.bf16.msra.mxu1 %v7278_v40  ;;  %v7362_v39 = vld [vmem:[%s8539_s4 + $0x488] ss:$16 sps:$4 sm:$0xff]   ;;  %v7367_v40 = vld [vmem:[%s8539_s4 + $0x4a4] ss:$16 sps:$4 sm:$0xff]  }
  0x9f   : > { %5095 = vmatprep.subr.bf16.mxu0 %v7283_v41  ;;  %5587 = vmatprep.subr.bf16.mxu1 %v7286_v42  ;;  %v7370_v41 = vld [vmem:[%s8539_s4 + $0x4ac] ss:$16 sps:$4 sm:$0xff]   ;;  %v7365_v42 = vld [vmem:[%s8539_s4 + $0x4a0] ss:$16 sps:$4 sm:$0xff]  }
  0xa2   : > { %5096 = vmatpush1.bf16.msra.mxu0 %v7281_v43  ;;  %5588 = vmatpush1.bf16.msra.mxu1 %v7284_v45  ;;  %v7368_v43 = vld [vmem:[%s8539_s4 + $0x4a8] ss:$16 sps:$4 sm:$0xff]   ;;  %v7373_v45 = vld [vmem:[%s8539_s4 + $0x4c4] ss:$16 sps:$4 sm:$0xff]  }
  0xa3   : > { %5097 = vmatprep.subr.bf16.mxu0 %v7289_v46  ;;  %5589 = vmatprep.subr.bf16.mxu1 %v7292_v47  ;;  %v7376_v46 = vld [vmem:[%s8539_s4 + $0x4cc] ss:$16 sps:$4 sm:$0xff]   ;;  %v7371_v47 = vld [vmem:[%s8539_s4 + $0x4c0] ss:$16 sps:$4 sm:$0xff]  }
  0xa6   : > { %5098 = vmatpush1.bf16.msra.mxu0 %v7287_v48  ;;  %5590 = vmatpush1.bf16.msra.mxu1 %v7290_v49  ;;  %v7374_v48 = vld [vmem:[%s8539_s4 + $0x4c8] ss:$16 sps:$4 sm:$0xff]   ;;  %v7379_v49 = vld [vmem:[%s8539_s4 + $0x4e4] ss:$16 sps:$4 sm:$0xff]  }
  0xa7   : > { %5099 = vmatprep.subr.bf16.mxu0 %v7295_v51  ;;  %5591 = vmatprep.subr.bf16.mxu1 %v7298_v52  ;;  %v7382_v51 = vld [vmem:[%s8539_s4 + $0x4ec] ss:$16 sps:$4 sm:$0xff]   ;;  %v7377_v52 = vld [vmem:[%s8539_s4 + $0x4e0] ss:$16 sps:$4 sm:$0xff]  }
  0xaa   : > { %5100 = vmatpush1.bf16.msra.mxu0 %v7293_v54  ;;  %5592 = vmatpush1.bf16.msra.mxu1 %v7296_v55  ;;  %v7380_v54 = vld [vmem:[%s8539_s4 + $0x4e8] ss:$16 sps:$4 sm:$0xff]   ;;  %v7385_v55 = vld [vmem:[%s8539_s4 + $0x504] ss:$16 sps:$4 sm:$0xff]  }
  0xab   : > { %5101 = vmatprep.subr.bf16.mxu0 %v7301_v56  ;;  %5593 = vmatprep.subr.bf16.mxu1 %v7304_v57  ;;  %v7388_v56 = vld [vmem:[%s8539_s4 + $0x50c] ss:$16 sps:$4 sm:$0xff]   ;;  %v7383_v57 = vld [vmem:[%s8539_s4 + $0x500] ss:$16 sps:$4 sm:$0xff]  }
  0xae   : > { %5102 = vmatpush1.bf16.msra.mxu0 %v7299_v58  ;;  %5594 = vmatpush1.bf16.msra.mxu1 %v7302_v59  ;;  %v7386_v58 = vld [vmem:[%s8539_s4 + $0x508] ss:$16 sps:$4 sm:$0xff]   ;;  %v7391_v59 = vld [vmem:[%s8539_s4 + $0x524] ss:$16 sps:$4 sm:$0xff]  }
  0xaf   : > { %5103 = vmatprep.subr.bf16.mxu0 %v7307_v60  ;;  %5595 = vmatprep.subr.bf16.mxu1 %v7310_v61  ;;  %v7394_v60 = vld [vmem:[%s8539_s4 + $0x52c] ss:$16 sps:$4 sm:$0xff]   ;;  %v7389_v61 = vld [vmem:[%s8539_s4 + $0x520] ss:$16 sps:$4 sm:$0xff]  }
  0xb2   : > { %5104 = vmatpush1.bf16.msra.mxu0 %v7305_v62  ;;  %5596 = vmatpush1.bf16.msra.mxu1 %v7308_v63  ;;  %v7392_v62 = vld [vmem:[%s8539_s4 + $0x528] ss:$16 sps:$4 sm:$0xff]   ;;  %v7397_v63 = vld [vmem:[%s8539_s4 + $0x544] ss:$16 sps:$4 sm:$0xff]  }
  0xb3   : > { %5105 = vmatprep.subr.bf16.mxu0 %v7313_v0  ;;  %5597 = vmatprep.subr.bf16.mxu1 %v7316_v1  ;;  %v7400_v0 = vld [vmem:[%s8539_s4 + $0x54c] ss:$16 sps:$4 sm:$0xff]   ;;  %v7395_v1 = vld [vmem:[%s8539_s4 + $0x540] ss:$16 sps:$4 sm:$0xff]  }
  0xb6   : > { %5106 = vmatpush1.bf16.msra.mxu0 %v7311_v2  ;;  %5598 = vmatpush1.bf16.msra.mxu1 %v7314_v3  ;;  %v7398_v2 = vld [vmem:[%s8539_s4 + $0x548] ss:$16 sps:$4 sm:$0xff]   ;;  %v7403_v3 = vld [vmem:[%s8539_s4 + $0x564] ss:$16 sps:$4 sm:$0xff]  }
  0xb7   : > { %5107 = vmatprep.subr.bf16.mxu0 %v7319_v4  ;;  %5599 = vmatprep.subr.bf16.mxu1 %v7322_v5  ;;  %v7406_v4 = vld [vmem:[%s8539_s4 + $0x56c] ss:$16 sps:$4 sm:$0xff]   ;;  %v7401_v5 = vld [vmem:[%s8539_s4 + $0x560] ss:$16 sps:$4 sm:$0xff]  }
  0xba   : > { %5108 = vmatpush1.bf16.msra.mxu0 %v7317_v6  ;;  %5600 = vmatpush1.bf16.msra.mxu1 %v7320_v7  ;;  %v7404_v6 = vld [vmem:[%s8539_s4 + $0x568] ss:$16 sps:$4 sm:$0xff]   ;;  %v7409_v7 = vld [vmem:[%s8539_s4 + $0x584] ss:$16 sps:$4 sm:$0xff]  }
  0xbb   : > { %5109 = vmatprep.subr.bf16.mxu0 %v7325_v8  ;;  %5601 = vmatprep.subr.bf16.mxu1 %v7328_v9  ;;  %v7412_v8 = vld [vmem:[%s8539_s4 + $0x58c] ss:$16 sps:$4 sm:$0xff]   ;;  %v7407_v9 = vld [vmem:[%s8539_s4 + $0x580] ss:$16 sps:$4 sm:$0xff]  }
  0xbe   : > { %5110 = vmatpush1.bf16.msra.mxu0 %v7323_v11  ;;  %5602 = vmatpush1.bf16.msra.mxu1 %v7326_v12  ;;  %v7415_v11 = vld [vmem:[%s8539_s4 + $0x5a4] ss:$16 sps:$4 sm:$0xff]   ;;  %v7418_v12 = vld [vmem:[%s8539_s4 + $0x5ac] ss:$16 sps:$4 sm:$0xff]  }
  0xbf   : > { %5111 = vmatprep.subr.bf16.mxu0 %v7331_v13  ;;  %5603 = vmatprep.subr.bf16.mxu1 %v7334_v15  ;;  %v7413_v13 = vld [vmem:[%s8539_s4 + $0x5a0] ss:$16 sps:$4 sm:$0xff]   ;;  %v7416_v15 = vld [vmem:[%s8539_s4 + $0x5a8] ss:$16 sps:$4 sm:$0xff]  }
  0xc2   : > { %5112 = vmatpush1.bf16.msra.mxu0 %v7329_v17  ;;  %5604 = vmatpush1.bf16.msra.mxu1 %v7332_v53  ;;  %v7421_v17 = vld [vmem:[%s8539_s4 + $0x5c4] ss:$16 sps:$4 sm:$0xff]   ;;  %v7424_v53 = vld [vmem:[%s8539_s4 + $0x5cc] ss:$16 sps:$4 sm:$0xff]  }
  0xc3   : > { %5122 = vmatprep.subr.bf16.mxu0 %v7337_v18  ;;  %5614 = vmatprep.subr.bf16.mxu1 %v7340_v19  ;;  %v7419_v18 = vld [vmem:[%s8539_s4 + $0x5c0] ss:$16 sps:$4 sm:$0xff]   ;;  %v7422_v19 = vld [vmem:[%s8539_s4 + $0x5c8] ss:$16 sps:$4 sm:$0xff]  }
  0xc5   : > { %5114 = vmatmul.mubr.bf16.vlgmr.msra.gmra.mrb[0].mxu0 %v1074_v22  ;;  %5606 = vmatmul.mubr.bf16.vlgmr.msra.gmra.mrb[0].mxu1 %v1074_v22  ;;  %v7425_v22 = vld [vmem:[%s8539_s4 + $0x5e0] ss:$16 sps:$4 sm:$0xff]  }
  0xc6   : > { %5123 = vmatpush1.bf16.msra.mxu0 %v7335_v21  ;;  %5615 = vmatpush1.bf16.msra.mxu1 %v7338_v23  ;;  %v7430_v21 = vld [vmem:[%s8539_s4 + $0x5ec] ss:$16 sps:$4 sm:$0xff]   ;;  %v7428_v23 = vld [vmem:[%s8539_s4 + $0x5e8] ss:$16 sps:$4 sm:$0xff]  }
  0xc7   : > { %5124 = vmatprep.subr.bf16.mxu0 %v7343_v24  ;;  %5616 = vmatprep.subr.bf16.mxu1 %v7346_v25  ;;  %v7434_v24 = vld [vmem:[%s8539_s4 + $0x604] ss:$16 sps:$4 sm:$0xff]   ;;  %v7437_v25 = vld [vmem:[%s8539_s4 + $0x60c] ss:$16 sps:$4 sm:$0xff]  }
  0xc8   : > { %5154 = vmatprep.mubr.bf16.mxu0 %v8726_v26  ;;  %5646 = vmatprep.mubr.bf16.mxu1 %v8726_v26 }
  0xca   : > { %5125 = vmatpush1.bf16.msra.mxu0 %v7341_v27  ;;  %5617 = vmatpush1.bf16.msra.mxu1 %v7344_v14  ;;  %v7432_v27 = vld [vmem:[%s8539_s4 + $0x600] ss:$16 sps:$4 sm:$0xff]   ;;  %v8793_v14 = vrot.slane %v8711_v16, %v8613_v50 }
  0xcb   : > { %5126 = vmatprep.subr.bf16.mxu0 %v7349_v28  ;;  %5618 = vmatprep.subr.bf16.mxu1 %v7352_v29  ;;  %v7435_v28 = vld [vmem:[%s8539_s4 + $0x608] ss:$16 sps:$4 sm:$0xff]   ;;  %v7440_v29 = vld [vmem:[%s8539_s4 + $0x624] ss:$16 sps:$4 sm:$0xff]   ;;  %v7438_v16 = vld [vmem:[%s8539_s4 + $0x620] ss:$16 sps:$4 sm:$0xff]  }
  0xce   : > { %5127 = vmatpush1.bf16.msra.mxu0 %v7347_v30  ;;  %5619 = vmatpush1.bf16.msra.mxu1 %v7350_v31  ;;  %v7443_v30 = vld [vmem:[%s8539_s4 + $0x62c] ss:$16 sps:$4 sm:$0xff]   ;;  %v1077_v31 = vcombine.high %v8726_v26, %v8726_v26  ;;  %v7444_v26 = vld [vmem:[%s8539_s4 + $0x640] ss:$16 sps:$4 sm:$0xff]  }
  0xcf   : > { %5128 = vmatprep.subr.bf16.mxu0 %v7355_v32  ;;  %5620 = vmatprep.subr.bf16.mxu1 %v7358_v33  ;;  %v7441_v32 = vld [vmem:[%s8539_s4 + $0x628] ss:$16 sps:$4 sm:$0xff]   ;;  %v7446_v33 = vld [vmem:[%s8539_s4 + $0x644] ss:$16 sps:$4 sm:$0xff]  }
  0xd2   : > { %5129 = vmatpush1.bf16.msra.mxu0 %v7353_v34  ;;  %5621 = vmatpush1.bf16.msra.mxu1 %v7356_v35  ;;  %v7449_v34 = vld [vmem:[%s8539_s4 + $0x64c] ss:$16 sps:$4 sm:$0xff]   ;;  %v7447_v35 = vld [vmem:[%s8539_s4 + $0x648] ss:$16 sps:$4 sm:$0xff]  }
  0xd3   : > { %5130 = vmatprep.subr.bf16.mxu0 %v7361_v36  ;;  %5622 = vmatprep.subr.bf16.mxu1 %v7364_v37  ;;  %v7452_v36 = vld [vmem:[%s8539_s4 + $0x664] ss:$16 sps:$4 sm:$0xff]   ;;  %v7455_v37 = vld [vmem:[%s8539_s4 + $0x66c] ss:$16 sps:$4 sm:$0xff]  }
  0xd6   : > { %5131 = vmatpush1.bf16.msra.mxu0 %v7359_v38  ;;  %5623 = vmatpush1.bf16.msra.mxu1 %v7362_v39  ;;  %v7450_v38 = vld [vmem:[%s8539_s4 + $0x660] ss:$16 sps:$4 sm:$0xff]   ;;  %v7453_v39 = vld [vmem:[%s8539_s4 + $0x668] ss:$16 sps:$4 sm:$0xff]  }
  0xd7   : > { %5132 = vmatprep.subr.bf16.mxu0 %v7367_v40  ;;  %5624 = vmatprep.subr.bf16.mxu1 %v7370_v41  ;;  %v7458_v40 = vld [vmem:[%s8539_s4 + $0x684] ss:$16 sps:$4 sm:$0xff]   ;;  %v7461_v41 = vld [vmem:[%s8539_s4 + $0x68c] ss:$16 sps:$4 sm:$0xff]  }
  0xda   : > { %5133 = vmatpush1.bf16.msra.mxu0 %v7365_v42  ;;  %5625 = vmatpush1.bf16.msra.mxu1 %v7368_v43  ;;  %v7456_v42 = vld [vmem:[%s8539_s4 + $0x680] ss:$16 sps:$4 sm:$0xff]   ;;  %v7459_v43 = vld [vmem:[%s8539_s4 + $0x688] ss:$16 sps:$4 sm:$0xff]  }
  0xdb   : > { %5134 = vmatprep.subr.bf16.mxu0 %v7373_v45  ;;  %5626 = vmatprep.subr.bf16.mxu1 %v7376_v46  ;;  %v7464_v45 = vld [vmem:[%s8539_s4 + $0x6a4] ss:$16 sps:$4 sm:$0xff]   ;;  %v7467_v46 = vld [vmem:[%s8539_s4 + $0x6ac] ss:$16 sps:$4 sm:$0xff]  }
  0xde   : > { %5135 = vmatpush1.bf16.msra.mxu0 %v7371_v47  ;;  %5627 = vmatpush1.bf16.msra.mxu1 %v7374_v48  ;;  %v7462_v47 = vld [vmem:[%s8539_s4 + $0x6a0] ss:$16 sps:$4 sm:$0xff]   ;;  %v7465_v48 = vld [vmem:[%s8539_s4 + $0x6a8] ss:$16 sps:$4 sm:$0xff]  }
  0xdf   : > { %5136 = vmatprep.subr.bf16.mxu0 %v7379_v49  ;;  %5628 = vmatprep.subr.bf16.mxu1 %v7382_v51  ;;  %v7470_v49 = vld [vmem:[%s8539_s4 + $0x6c4] ss:$16 sps:$4 sm:$0xff]   ;;  %v7473_v51 = vld [vmem:[%s8539_s4 + $0x6cc] ss:$16 sps:$4 sm:$0xff]  }
  0xe2   : > { %5137 = vmatpush1.bf16.msra.mxu0 %v7377_v52  ;;  %5629 = vmatpush1.bf16.msra.mxu1 %v7380_v54  ;;  %v7468_v52 = vld [vmem:[%s8539_s4 + $0x6c0] ss:$16 sps:$4 sm:$0xff]   ;;  %v7471_v54 = vld [vmem:[%s8539_s4 + $0x6c8] ss:$16 sps:$4 sm:$0xff]  }
  0xe3   : > { %5138 = vmatprep.subr.bf16.mxu0 %v7385_v55  ;;  %5630 = vmatprep.subr.bf16.mxu1 %v7388_v56  ;;  %v7476_v55 = vld [vmem:[%s8539_s4 + $0x6e4] ss:$16 sps:$4 sm:$0xff]   ;;  %v7479_v56 = vld [vmem:[%s8539_s4 + $0x6ec] ss:$16 sps:$4 sm:$0xff]  }
  0xe6   : > { %5139 = vmatpush1.bf16.msra.mxu0 %v7383_v57  ;;  %5631 = vmatpush1.bf16.msra.mxu1 %v7386_v58  ;;  %v7474_v57 = vld [vmem:[%s8539_s4 + $0x6e0] ss:$16 sps:$4 sm:$0xff]   ;;  %v7477_v58 = vld [vmem:[%s8539_s4 + $0x6e8] ss:$16 sps:$4 sm:$0xff]  }
  0xe7   : > { %5140 = vmatprep.subr.bf16.mxu0 %v7391_v59  ;;  %5632 = vmatprep.subr.bf16.mxu1 %v7394_v60  ;;  %v7482_v59 = vld [vmem:[%s8539_s4 + $0x704] ss:$16 sps:$4 sm:$0xff]   ;;  %v7485_v60 = vld [vmem:[%s8539_s4 + $0x70c] ss:$16 sps:$4 sm:$0xff]  }
  0xea   : > { %5141 = vmatpush1.bf16.msra.mxu0 %v7389_v61  ;;  %5633 = vmatpush1.bf16.msra.mxu1 %v7392_v62  ;;  %v7480_v61 = vld [vmem:[%s8539_s4 + $0x700] ss:$16 sps:$4 sm:$0xff]   ;;  %v7483_v62 = vld [vmem:[%s8539_s4 + $0x708] ss:$16 sps:$4 sm:$0xff]  }
  0xeb   : > { %5142 = vmatprep.subr.bf16.mxu0 %v7397_v63  ;;  %5634 = vmatprep.subr.bf16.mxu1 %v7400_v0  ;;  %v7488_v63 = vld [vmem:[%s8539_s4 + $0x724] ss:$16 sps:$4 sm:$0xff]   ;;  %v7491_v0 = vld [vmem:[%s8539_s4 + $0x72c] ss:$16 sps:$4 sm:$0xff]  }
  0xee   : > { %5143 = vmatpush1.bf16.msra.mxu0 %v7395_v1  ;;  %5635 = vmatpush1.bf16.msra.mxu1 %v7398_v2  ;;  %v7486_v1 = vld [vmem:[%s8539_s4 + $0x720] ss:$16 sps:$4 sm:$0xff]   ;;  %v7489_v2 = vld [vmem:[%s8539_s4 + $0x728] ss:$16 sps:$4 sm:$0xff]  }
  0xef   : > { %5144 = vmatprep.subr.bf16.mxu0 %v7403_v3  ;;  %5636 = vmatprep.subr.bf16.mxu1 %v7406_v4  ;;  %v7494_v3 = vld [vmem:[%s8539_s4 + $0x744] ss:$16 sps:$4 sm:$0xff]   ;;  %v7497_v4 = vld [vmem:[%s8539_s4 + $0x74c] ss:$16 sps:$4 sm:$0xff]  }
  0xf2   : > { %5145 = vmatpush1.bf16.msra.mxu0 %v7401_v5  ;;  %5637 = vmatpush1.bf16.msra.mxu1 %v7404_v6  ;;  %v7492_v5 = vld [vmem:[%s8539_s4 + $0x740] ss:$16 sps:$4 sm:$0xff]   ;;  %v7495_v6 = vld [vmem:[%s8539_s4 + $0x748] ss:$16 sps:$4 sm:$0xff]  }
  0xf3   : > { %5146 = vmatprep.subr.bf16.mxu0 %v7409_v7  ;;  %5638 = vmatprep.subr.bf16.mxu1 %v7412_v8  ;;  %v7500_v7 = vld [vmem:[%s8539_s4 + $0x764] ss:$16 sps:$4 sm:$0xff]   ;;  %v7503_v8 = vld [vmem:[%s8539_s4 + $0x76c] ss:$16 sps:$4 sm:$0xff]  }
  0xf6   : > { %5147 = vmatpush1.bf16.msra.mxu0 %v7407_v9  ;;  %5639 = vmatpush1.bf16.msra.mxu1 %v7410_v10  ;;  %v7498_v9 = vld [vmem:[%s8539_s4 + $0x760] ss:$16 sps:$4 sm:$0xff]   ;;  %v7501_v10 = vld [vmem:[%s8539_s4 + $0x768] ss:$16 sps:$4 sm:$0xff]  }
  0xf7   : > { %5148 = vmatprep.subr.bf16.mxu0 %v7415_v11  ;;  %5640 = vmatprep.subr.bf16.mxu1 %v7418_v12  ;;  %v7506_v11 = vld [vmem:[%s8539_s4 + $0x784] ss:$16 sps:$4 sm:$0xff]   ;;  %v7509_v12 = vld [vmem:[%s8539_s4 + $0x78c] ss:$16 sps:$4 sm:$0xff]  }
  0xfa   : > { %5149 = vmatpush1.bf16.msra.mxu0 %v7413_v13  ;;  %5641 = vmatpush1.bf16.msra.mxu1 %v7416_v15  ;;  %v7504_v13 = vld [vmem:[%s8539_s4 + $0x780] ss:$16 sps:$4 sm:$0xff]   ;;  %v7507_v15 = vld [vmem:[%s8539_s4 + $0x788] ss:$16 sps:$4 sm:$0xff]  }
  0xfb   : > { %5150 = vmatprep.subr.bf16.mxu0 %v7421_v17  ;;  %5642 = vmatprep.subr.bf16.mxu1 %v7424_v53  ;;  %v7512_v17 = vld [vmem:[%s8539_s4 + $0x7a4] ss:$16 sps:$4 sm:$0xff]   ;;  %v7515_v53 = vld [vmem:[%s8539_s4 + $0x7ac] ss:$16 sps:$4 sm:$0xff]  }
  0xfe   : > { %5151 = vmatpush1.bf16.msra.mxu0 %v7419_v18  ;;  %5643 = vmatpush1.bf16.msra.mxu1 %v7422_v19  ;;  %v7510_v18 = vld [vmem:[%s8539_s4 + $0x7a0] ss:$16 sps:$4 sm:$0xff]   ;;  %v7513_v19 = vld [vmem:[%s8539_s4 + $0x7a8] ss:$16 sps:$4 sm:$0xff]  }
  0xff   : > { %5152 = vmatprep.subr.bf16.mxu0 %v7427_v20  ;;  %5644 = vmatprep.subr.bf16.mxu1 %v7430_v21  ;;  %v7518_v20 = vld [vmem:[%s8539_s4 + $0x7c4] ss:$16 sps:$4 sm:$0xff]   ;;  %v7521_v21 = vld [vmem:[%s8539_s4 + $0x7cc] ss:$16 sps:$4 sm:$0xff]  }
 0x102   : > { %5153 = vmatpush1.bf16.msra.mxu0 %v7425_v22  ;;  %5645 = vmatpush1.bf16.msra.mxu1 %v7428_v23  ;;  %v8855_v22 = vld.sshfl [vmem:[%s8557_s26 + $0x8] sm:$0xff pattern:$0x75316420]  ;;  %v7516_v23 = vld [vmem:[%s8539_s4 + $0x7c0] ss:$16 sps:$4 sm:$0xff]  }
 0x103   : > { %5163 = vmatprep.subr.bf16.mxu0 %v7434_v24  ;;  %5655 = vmatprep.subr.bf16.mxu1 %v7437_v25  ;;  %v7519_v24 = vld [vmem:[%s8539_s4 + $0x7c8] ss:$16 sps:$4 sm:$0xff]   ;;  %v7524_v25 = vld [vmem:[%s8539_s4 + $0x7e4] ss:$16 sps:$4 sm:$0xff]  }
 0x105   : > { %5155 = vmatmul.mubr.bf16.vlgmr.msra.gmra.mrb[0].mxu0 %v8793_v14  ;;  %5647 = vmatmul.mubr.bf16.vlgmr.msra.gmra.mrb[0].mxu1 %v8793_v14 }
 0x106   : > { %5164 = vmatpush1.bf16.msra.mxu0 %v7432_v27  ;;  %5656 = vmatpush1.bf16.msra.mxu1 %v7435_v28  ;;  %v7527_v27 = vld [vmem:[%s8539_s4 + $0x7ec] ss:$16 sps:$4 sm:$0xff]   ;;  %v7522_v28 = vld [vmem:[%s8539_s4 + $0x7e0] ss:$16 sps:$4 sm:$0xff]  }
 0x107   : > { %5165 = vmatprep.subr.bf16.mxu0 %v7440_v29  ;;  %5657 = vmatprep.subr.bf16.mxu1 %v7443_v30  ;;  %v7525_v29 = vld [vmem:[%s8539_s4 + $0x7e8] ss:$16 sps:$4 sm:$0xff]   ;;  %v7530_v30 = vld [vmem:[%s8539_s4 + $0x804] ss:$16 sps:$4 sm:$0xff]  }
 0x108   : > { %5195 = vmatprep.mubr.bf16.mxu0 %v1077_v31  ;;  %5687 = vmatprep.mubr.bf16.mxu1 %v1077_v31  ;;  %v7533_v31 = vld [vmem:[%s8539_s4 + $0x80c] ss:$16 sps:$4 sm:$0xff]  }
 0x10a   : > { %5166 = vmatpush1.bf16.msra.mxu0 %v7438_v16  ;;  %5658 = vmatpush1.bf16.msra.mxu1 %v7441_v32  ;;  %v1093_v16 = vcombine.high %v8855_v22, %v8855_v22  ;;  %v1075_v32 = vcombine.high %v8793_v14, %v8793_v14  ;;  %v7534_v14 = vld [vmem:[%s8539_s4 + $0x820] ss:$16 sps:$4 sm:$0xff]  }
 0x10b   : > { %5167 = vmatprep.subr.bf16.mxu0 %v7446_v33  ;;  %5659 = vmatprep.subr.bf16.mxu1 %v7449_v34  ;;  %v7528_v33 = vld [vmem:[%s8539_s4 + $0x800] ss:$16 sps:$4 sm:$0xff]   ;;  %v7531_v34 = vld [vmem:[%s8539_s4 + $0x808] ss:$16 sps:$4 sm:$0xff]  }
 0x10e   : > { %5168 = vmatpush1.bf16.msra.mxu0 %v7444_v26  ;;  %5660 = vmatpush1.bf16.msra.mxu1 %v7447_v35  ;;  %v7536_v26 = vld [vmem:[%s8539_s4 + $0x824] ss:$16 sps:$4 sm:$0xff]   ;;  %v7539_v35 = vld [vmem:[%s8539_s4 + $0x82c] ss:$16 sps:$4 sm:$0xff]  }
 0x10f   : > { %5169 = vmatprep.subr.bf16.mxu0 %v7452_v36  ;;  %5661 = vmatprep.subr.bf16.mxu1 %v7455_v37  ;;  %v8874_v36 = vrot.slane %v1093_v16, %v8613_v50  ;;  %v7537_v37 = vld [vmem:[%s8539_s4 + $0x828] ss:$16 sps:$4 sm:$0xff]   ;;  %v7620_v16 = vld [vmem:[%s8539_s4 + $0x9e4] ss:$16 sps:$4 sm:$0xff]  }
 0x112   : > { %5170 = vmatpush1.bf16.msra.mxu0 %v7450_v38  ;;  %5662 = vmatpush1.bf16.msra.mxu1 %v7453_v39  ;;  %v7542_v38 = vld [vmem:[%s8539_s4 + $0x844] ss:$16 sps:$4 sm:$0xff]   ;;  %v7545_v39 = vld [vmem:[%s8539_s4 + $0x84c] ss:$16 sps:$4 sm:$0xff]  }
 0x113   : > { %5171 = vmatprep.subr.bf16.mxu0 %v7458_v40  ;;  %5663 = vmatprep.subr.bf16.mxu1 %v7461_v41  ;;  %v7540_v40 = vld [vmem:[%s8539_s4 + $0x840] ss:$16 sps:$4 sm:$0xff]   ;;  %v7543_v41 = vld [vmem:[%s8539_s4 + $0x848] ss:$16 sps:$4 sm:$0xff]  }
 0x116   : > { %5172 = vmatpush1.bf16.msra.mxu0 %v7456_v42  ;;  %5664 = vmatpush1.bf16.msra.mxu1 %v7459_v43  ;;  %v7548_v42 = vld [vmem:[%s8539_s4 + $0x864] ss:$16 sps:$4 sm:$0xff]   ;;  %v7551_v43 = vld [vmem:[%s8539_s4 + $0x86c] ss:$16 sps:$4 sm:$0xff]  }
 0x117   : > { %5173 = vmatprep.subr.bf16.mxu0 %v7464_v45  ;;  %5665 = vmatprep.subr.bf16.mxu1 %v7467_v46  ;;  %v7546_v45 = vld [vmem:[%s8539_s4 + $0x860] ss:$16 sps:$4 sm:$0xff]   ;;  %v7549_v46 = vld [vmem:[%s8539_s4 + $0x868] ss:$16 sps:$4 sm:$0xff]  }
 0x11a   : > { %5174 = vmatpush1.bf16.msra.mxu0 %v7462_v47  ;;  %5666 = vmatpush1.bf16.msra.mxu1 %v7465_v48  ;;  %v7554_v47 = vld [vmem:[%s8539_s4 + $0x884] ss:$16 sps:$4 sm:$0xff]   ;;  %v7557_v48 = vld [vmem:[%s8539_s4 + $0x88c] ss:$16 sps:$4 sm:$0xff]  }
 0x11b   : > { %5175 = vmatprep.subr.bf16.mxu0 %v7470_v49  ;;  %5667 = vmatprep.subr.bf16.mxu1 %v7473_v51  ;;  %v7552_v49 = vld [vmem:[%s8539_s4 + $0x880] ss:$16 sps:$4 sm:$0xff]   ;;  %v7555_v51 = vld [vmem:[%s8539_s4 + $0x888] ss:$16 sps:$4 sm:$0xff]  }
 0x11e   : > { %5176 = vmatpush1.bf16.msra.mxu0 %v7468_v52  ;;  %5668 = vmatpush1.bf16.msra.mxu1 %v7471_v54  ;;  %v7560_v52 = vld [vmem:[%s8539_s4 + $0x8a4] ss:$16 sps:$4 sm:$0xff]   ;;  %v7563_v54 = vld [vmem:[%s8539_s4 + $0x8ac] ss:$16 sps:$4 sm:$0xff]  }
 0x11f   : > { %5177 = vmatprep.subr.bf16.mxu0 %v7476_v55  ;;  %5669 = vmatprep.subr.bf16.mxu1 %v7479_v56  ;;  %v7558_v55 = vld [vmem:[%s8539_s4 + $0x8a0] ss:$16 sps:$4 sm:$0xff]   ;;  %v7561_v56 = vld [vmem:[%s8539_s4 + $0x8a8] ss:$16 sps:$4 sm:$0xff]  }
 0x122   : > { %5178 = vmatpush1.bf16.msra.mxu0 %v7474_v57  ;;  %5670 = vmatpush1.bf16.msra.mxu1 %v7477_v58  ;;  %v7566_v57 = vld [vmem:[%s8539_s4 + $0x8c4] ss:$16 sps:$4 sm:$0xff]   ;;  %v7569_v58 = vld [vmem:[%s8539_s4 + $0x8cc] ss:$16 sps:$4 sm:$0xff]  }
 0x123   : > { %5179 = vmatprep.subr.bf16.mxu0 %v7482_v59  ;;  %5671 = vmatprep.subr.bf16.mxu1 %v7485_v60  ;;  %v7564_v59 = vld [vmem:[%s8539_s4 + $0x8c0] ss:$16 sps:$4 sm:$0xff]   ;;  %v7567_v60 = vld [vmem:[%s8539_s4 + $0x8c8] ss:$16 sps:$4 sm:$0xff]  }
 0x126   : > { %5180 = vmatpush1.bf16.msra.mxu0 %v7480_v61  ;;  %5672 = vmatpush1.bf16.msra.mxu1 %v7483_v62  ;;  %v7572_v61 = vld [vmem:[%s8539_s4 + $0x8e4] ss:$16 sps:$4 sm:$0xff]   ;;  %v7575_v62 = vld [vmem:[%s8539_s4 + $0x8ec] ss:$16 sps:$4 sm:$0xff]  }
 0x127   : > { %5181 = vmatprep.subr.bf16.mxu0 %v7488_v63  ;;  %5673 = vmatprep.subr.bf16.mxu1 %v7491_v0  ;;  %v7570_v63 = vld [vmem:[%s8539_s4 + $0x8e0] ss:$16 sps:$4 sm:$0xff]   ;;  %v7573_v0 = vld [vmem:[%s8539_s4 + $0x8e8] ss:$16 sps:$4 sm:$0xff]  }
 0x12a   : > { %5182 = vmatpush1.bf16.msra.mxu0 %v7486_v1  ;;  %5674 = vmatpush1.bf16.msra.mxu1 %v7489_v2  ;;  %v7578_v1 = vld [vmem:[%s8539_s4 + $0x904] ss:$16 sps:$4 sm:$0xff]   ;;  %v7581_v2 = vld [vmem:[%s8539_s4 + $0x90c] ss:$16 sps:$4 sm:$0xff]  }
 0x12b   : > { %5183 = vmatprep.subr.bf16.mxu0 %v7494_v3  ;;  %5675 = vmatprep.subr.bf16.mxu1 %v7497_v4  ;;  %v7576_v3 = vld [vmem:[%s8539_s4 + $0x900] ss:$16 sps:$4 sm:$0xff]   ;;  %v7579_v4 = vld [vmem:[%s8539_s4 + $0x908] ss:$16 sps:$4 sm:$0xff]  }
 0x12e   : > { %5184 = vmatpush1.bf16.msra.mxu0 %v7492_v5  ;;  %5676 = vmatpush1.bf16.msra.mxu1 %v7495_v6  ;;  %v7584_v5 = vld [vmem:[%s8539_s4 + $0x924] ss:$16 sps:$4 sm:$0xff]   ;;  %v7587_v6 = vld [vmem:[%s8539_s4 + $0x92c] ss:$16 sps:$4 sm:$0xff]  }
 0x12f   : > { %5185 = vmatprep.subr.bf16.mxu0 %v7500_v7  ;;  %5677 = vmatprep.subr.bf16.mxu1 %v7503_v8  ;;  %v7582_v7 = vld [vmem:[%s8539_s4 + $0x920] ss:$16 sps:$4 sm:$0xff]   ;;  %v7585_v8 = vld [vmem:[%s8539_s4 + $0x928] ss:$16 sps:$4 sm:$0xff]  }
 0x132   : > { %5186 = vmatpush1.bf16.msra.mxu0 %v7498_v9  ;;  %5678 = vmatpush1.bf16.msra.mxu1 %v7501_v10  ;;  %v7590_v9 = vld [vmem:[%s8539_s4 + $0x944] ss:$16 sps:$4 sm:$0xff]   ;;  %v7593_v10 = vld [vmem:[%s8539_s4 + $0x94c] ss:$16 sps:$4 sm:$0xff]  }
 0x133   : > { %5187 = vmatprep.subr.bf16.mxu0 %v7506_v11  ;;  %5679 = vmatprep.subr.bf16.mxu1 %v7509_v12  ;;  %v7588_v11 = vld [vmem:[%s8539_s4 + $0x940] ss:$16 sps:$4 sm:$0xff]   ;;  %v7591_v12 = vld [vmem:[%s8539_s4 + $0x948] ss:$16 sps:$4 sm:$0xff]  }
 0x136   : > { %5188 = vmatpush1.bf16.msra.mxu0 %v7504_v13  ;;  %5680 = vmatpush1.bf16.msra.mxu1 %v7507_v15  ;;  %v7596_v13 = vld [vmem:[%s8539_s4 + $0x964] ss:$16 sps:$4 sm:$0xff]   ;;  %v7599_v15 = vld [vmem:[%s8539_s4 + $0x96c] ss:$16 sps:$4 sm:$0xff]  }
 0x137   : > { %5189 = vmatprep.subr.bf16.mxu0 %v7512_v17  ;;  %5681 = vmatprep.subr.bf16.mxu1 %v7515_v53  ;;  %v7594_v17 = vld [vmem:[%s8539_s4 + $0x960] ss:$16 sps:$4 sm:$0xff]   ;;  %v7597_v53 = vld [vmem:[%s8539_s4 + $0x968] ss:$16 sps:$4 sm:$0xff]  }
 0x13a   : > { %5190 = vmatpush1.bf16.msra.mxu0 %v7510_v18  ;;  %5682 = vmatpush1.bf16.msra.mxu1 %v7513_v19  ;;  %v7602_v18 = vld [vmem:[%s8539_s4 + $0x984] ss:$16 sps:$4 sm:$0xff]   ;;  %v7605_v19 = vld [vmem:[%s8539_s4 + $0x98c] ss:$16 sps:$4 sm:$0xff]  }
 0x13b   : > { %5191 = vmatprep.subr.bf16.mxu0 %v7518_v20  ;;  %5683 = vmatprep.subr.bf16.mxu1 %v7521_v21  ;;  %v7600_v20 = vld [vmem:[%s8539_s4 + $0x980] ss:$16 sps:$4 sm:$0xff]   ;;  %v7603_v21 = vld [vmem:[%s8539_s4 + $0x988] ss:$16 sps:$4 sm:$0xff]  }
 0x13e   : > { %5192 = vmatpush1.bf16.msra.mxu0 %v7516_v23  ;;  %5684 = vmatpush1.bf16.msra.mxu1 %v7519_v24  ;;  %v7608_v23 = vld [vmem:[%s8539_s4 + $0x9a4] ss:$16 sps:$4 sm:$0xff]   ;;  %v7611_v24 = vld [vmem:[%s8539_s4 + $0x9ac] ss:$16 sps:$4 sm:$0xff]  }
 0x13f   : > { %5193 = vmatprep.subr.bf16.mxu0 %v7524_v25  ;;  %5685 = vmatprep.subr.bf16.mxu1 %v7527_v27  ;;  %v7606_v25 = vld [vmem:[%s8539_s4 + $0x9a0] ss:$16 sps:$4 sm:$0xff]   ;;  %v7609_v27 = vld [vmem:[%s8539_s4 + $0x9a8] ss:$16 sps:$4 sm:$0xff]  }
 0x142   : > { %5194 = vmatpush1.bf16.msra.mxu0 %v7522_v28  ;;  %5686 = vmatpush1.bf16.msra.mxu1 %v7525_v29  ;;  %v7614_v28 = vld [vmem:[%s8539_s4 + $0x9c4] ss:$16 sps:$4 sm:$0xff]   ;;  %v7617_v29 = vld [vmem:[%s8539_s4 + $0x9cc] ss:$16 sps:$4 sm:$0xff]  }
 0x143   : > { %5204 = vmatprep.subr.bf16.mxu0 %v7530_v30  ;;  %5696 = vmatprep.subr.bf16.mxu1 %v7533_v31  ;;  %v7612_v30 = vld [vmem:[%s8539_s4 + $0x9c0] ss:$16 sps:$4 sm:$0xff]   ;;  %v7615_v31 = vld [vmem:[%s8539_s4 + $0x9c8] ss:$16 sps:$4 sm:$0xff]  }
 0x145   : > { %5196 = vmatmul.mubr.bf16.vlgmr.msra.gmra.mrb[0].mxu0 %v1075_v32  ;;  %5688 = vmatmul.mubr.bf16.vlgmr.msra.gmra.mrb[0].mxu1 %v1075_v32  ;;  %v7623_v32 = vld [vmem:[%s8539_s4 + $0x9ec] ss:$16 sps:$4 sm:$0xff]  }
 0x146   : > { %5205 = vmatpush1.bf16.msra.mxu0 %v7528_v33  ;;  %5697 = vmatpush1.bf16.msra.mxu1 %v7531_v34  ;;  %v7618_v33 = vld [vmem:[%s8539_s4 + $0x9e0] ss:$16 sps:$4 sm:$0xff]   ;;  %v7621_v34 = vld [vmem:[%s8539_s4 + $0x9e8] ss:$16 sps:$4 sm:$0xff]  }
 0x147   : > { %5206 = vmatprep.subr.bf16.mxu0 %v7536_v26  ;;  %5698 = vmatprep.subr.bf16.mxu1 %v7539_v35  ;;  %v7626_v26 = vld [vmem:[%s8539_s4 + $0xa04] ss:$16 sps:$4 sm:$0xff]   ;;  %v7629_v35 = vld [vmem:[%s8539_s4 + $0xa0c] ss:$16 sps:$4 sm:$0xff]  }
 0x148   : > { %5236 = vmatprep.mubr.bf16.mxu0 %v8874_v36  ;;  %5728 = vmatprep.mubr.bf16.mxu1 %v8874_v36 }
 0x14a   : > { %5207 = vmatpush1.bf16.msra.mxu0 %v7534_v14  ;;  %5699 = vmatpush1.bf16.msra.mxu1 %v7537_v37  ;;  %v8940_v14 = vrot.slane %v8855_v22, %v8613_v50  ;;  %v7624_v37 = vld [vmem:[%s8539_s4 + $0xa00] ss:$16 sps:$4 sm:$0xff]  }
 0x14b   : > { %5208 = vmatprep.subr.bf16.mxu0 %v7542_v38  ;;  %5700 = vmatprep.subr.bf16.mxu1 %v7545_v39  ;;  %v7627_v38 = vld [vmem:[%s8539_s4 + $0xa08] ss:$16 sps:$4 sm:$0xff]   ;;  %v7632_v39 = vld [vmem:[%s8539_s4 + $0xa24] ss:$16 sps:$4 sm:$0xff]   ;;  %v7630_v22 = vld [vmem:[%s8539_s4 + $0xa20] ss:$16 sps:$4 sm:$0xff]  }
 0x14e   : > { %5209 = vmatpush1.bf16.msra.mxu0 %v7540_v40  ;;  %5701 = vmatpush1.bf16.msra.mxu1 %v7543_v41  ;;  %v7635_v40 = vld [vmem:[%s8539_s4 + $0xa2c] ss:$16 sps:$4 sm:$0xff]   ;;  %v1125_v41 = vcombine.high %v8874_v36, %v8874_v36  ;;  %v7636_v36 = vld [vmem:[%s8539_s4 + $0xa40] ss:$16 sps:$4 sm:$0xff]  }
 0x14f   : > { %5210 = vmatprep.subr.bf16.mxu0 %v7548_v42  ;;  %5702 = vmatprep.subr.bf16.mxu1 %v7551_v43  ;;  %v7633_v42 = vld [vmem:[%s8539_s4 + $0xa28] ss:$16 sps:$4 sm:$0xff]   ;;  %v7638_v43 = vld [vmem:[%s8539_s4 + $0xa44] ss:$16 sps:$4 sm:$0xff]  }
 0x152   : > { %5211 = vmatpush1.bf16.msra.mxu0 %v7546_v45  ;;  %5703 = vmatpush1.bf16.msra.mxu1 %v7549_v46  ;;  %v7641_v45 = vld [vmem:[%s8539_s4 + $0xa4c] ss:$16 sps:$4 sm:$0xff]   ;;  %v7639_v46 = vld [vmem:[%s8539_s4 + $0xa48] ss:$16 sps:$4 sm:$0xff]  }
 0x153   : > { %5212 = vmatprep.subr.bf16.mxu0 %v7554_v47  ;;  %5704 = vmatprep.subr.bf16.mxu1 %v7557_v48  ;;  %v7644_v47 = vld [vmem:[%s8539_s4 + $0xa64] ss:$16 sps:$4 sm:$0xff]   ;;  %v7647_v48 = vld [vmem:[%s8539_s4 + $0xa6c] ss:$16 sps:$4 sm:$0xff]  }
 0x156   : > { %5213 = vmatpush1.bf16.msra.mxu0 %v7552_v49  ;;  %5705 = vmatpush1.bf16.msra.mxu1 %v7555_v51  ;;  %v7642_v49 = vld [vmem:[%s8539_s4 + $0xa60] ss:$16 sps:$4 sm:$0xff]   ;;  %v7645_v51 = vld [vmem:[%s8539_s4 + $0xa68] ss:$16 sps:$4 sm:$0xff]  }
 0x157   : > { %5214 = vmatprep.subr.bf16.mxu0 %v7560_v52  ;;  %5706 = vmatprep.subr.bf16.mxu1 %v7563_v54  ;;  %v7650_v52 = vld [vmem:[%s8539_s4 + $0xa84] ss:$16 sps:$4 sm:$0xff]   ;;  %v7653_v54 = vld [vmem:[%s8539_s4 + $0xa8c] ss:$16 sps:$4 sm:$0xff]  }
 0x15a   : > { %5215 = vmatpush1.bf16.msra.mxu0 %v7558_v55  ;;  %5707 = vmatpush1.bf16.msra.mxu1 %v7561_v56  ;;  %v7648_v55 = vld [vmem:[%s8539_s4 + $0xa80] ss:$16 sps:$4 sm:$0xff]   ;;  %v7651_v56 = vld [vmem:[%s8539_s4 + $0xa88] ss:$16 sps:$4 sm:$0xff]  }
 0x15b   : > { %5216 = vmatprep.subr.bf16.mxu0 %v7566_v57  ;;  %5708 = vmatprep.subr.bf16.mxu1 %v7569_v58  ;;  %v7656_v57 = vld [vmem:[%s8539_s4 + $0xaa4] ss:$16 sps:$4 sm:$0xff]   ;;  %v7659_v58 = vld [vmem:[%s8539_s4 + $0xaac] ss:$16 sps:$4 sm:$0xff]  }
 0x15e   : > { %5217 = vmatpush1.bf16.msra.mxu0 %v7564_v59  ;;  %5709 = vmatpush1.bf16.msra.mxu1 %v7567_v60  ;;  %v7654_v59 = vld [vmem:[%s8539_s4 + $0xaa0] ss:$16 sps:$4 sm:$0xff]   ;;  %v7657_v60 = vld [vmem:[%s8539_s4 + $0xaa8] ss:$16 sps:$4 sm:$0xff]  }
 0x15f   : > { %5218 = vmatprep.subr.bf16.mxu0 %v7572_v61  ;;  %5710 = vmatprep.subr.bf16.mxu1 %v7575_v62  ;;  %v7662_v61 = vld [vmem:[%s8539_s4 + $0xac4] ss:$16 sps:$4 sm:$0xff]   ;;  %v7665_v62 = vld [vmem:[%s8539_s4 + $0xacc] ss:$16 sps:$4 sm:$0xff]  }
 0x162   : > { %5219 = vmatpush1.bf16.msra.mxu0 %v7570_v63  ;;  %5711 = vmatpush1.bf16.msra.mxu1 %v7573_v0  ;;  %v7660_v63 = vld [vmem:[%s8539_s4 + $0xac0] ss:$16 sps:$4 sm:$0xff]   ;;  %v7663_v0 = vld [vmem:[%s8539_s4 + $0xac8] ss:$16 sps:$4 sm:$0xff]  }
 0x163   : > { %5220 = vmatprep.subr.bf16.mxu0 %v7578_v1  ;;  %5712 = vmatprep.subr.bf16.mxu1 %v7581_v2  ;;  %v7668_v1 = vld [vmem:[%s8539_s4 + $0xae4] ss:$16 sps:$4 sm:$0xff]   ;;  %v7671_v2 = vld [vmem:[%s8539_s4 + $0xaec] ss:$16 sps:$4 sm:$0xff]  }
 0x166   : > { %5221 = vmatpush1.bf16.msra.mxu0 %v7576_v3  ;;  %5713 = vmatpush1.bf16.msra.mxu1 %v7579_v4  ;;  %v7666_v3 = vld [vmem:[%s8539_s4 + $0xae0] ss:$16 sps:$4 sm:$0xff]   ;;  %v7669_v4 = vld [vmem:[%s8539_s4 + $0xae8] ss:$16 sps:$4 sm:$0xff]  }
 0x167   : > { %5222 = vmatprep.subr.bf16.mxu0 %v7584_v5  ;;  %5714 = vmatprep.subr.bf16.mxu1 %v7587_v6  ;;  %v7674_v5 = vld [vmem:[%s8539_s4 + $0xb04] ss:$16 sps:$4 sm:$0xff]   ;;  %v7677_v6 = vld [vmem:[%s8539_s4 + $0xb0c] ss:$16 sps:$4 sm:$0xff]  }
 0x16a   : > { %5223 = vmatpush1.bf16.msra.mxu0 %v7582_v7  ;;  %5715 = vmatpush1.bf16.msra.mxu1 %v7585_v8  ;;  %v7672_v7 = vld [vmem:[%s8539_s4 + $0xb00] ss:$16 sps:$4 sm:$0xff]   ;;  %v7675_v8 = vld [vmem:[%s8539_s4 + $0xb08] ss:$16 sps:$4 sm:$0xff]  }
 0x16b   : > { %5224 = vmatprep.subr.bf16.mxu0 %v7590_v9  ;;  %5716 = vmatprep.subr.bf16.mxu1 %v7593_v10  ;;  %v7680_v9 = vld [vmem:[%s8539_s4 + $0xb24] ss:$16 sps:$4 sm:$0xff]   ;;  %v7683_v10 = vld [vmem:[%s8539_s4 + $0xb2c] ss:$16 sps:$4 sm:$0xff]  }
 0x16e   : > { %5225 = vmatpush1.bf16.msra.mxu0 %v7588_v11  ;;  %5717 = vmatpush1.bf16.msra.mxu1 %v7591_v12  ;;  %v7678_v11 = vld [vmem:[%s8539_s4 + $0xb20] ss:$16 sps:$4 sm:$0xff]   ;;  %v7681_v12 = vld [vmem:[%s8539_s4 + $0xb28] ss:$16 sps:$4 sm:$0xff]  }
 0x16f   : > { %5226 = vmatprep.subr.bf16.mxu0 %v7596_v13  ;;  %5718 = vmatprep.subr.bf16.mxu1 %v7599_v15  ;;  %v7686_v13 = vld [vmem:[%s8539_s4 + $0xb44] ss:$16 sps:$4 sm:$0xff]   ;;  %v7689_v15 = vld [vmem:[%s8539_s4 + $0xb4c] ss:$16 sps:$4 sm:$0xff]  }
 0x172   : > { %5227 = vmatpush1.bf16.msra.mxu0 %v7594_v17  ;;  %5719 = vmatpush1.bf16.msra.mxu1 %v7597_v53  ;;  %v7684_v17 = vld [vmem:[%s8539_s4 + $0xb40] ss:$16 sps:$4 sm:$0xff]   ;;  %v7687_v53 = vld [vmem:[%s8539_s4 + $0xb48] ss:$16 sps:$4 sm:$0xff]  }
 0x173   : > { %5228 = vmatprep.subr.bf16.mxu0 %v7602_v18  ;;  %5720 = vmatprep.subr.bf16.mxu1 %v7605_v19  ;;  %v7692_v18 = vld [vmem:[%s8539_s4 + $0xb64] ss:$16 sps:$4 sm:$0xff]   ;;  %v7695_v19 = vld [vmem:[%s8539_s4 + $0xb6c] ss:$16 sps:$4 sm:$0xff]  }
 0x176   : > { %5229 = vmatpush1.bf16.msra.mxu0 %v7600_v20  ;;  %5721 = vmatpush1.bf16.msra.mxu1 %v7603_v21  ;;  %v7690_v20 = vld [vmem:[%s8539_s4 + $0xb60] ss:$16 sps:$4 sm:$0xff]   ;;  %v7693_v21 = vld [vmem:[%s8539_s4 + $0xb68] ss:$16 sps:$4 sm:$0xff]  }
 0x177   : > { %5230 = vmatprep.subr.bf16.mxu0 %v7608_v23  ;;  %5722 = vmatprep.subr.bf16.mxu1 %v7611_v24  ;;  %v7698_v23 = vld [vmem:[%s8539_s4 + $0xb84] ss:$16 sps:$4 sm:$0xff]   ;;  %v7701_v24 = vld [vmem:[%s8539_s4 + $0xb8c] ss:$16 sps:$4 sm:$0xff]  }
 0x17a   : > { %5231 = vmatpush1.bf16.msra.mxu0 %v7606_v25  ;;  %5723 = vmatpush1.bf16.msra.mxu1 %v7609_v27  ;;  %v7696_v25 = vld [vmem:[%s8539_s4 + $0xb80] ss:$16 sps:$4 sm:$0xff]   ;;  %v7699_v27 = vld [vmem:[%s8539_s4 + $0xb88] ss:$16 sps:$4 sm:$0xff]  }
 0x17b   : > { %5232 = vmatprep.subr.bf16.mxu0 %v7614_v28  ;;  %5724 = vmatprep.subr.bf16.mxu1 %v7617_v29  ;;  %v7704_v28 = vld [vmem:[%s8539_s4 + $0xba4] ss:$16 sps:$4 sm:$0xff]   ;;  %v7707_v29 = vld [vmem:[%s8539_s4 + $0xbac] ss:$16 sps:$4 sm:$0xff]  }
 0x17e   : > { %5233 = vmatpush1.bf16.msra.mxu0 %v7612_v30  ;;  %5725 = vmatpush1.bf16.msra.mxu1 %v7615_v31  ;;  %v7702_v30 = vld [vmem:[%s8539_s4 + $0xba0] ss:$16 sps:$4 sm:$0xff]   ;;  %v7705_v31 = vld [vmem:[%s8539_s4 + $0xba8] ss:$16 sps:$4 sm:$0xff]  }
 0x17f   : > { %5234 = vmatprep.subr.bf16.mxu0 %v7620_v16  ;;  %5726 = vmatprep.subr.bf16.mxu1 %v7623_v32  ;;  %v7710_v16 = vld [vmem:[%s8539_s4 + $0xbc4] ss:$16 sps:$4 sm:$0xff]   ;;  %v7713_v32 = vld [vmem:[%s8539_s4 + $0xbcc] ss:$16 sps:$4 sm:$0xff]  }
 0x182   : > { %5235 = vmatpush1.bf16.msra.mxu0 %v7618_v33  ;;  %5727 = vmatpush1.bf16.msra.mxu1 %v7621_v34  ;;  %v8298_v33 = vld [vmem:[%s8557_s26 + $0x8] sm:$0xff] }
 0x183   : > { %5245 = vmatprep.subr.bf16.mxu0 %v7626_v26  ;;  %5737 = vmatprep.subr.bf16.mxu1 %v7629_v35  ;;  %v1078_v34 = vcombine.high %v8298_v33, %v8298_v33  ;;  %v7708_v26 = vld [vmem:[%s8539_s4 + $0xbc0] ss:$16 sps:$4 sm:$0xff]   ;;  %v7711_v35 = vld [vmem:[%s8539_s4 + $0xbc8] ss:$16 sps:$4 sm:$0xff]  }
 0x184   : > { %v7792_v33 = vld [vmem:[%s8539_s4 + $0xd80] ss:$16 sps:$4 sm:$0xff]  }
 0x185   : > { %5237 = vmatmul.mubr.bf16.vlgmr.msra.gmra.mrb[0].mxu0 %v8940_v14  ;;  %5729 = vmatmul.mubr.bf16.vlgmr.msra.gmra.mrb[0].mxu1 %v8940_v14 }
 0x186   : > { %5246 = vmatpush1.bf16.msra.mxu0 %v7624_v37  ;;  %5738 = vmatpush1.bf16.msra.mxu1 %v7627_v38  ;;  %v7716_v37 = vld [vmem:[%s8539_s4 + $0xbe4] ss:$16 sps:$4 sm:$0xff]   ;;  %v7719_v38 = vld [vmem:[%s8539_s4 + $0xbec] ss:$16 sps:$4 sm:$0xff]  }
 0x187   : > { %5247 = vmatprep.subr.bf16.mxu0 %v7632_v39  ;;  %5739 = vmatprep.subr.bf16.mxu1 %v7635_v40  ;;  %v9008_v39 = vrot.slane %v1078_v34, %v8613_v50  ;;  %v7714_v40 = vld [vmem:[%s8539_s4 + $0xbe0] ss:$16 sps:$4 sm:$0xff]   ;;  %v7795_v34 = vld [vmem:[%s8539_s4 + $0xd88] ss:$16 sps:$4 sm:$0xff]  }
 0x188   : > { %5277 = vmatprep.mubr.bf16.mxu0 %v1125_v41  ;;  %5769 = vmatprep.mubr.bf16.mxu1 %v1125_v41  ;;  %v7717_v41 = vld [vmem:[%s8539_s4 + $0xbe8] ss:$16 sps:$4 sm:$0xff]  }
 0x18a   : > { %5248 = vmatpush1.bf16.msra.mxu0 %v7630_v22  ;;  %5740 = vmatpush1.bf16.msra.mxu1 %v7633_v42  ;;  %v7722_v22 = vld [vmem:[%s8539_s4 + $0xc04] ss:$16 sps:$4 sm:$0xff]   ;;  %v7725_v42 = vld [vmem:[%s8539_s4 + $0xc0c] ss:$16 sps:$4 sm:$0xff]  }
 0x18b   : > { %5249 = vmatprep.subr.bf16.mxu0 %v7638_v43  ;;  %5741 = vmatprep.subr.bf16.mxu1 %v7641_v45  ;;  %v1094_v43 = vcombine.high %v9008_v39, %v9008_v39  ;;  %v1123_v45 = vcombine.high %v8940_v14, %v8940_v14  ;;  %v7726_v14 = vld [vmem:[%s8539_s4 + $0xc20] ss:$16 sps:$4 sm:$0xff]  }
 0x18e   : > { %5250 = vmatpush1.bf16.msra.mxu0 %v7636_v36  ;;  %5742 = vmatpush1.bf16.msra.mxu1 %v7639_v46  ;;  %v7720_v36 = vld [vmem:[%s8539_s4 + $0xc00] ss:$16 sps:$4 sm:$0xff]   ;;  %v7723_v46 = vld [vmem:[%s8539_s4 + $0xc08] ss:$16 sps:$4 sm:$0xff]  }
 0x18f   : > { %5251 = vmatprep.subr.bf16.mxu0 %v7644_v47  ;;  %5743 = vmatprep.subr.bf16.mxu1 %v7647_v48  ;;  %v7728_v47 = vld [vmem:[%s8539_s4 + $0xc24] ss:$16 sps:$4 sm:$0xff]   ;;  %v7731_v48 = vld [vmem:[%s8539_s4 + $0xc2c] ss:$16 sps:$4 sm:$0xff]  }
 0x192   : > { %5252 = vmatpush1.bf16.msra.mxu0 %v7642_v49  ;;  %5744 = vmatpush1.bf16.msra.mxu1 %v7645_v51  ;;  %v9023_v49 = vrot.slane %v1094_v43, %v8613_v50  ;;  %v7729_v51 = vld [vmem:[%s8539_s4 + $0xc28] ss:$16 sps:$4 sm:$0xff]   ;;  %v7812_v43 = vld [vmem:[%s8539_s4 + $0xde4] ss:$16 sps:$4 sm:$0xff]  }
 0x193   : > { %5253 = vmatprep.subr.bf16.mxu0 %v7650_v52  ;;  %5745 = vmatprep.subr.bf16.mxu1 %v7653_v54  ;;  %v7734_v52 = vld [vmem:[%s8539_s4 + $0xc44] ss:$16 sps:$4 sm:$0xff]   ;;  %v7737_v54 = vld [vmem:[%s8539_s4 + $0xc4c] ss:$16 sps:$4 sm:$0xff]  }
 0x196   : > { %5254 = vmatpush1.bf16.msra.mxu0 %v7648_v55  ;;  %5746 = vmatpush1.bf16.msra.mxu1 %v7651_v56  ;;  %v7732_v55 = vld [vmem:[%s8539_s4 + $0xc40] ss:$16 sps:$4 sm:$0xff]   ;;  %v7735_v56 = vld [vmem:[%s8539_s4 + $0xc48] ss:$16 sps:$4 sm:$0xff]  }
 0x197   : > { %5255 = vmatprep.subr.bf16.mxu0 %v7656_v57  ;;  %5747 = vmatprep.subr.bf16.mxu1 %v7659_v58  ;;  %v7740_v57 = vld [vmem:[%s8539_s4 + $0xc64] ss:$16 sps:$4 sm:$0xff]   ;;  %v7743_v58 = vld [vmem:[%s8539_s4 + $0xc6c] ss:$16 sps:$4 sm:$0xff]  }
 0x19a   : > { %5256 = vmatpush1.bf16.msra.mxu0 %v7654_v59  ;;  %5748 = vmatpush1.bf16.msra.mxu1 %v7657_v60  ;;  %v7738_v59 = vld [vmem:[%s8539_s4 + $0xc60] ss:$16 sps:$4 sm:$0xff]   ;;  %v7741_v60 = vld [vmem:[%s8539_s4 + $0xc68] ss:$16 sps:$4 sm:$0xff]  }
 0x19b   : > { %5257 = vmatprep.subr.bf16.mxu0 %v7662_v61  ;;  %5749 = vmatprep.subr.bf16.mxu1 %v7665_v62  ;;  %v7746_v61 = vld [vmem:[%s8539_s4 + $0xc84] ss:$16 sps:$4 sm:$0xff]   ;;  %v7749_v62 = vld [vmem:[%s8539_s4 + $0xc8c] ss:$16 sps:$4 sm:$0xff]  }
 0x19e   : > { %5258 = vmatpush1.bf16.msra.mxu0 %v7660_v63  ;;  %5750 = vmatpush1.bf16.msra.mxu1 %v7663_v0  ;;  %v7744_v63 = vld [vmem:[%s8539_s4 + $0xc80] ss:$16 sps:$4 sm:$0xff]   ;;  %v7747_v0 = vld [vmem:[%s8539_s4 + $0xc88] ss:$16 sps:$4 sm:$0xff]  }
 0x19f   : > { %5259 = vmatprep.subr.bf16.mxu0 %v7668_v1  ;;  %5751 = vmatprep.subr.bf16.mxu1 %v7671_v2  ;;  %v7752_v1 = vld [vmem:[%s8539_s4 + $0xca4] ss:$16 sps:$4 sm:$0xff]   ;;  %v7755_v2 = vld [vmem:[%s8539_s4 + $0xcac] ss:$16 sps:$4 sm:$0xff]  }
 0x1a2   : > { %5260 = vmatpush1.bf16.msra.mxu0 %v7666_v3  ;;  %5752 = vmatpush1.bf16.msra.mxu1 %v7669_v4  ;;  %v7750_v3 = vld [vmem:[%s8539_s4 + $0xca0] ss:$16 sps:$4 sm:$0xff]   ;;  %v7753_v4 = vld [vmem:[%s8539_s4 + $0xca8] ss:$16 sps:$4 sm:$0xff]  }
 0x1a3   : > { %5261 = vmatprep.subr.bf16.mxu0 %v7674_v5  ;;  %5753 = vmatprep.subr.bf16.mxu1 %v7677_v6  ;;  %v7758_v5 = vld [vmem:[%s8539_s4 + $0xcc4] ss:$16 sps:$4 sm:$0xff]   ;;  %v7761_v6 = vld [vmem:[%s8539_s4 + $0xccc] ss:$16 sps:$4 sm:$0xff]  }
 0x1a6   : > { %5262 = vmatpush1.bf16.msra.mxu0 %v7672_v7  ;;  %5754 = vmatpush1.bf16.msra.mxu1 %v7675_v8  ;;  %v7756_v7 = vld [vmem:[%s8539_s4 + $0xcc0] ss:$16 sps:$4 sm:$0xff]   ;;  %v7759_v8 = vld [vmem:[%s8539_s4 + $0xcc8] ss:$16 sps:$4 sm:$0xff]  }
 0x1a7   : > { %5263 = vmatprep.subr.bf16.mxu0 %v7680_v9  ;;  %5755 = vmatprep.subr.bf16.mxu1 %v7683_v10  ;;  %v7764_v9 = vld [vmem:[%s8539_s4 + $0xce4] ss:$16 sps:$4 sm:$0xff]   ;;  %v7767_v10 = vld [vmem:[%s8539_s4 + $0xcec] ss:$16 sps:$4 sm:$0xff]  }
 0x1aa   : > { %5264 = vmatpush1.bf16.msra.mxu0 %v7678_v11  ;;  %5756 = vmatpush1.bf16.msra.mxu1 %v7681_v12  ;;  %v7762_v11 = vld [vmem:[%s8539_s4 + $0xce0] ss:$16 sps:$4 sm:$0xff]   ;;  %v7765_v12 = vld [vmem:[%s8539_s4 + $0xce8] ss:$16 sps:$4 sm:$0xff]  }
 0x1ab   : > { %5265 = vmatprep.subr.bf16.mxu0 %v7686_v13  ;;  %5757 = vmatprep.subr.bf16.mxu1 %v7689_v15  ;;  %v7770_v13 = vld [vmem:[%s8539_s4 + $0xd04] ss:$16 sps:$4 sm:$0xff]   ;;  %v7773_v15 = vld [vmem:[%s8539_s4 + $0xd0c] ss:$16 sps:$4 sm:$0xff]  }
 0x1ae   : > { %5266 = vmatpush1.bf16.msra.mxu0 %v7684_v17  ;;  %5758 = vmatpush1.bf16.msra.mxu1 %v7687_v53  ;;  %v7768_v17 = vld [vmem:[%s8539_s4 + $0xd00] ss:$16 sps:$4 sm:$0xff]   ;;  %v7771_v53 = vld [vmem:[%s8539_s4 + $0xd08] ss:$16 sps:$4 sm:$0xff]  }
 0x1af   : > { %5267 = vmatprep.subr.bf16.mxu0 %v7692_v18  ;;  %5759 = vmatprep.subr.bf16.mxu1 %v7695_v19  ;;  %v7776_v18 = vld [vmem:[%s8539_s4 + $0xd24] ss:$16 sps:$4 sm:$0xff]   ;;  %v7779_v19 = vld [vmem:[%s8539_s4 + $0xd2c] ss:$16 sps:$4 sm:$0xff]  }
 0x1b2   : > { %5268 = vmatpush1.bf16.msra.mxu0 %v7690_v20  ;;  %5760 = vmatpush1.bf16.msra.mxu1 %v7693_v21  ;;  %v7774_v20 = vld [vmem:[%s8539_s4 + $0xd20] ss:$16 sps:$4 sm:$0xff]   ;;  %v7777_v21 = vld [vmem:[%s8539_s4 + $0xd28] ss:$16 sps:$4 sm:$0xff]  }
 0x1b3   : > { %5269 = vmatprep.subr.bf16.mxu0 %v7698_v23  ;;  %5761 = vmatprep.subr.bf16.mxu1 %v7701_v24  ;;  %v7782_v23 = vld [vmem:[%s8539_s4 + $0xd44] ss:$16 sps:$4 sm:$0xff]   ;;  %v7785_v24 = vld [vmem:[%s8539_s4 + $0xd4c] ss:$16 sps:$4 sm:$0xff]  }
 0x1b6   : > { %5270 = vmatpush1.bf16.msra.mxu0 %v7696_v25  ;;  %5762 = vmatpush1.bf16.msra.mxu1 %v7699_v27  ;;  %v7780_v25 = vld [vmem:[%s8539_s4 + $0xd40] ss:$16 sps:$4 sm:$0xff]   ;;  %v7783_v27 = vld [vmem:[%s8539_s4 + $0xd48] ss:$16 sps:$4 sm:$0xff]  }
 0x1b7   : > { %5271 = vmatprep.subr.bf16.mxu0 %v7704_v28  ;;  %5763 = vmatprep.subr.bf16.mxu1 %v7707_v29  ;;  %v7788_v28 = vld [vmem:[%s8539_s4 + $0xd64] ss:$16 sps:$4 sm:$0xff]   ;;  %v7791_v29 = vld [vmem:[%s8539_s4 + $0xd6c] ss:$16 sps:$4 sm:$0xff]  }
 0x1ba   : > { %5272 = vmatpush1.bf16.msra.mxu0 %v7702_v30  ;;  %5764 = vmatpush1.bf16.msra.mxu1 %v7705_v31  ;;  %v7786_v30 = vld [vmem:[%s8539_s4 + $0xd60] ss:$16 sps:$4 sm:$0xff]   ;;  %v7789_v31 = vld [vmem:[%s8539_s4 + $0xd68] ss:$16 sps:$4 sm:$0xff]  }
 0x1bb   : > { %5273 = vmatprep.subr.bf16.mxu0 %v7710_v16  ;;  %5765 = vmatprep.subr.bf16.mxu1 %v7713_v32  ;;  %v7794_v16 = vld [vmem:[%s8539_s4 + $0xd84] ss:$16 sps:$4 sm:$0xff]   ;;  %v7797_v32 = vld [vmem:[%s8539_s4 + $0xd8c] ss:$16 sps:$4 sm:$0xff]  }
 0x1be   : > { %5274 = vmatpush1.bf16.msra.mxu0 %v7708_v26  ;;  %5766 = vmatpush1.bf16.msra.mxu1 %v7711_v35  ;;  %v7800_v26 = vld [vmem:[%s8539_s4 + $0xda4] ss:$16 sps:$4 sm:$0xff]   ;;  %v7803_v35 = vld [vmem:[%s8539_s4 + $0xdac] ss:$16 sps:$4 sm:$0xff]  }
 0x1bf   : > { %5275 = vmatprep.subr.bf16.mxu0 %v7716_v37  ;;  %5767 = vmatprep.subr.bf16.mxu1 %v7719_v38  ;;  %v7798_v37 = vld [vmem:[%s8539_s4 + $0xda0] ss:$16 sps:$4 sm:$0xff]   ;;  %v7801_v38 = vld [vmem:[%s8539_s4 + $0xda8] ss:$16 sps:$4 sm:$0xff]  }
 0x1c2   : > { %5276 = vmatpush1.bf16.msra.mxu0 %v7714_v40  ;;  %5768 = vmatpush1.bf16.msra.mxu1 %v7717_v41  ;;  %v7806_v40 = vld [vmem:[%s8539_s4 + $0xdc4] ss:$16 sps:$4 sm:$0xff]   ;;  %v7809_v41 = vld [vmem:[%s8539_s4 + $0xdcc] ss:$16 sps:$4 sm:$0xff]  }
 0x1c3   : > { %5286 = vmatprep.subr.bf16.mxu0 %v7722_v22  ;;  %5778 = vmatprep.subr.bf16.mxu1 %v7725_v42  ;;  %v7804_v22 = vld [vmem:[%s8539_s4 + $0xdc0] ss:$16 sps:$4 sm:$0xff]   ;;  %v7807_v42 = vld [vmem:[%s8539_s4 + $0xdc8] ss:$16 sps:$4 sm:$0xff]  }
 0x1c5   : > { %5278 = vmatmul.mubr.bf16.vlgmr.msra.gmra.mrb[0].mxu0 %v1123_v45  ;;  %5770 = vmatmul.mubr.bf16.vlgmr.msra.gmra.mrb[0].mxu1 %v1123_v45  ;;  %v7815_v45 = vld [vmem:[%s8539_s4 + $0xdec] ss:$16 sps:$4 sm:$0xff]  }
 0x1c6   : > { %5287 = vmatpush1.bf16.msra.mxu0 %v7720_v36  ;;  %5779 = vmatpush1.bf16.msra.mxu1 %v7723_v46  ;;  %v7810_v36 = vld [vmem:[%s8539_s4 + $0xde0] ss:$16 sps:$4 sm:$0xff]   ;;  %v7813_v46 = vld [vmem:[%s8539_s4 + $0xde8] ss:$16 sps:$4 sm:$0xff]  }
 0x1c7   : > { %5288 = vmatprep.subr.bf16.mxu0 %v7728_v47  ;;  %5780 = vmatprep.subr.bf16.mxu1 %v7731_v48  ;;  %v7819_v47 = vld [vmem:[%s8539_s4 + $0xe04] ss:$16 sps:$4 sm:$0xff]   ;;  %v7822_v48 = vld [vmem:[%s8539_s4 + $0xe0c] ss:$16 sps:$4 sm:$0xff]  }
 0x1c8   : > { %5318 = vmatprep.mubr.bf16.mxu0 %v9023_v49  ;;  %5810 = vmatprep.mubr.bf16.mxu1 %v9023_v49 }
 0x1ca   : > { %5289 = vmatpush1.bf16.msra.mxu0 %v7726_v14  ;;  %5781 = vmatpush1.bf16.msra.mxu1 %v7729_v51  ;;  %v9089_v14 = vrot.slane %v9008_v39, %v8613_v50  ;;  %v7817_v51 = vld [vmem:[%s8539_s4 + $0xe00] ss:$16 sps:$4 sm:$0xff]  }
 0x1cb   : > { %5290 = vmatprep.subr.bf16.mxu0 %v7734_v52  ;;  %5782 = vmatprep.subr.bf16.mxu1 %v7737_v54  ;;  %v7820_v52 = vld [vmem:[%s8539_s4 + $0xe08] ss:$16 sps:$4 sm:$0xff]   ;;  %v7825_v54 = vld [vmem:[%s8539_s4 + $0xe24] ss:$16 sps:$4 sm:$0xff]   ;;  %v7823_v39 = vld [vmem:[%s8539_s4 + $0xe20] ss:$16 sps:$4 sm:$0xff]  }
 0x1ce   : > { %5291 = vmatpush1.bf16.msra.mxu0 %v7732_v55  ;;  %5783 = vmatpush1.bf16.msra.mxu1 %v7735_v56  ;;  %v7828_v55 = vld [vmem:[%s8539_s4 + $0xe2c] ss:$16 sps:$4 sm:$0xff]   ;;  %v1126_v56 = vcombine.high %v9023_v49, %v9023_v49  ;;  %v7829_v49 = vld [vmem:[%s8539_s4 + $0xe40] ss:$16 sps:$4 sm:$0xff]  }
 0x1cf   : > { %5292 = vmatprep.subr.bf16.mxu0 %v7740_v57  ;;  %5784 = vmatprep.subr.bf16.mxu1 %v7743_v58  ;;  %v7826_v57 = vld [vmem:[%s8539_s4 + $0xe28] ss:$16 sps:$4 sm:$0xff]   ;;  %v7831_v58 = vld [vmem:[%s8539_s4 + $0xe44] ss:$16 sps:$4 sm:$0xff]  }
 0x1d2   : > { %5293 = vmatpush1.bf16.msra.mxu0 %v7738_v59  ;;  %5785 = vmatpush1.bf16.msra.mxu1 %v7741_v60  ;;  %v7834_v59 = vld [vmem:[%s8539_s4 + $0xe4c] ss:$16 sps:$4 sm:$0xff]   ;;  %v7832_v60 = vld [vmem:[%s8539_s4 + $0xe48] ss:$16 sps:$4 sm:$0xff]  }
 0x1d3   : > { %5294 = vmatprep.subr.bf16.mxu0 %v7746_v61  ;;  %5786 = vmatprep.subr.bf16.mxu1 %v7749_v62  ;;  %v7837_v61 = vld [vmem:[%s8539_s4 + $0xe64] ss:$16 sps:$4 sm:$0xff]   ;;  %v7840_v62 = vld [vmem:[%s8539_s4 + $0xe6c] ss:$16 sps:$4 sm:$0xff]  }
 0x1d6   : > { %5295 = vmatpush1.bf16.msra.mxu0 %v7744_v63  ;;  %5787 = vmatpush1.bf16.msra.mxu1 %v7747_v0  ;;  %v7835_v63 = vld [vmem:[%s8539_s4 + $0xe60] ss:$16 sps:$4 sm:$0xff]   ;;  %v7838_v0 = vld [vmem:[%s8539_s4 + $0xe68] ss:$16 sps:$4 sm:$0xff]  }
 0x1d7   : > { %5296 = vmatprep.subr.bf16.mxu0 %v7752_v1  ;;  %5788 = vmatprep.subr.bf16.mxu1 %v7755_v2  ;;  %v7843_v1 = vld [vmem:[%s8539_s4 + $0xe84] ss:$16 sps:$4 sm:$0xff]   ;;  %v7846_v2 = vld [vmem:[%s8539_s4 + $0xe8c] ss:$16 sps:$4 sm:$0xff]  }
 0x1da   : > { %5297 = vmatpush1.bf16.msra.mxu0 %v7750_v3  ;;  %5789 = vmatpush1.bf16.msra.mxu1 %v7753_v4  ;;  %v7841_v3 = vld [vmem:[%s8539_s4 + $0xe80] ss:$16 sps:$4 sm:$0xff]   ;;  %v7844_v4 = vld [vmem:[%s8539_s4 + $0xe88] ss:$16 sps:$4 sm:$0xff]  }
 0x1db   : > { %5298 = vmatprep.subr.bf16.mxu0 %v7758_v5  ;;  %5790 = vmatprep.subr.bf16.mxu1 %v7761_v6  ;;  %v7849_v5 = vld [vmem:[%s8539_s4 + $0xea4] ss:$16 sps:$4 sm:$0xff]   ;;  %v7852_v6 = vld [vmem:[%s8539_s4 + $0xeac] ss:$16 sps:$4 sm:$0xff]  }
 0x1de   : > { %5299 = vmatpush1.bf16.msra.mxu0 %v7756_v7  ;;  %5791 = vmatpush1.bf16.msra.mxu1 %v7759_v8  ;;  %v7847_v7 = vld [vmem:[%s8539_s4 + $0xea0] ss:$16 sps:$4 sm:$0xff]   ;;  %v7850_v8 = vld [vmem:[%s8539_s4 + $0xea8] ss:$16 sps:$4 sm:$0xff]  }
 0x1df   : > { %5300 = vmatprep.subr.bf16.mxu0 %v7764_v9  ;;  %5792 = vmatprep.subr.bf16.mxu1 %v7767_v10  ;;  %v7855_v9 = vld [vmem:[%s8539_s4 + $0xec4] ss:$16 sps:$4 sm:$0xff]   ;;  %v7858_v10 = vld [vmem:[%s8539_s4 + $0xecc] ss:$16 sps:$4 sm:$0xff]  }
 0x1e2   : > { %5301 = vmatpush1.bf16.msra.mxu0 %v7762_v11  ;;  %5793 = vmatpush1.bf16.msra.mxu1 %v7765_v12  ;;  %v7853_v11 = vld [vmem:[%s8539_s4 + $0xec0] ss:$16 sps:$4 sm:$0xff]   ;;  %v7856_v12 = vld [vmem:[%s8539_s4 + $0xec8] ss:$16 sps:$4 sm:$0xff]  }
 0x1e3   : > { %5302 = vmatprep.subr.bf16.mxu0 %v7770_v13  ;;  %5794 = vmatprep.subr.bf16.mxu1 %v7773_v15  ;;  %v7861_v13 = vld [vmem:[%s8539_s4 + $0xee4] ss:$16 sps:$4 sm:$0xff]   ;;  %v7864_v15 = vld [vmem:[%s8539_s4 + $0xeec] ss:$16 sps:$4 sm:$0xff]  }
 0x1e6   : > { %5303 = vmatpush1.bf16.msra.mxu0 %v7768_v17  ;;  %5795 = vmatpush1.bf16.msra.mxu1 %v7771_v53  ;;  %v7859_v17 = vld [vmem:[%s8539_s4 + $0xee0] ss:$16 sps:$4 sm:$0xff]   ;;  %v7862_v53 = vld [vmem:[%s8539_s4 + $0xee8] ss:$16 sps:$4 sm:$0xff]  }
 0x1e7   : > { %5304 = vmatprep.subr.bf16.mxu0 %v7776_v18  ;;  %5796 = vmatprep.subr.bf16.mxu1 %v7779_v19  ;;  %v7867_v18 = vld [vmem:[%s8539_s4 + $0xf04] ss:$16 sps:$4 sm:$0xff]   ;;  %v7870_v19 = vld [vmem:[%s8539_s4 + $0xf0c] ss:$16 sps:$4 sm:$0xff]  }
 0x1ea   : > { %5305 = vmatpush1.bf16.msra.mxu0 %v7774_v20  ;;  %5797 = vmatpush1.bf16.msra.mxu1 %v7777_v21  ;;  %v7865_v20 = vld [vmem:[%s8539_s4 + $0xf00] ss:$16 sps:$4 sm:$0xff]   ;;  %v7868_v21 = vld [vmem:[%s8539_s4 + $0xf08] ss:$16 sps:$4 sm:$0xff]  }
 0x1eb   : > { %5306 = vmatprep.subr.bf16.mxu0 %v7782_v23  ;;  %5798 = vmatprep.subr.bf16.mxu1 %v7785_v24  ;;  %v7873_v23 = vld [vmem:[%s8539_s4 + $0xf24] ss:$16 sps:$4 sm:$0xff]   ;;  %v7876_v24 = vld [vmem:[%s8539_s4 + $0xf2c] ss:$16 sps:$4 sm:$0xff]  }
 0x1ee   : > { %5307 = vmatpush1.bf16.msra.mxu0 %v7780_v25  ;;  %5799 = vmatpush1.bf16.msra.mxu1 %v7783_v27  ;;  %v7871_v25 = vld [vmem:[%s8539_s4 + $0xf20] ss:$16 sps:$4 sm:$0xff]   ;;  %v7874_v27 = vld [vmem:[%s8539_s4 + $0xf28] ss:$16 sps:$4 sm:$0xff]  }
 0x1ef   : > { %5308 = vmatprep.subr.bf16.mxu0 %v7788_v28  ;;  %5800 = vmatprep.subr.bf16.mxu1 %v7791_v29  ;;  %v7879_v28 = vld [vmem:[%s8539_s4 + $0xf44] ss:$16 sps:$4 sm:$0xff]   ;;  %v7882_v29 = vld [vmem:[%s8539_s4 + $0xf4c] ss:$16 sps:$4 sm:$0xff]  }
 0x1f2   : > { %5309 = vmatpush1.bf16.msra.mxu0 %v7786_v30  ;;  %5801 = vmatpush1.bf16.msra.mxu1 %v7789_v31  ;;  %v7877_v30 = vld [vmem:[%s8539_s4 + $0xf40] ss:$16 sps:$4 sm:$0xff]   ;;  %v7880_v31 = vld [vmem:[%s8539_s4 + $0xf48] ss:$16 sps:$4 sm:$0xff]  }
 0x1f3   : > { %5310 = vmatprep.subr.bf16.mxu0 %v7794_v16  ;;  %5802 = vmatprep.subr.bf16.mxu1 %v7797_v32  ;;  %v7885_v16 = vld [vmem:[%s8539_s4 + $0xf64] ss:$16 sps:$4 sm:$0xff]   ;;  %v7888_v32 = vld [vmem:[%s8539_s4 + $0xf6c] ss:$16 sps:$4 sm:$0xff]  }
 0x1f6   : > { %5311 = vmatpush1.bf16.msra.mxu0 %v7792_v33  ;;  %5803 = vmatpush1.bf16.msra.mxu1 %v7795_v34  ;;  %v7883_v33 = vld [vmem:[%s8539_s4 + $0xf60] ss:$16 sps:$4 sm:$0xff]   ;;  %v7886_v34 = vld [vmem:[%s8539_s4 + $0xf68] ss:$16 sps:$4 sm:$0xff]  }
 0x1f7   : > { %5312 = vmatprep.subr.bf16.mxu0 %v7800_v26  ;;  %5804 = vmatprep.subr.bf16.mxu1 %v7803_v35  ;;  %v7891_v26 = vld [vmem:[%s8539_s4 + $0xf84] ss:$16 sps:$4 sm:$0xff]   ;;  %v7894_v35 = vld [vmem:[%s8539_s4 + $0xf8c] ss:$16 sps:$4 sm:$0xff]  }
 0x1fa   : > { %5313 = vmatpush1.bf16.msra.mxu0 %v7798_v37  ;;  %5805 = vmatpush1.bf16.msra.mxu1 %v7801_v38  ;;  %v7889_v37 = vld [vmem:[%s8539_s4 + $0xf80] ss:$16 sps:$4 sm:$0xff]   ;;  %v7892_v38 = vld [vmem:[%s8539_s4 + $0xf88] ss:$16 sps:$4 sm:$0xff]  }
 0x1fb   : > { %5314 = vmatprep.subr.bf16.mxu0 %v7806_v40  ;;  %5806 = vmatprep.subr.bf16.mxu1 %v7809_v41  ;;  %v7897_v40 = vld [vmem:[%s8539_s4 + $0xfa4] ss:$16 sps:$4 sm:$0xff]   ;;  %v7900_v41 = vld [vmem:[%s8539_s4 + $0xfac] ss:$16 sps:$4 sm:$0xff]  }
 0x1fe   : > { %5315 = vmatpush1.bf16.msra.mxu0 %v7804_v22  ;;  %5807 = vmatpush1.bf16.msra.mxu1 %v7807_v42  ;;  %v7895_v22 = vld [vmem:[%s8539_s4 + $0xfa0] ss:$16 sps:$4 sm:$0xff]   ;;  %v7898_v42 = vld [vmem:[%s8539_s4 + $0xfa8] ss:$16 sps:$4 sm:$0xff]  }
 0x1ff   : > { %5316 = vmatprep.subr.bf16.mxu0 %v7812_v43  ;;  %5808 = vmatprep.subr.bf16.mxu1 %v7815_v45  ;;  %v7903_v43 = vld [vmem:[%s8539_s4 + $0xfc4] ss:$16 sps:$4 sm:$0xff]   ;;  %v7906_v45 = vld [vmem:[%s8539_s4 + $0xfcc] ss:$16 sps:$4 sm:$0xff]  }
 0x202   : > { %5317 = vmatpush1.bf16.msra.mxu0 %v7810_v36  ;;  %5809 = vmatpush1.bf16.msra.mxu1 %v7813_v46  ;;  %v9152_v36 = vld [vmem:[%s8557_s26 + $0x10] sm:$0xff] }
 0x203   : > { %5327 = vmatprep.subr.bf16.mxu0 %v7819_v47  ;;  %5819 = vmatprep.subr.bf16.mxu1 %v7822_v48  ;;  %v7901_v46 = vld [vmem:[%s8539_s4 + $0xfc0] ss:$16 sps:$4 sm:$0xff]   ;;  %v7904_v47 = vld [vmem:[%s8539_s4 + $0xfc8] ss:$16 sps:$4 sm:$0xff]   ;;  %v7909_v48 = vld [vmem:[%s8539_s4 + $0xfe4] ss:$16 sps:$4 sm:$0xff]  }
 0x205   : > { %5319 = vmatmul.mubr.bf16.vlgmr.msra.gmra.mrb[0].mxu0 %v9089_v14  ;;  %5811 = vmatmul.mubr.bf16.vlgmr.msra.gmra.mrb[0].mxu1 %v9089_v14 }
 0x206   : > { %5328 = vmatpush1.bf16.msra.mxu0 %v7817_v51  ;;  %5820 = vmatpush1.bf16.msra.mxu1 %v7820_v52  ;;  %v7912_v51 = vld [vmem:[%s8539_s4 + $0xfec] ss:$16 sps:$4 sm:$0xff]   ;;  %v9160_v52 = vrot.slane %v9152_v36, %v8613_v50 }
 0x207   : > { %5329 = vmatprep.subr.bf16.mxu0 %v7825_v54  ;;  %5821 = vmatprep.subr.bf16.mxu1 %v7828_v55  ;;  %v7907_v54 = vld [vmem:[%s8539_s4 + $0xfe0] ss:$16 sps:$4 sm:$0xff]   ;;  %v7910_v55 = vld [vmem:[%s8539_s4 + $0xfe8] ss:$16 sps:$4 sm:$0xff]  }
 0x208   : > { %5359 = vmatprep.mubr.bf16.mxu0 %v1126_v56  ;;  %5851 = vmatprep.mubr.bf16.mxu1 %v1126_v56  ;;  %v7915_v56 = vld [vmem:[%s8539_s4 + $0x1004] ss:$16 sps:$4 sm:$0xff]  }
 0x20a   : > { %5330 = vmatpush1.bf16.msra.mxu0 %v7823_v39  ;;  %5822 = vmatpush1.bf16.msra.mxu1 %v7826_v57  ;;  %v7918_v39 = vld [vmem:[%s8539_s4 + $0x100c] ss:$16 sps:$4 sm:$0xff]   ;;  %v1142_v57 = vcombine.high %v9160_v52, %v9160_v52 }
 0x20b   : > { %5331 = vmatprep.subr.bf16.mxu0 %v7831_v58  ;;  %5823 = vmatprep.subr.bf16.mxu1 %v7834_v59  ;;  %v1124_v58 = vcombine.high %v9089_v14, %v9089_v14  ;;  %v7913_v59 = vld [vmem:[%s8539_s4 + $0x1000] ss:$16 sps:$4 sm:$0xff]  }
 0x20c   : > { %v7919_v14 = vld [vmem:[%s8539_s4 + $0x1020] ss:$16 sps:$4 sm:$0xff]  }
 0x20e   : > { %5332 = vmatpush1.bf16.msra.mxu0 %v7829_v49  ;;  %5824 = vmatpush1.bf16.msra.mxu1 %v7832_v60  ;;  %v7916_v49 = vld [vmem:[%s8539_s4 + $0x1008] ss:$16 sps:$4 sm:$0xff]   ;;  %v7921_v60 = vld [vmem:[%s8539_s4 + $0x1024] ss:$16 sps:$4 sm:$0xff]  }
 0x20f   : > { %5333 = vmatprep.subr.bf16.mxu0 %v7837_v61  ;;  %5825 = vmatprep.subr.bf16.mxu1 %v7840_v62  ;;  %v7924_v61 = vld [vmem:[%s8539_s4 + $0x102c] ss:$16 sps:$4 sm:$0xff]   ;;  %v9175_v62 = vrot.slane %v1142_v57, %v8613_v50  ;;  %v8000_v57 = vld [vmem:[%s8539_s4 + $0x11c8] ss:$16 sps:$4 sm:$0xff]  }
 0x212   : > { %5334 = vmatpush1.bf16.msra.mxu0 %v7835_v63  ;;  %5826 = vmatpush1.bf16.msra.mxu1 %v7838_v0  ;;  %v7922_v63 = vld [vmem:[%s8539_s4 + $0x1028] ss:$16 sps:$4 sm:$0xff]   ;;  %v7927_v0 = vld [vmem:[%s8539_s4 + $0x1044] ss:$16 sps:$4 sm:$0xff]  }
 0x213   : > { %5335 = vmatprep.subr.bf16.mxu0 %v7843_v1  ;;  %5827 = vmatprep.subr.bf16.mxu1 %v7846_v2  ;;  %v7930_v1 = vld [vmem:[%s8539_s4 + $0x104c] ss:$16 sps:$4 sm:$0xff]   ;;  %v7925_v2 = vld [vmem:[%s8539_s4 + $0x1040] ss:$16 sps:$4 sm:$0xff]  }
 0x216   : > { %5336 = vmatpush1.bf16.msra.mxu0 %v7841_v3  ;;  %5828 = vmatpush1.bf16.msra.mxu1 %v7844_v4  ;;  %v7928_v3 = vld [vmem:[%s8539_s4 + $0x1048] ss:$16 sps:$4 sm:$0xff]   ;;  %v7933_v4 = vld [vmem:[%s8539_s4 + $0x1064] ss:$16 sps:$4 sm:$0xff]  }
 0x217   : > { %5337 = vmatprep.subr.bf16.mxu0 %v7849_v5  ;;  %5829 = vmatprep.subr.bf16.mxu1 %v7852_v6  ;;  %v7936_v5 = vld [vmem:[%s8539_s4 + $0x106c] ss:$16 sps:$4 sm:$0xff]   ;;  %v7931_v6 = vld [vmem:[%s8539_s4 + $0x1060] ss:$16 sps:$4 sm:$0xff]  }
 0x21a   : > { %5338 = vmatpush1.bf16.msra.mxu0 %v7847_v7  ;;  %5830 = vmatpush1.bf16.msra.mxu1 %v7850_v8  ;;  %v7934_v7 = vld [vmem:[%s8539_s4 + $0x1068] ss:$16 sps:$4 sm:$0xff]   ;;  %v7939_v8 = vld [vmem:[%s8539_s4 + $0x1084] ss:$16 sps:$4 sm:$0xff]  }
 0x21b   : > { %5339 = vmatprep.subr.bf16.mxu0 %v7855_v9  ;;  %5831 = vmatprep.subr.bf16.mxu1 %v7858_v10  ;;  %v7942_v9 = vld [vmem:[%s8539_s4 + $0x108c] ss:$16 sps:$4 sm:$0xff]   ;;  %v7937_v10 = vld [vmem:[%s8539_s4 + $0x1080] ss:$16 sps:$4 sm:$0xff]  }
 0x21e   : > { %5340 = vmatpush1.bf16.msra.mxu0 %v7853_v11  ;;  %5832 = vmatpush1.bf16.msra.mxu1 %v7856_v12  ;;  %v7940_v11 = vld [vmem:[%s8539_s4 + $0x1088] ss:$16 sps:$4 sm:$0xff]   ;;  %v7945_v12 = vld [vmem:[%s8539_s4 + $0x10a4] ss:$16 sps:$4 sm:$0xff]  }
 0x21f   : > { %5341 = vmatprep.subr.bf16.mxu0 %v7861_v13  ;;  %5833 = vmatprep.subr.bf16.mxu1 %v7864_v15  ;;  %v7948_v13 = vld [vmem:[%s8539_s4 + $0x10ac] ss:$16 sps:$4 sm:$0xff]   ;;  %v7943_v15 = vld [vmem:[%s8539_s4 + $0x10a0] ss:$16 sps:$4 sm:$0xff]  }
 0x222   : > { %5342 = vmatpush1.bf16.msra.mxu0 %v7859_v17  ;;  %5834 = vmatpush1.bf16.msra.mxu1 %v7862_v53  ;;  %v7946_v17 = vld [vmem:[%s8539_s4 + $0x10a8] ss:$16 sps:$4 sm:$0xff]   ;;  %v7951_v53 = vld [vmem:[%s8539_s4 + $0x10c4] ss:$16 sps:$4 sm:$0xff]  }
 0x223   : > { %5343 = vmatprep.subr.bf16.mxu0 %v7867_v18  ;;  %5835 = vmatprep.subr.bf16.mxu1 %v7870_v19  ;;  %v7954_v18 = vld [vmem:[%s8539_s4 + $0x10cc] ss:$16 sps:$4 sm:$0xff]   ;;  %v7949_v19 = vld [vmem:[%s8539_s4 + $0x10c0] ss:$16 sps:$4 sm:$0xff]  }
 0x226   : > { %5344 = vmatpush1.bf16.msra.mxu0 %v7865_v20  ;;  %5836 = vmatpush1.bf16.msra.mxu1 %v7868_v21  ;;  %v7952_v20 = vld [vmem:[%s8539_s4 + $0x10c8] ss:$16 sps:$4 sm:$0xff]   ;;  %v7957_v21 = vld [vmem:[%s8539_s4 + $0x10e4] ss:$16 sps:$4 sm:$0xff]  }
 0x227   : > { %5345 = vmatprep.subr.bf16.mxu0 %v7873_v23  ;;  %5837 = vmatprep.subr.bf16.mxu1 %v7876_v24  ;;  %v7960_v23 = vld [vmem:[%s8539_s4 + $0x10ec] ss:$16 sps:$4 sm:$0xff]   ;;  %v7955_v24 = vld [vmem:[%s8539_s4 + $0x10e0] ss:$16 sps:$4 sm:$0xff]  }
 0x22a   : > { %5346 = vmatpush1.bf16.msra.mxu0 %v7871_v25  ;;  %5838 = vmatpush1.bf16.msra.mxu1 %v7874_v27  ;;  %v7958_v25 = vld [vmem:[%s8539_s4 + $0x10e8] ss:$16 sps:$4 sm:$0xff]   ;;  %v7963_v27 = vld [vmem:[%s8539_s4 + $0x1104] ss:$16 sps:$4 sm:$0xff]  }
 0x22b   : > { %5347 = vmatprep.subr.bf16.mxu0 %v7879_v28  ;;  %5839 = vmatprep.subr.bf16.mxu1 %v7882_v29  ;;  %v7966_v28 = vld [vmem:[%s8539_s4 + $0x110c] ss:$16 sps:$4 sm:$0xff]   ;;  %v7961_v29 = vld [vmem:[%s8539_s4 + $0x1100] ss:$16 sps:$4 sm:$0xff]  }
 0x22e   : > { %5348 = vmatpush1.bf16.msra.mxu0 %v7877_v30  ;;  %5840 = vmatpush1.bf16.msra.mxu1 %v7880_v31  ;;  %v7964_v30 = vld [vmem:[%s8539_s4 + $0x1108] ss:$16 sps:$4 sm:$0xff]   ;;  %v7969_v31 = vld [vmem:[%s8539_s4 + $0x1124] ss:$16 sps:$4 sm:$0xff]  }
 0x22f   : > { %5349 = vmatprep.subr.bf16.mxu0 %v7885_v16  ;;  %5841 = vmatprep.subr.bf16.mxu1 %v7888_v32  ;;  %v7972_v16 = vld [vmem:[%s8539_s4 + $0x112c] ss:$16 sps:$4 sm:$0xff]   ;;  %v7967_v32 = vld [vmem:[%s8539_s4 + $0x1120] ss:$16 sps:$4 sm:$0xff]  }
 0x232   : > { %5350 = vmatpush1.bf16.msra.mxu0 %v7883_v33  ;;  %5842 = vmatpush1.bf16.msra.mxu1 %v7886_v34  ;;  %v7970_v33 = vld [vmem:[%s8539_s4 + $0x1128] ss:$16 sps:$4 sm:$0xff]   ;;  %v7975_v34 = vld [vmem:[%s8539_s4 + $0x1144] ss:$16 sps:$4 sm:$0xff]  }
 0x233   : > { %5351 = vmatprep.subr.bf16.mxu0 %v7891_v26  ;;  %5843 = vmatprep.subr.bf16.mxu1 %v7894_v35  ;;  %v7978_v26 = vld [vmem:[%s8539_s4 + $0x114c] ss:$16 sps:$4 sm:$0xff]   ;;  %v7973_v35 = vld [vmem:[%s8539_s4 + $0x1140] ss:$16 sps:$4 sm:$0xff]  }
 0x236   : > { %5352 = vmatpush1.bf16.msra.mxu0 %v7889_v37  ;;  %5844 = vmatpush1.bf16.msra.mxu1 %v7892_v38  ;;  %v7976_v37 = vld [vmem:[%s8539_s4 + $0x1148] ss:$16 sps:$4 sm:$0xff]   ;;  %v7981_v38 = vld [vmem:[%s8539_s4 + $0x1164] ss:$16 sps:$4 sm:$0xff]  }
 0x237   : > { %5353 = vmatprep.subr.bf16.mxu0 %v7897_v40  ;;  %5845 = vmatprep.subr.bf16.mxu1 %v7900_v41  ;;  %v7984_v40 = vld [vmem:[%s8539_s4 + $0x116c] ss:$16 sps:$4 sm:$0xff]   ;;  %v7979_v41 = vld [vmem:[%s8539_s4 + $0x1160] ss:$16 sps:$4 sm:$0xff]  }
 0x23a   : > { %5354 = vmatpush1.bf16.msra.mxu0 %v7895_v22  ;;  %5846 = vmatpush1.bf16.msra.mxu1 %v7898_v42  ;;  %v7982_v22 = vld [vmem:[%s8539_s4 + $0x1168] ss:$16 sps:$4 sm:$0xff]   ;;  %v7987_v42 = vld [vmem:[%s8539_s4 + $0x1184] ss:$16 sps:$4 sm:$0xff]  }
 0x23b   : > { %5355 = vmatprep.subr.bf16.mxu0 %v7903_v43  ;;  %5847 = vmatprep.subr.bf16.mxu1 %v7906_v45  ;;  %v7990_v43 = vld [vmem:[%s8539_s4 + $0x118c] ss:$16 sps:$4 sm:$0xff]   ;;  %v7985_v45 = vld [vmem:[%s8539_s4 + $0x1180] ss:$16 sps:$4 sm:$0xff]  }
 0x23e   : > { %5356 = vmatpush1.bf16.msra.mxu0 %v7901_v46  ;;  %5848 = vmatpush1.bf16.msra.mxu1 %v7904_v47  ;;  %v7988_v46 = vld [vmem:[%s8539_s4 + $0x1188] ss:$16 sps:$4 sm:$0xff]   ;;  %v7993_v47 = vld [vmem:[%s8539_s4 + $0x11a4] ss:$16 sps:$4 sm:$0xff]  }
 0x23f   : > { %5357 = vmatprep.subr.bf16.mxu0 %v7909_v48  ;;  %5849 = vmatprep.subr.bf16.mxu1 %v7912_v51  ;;  %v7996_v48 = vld [vmem:[%s8539_s4 + $0x11ac] ss:$16 sps:$4 sm:$0xff]   ;;  %v7991_v51 = vld [vmem:[%s8539_s4 + $0x11a0] ss:$16 sps:$4 sm:$0xff]  }
 0x242   : > { %5358 = vmatpush1.bf16.msra.mxu0 %v7907_v54  ;;  %5850 = vmatpush1.bf16.msra.mxu1 %v7910_v55  ;;  %v7994_v54 = vld [vmem:[%s8539_s4 + $0x11a8] ss:$16 sps:$4 sm:$0xff]   ;;  %v7999_v55 = vld [vmem:[%s8539_s4 + $0x11c4] ss:$16 sps:$4 sm:$0xff]  }
 0x243   : > { %5368 = vmatprep.subr.bf16.mxu0 %v7915_v56  ;;  %5860 = vmatprep.subr.bf16.mxu1 %v7918_v39  ;;  %v8002_v56 = vld [vmem:[%s8539_s4 + $0x11cc] ss:$16 sps:$4 sm:$0xff]   ;;  %v7997_v39 = vld [vmem:[%s8539_s4 + $0x11c0] ss:$16 sps:$4 sm:$0xff]  }
 0x245   : > { %5360 = vmatmul.mubr.bf16.vlgmr.msra.gmra.mrb[0].mxu0 %v1124_v58  ;;  %5852 = vmatmul.mubr.bf16.vlgmr.msra.gmra.mrb[0].mxu1 %v1124_v58  ;;  %v8005_v58 = vld [vmem:[%s8539_s4 + $0x11e4] ss:$16 sps:$4 sm:$0xff]  }
 0x246   : > { %5369 = vmatpush1.bf16.msra.mxu0 %v7913_v59  ;;  %5861 = vmatpush1.bf16.msra.mxu1 %v7916_v49  ;;  %v8008_v59 = vld [vmem:[%s8539_s4 + $0x11ec] ss:$16 sps:$4 sm:$0xff]   ;;  %v8003_v49 = vld [vmem:[%s8539_s4 + $0x11e0] ss:$16 sps:$4 sm:$0xff]  }
 0x247   : > { %5370 = vmatprep.subr.bf16.mxu0 %v7921_v60  ;;  %5862 = vmatprep.subr.bf16.mxu1 %v7924_v61  ;;  %v8006_v60 = vld [vmem:[%s8539_s4 + $0x11e8] ss:$16 sps:$4 sm:$0xff]   ;;  %v8011_v61 = vld [vmem:[%s8539_s4 + $0x1204] ss:$16 sps:$4 sm:$0xff]  }
 0x248   : > { %5400 = vmatprep.mubr.bf16.mxu0 %v9175_v62  ;;  %5892 = vmatprep.mubr.bf16.mxu1 %v9175_v62 }
 0x24a   : > { %5371 = vmatpush1.bf16.msra.mxu0 %v7919_v14  ;;  %5863 = vmatpush1.bf16.msra.mxu1 %v7922_v63  ;;  %v8014_v14 = vld [vmem:[%s8539_s4 + $0x120c] ss:$16 sps:$4 sm:$0xff]   ;;  %v9241_v63 = vrot.slane %v9160_v52, %v8613_v50  ;;  %v8015_v52 = vld [vmem:[%s8539_s4 + $0x1220] ss:$16 sps:$4 sm:$0xff]  }
 0x24b   : > { %5372 = vmatprep.subr.bf16.mxu0 %v7927_v0  ;;  %5864 = vmatprep.subr.bf16.mxu1 %v7930_v1  ;;  %v8009_v0 = vld [vmem:[%s8539_s4 + $0x1200] ss:$16 sps:$4 sm:$0xff]   ;;  %v8012_v1 = vld [vmem:[%s8539_s4 + $0x1208] ss:$16 sps:$4 sm:$0xff]  }
 0x24e   : > { %5373 = vmatpush1.bf16.msra.mxu0 %v7925_v2  ;;  %5865 = vmatpush1.bf16.msra.mxu1 %v7928_v3  ;;  %v8017_v2 = vld [vmem:[%s8539_s4 + $0x1224] ss:$16 sps:$4 sm:$0xff]   ;;  %v8020_v3 = vld [vmem:[%s8539_s4 + $0x122c] ss:$16 sps:$4 sm:$0xff]  }
 0x24f   : > { %5374 = vmatprep.subr.bf16.mxu0 %v7933_v4  ;;  %5866 = vmatprep.subr.bf16.mxu1 %v7936_v5  ;;  %v1174_v4 = vcombine.high %v9175_v62, %v9175_v62  ;;  %v8018_v5 = vld [vmem:[%s8539_s4 + $0x1228] ss:$16 sps:$4 sm:$0xff]   ;;  %v8021_v62 = vld [vmem:[%s8539_s4 + $0x1240] ss:$16 sps:$4 sm:$0xff]  }
 0x252   : > { %5375 = vmatpush1.bf16.msra.mxu0 %v7931_v6  ;;  %5867 = vmatpush1.bf16.msra.mxu1 %v7934_v7  ;;  %v8023_v6 = vld [vmem:[%s8539_s4 + $0x1244] ss:$16 sps:$4 sm:$0xff]   ;;  %v8026_v7 = vld [vmem:[%s8539_s4 + $0x124c] ss:$16 sps:$4 sm:$0xff]  }
 0x253   : > { %5376 = vmatprep.subr.bf16.mxu0 %v7939_v8  ;;  %5868 = vmatprep.subr.bf16.mxu1 %v7942_v9  ;;  %v8024_v8 = vld [vmem:[%s8539_s4 + $0x1248] ss:$16 sps:$4 sm:$0xff]   ;;  %v8029_v9 = vld [vmem:[%s8539_s4 + $0x1264] ss:$16 sps:$4 sm:$0xff]  }
 0x256   : > { %5377 = vmatpush1.bf16.msra.mxu0 %v7937_v10  ;;  %5869 = vmatpush1.bf16.msra.mxu1 %v7940_v11  ;;  %v8032_v10 = vld [vmem:[%s8539_s4 + $0x126c] ss:$16 sps:$4 sm:$0xff]   ;;  %v8027_v11 = vld [vmem:[%s8539_s4 + $0x1260] ss:$16 sps:$4 sm:$0xff]  }
 0x257   : > { %5378 = vmatprep.subr.bf16.mxu0 %v7945_v12  ;;  %5870 = vmatprep.subr.bf16.mxu1 %v7948_v13  ;;  %v8030_v12 = vld [vmem:[%s8539_s4 + $0x1268] ss:$16 sps:$4 sm:$0xff]   ;;  %v8035_v13 = vld [vmem:[%s8539_s4 + $0x1284] ss:$16 sps:$4 sm:$0xff]  }
 0x25a   : > { %5379 = vmatpush1.bf16.msra.mxu0 %v7943_v15  ;;  %5871 = vmatpush1.bf16.msra.mxu1 %v7946_v17  ;;  %v8038_v15 = vld [vmem:[%s8539_s4 + $0x128c] ss:$16 sps:$4 sm:$0xff]   ;;  %v8033_v17 = vld [vmem:[%s8539_s4 + $0x1280] ss:$16 sps:$4 sm:$0xff]  }
 0x25b   : > { %5380 = vmatprep.subr.bf16.mxu0 %v7951_v53  ;;  %5872 = vmatprep.subr.bf16.mxu1 %v7954_v18  ;;  %v8036_v53 = vld [vmem:[%s8539_s4 + $0x1288] ss:$16 sps:$4 sm:$0xff]   ;;  %v8041_v18 = vld [vmem:[%s8539_s4 + $0x12a4] ss:$16 sps:$4 sm:$0xff]  }
 0x25e   : > { %5381 = vmatpush1.bf16.msra.mxu0 %v7949_v19  ;;  %5873 = vmatpush1.bf16.msra.mxu1 %v7952_v20  ;;  %v8044_v19 = vld [vmem:[%s8539_s4 + $0x12ac] ss:$16 sps:$4 sm:$0xff]   ;;  %v8039_v20 = vld [vmem:[%s8539_s4 + $0x12a0] ss:$16 sps:$4 sm:$0xff]  }
 0x25f   : > { %5382 = vmatprep.subr.bf16.mxu0 %v7957_v21  ;;  %5874 = vmatprep.subr.bf16.mxu1 %v7960_v23  ;;  %v8042_v21 = vld [vmem:[%s8539_s4 + $0x12a8] ss:$16 sps:$4 sm:$0xff]   ;;  %v8047_v23 = vld [vmem:[%s8539_s4 + $0x12c4] ss:$16 sps:$4 sm:$0xff]  }
 0x262   : > { %5383 = vmatpush1.bf16.msra.mxu0 %v7955_v24  ;;  %5875 = vmatpush1.bf16.msra.mxu1 %v7958_v25  ;;  %v8050_v24 = vld [vmem:[%s8539_s4 + $0x12cc] ss:$16 sps:$4 sm:$0xff]   ;;  %v8045_v25 = vld [vmem:[%s8539_s4 + $0x12c0] ss:$16 sps:$4 sm:$0xff]  }
 0x263   : > { %5384 = vmatprep.subr.bf16.mxu0 %v7963_v27  ;;  %5876 = vmatprep.subr.bf16.mxu1 %v7966_v28  ;;  %v8048_v27 = vld [vmem:[%s8539_s4 + $0x12c8] ss:$16 sps:$4 sm:$0xff]   ;;  %v8053_v28 = vld [vmem:[%s8539_s4 + $0x12e4] ss:$16 sps:$4 sm:$0xff]  }
 0x266   : > { %5385 = vmatpush1.bf16.msra.mxu0 %v7961_v29  ;;  %5877 = vmatpush1.bf16.msra.mxu1 %v7964_v30  ;;  %v8056_v29 = vld [vmem:[%s8539_s4 + $0x12ec] ss:$16 sps:$4 sm:$0xff]   ;;  %v8051_v30 = vld [vmem:[%s8539_s4 + $0x12e0] ss:$16 sps:$4 sm:$0xff]  }
 0x267   : > { %5386 = vmatprep.subr.bf16.mxu0 %v7969_v31  ;;  %5878 = vmatprep.subr.bf16.mxu1 %v7972_v16  ;;  %v8054_v31 = vld [vmem:[%s8539_s4 + $0x12e8] ss:$16 sps:$4 sm:$0xff]   ;;  %v8059_v16 = vld [vmem:[%s8539_s4 + $0x1304] ss:$16 sps:$4 sm:$0xff]  }
 0x26a   : > { %5387 = vmatpush1.bf16.msra.mxu0 %v7967_v32  ;;  %5879 = vmatpush1.bf16.msra.mxu1 %v7970_v33  ;;  %v8062_v32 = vld [vmem:[%s8539_s4 + $0x130c] ss:$16 sps:$4 sm:$0xff]   ;;  %v8057_v33 = vld [vmem:[%s8539_s4 + $0x1300] ss:$16 sps:$4 sm:$0xff]  }
 0x26b   : > { %5388 = vmatprep.subr.bf16.mxu0 %v7975_v34  ;;  %5880 = vmatprep.subr.bf16.mxu1 %v7978_v26  ;;  %v8060_v34 = vld [vmem:[%s8539_s4 + $0x1308] ss:$16 sps:$4 sm:$0xff]   ;;  %v8065_v26 = vld [vmem:[%s8539_s4 + $0x1324] ss:$16 sps:$4 sm:$0xff]  }
 0x26e   : > { %5389 = vmatpush1.bf16.msra.mxu0 %v7973_v35  ;;  %5881 = vmatpush1.bf16.msra.mxu1 %v7976_v37  ;;  %v8068_v35 = vld [vmem:[%s8539_s4 + $0x132c] ss:$16 sps:$4 sm:$0xff]   ;;  %v8063_v37 = vld [vmem:[%s8539_s4 + $0x1320] ss:$16 sps:$4 sm:$0xff]  }
 0x26f   : > { %5390 = vmatprep.subr.bf16.mxu0 %v7981_v38  ;;  %5882 = vmatprep.subr.bf16.mxu1 %v7984_v40  ;;  %v8066_v38 = vld [vmem:[%s8539_s4 + $0x1328] ss:$16 sps:$4 sm:$0xff]   ;;  %v8071_v40 = vld [vmem:[%s8539_s4 + $0x1344] ss:$16 sps:$4 sm:$0xff]  }
 0x272   : > { %5391 = vmatpush1.bf16.msra.mxu0 %v7979_v41  ;;  %5883 = vmatpush1.bf16.msra.mxu1 %v7982_v22  ;;  %v8074_v41 = vld [vmem:[%s8539_s4 + $0x134c] ss:$16 sps:$4 sm:$0xff]   ;;  %v8069_v22 = vld [vmem:[%s8539_s4 + $0x1340] ss:$16 sps:$4 sm:$0xff]  }
 0x273   : > { %5392 = vmatprep.subr.bf16.mxu0 %v7987_v42  ;;  %5884 = vmatprep.subr.bf16.mxu1 %v7990_v43  ;;  %v8072_v42 = vld [vmem:[%s8539_s4 + $0x1348] ss:$16 sps:$4 sm:$0xff]   ;;  %v8077_v43 = vld [vmem:[%s8539_s4 + $0x1364] ss:$16 sps:$4 sm:$0xff]  }
 0x276   : > { %5393 = vmatpush1.bf16.msra.mxu0 %v7985_v45  ;;  %5885 = vmatpush1.bf16.msra.mxu1 %v7988_v46  ;;  %v8080_v45 = vld [vmem:[%s8539_s4 + $0x136c] ss:$16 sps:$4 sm:$0xff]   ;;  %v8075_v46 = vld [vmem:[%s8539_s4 + $0x1360] ss:$16 sps:$4 sm:$0xff]  }
 0x277   : > { %5394 = vmatprep.subr.bf16.mxu0 %v7993_v47  ;;  %5886 = vmatprep.subr.bf16.mxu1 %v7996_v48  ;;  %v8078_v47 = vld [vmem:[%s8539_s4 + $0x1368] ss:$16 sps:$4 sm:$0xff]   ;;  %v8083_v48 = vld [vmem:[%s8539_s4 + $0x1384] ss:$16 sps:$4 sm:$0xff]  }
 0x27a   : > { %5395 = vmatpush1.bf16.msra.mxu0 %v7991_v51  ;;  %5887 = vmatpush1.bf16.msra.mxu1 %v7994_v54  ;;  %v8086_v51 = vld [vmem:[%s8539_s4 + $0x138c] ss:$16 sps:$4 sm:$0xff]   ;;  %v8081_v54 = vld [vmem:[%s8539_s4 + $0x1380] ss:$16 sps:$4 sm:$0xff]  }
 0x27b   : > { %5396 = vmatprep.subr.bf16.mxu0 %v7999_v55  ;;  %5888 = vmatprep.subr.bf16.mxu1 %v8002_v56  ;;  %v8084_v55 = vld [vmem:[%s8539_s4 + $0x1388] ss:$16 sps:$4 sm:$0xff]   ;;  %v8089_v56 = vld [vmem:[%s8539_s4 + $0x13a4] ss:$16 sps:$4 sm:$0xff]  }
 0x27e   : > { %5397 = vmatpush1.bf16.msra.mxu0 %v7997_v39  ;;  %5889 = vmatpush1.bf16.msra.mxu1 %v8000_v57  ;;  %v8092_v39 = vld [vmem:[%s8539_s4 + $0x13ac] ss:$16 sps:$4 sm:$0xff]   ;;  %v8087_v57 = vld [vmem:[%s8539_s4 + $0x13a0] ss:$16 sps:$4 sm:$0xff]  }
 0x27f   : > { %5398 = vmatprep.subr.bf16.mxu0 %v8005_v58  ;;  %5890 = vmatprep.subr.bf16.mxu1 %v8008_v59  ;;  %v8090_v58 = vld [vmem:[%s8539_s4 + $0x13a8] ss:$16 sps:$4 sm:$0xff]   ;;  %v8095_v59 = vld [vmem:[%s8539_s4 + $0x13c4] ss:$16 sps:$4 sm:$0xff]  }
 0x282   : > { %5399 = vmatpush1.bf16.msra.mxu0 %v8003_v49  ;;  %5891 = vmatpush1.bf16.msra.mxu1 %v8006_v60  ;;  %v8098_v49 = vld [vmem:[%s8539_s4 + $0x13cc] ss:$16 sps:$4 sm:$0xff]   ;;  %v1127_v60 = vcombine.high %v9152_v36, %v9152_v36  ;;  %v8099_v36 = vld [vmem:[%s8539_s4 + $0x13e0] ss:$16 sps:$4 sm:$0xff]  }
 0x283   : > { %5409 = vmatprep.subr.bf16.mxu0 %v8011_v61  ;;  %5901 = vmatprep.subr.bf16.mxu1 %v8014_v14  ;;  %v8093_v61 = vld [vmem:[%s8539_s4 + $0x13c0] ss:$16 sps:$4 sm:$0xff]   ;;  %v8096_v14 = vld [vmem:[%s8539_s4 + $0x13c8] ss:$16 sps:$4 sm:$0xff]  }
 0x285   : > { %5401 = vmatmul.mubr.bf16.vlgmr.msra.gmra.mrb[0].mxu0 %v9241_v63  ;;  %5893 = vmatmul.mubr.bf16.vlgmr.msra.gmra.mrb[0].mxu1 %v9241_v63 }
 0x286   : > { %5410 = vmatpush1.bf16.msra.mxu0 %v8009_v0  ;;  %5902 = vmatpush1.bf16.msra.mxu1 %v8012_v1  ;;  %v8101_v0 = vld [vmem:[%s8539_s4 + $0x13e4] ss:$16 sps:$4 sm:$0xff]   ;;  %v8104_v1 = vld [vmem:[%s8539_s4 + $0x13ec] ss:$16 sps:$4 sm:$0xff]  }
 0x287   : > { %5411 = vmatprep.subr.bf16.mxu0 %v8017_v2  ;;  %5903 = vmatprep.subr.bf16.mxu1 %v8020_v3  ;;  %v9310_v2 = vrot.slane %v1127_v60, %v8613_v50  ;;  %v8102_v3 = vld [vmem:[%s8539_s4 + $0x13e8] ss:$16 sps:$4 sm:$0xff]  }
 0x288   : > { %5441 = vmatprep.mubr.bf16.mxu0 %v1174_v4  ;;  %5933 = vmatprep.mubr.bf16.mxu1 %v1174_v4  ;;  %v8107_v4 = vld [vmem:[%s8539_s4 + $0x1404] ss:$16 sps:$4 sm:$0xff]   ;;  %v8180_v60 = vld [vmem:[%s8539_s4 + $0x1588] ss:$16 sps:$4 sm:$0xff]  }
 0x28a   : > { %5412 = vmatpush1.bf16.msra.mxu0 %v8015_v52  ;;  %5904 = vmatpush1.bf16.msra.mxu1 %v8018_v5  ;;  %v8110_v52 = vld [vmem:[%s8539_s4 + $0x140c] ss:$16 sps:$4 sm:$0xff]   ;;  %v1143_v5 = vcombine.high %v9310_v2, %v9310_v2 }
 0x28b   : > { %5413 = vmatprep.subr.bf16.mxu0 %v8023_v6  ;;  %5905 = vmatprep.subr.bf16.mxu1 %v8026_v7  ;;  %v1172_v6 = vcombine.high %v9241_v63, %v9241_v63  ;;  %v8105_v7 = vld [vmem:[%s8539_s4 + $0x1400] ss:$16 sps:$4 sm:$0xff]  }
 0x28c   : > { %v8111_v63 = vld [vmem:[%s8539_s4 + $0x1420] ss:$16 sps:$4 sm:$0xff]  }
 0x28e   : > { %5414 = vmatpush1.bf16.msra.mxu0 %v8021_v62  ;;  %5906 = vmatpush1.bf16.msra.mxu1 %v8024_v8  ;;  %v8108_v62 = vld [vmem:[%s8539_s4 + $0x1408] ss:$16 sps:$4 sm:$0xff]   ;;  %v8113_v8 = vld [vmem:[%s8539_s4 + $0x1424] ss:$16 sps:$4 sm:$0xff]  }
 0x28f   : > { %5415 = vmatprep.subr.bf16.mxu0 %v8029_v9  ;;  %5907 = vmatprep.subr.bf16.mxu1 %v8032_v10  ;;  %v8116_v9 = vld [vmem:[%s8539_s4 + $0x142c] ss:$16 sps:$4 sm:$0xff]   ;;  %v9325_v10 = vrot.slane %v1143_v5, %v8613_v50  ;;  %v8197_v5 = vld [vmem:[%s8539_s4 + $0x15e4] ss:$16 sps:$4 sm:$0xff]  }
 0x292   : > { %5416 = vmatpush1.bf16.msra.mxu0 %v8027_v11  ;;  %5908 = vmatpush1.bf16.msra.mxu1 %v8030_v12  ;;  %v8114_v11 = vld [vmem:[%s8539_s4 + $0x1428] ss:$16 sps:$4 sm:$0xff]   ;;  %v8119_v12 = vld [vmem:[%s8539_s4 + $0x1444] ss:$16 sps:$4 sm:$0xff]  }
 0x293   : > { %5417 = vmatprep.subr.bf16.mxu0 %v8035_v13  ;;  %5909 = vmatprep.subr.bf16.mxu1 %v8038_v15  ;;  %v8122_v13 = vld [vmem:[%s8539_s4 + $0x144c] ss:$16 sps:$4 sm:$0xff]   ;;  %v8117_v15 = vld [vmem:[%s8539_s4 + $0x1440] ss:$16 sps:$4 sm:$0xff]  }
 0x296   : > { %5418 = vmatpush1.bf16.msra.mxu0 %v8033_v17  ;;  %5910 = vmatpush1.bf16.msra.mxu1 %v8036_v53  ;;  %v8120_v17 = vld [vmem:[%s8539_s4 + $0x1448] ss:$16 sps:$4 sm:$0xff]   ;;  %v8125_v53 = vld [vmem:[%s8539_s4 + $0x1464] ss:$16 sps:$4 sm:$0xff]  }
 0x297   : > { %5419 = vmatprep.subr.bf16.mxu0 %v8041_v18  ;;  %5911 = vmatprep.subr.bf16.mxu1 %v8044_v19  ;;  %v8128_v18 = vld [vmem:[%s8539_s4 + $0x146c] ss:$16 sps:$4 sm:$0xff]   ;;  %v8123_v19 = vld [vmem:[%s8539_s4 + $0x1460] ss:$16 sps:$4 sm:$0xff]  }
 0x29a   : > { %5420 = vmatpush1.bf16.msra.mxu0 %v8039_v20  ;;  %5912 = vmatpush1.bf16.msra.mxu1 %v8042_v21  ;;  %v8126_v20 = vld [vmem:[%s8539_s4 + $0x1468] ss:$16 sps:$4 sm:$0xff]   ;;  %v8131_v21 = vld [vmem:[%s8539_s4 + $0x1484] ss:$16 sps:$4 sm:$0xff]  }
 0x29b   : > { %5421 = vmatprep.subr.bf16.mxu0 %v8047_v23  ;;  %5913 = vmatprep.subr.bf16.mxu1 %v8050_v24  ;;  %v8134_v23 = vld [vmem:[%s8539_s4 + $0x148c] ss:$16 sps:$4 sm:$0xff]   ;;  %v8129_v24 = vld [vmem:[%s8539_s4 + $0x1480] ss:$16 sps:$4 sm:$0xff]  }
 0x29e   : > { %5422 = vmatpush1.bf16.msra.mxu0 %v8045_v25  ;;  %5914 = vmatpush1.bf16.msra.mxu1 %v8048_v27  ;;  %v8132_v25 = vld [vmem:[%s8539_s4 + $0x1488] ss:$16 sps:$4 sm:$0xff]   ;;  %v8137_v27 = vld [vmem:[%s8539_s4 + $0x14a4] ss:$16 sps:$4 sm:$0xff]  }
 0x29f   : > { %5423 = vmatprep.subr.bf16.mxu0 %v8053_v28  ;;  %5915 = vmatprep.subr.bf16.mxu1 %v8056_v29  ;;  %v8140_v28 = vld [vmem:[%s8539_s4 + $0x14ac] ss:$16 sps:$4 sm:$0xff]   ;;  %v8135_v29 = vld [vmem:[%s8539_s4 + $0x14a0] ss:$16 sps:$4 sm:$0xff]  }
 0x2a2   : > { %5424 = vmatpush1.bf16.msra.mxu0 %v8051_v30  ;;  %5916 = vmatpush1.bf16.msra.mxu1 %v8054_v31  ;;  %v8138_v30 = vld [vmem:[%s8539_s4 + $0x14a8] ss:$16 sps:$4 sm:$0xff]   ;;  %v8143_v31 = vld [vmem:[%s8539_s4 + $0x14c4] ss:$16 sps:$4 sm:$0xff]  }
 0x2a3   : > { %5425 = vmatprep.subr.bf16.mxu0 %v8059_v16  ;;  %5917 = vmatprep.subr.bf16.mxu1 %v8062_v32  ;;  %v8146_v16 = vld [vmem:[%s8539_s4 + $0x14cc] ss:$16 sps:$4 sm:$0xff]   ;;  %v8141_v32 = vld [vmem:[%s8539_s4 + $0x14c0] ss:$16 sps:$4 sm:$0xff]  }
 0x2a6   : > { %5426 = vmatpush1.bf16.msra.mxu0 %v8057_v33  ;;  %5918 = vmatpush1.bf16.msra.mxu1 %v8060_v34  ;;  %v8144_v33 = vld [vmem:[%s8539_s4 + $0x14c8] ss:$16 sps:$4 sm:$0xff]   ;;  %v8149_v34 = vld [vmem:[%s8539_s4 + $0x14e4] ss:$16 sps:$4 sm:$0xff]  }
 0x2a7   : > { %5427 = vmatprep.subr.bf16.mxu0 %v8065_v26  ;;  %5919 = vmatprep.subr.bf16.mxu1 %v8068_v35  ;;  %v8152_v26 = vld [vmem:[%s8539_s4 + $0x14ec] ss:$16 sps:$4 sm:$0xff]   ;;  %v8147_v35 = vld [vmem:[%s8539_s4 + $0x14e0] ss:$16 sps:$4 sm:$0xff]  }
 0x2aa   : > { %5428 = vmatpush1.bf16.msra.mxu0 %v8063_v37  ;;  %5920 = vmatpush1.bf16.msra.mxu1 %v8066_v38  ;;  %v8150_v37 = vld [vmem:[%s8539_s4 + $0x14e8] ss:$16 sps:$4 sm:$0xff]   ;;  %v8155_v38 = vld [vmem:[%s8539_s4 + $0x1504] ss:$16 sps:$4 sm:$0xff]  }
 0x2ab   : > { %5429 = vmatprep.subr.bf16.mxu0 %v8071_v40  ;;  %5921 = vmatprep.subr.bf16.mxu1 %v8074_v41  ;;  %v8158_v40 = vld [vmem:[%s8539_s4 + $0x150c] ss:$16 sps:$4 sm:$0xff]   ;;  %v8153_v41 = vld [vmem:[%s8539_s4 + $0x1500] ss:$16 sps:$4 sm:$0xff]  }
 0x2ae   : > { %5430 = vmatpush1.bf16.msra.mxu0 %v8069_v22  ;;  %5922 = vmatpush1.bf16.msra.mxu1 %v8072_v42  ;;  %v8156_v22 = vld [vmem:[%s8539_s4 + $0x1508] ss:$16 sps:$4 sm:$0xff]   ;;  %v8161_v42 = vld [vmem:[%s8539_s4 + $0x1524] ss:$16 sps:$4 sm:$0xff]  }
 0x2af   : > { %5431 = vmatprep.subr.bf16.mxu0 %v8077_v43  ;;  %5923 = vmatprep.subr.bf16.mxu1 %v8080_v45  ;;  %v8164_v43 = vld [vmem:[%s8539_s4 + $0x152c] ss:$16 sps:$4 sm:$0xff]   ;;  %v8159_v45 = vld [vmem:[%s8539_s4 + $0x1520] ss:$16 sps:$4 sm:$0xff]  }
 0x2b2   : > { %5432 = vmatpush1.bf16.msra.mxu0 %v8075_v46  ;;  %5924 = vmatpush1.bf16.msra.mxu1 %v8078_v47  ;;  %v8162_v46 = vld [vmem:[%s8539_s4 + $0x1528] ss:$16 sps:$4 sm:$0xff]   ;;  %v8167_v47 = vld [vmem:[%s8539_s4 + $0x1544] ss:$16 sps:$4 sm:$0xff]  }
 0x2b3   : > { %5433 = vmatprep.subr.bf16.mxu0 %v8083_v48  ;;  %5925 = vmatprep.subr.bf16.mxu1 %v8086_v51  ;;  %v8170_v48 = vld [vmem:[%s8539_s4 + $0x154c] ss:$16 sps:$4 sm:$0xff]   ;;  %v8165_v51 = vld [vmem:[%s8539_s4 + $0x1540] ss:$16 sps:$4 sm:$0xff]  }
 0x2b6   : > { %5434 = vmatpush1.bf16.msra.mxu0 %v8081_v54  ;;  %5926 = vmatpush1.bf16.msra.mxu1 %v8084_v55  ;;  %v8168_v54 = vld [vmem:[%s8539_s4 + $0x1548] ss:$16 sps:$4 sm:$0xff]   ;;  %v8173_v55 = vld [vmem:[%s8539_s4 + $0x1564] ss:$16 sps:$4 sm:$0xff]  }
 0x2b7   : > { %5435 = vmatprep.subr.bf16.mxu0 %v8089_v56  ;;  %5927 = vmatprep.subr.bf16.mxu1 %v8092_v39  ;;  %v8176_v56 = vld [vmem:[%s8539_s4 + $0x156c] ss:$16 sps:$4 sm:$0xff]   ;;  %v8171_v39 = vld [vmem:[%s8539_s4 + $0x1560] ss:$16 sps:$4 sm:$0xff]  }
 0x2ba   : > { %5436 = vmatpush1.bf16.msra.mxu0 %v8087_v57  ;;  %5928 = vmatpush1.bf16.msra.mxu1 %v8090_v58  ;;  %v8174_v57 = vld [vmem:[%s8539_s4 + $0x1568] ss:$16 sps:$4 sm:$0xff]   ;;  %v8179_v58 = vld [vmem:[%s8539_s4 + $0x1584] ss:$16 sps:$4 sm:$0xff]  }
 0x2bb   : > { %5437 = vmatprep.subr.bf16.mxu0 %v8095_v59  ;;  %5929 = vmatprep.subr.bf16.mxu1 %v8098_v49  ;;  %v8182_v59 = vld [vmem:[%s8539_s4 + $0x158c] ss:$16 sps:$4 sm:$0xff]   ;;  %v8177_v49 = vld [vmem:[%s8539_s4 + $0x1580] ss:$16 sps:$4 sm:$0xff]  }
 0x2be   : > { %5438 = vmatpush1.bf16.msra.mxu0 %v8093_v61  ;;  %5930 = vmatpush1.bf16.msra.mxu1 %v8096_v14  ;;  %v8185_v61 = vld [vmem:[%s8539_s4 + $0x15a4] ss:$16 sps:$4 sm:$0xff]   ;;  %v8188_v14 = vld [vmem:[%s8539_s4 + $0x15ac] ss:$16 sps:$4 sm:$0xff]  }
 0x2bf   : > { %5439 = vmatprep.subr.bf16.mxu0 %v8101_v0  ;;  %5931 = vmatprep.subr.bf16.mxu1 %v8104_v1  ;;  %v8183_v0 = vld [vmem:[%s8539_s4 + $0x15a0] ss:$16 sps:$4 sm:$0xff]   ;;  %v8186_v1 = vld [vmem:[%s8539_s4 + $0x15a8] ss:$16 sps:$4 sm:$0xff]  }
 0x2c2   : > { %5440 = vmatpush1.bf16.msra.mxu0 %v8099_v36  ;;  %5932 = vmatpush1.bf16.msra.mxu1 %v8102_v3  ;;  %v8191_v36 = vld [vmem:[%s8539_s4 + $0x15c4] ss:$16 sps:$4 sm:$0xff]   ;;  %v8194_v3 = vld [vmem:[%s8539_s4 + $0x15cc] ss:$16 sps:$4 sm:$0xff]  }
 0x2c3   : > { %5450 = vmatprep.subr.bf16.mxu0 %v8107_v4  ;;  %5942 = vmatprep.subr.bf16.mxu1 %v8110_v52  ;;  %v8189_v4 = vld [vmem:[%s8539_s4 + $0x15c0] ss:$16 sps:$4 sm:$0xff]   ;;  %v8192_v52 = vld [vmem:[%s8539_s4 + $0x15c8] ss:$16 sps:$4 sm:$0xff]  }
 0x2c5   : > { %5442 = vmatmul.mubr.bf16.vlgmr.msra.gmra.mrb[0].mxu0 %v1172_v6  ;;  %5934 = vmatmul.mubr.bf16.vlgmr.msra.gmra.mrb[0].mxu1 %v1172_v6  ;;  %v8200_v6 = vld [vmem:[%s8539_s4 + $0x15ec] ss:$16 sps:$4 sm:$0xff]  }
 0x2c6   : > { %5451 = vmatpush1.bf16.msra.mxu0 %v8105_v7  ;;  %5943 = vmatpush1.bf16.msra.mxu1 %v8108_v62  ;;  %v8195_v7 = vld [vmem:[%s8539_s4 + $0x15e0] ss:$16 sps:$4 sm:$0xff]   ;;  %v8198_v62 = vld [vmem:[%s8539_s4 + $0x15e8] ss:$16 sps:$4 sm:$0xff]  }
 0x2c7   : > { %5452 = vmatprep.subr.bf16.mxu0 %v8113_v8  ;;  %5944 = vmatprep.subr.bf16.mxu1 %v8116_v9  ;;  %v8204_v8 = vld [vmem:[%s8539_s4 + $0x1604] ss:$16 sps:$4 sm:$0xff]   ;;  %v8207_v9 = vld [vmem:[%s8539_s4 + $0x160c] ss:$16 sps:$4 sm:$0xff]  }
 0x2c8   : > { %5482 = vmatprep.mubr.bf16.mxu0 %v9325_v10  ;;  %5974 = vmatprep.mubr.bf16.mxu1 %v9325_v10 }
 0x2ca   : > { %5453 = vmatpush1.bf16.msra.mxu0 %v8111_v63  ;;  %5945 = vmatpush1.bf16.msra.mxu1 %v8114_v11  ;;  %v9391_v63 = vrot.slane %v9310_v2, %v8613_v50  ;;  %v8202_v11 = vld [vmem:[%s8539_s4 + $0x1600] ss:$16 sps:$4 sm:$0xff]   ;;  %v8211_v2 = vld [vmem:[%s8539_s4 + $0x1628] ss:$16 sps:$4 sm:$0xff]  }
 0x2cb   : > { %5454 = vmatprep.subr.bf16.mxu0 %v8119_v12  ;;  %5946 = vmatprep.subr.bf16.mxu1 %v8122_v13  ;;  %v8205_v12 = vld [vmem:[%s8539_s4 + $0x1608] ss:$16 sps:$4 sm:$0xff]   ;;  %v8210_v13 = vld [vmem:[%s8539_s4 + $0x1624] ss:$16 sps:$4 sm:$0xff]   ;;  %v8208_v50 = vld [vmem:[%s8539_s4 + $0x1620] ss:$16 sps:$4 sm:$0xff]  }
 0x2ce   : > { %5455 = vmatpush1.bf16.msra.mxu0 %v8117_v15  ;;  %5947 = vmatpush1.bf16.msra.mxu1 %v8120_v17  ;;  %v8213_v15 = vld [vmem:[%s8539_s4 + $0x162c] ss:$16 sps:$4 sm:$0xff]   ;;  %v1175_v17 = vcombine.high %v9325_v10, %v9325_v10  ;;  %v8214_v10 = vld [vmem:[%s8539_s4 + $0x1640] ss:$16 sps:$4 sm:$0xff]  }
 0x2cf   : > { %5456 = vmatprep.subr.bf16.mxu0 %v8125_v53  ;;  %5948 = vmatprep.subr.bf16.mxu1 %v8128_v18  ;;  %v8216_v53 = vld [vmem:[%s8539_s4 + $0x1644] ss:$16 sps:$4 sm:$0xff]   ;;  %v8219_v18 = vld [vmem:[%s8539_s4 + $0x164c] ss:$16 sps:$4 sm:$0xff]  }
 0x2d2   : > { %5457 = vmatpush1.bf16.msra.mxu0 %v8123_v19  ;;  %5949 = vmatpush1.bf16.msra.mxu1 %v8126_v20  ;;  %v8217_v19 = vld [vmem:[%s8539_s4 + $0x1648] ss:$16 sps:$4 sm:$0xff]   ;;  %v8222_v20 = vld [vmem:[%s8539_s4 + $0x1664] ss:$16 sps:$4 sm:$0xff]  }
 0x2d3   : > { %5458 = vmatprep.subr.bf16.mxu0 %v8131_v21  ;;  %5950 = vmatprep.subr.bf16.mxu1 %v8134_v23  ;;  %v8225_v21 = vld [vmem:[%s8539_s4 + $0x166c] ss:$16 sps:$4 sm:$0xff]   ;;  %v8220_v23 = vld [vmem:[%s8539_s4 + $0x1660] ss:$16 sps:$4 sm:$0xff]  }
 0x2d6   : > { %5459 = vmatpush1.bf16.msra.mxu0 %v8129_v24  ;;  %5951 = vmatpush1.bf16.msra.mxu1 %v8132_v25  ;;  %v8223_v24 = vld [vmem:[%s8539_s4 + $0x1668] ss:$16 sps:$4 sm:$0xff]   ;;  %v8228_v25 = vld [vmem:[%s8539_s4 + $0x1684] ss:$16 sps:$4 sm:$0xff]  }
 0x2d7   : > { %5460 = vmatprep.subr.bf16.mxu0 %v8137_v27  ;;  %5952 = vmatprep.subr.bf16.mxu1 %v8140_v28  ;;  %v8231_v27 = vld [vmem:[%s8539_s4 + $0x168c] ss:$16 sps:$4 sm:$0xff]   ;;  %v8226_v28 = vld [vmem:[%s8539_s4 + $0x1680] ss:$16 sps:$4 sm:$0xff]  }
 0x2da   : > { %5461 = vmatpush1.bf16.msra.mxu0 %v8135_v29  ;;  %5953 = vmatpush1.bf16.msra.mxu1 %v8138_v30  ;;  %v8229_v29 = vld [vmem:[%s8539_s4 + $0x1688] ss:$16 sps:$4 sm:$0xff]   ;;  %v8234_v30 = vld [vmem:[%s8539_s4 + $0x16a4] ss:$16 sps:$4 sm:$0xff]  }
 0x2db   : > { %5462 = vmatprep.subr.bf16.mxu0 %v8143_v31  ;;  %5954 = vmatprep.subr.bf16.mxu1 %v8146_v16  ;;  %v8237_v31 = vld [vmem:[%s8539_s4 + $0x16ac] ss:$16 sps:$4 sm:$0xff]   ;;  %v8232_v16 = vld [vmem:[%s8539_s4 + $0x16a0] ss:$16 sps:$4 sm:$0xff]  }
 0x2de   : > { %5463 = vmatpush1.bf16.msra.mxu0 %v8141_v32  ;;  %5955 = vmatpush1.bf16.msra.mxu1 %v8144_v33  ;;  %v8235_v32 = vld [vmem:[%s8539_s4 + $0x16a8] ss:$16 sps:$4 sm:$0xff]   ;;  %v8240_v33 = vld [vmem:[%s8539_s4 + $0x16c4] ss:$16 sps:$4 sm:$0xff]  }
 0x2df   : > { %5464 = vmatprep.subr.bf16.mxu0 %v8149_v34  ;;  %5956 = vmatprep.subr.bf16.mxu1 %v8152_v26  ;;  %v8243_v34 = vld [vmem:[%s8539_s4 + $0x16cc] ss:$16 sps:$4 sm:$0xff]   ;;  %v8238_v26 = vld [vmem:[%s8539_s4 + $0x16c0] ss:$16 sps:$4 sm:$0xff]  }
 0x2e2   : > { %5465 = vmatpush1.bf16.msra.mxu0 %v8147_v35  ;;  %5957 = vmatpush1.bf16.msra.mxu1 %v8150_v37  ;;  %v8241_v35 = vld [vmem:[%s8539_s4 + $0x16c8] ss:$16 sps:$4 sm:$0xff]   ;;  %v8246_v37 = vld [vmem:[%s8539_s4 + $0x16e4] ss:$16 sps:$4 sm:$0xff]  }
 0x2e3   : > { %5466 = vmatprep.subr.bf16.mxu0 %v8155_v38  ;;  %5958 = vmatprep.subr.bf16.mxu1 %v8158_v40  ;;  %v8249_v38 = vld [vmem:[%s8539_s4 + $0x16ec] ss:$16 sps:$4 sm:$0xff]   ;;  %v8244_v40 = vld [vmem:[%s8539_s4 + $0x16e0] ss:$16 sps:$4 sm:$0xff]  }
 0x2e6   : > { %5467 = vmatpush1.bf16.msra.mxu0 %v8153_v41  ;;  %5959 = vmatpush1.bf16.msra.mxu1 %v8156_v22  ;;  %v8247_v41 = vld [vmem:[%s8539_s4 + $0x16e8] ss:$16 sps:$4 sm:$0xff]   ;;  %v8252_v22 = vld [vmem:[%s8539_s4 + $0x1704] ss:$16 sps:$4 sm:$0xff]  }
 0x2e7   : > { %5468 = vmatprep.subr.bf16.mxu0 %v8161_v42  ;;  %5960 = vmatprep.subr.bf16.mxu1 %v8164_v43  ;;  %v8255_v42 = vld [vmem:[%s8539_s4 + $0x170c] ss:$16 sps:$4 sm:$0xff]   ;;  %v8250_v43 = vld [vmem:[%s8539_s4 + $0x1700] ss:$16 sps:$4 sm:$0xff]  }
 0x2ea   : > { %5469 = vmatpush1.bf16.msra.mxu0 %v8159_v45  ;;  %5961 = vmatpush1.bf16.msra.mxu1 %v8162_v46  ;;  %v8253_v45 = vld [vmem:[%s8539_s4 + $0x1708] ss:$16 sps:$4 sm:$0xff]   ;;  %v8258_v46 = vld [vmem:[%s8539_s4 + $0x1724] ss:$16 sps:$4 sm:$0xff]  }
 0x2eb   : > { %5470 = vmatprep.subr.bf16.mxu0 %v8167_v47  ;;  %5962 = vmatprep.subr.bf16.mxu1 %v8170_v48  ;;  %v8261_v47 = vld [vmem:[%s8539_s4 + $0x172c] ss:$16 sps:$4 sm:$0xff]   ;;  %v8256_v48 = vld [vmem:[%s8539_s4 + $0x1720] ss:$16 sps:$4 sm:$0xff]  }
 0x2ee   : > { %5471 = vmatpush1.bf16.msra.mxu0 %v8165_v51  ;;  %5963 = vmatpush1.bf16.msra.mxu1 %v8168_v54  ;;  %v8259_v51 = vld [vmem:[%s8539_s4 + $0x1728] ss:$16 sps:$4 sm:$0xff]   ;;  %v8264_v54 = vld [vmem:[%s8539_s4 + $0x1744] ss:$16 sps:$4 sm:$0xff]  }
 0x2ef   : > { %5472 = vmatprep.subr.bf16.mxu0 %v8173_v55  ;;  %5964 = vmatprep.subr.bf16.mxu1 %v8176_v56  ;;  %v8267_v55 = vld [vmem:[%s8539_s4 + $0x174c] ss:$16 sps:$4 sm:$0xff]   ;;  %v8262_v56 = vld [vmem:[%s8539_s4 + $0x1740] ss:$16 sps:$4 sm:$0xff]  }
 0x2f2   : > { %5473 = vmatpush1.bf16.msra.mxu0 %v8171_v39  ;;  %5965 = vmatpush1.bf16.msra.mxu1 %v8174_v57  ;;  %v8265_v39 = vld [vmem:[%s8539_s4 + $0x1748] ss:$16 sps:$4 sm:$0xff]   ;;  %v8270_v57 = vld [vmem:[%s8539_s4 + $0x1764] ss:$16 sps:$4 sm:$0xff]  }
 0x2f3   : > { %5474 = vmatprep.subr.bf16.mxu0 %v8179_v58  ;;  %5966 = vmatprep.subr.bf16.mxu1 %v8182_v59  ;;  %v8273_v58 = vld [vmem:[%s8539_s4 + $0x176c] ss:$16 sps:$4 sm:$0xff]   ;;  %v8268_v59 = vld [vmem:[%s8539_s4 + $0x1760] ss:$16 sps:$4 sm:$0xff]  }
 0x2f6   : > { %5475 = vmatpush1.bf16.msra.mxu0 %v8177_v49  ;;  %5967 = vmatpush1.bf16.msra.mxu1 %v8180_v60  ;;  %v8271_v49 = vld [vmem:[%s8539_s4 + $0x1768] ss:$16 sps:$4 sm:$0xff]   ;;  %v8276_v60 = vld [vmem:[%s8539_s4 + $0x1784] ss:$16 sps:$4 sm:$0xff]  }
 0x2f7   : > { %5476 = vmatprep.subr.bf16.mxu0 %v8185_v61  ;;  %5968 = vmatprep.subr.bf16.mxu1 %v8188_v14  ;;  %v8279_v61 = vld [vmem:[%s8539_s4 + $0x178c] ss:$16 sps:$4 sm:$0xff]   ;;  %v8274_v14 = vld [vmem:[%s8539_s4 + $0x1780] ss:$16 sps:$4 sm:$0xff]  }
 0x2fa   : > { %5477 = vmatpush1.bf16.msra.mxu0 %v8183_v0  ;;  %5969 = vmatpush1.bf16.msra.mxu1 %v8186_v1  ;;  %v8277_v0 = vld [vmem:[%s8539_s4 + $0x1788] ss:$16 sps:$4 sm:$0xff]   ;;  %v8282_v1 = vld [vmem:[%s8539_s4 + $0x17a4] ss:$16 sps:$4 sm:$0xff]  }
 0x2fb   : > { %5478 = vmatprep.subr.bf16.mxu0 %v8191_v36  ;;  %5970 = vmatprep.subr.bf16.mxu1 %v8194_v3  ;;  %v8285_v36 = vld [vmem:[%s8539_s4 + $0x17ac] ss:$16 sps:$4 sm:$0xff]   ;;  %v8280_v3 = vld [vmem:[%s8539_s4 + $0x17a0] ss:$16 sps:$4 sm:$0xff]  }
 0x2fe   : > { %5479 = vmatpush1.bf16.msra.mxu0 %v8189_v4  ;;  %5971 = vmatpush1.bf16.msra.mxu1 %v8192_v52  ;;  %v8283_v4 = vld [vmem:[%s8539_s4 + $0x17a8] ss:$16 sps:$4 sm:$0xff]   ;;  %v8288_v52 = vld [vmem:[%s8539_s4 + $0x17c4] ss:$16 sps:$4 sm:$0xff]  }
 0x2ff   : > { %5480 = vmatprep.subr.bf16.mxu0 %v8197_v5  ;;  %5972 = vmatprep.subr.bf16.mxu1 %v8200_v6  ;;  %v8291_v5 = vld [vmem:[%s8539_s4 + $0x17cc] ss:$16 sps:$4 sm:$0xff]   ;;  %v8286_v6 = vld [vmem:[%s8539_s4 + $0x17c0] ss:$16 sps:$4 sm:$0xff]  }
 0x302   : > { %5481 = vmatpush1.bf16.msra.mxu0 %v8195_v7  ;;  %5973 = vmatpush1.bf16.msra.mxu1 %v8198_v62  ;;  %v8289_v7 = vld [vmem:[%s8539_s4 + $0x17c8] ss:$16 sps:$4 sm:$0xff]   ;;  %v8294_v62 = vld [vmem:[%s8539_s4 + $0x17e4] ss:$16 sps:$4 sm:$0xff]  }
 0x303   : > { %5491 = vmatprep.subr.bf16.mxu0 %v8204_v8  ;;  %5983 = vmatprep.subr.bf16.mxu1 %v8207_v9  ;;  %v8297_v8 = vld [vmem:[%s8539_s4 + $0x17ec] ss:$16 sps:$4 sm:$0xff]   ;;  %v8292_v9 = vld [vmem:[%s8539_s4 + $0x17e0] ss:$16 sps:$4 sm:$0xff]  }
 0x305   : > { %5483 = vmatmul.mubr.bf16.vlgmr.msra.gmra.mrb[0].mxu0 %v9391_v63  ;;  %5975 = vmatmul.mubr.bf16.vlgmr.msra.gmra.mrb[0].mxu1 %v9391_v63 }
 0x306   : > { %5492 = vmatpush1.bf16.msra.mxu0 %v8202_v11  ;;  %5984 = vmatpush1.bf16.msra.mxu1 %v8205_v12  ;;  %v8295_v11 = vld [vmem:[%s8539_s4 + $0x17e8] ss:$16 sps:$4 sm:$0xff]   ;;  %v1173_v12 = vcombine.high %v9391_v63, %v9391_v63 }
 0x307   : > { %5493 = vmatprep.subr.bf16.mxu0 %v8210_v13  ;;  %5985 = vmatprep.subr.bf16.mxu1 %v8213_v15  ;;  %v8404_v13 = vmov 1983009808  }
 0x308   : > { %5523 = vmatprep.mubr.bf16.mxu0 %v1175_v17  ;;  %6015 = vmatprep.mubr.bf16.mxu1 %v1175_v17  ;;  %v6031_v15 = vunpack.c.l.s4 %v8404_v13 }
 0x30a   : > { %5494 = vmatpush1.bf16.msra.mxu0 %v8208_v50  ;;  %5986 = vmatpush1.bf16.msra.mxu1 %v8211_v2  ;;  %v6032_v17 = vunpack.c.0.s8 %v6031_v15 }
 0x30b   : > { %5495 = vmatprep.subr.bf16.mxu0 %v8216_v53  ;;  %5987 = vmatprep.subr.bf16.mxu1 %v8219_v18 }
 0x30c   : > { %v6035_v53 = vsub.s32 %v6032_v17, %v8605_v44 }
 0x30e   : > { %5496 = vmatpush1.bf16.msra.mxu0 %v8214_v10  ;;  %5988 = vmatpush1.bf16.msra.mxu1 %v8217_v19 }
 0x30f   : > { %5497 = vmatprep.subr.bf16.mxu0 %v8222_v20  ;;  %5989 = vmatprep.subr.bf16.mxu1 %v8225_v21 }
 0x312   : > { %5498 = vmatpush1.bf16.msra.mxu0 %v8220_v23  ;;  %5990 = vmatpush1.bf16.msra.mxu1 %v8223_v24 }
 0x313   : > { %5499 = vmatprep.subr.bf16.mxu0 %v8228_v25  ;;  %5991 = vmatprep.subr.bf16.mxu1 %v8231_v27 }
 0x316   : > { %5500 = vmatpush1.bf16.msra.mxu0 %v8226_v28  ;;  %5992 = vmatpush1.bf16.msra.mxu1 %v8229_v29  ;;  %v254_v28 = vld [vmem:[%s8562_s16] sm:$0xff] }
 0x317   : > { %5501 = vmatprep.subr.bf16.mxu0 %v8234_v30  ;;  %5993 = vmatprep.subr.bf16.mxu1 %v8237_v31  ;;  %v6053_v31 = vld [vmem:[%s241_s6] sm:$0xf] (!%p6972_p6) }
 0x31a   : > { %5502 = vmatpush1.bf16.msra.mxu0 %v8232_v16  ;;  %5994 = vmatpush1.bf16.msra.mxu1 %v8235_v32  ;;  %v6057_v16 = vsub.s32 (!%p6972_p6), 0, %v8605_v44  ;;  %v6061_v32 = vsub.s32 (!%p6972_p6), 1, %v8605_v44 }
 0x31b   : > { %5503 = vmatprep.subr.bf16.mxu0 %v8240_v33  ;;  %5995 = vmatprep.subr.bf16.mxu1 %v8243_v34  ;;  %v6065_v33 = vsub.s32 (!%p6972_p6), 2, %v8605_v44  ;;  %v6069_v34 = vsub.s32 (!%p6972_p6), 3, %v8605_v44 }
 0x31e   : > { %5504 = vmatpush1.bf16.msra.mxu0 %v8238_v26  ;;  %5996 = vmatpush1.bf16.msra.mxu1 %v8241_v35  ;;  %v6058_v26 = vrot.slane (!%p6972_p6), %v6053_v31, %v6057_v16  ;;  %v6062_v35 = vrot.slane (!%p6972_p6), %v6053_v31, %v6061_v32 }
 0x31f   : > { %5505 = vmatprep.subr.bf16.mxu0 %v8246_v37  ;;  %5997 = vmatprep.subr.bf16.mxu1 %v8249_v38  ;;  %v6066_v37 = vrot.slane (!%p6972_p6), %v6053_v31, %v6065_v33  ;;  %v6070_v38 = vrot.slane (!%p6972_p6), %v6053_v31, %v6069_v34 }
 0x322   : > { %5506 = vmatpush1.bf16.msra.mxu0 %v8244_v40  ;;  %5998 = vmatpush1.bf16.msra.mxu1 %v8247_v41  ;;  %v6071_v40 = vcombine.low (!%p6972_p6), %v6058_v26, %v6062_v35  ;;  %v6072_v41 = vcombine.low (!%p6972_p6), %v6066_v37, %v6070_v38 }
 0x323   : > { %5507 = vmatprep.subr.bf16.mxu0 %v8252_v22  ;;  %5999 = vmatprep.subr.bf16.mxu1 %v8255_v42 }
 0x324   : > { %v6079_v22 = vrot.slane (!%p6972_p6), %v6071_v40, %v6035_v53  ;;  %v6086_v42 = vrot.slane (!%p6972_p6), %v6072_v41, %v6035_v53 }
 0x326   : > { %5508 = vmatpush1.bf16.msra.mxu0 %v8250_v43  ;;  %6000 = vmatpush1.bf16.msra.mxu1 %v8253_v45  ;;  %v6087_v45 = vcombine.low (!%p6972_p6), %v6079_v22, %v6086_v42 }
 0x327   : > { %5509 = vmatprep.subr.bf16.mxu0 %v8258_v46  ;;  %6001 = vmatprep.subr.bf16.mxu1 %v8261_v47 }
 0x32a   : > { %5510 = vmatpush1.bf16.msra.mxu0 %v8256_v48  ;;  %6002 = vmatpush1.bf16.msra.mxu1 %v8259_v51 }
 0x32b   : > { %5511 = vmatprep.subr.bf16.mxu0 %v8264_v54  ;;  %6003 = vmatprep.subr.bf16.mxu1 %v8267_v55 }
 0x32e   : > { %5512 = vmatpush1.bf16.msra.mxu0 %v8262_v56  ;;  %6004 = vmatpush1.bf16.msra.mxu1 %v8265_v39 }
 0x32f   : > { %5513 = vmatprep.subr.bf16.mxu0 %v8270_v57  ;;  %6005 = vmatprep.subr.bf16.mxu1 %v8273_v58 }
 0x332   : > { %5514 = vmatpush1.bf16.msra.mxu0 %v8268_v59  ;;  %6006 = vmatpush1.bf16.msra.mxu1 %v8271_v49 }
 0x333   : > { %5515 = vmatprep.subr.bf16.mxu0 %v8276_v60  ;;  %6007 = vmatprep.subr.bf16.mxu1 %v8279_v61 }
 0x336   : > { %5516 = vmatpush1.bf16.msra.mxu0 %v8274_v14  ;;  %6008 = vmatpush1.bf16.msra.mxu1 %v8277_v0 }
 0x337   : > { %5517 = vmatprep.subr.bf16.mxu0 %v8282_v1  ;;  %6009 = vmatprep.subr.bf16.mxu1 %v8285_v36 }
 0x33a   : > { %5518 = vmatpush1.bf16.msra.mxu0 %v8280_v3  ;;  %6010 = vmatpush1.bf16.msra.mxu1 %v8283_v4 }
 0x33b   : > { %5519 = vmatprep.subr.bf16.mxu0 %v8288_v52  ;;  %6011 = vmatprep.subr.bf16.mxu1 %v8291_v5 }
 0x33e   : > { %5520 = vmatpush1.bf16.msra.mxu0 %v8286_v6  ;;  %6012 = vmatpush1.bf16.msra.mxu1 %v8289_v7 }
 0x33f   : > { %5521 = vmatprep.subr.bf16.mxu0 %v8294_v62  ;;  %6013 = vmatprep.subr.bf16.mxu1 %v8297_v8 }
 0x342   : > { %5522 = vmatpush1.bf16.msra.mxu0 %v8292_v9  ;;  %6014 = vmatpush1.bf16.msra.mxu1 %v8295_v11 }
 0x345   : > { %5524 = vmatmul.mubr.bf16.vlgmr.msra.gmra.mrb[0].mxu0 %v1173_v12  ;;  %6016 = vmatmul.mubr.bf16.vlgmr.msra.gmra.mrb[0].mxu1 %v1173_v12 }
 0x418   : > { %v5525_v50 = vpop.f32.mrb[0].mxu0  ;;  %v6017_v2 = vpop.f32.mrb[0].mxu1 }
 0x419   : > { %v5527_v18 = vpop.f32.mrb[1].mxu0  ;;  %v6019_v10 = vpop.f32.mrb[1].mxu1 }
 0x41a   : > { %v6028_v19 = vcombine.low %v5525_v50, %v5527_v18  ;;  %v6029_v20 = vcombine.low %v6017_v2, %v6019_v10  ;;  %v5529_v21 = vpop.f32.mrb[2].mxu0  ;;  %v6021_v23 = vpop.f32.mrb[2].mxu1 }
 0x41b   : > { %v5530_v63 = vpop.f32.mrb[3].mxu0  ;;  %v6022_v24 = vpop.f32.mrb[3].mxu1 }
 0x41c   : > { %v6036_v25 = vrot.slane %v6028_v19, %v6035_v53  ;;  %v6043_v27 = vrot.slane %v6029_v20, %v6035_v53  ;;  %6051 = sbr.rel (%p6972_p6) target bundleno = 1071 (0x42f), region = 44 }
 0x41e   : > { %v6044_v29 = vcombine.low %v6036_v25, %v6043_v27 }
 0x420   : > { %v6046_v30 = vadd.f32 %v6044_v29, %v254_v28 }
 0x422   : > { %6047 = vst [vmem:[%s8562_s16] sm:$0xff] %v6046_v30 }
 0x429   : > { %v6052_v43 = vld [vmem:[%s8562_s16] sm:$0xff] }
 0x42a   : > { %v6089_v46 = vadd.f32 %v6087_v45, %v6052_v43 }
 0x42c   : > { %v6090_v47 = vmax.f32 %v6089_v46, 0.0 }
 0x42e   : > { %6091 = vst [vmem:[%s8562_s16] sm:$0xff] %v6090_v47 }
 0x42f PF: > { %s16_s19 = sadd.s32 1, %s8396_s19   ;;  %s9507_s12 = smov %s8372_s13 }
 0x430   : > { %p13_p8 = scmp.ge.s32.totalorder %s16_s19, 14   ;;  %s9508_s13 = smov %s8376_s14 }
 0x431   : > { %s9509_s14 = smov %s8492_s5  ;;  %s9510_s15 = smov %s8388_s17 }
 0x432   : > { %s9511_s16 = smov %s8392_s18  ;;  %s9512_s17 = smov %s9515_s21 }
 0x433   : > { %s9513_s18 = smov %s9519_s22  ;;  %15 = sbr.rel (!%p13_p8) target bundleno = 5 (0x5), region = 86 }
 0x43a   :  { %6114 = vsyncpa [#allocation3], 1 }
 0x43b   :  { %6116 = vsyncpa [#allocation3 + $0x1], 1 }

</bundles_post_ra>
